<compile_context>
chip_gen: v6e
topology: v6e:2x2x1
jax: 0.10.0
libtpu: 0.0.40
codegen_flags: <defaults>
</compile_context>

<pallas_src>
import jax
import jax.numpy as jnp
from jax import lax
from jax.experimental import pallas as pl
from jax.experimental.pallas import tpu as pltpu

# ---------------------------------------------------------------------------
# Static problem configuration (matches the demo shapes in __main__).
# ---------------------------------------------------------------------------
C_IN, H_IN, W_IN = 4, 16, 16          # encoder input (c_dim, H, W)
FILT = 32                             # filt_per_layer
Z_DIM = 8                             # z_dim
KH = KW = 4                           # all convs are 4x4
H1, W1 = 8, 8                         # after conv1 (stride 2, pad 1)
H2, W2 = 4, 4                         # after conv2 (stride 2, pad 1)
H3, W3 = 4, 4                         # after ZeroPad2d((1,2,1,2)) + conv3 (s1)
P1H, P1W = H_IN + 2, W_IN + 2         # 18 x 18  padded input
P2H, P2W = H1 + 2, W1 + 2             # 10 x 10  padded conv1 output
P3H, P3W = H2 + 3, W2 + 3             # 7 x 7    ZeroPad2d((1,2,1,2)) of conv2 out
FC_IN = FILT * H3 * W3                # 512


# ---------------------------------------------------------------------------
# Fused encoder kernel (one grid step == one image)
# ---------------------------------------------------------------------------
def _encoder_kernel(x_ref, w1_ref, b1_ref, w2_ref, b2_ref, w3_ref, b3_ref,
                    wh_ref, bh_ref, eps_ref,
                    z_ref, mu_ref, logvar_ref,
                    p1, patch1, p2, patch2, p3, patch3):
    # Zero the padded buffers once: scratch persists across grid steps and the
    # interiors are fully rewritten every step (borders stay zero).
    @pl.when(pl.program_id(0) == 0)
    def _():
        p1[...] = jnp.zeros_like(p1)
        p2[...] = jnp.zeros_like(p2)
        p3[...] = jnp.zeros_like(p3)

    # ---- conv1: Conv2d(C_IN, FILT, 4, stride=2, padding=1) + ReLU ----------
    # x_ref rows are (h*W_IN + w, c); write interior of the 18x18 padded buffer.
    for h in range(H_IN):
        dst = (h + 1) * P1W + 1
        p1[dst:dst + W_IN, :] = x_ref[h * W_IN:(h + 1) * W_IN, :]
    # in-kernel im2col: patch1[oy*W1+ox, t*C_IN+c] = xpad[2*oy+i, 2*ox+j, c]
    for t in range(KH * KW):
        i, j = divmod(t, KW)
        for oy in range(H1):
            rows = p1[pl.ds((2 * oy + i) * P1W + j, W1, stride=2), :]
            patch1[oy * W1:(oy + 1) * W1, t * C_IN:(t + 1) * C_IN] = rows
    y1 = jnp.maximum(
        jnp.dot(patch1[...], w1_ref[...], preferred_element_type=jnp.float32)
        + b1_ref[...], 0.0)                                     # (64, 32)

    # ---- conv2: Conv2d(FILT, FILT, 4, stride=2, padding=1) + ReLU ----------
    for h in range(H1):
        dst = (h + 1) * P2W + 1
        p2[dst:dst + W1, :] = y1[h * W1:(h + 1) * W1, :]
    for t in range(KH * KW):
        i, j = divmod(t, KW)
        for oy in range(H2):
            rows = p2[pl.ds((2 * oy + i) * P2W + j, W2, stride=2), :]
            patch2[oy * W2:(oy + 1) * W2, t * FILT:(t + 1) * FILT] = rows
    y2 = jnp.maximum(
        jnp.dot(patch2[...], w2_ref[...], preferred_element_type=jnp.float32)
        + b2_ref[...], 0.0)                                     # (16, 32)

    # ---- ZeroPad2d((1,2,1,2)) + Conv2d(FILT, FILT, 4, stride=1) + ReLU -----
    for h in range(H2):
        dst = (h + 1) * P3W + 1
        p3[dst:dst + W2, :] = y2[h * W2:(h + 1) * W2, :]
    for t in range(KH * KW):
        i, j = divmod(t, KW)
        for oy in range(H3):
            src = (oy + i) * P3W + j
            patch3[oy * W3:(oy + 1) * W3, t * FILT:(t + 1) * FILT] = p3[src:src + W3, :]
    y3 = jnp.maximum(
        jnp.dot(patch3[...], w3_ref[...], preferred_element_type=jnp.float32)
        + b3_ref[...], 0.0)                                     # (16, 32), (spatial, ch)

    # ---- fused fc_mu / fc_var + reparameterize -----------------------------
    # wh rows are ordered s*FILT + c host-side, which folds PyTorch's NCHW
    # flatten (k = c*16 + s); contract over both spatial and channel dims as an
    # unrolled sum of tiny (1, FILT) @ (FILT, 2*Z) dots (no in-kernel reshape).
    acc = bh_ref[...]                                           # (1, 2*Z_DIM)
    for s in range(H3 * W3):
        acc = acc + jnp.dot(y3[s:s + 1, :], wh_ref[s * FILT:(s + 1) * FILT, :],
                            preferred_element_type=jnp.float32)
    mu = acc[:, :Z_DIM]
    logvar = acc[:, Z_DIM:]
    std = jnp.exp(0.5 * logvar)                                 # EUP path
    z_ref[...] = mu + eps_ref[...] * std
    mu_ref[...] = mu
    logvar_ref[...] = logvar


# ---------------------------------------------------------------------------
# Wrapper: one fused pallas_call for the whole encoder forward
# ---------------------------------------------------------------------------
def encoder_forward(kparams, x_nchw, eps):
    B = x_nchw.shape[0]
    assert x_nchw.shape == (B, C_IN, H_IN, W_IN)
    assert eps.shape == (B, Z_DIM)

    # Tiny (8 KiB) input layout fixup; all other layout work is folded into the
    # pre-laid-out weights / in-kernel indexing.
    x_rows = jnp.transpose(x_nchw, (0, 2, 3, 1)).reshape(B, H_IN * W_IN, C_IN)
    eps3 = eps.reshape(B, 1, Z_DIM)

    def _const2d(shape):  # whole-array weight block, DMA'd once (same block every step)
        return pl.BlockSpec(shape, lambda b: (0, 0))

    per_img_vec = pl.BlockSpec((None, 1, Z_DIM), lambda b: (b, 0, 0))

    grid_spec = pltpu.PrefetchScalarGridSpec(
        num_scalar_prefetch=0,
        grid=(B,),
        in_specs=[
            pl.BlockSpec((None, H_IN * W_IN, C_IN), lambda b: (b, 0, 0)),   # x (per-image)
            _const2d((KH * KW * C_IN, FILT)), _const2d((1, FILT)),          # conv1 w, b
            _const2d((KH * KW * FILT, FILT)), _const2d((1, FILT)),          # conv2 w, b
            _const2d((KH * KW * FILT, FILT)), _const2d((1, FILT)),          # conv3 w, b
            _const2d((FC_IN, 2 * Z_DIM)), _const2d((1, 2 * Z_DIM)),         # fused head w, b
            per_img_vec,                                                    # eps (per-image)
        ],
        out_specs=(per_img_vec, per_img_vec, per_img_vec),
        scratch_shapes=[
            pltpu.VMEM((P1H * P1W, C_IN), jnp.float32),          # padded input
            pltpu.VMEM((H1 * W1, KH * KW * C_IN), jnp.float32),  # conv1 patches
            pltpu.VMEM((P2H * P2W, FILT), jnp.float32),          # padded conv1 out
            pltpu.VMEM((H2 * W2, KH * KW * FILT), jnp.float32),  # conv2 patches
            pltpu.VMEM((P3H * P3W, FILT), jnp.float32),          # ZeroPad2d buffer
            pltpu.VMEM((H3 * W3, KH * KW * FILT), jnp.float32),  # conv3 patches
        ],
    )

    out_sds = jax.ShapeDtypeStruct((B, 1, Z_DIM), jnp.float32)
    z, mu, logvar = pl.pallas_call(
        _encoder_kernel,
        grid_spec=grid_spec,
        out_shape=(out_sds, out_sds, out_sds),
        compiler_params=pltpu.CompilerParams(dimension_semantics=("arbitrary",)),
    )(x_rows, kparams["w1"], kparams["b1"], kparams["w2"], kparams["b2"],
      kparams["w3"], kparams["b3"], kparams["whead"], kparams["bhead"], eps3)
    return (z.reshape(B, Z_DIM), mu.reshape(B, Z_DIM), logvar.reshape(B, Z_DIM))


# ---------------------------------------------------------------------------
# One-time (outside jit) weight layout prep
# ---------------------------------------------------------------------------
def prep_kernel_params(p):
    def conv_w(w):  # (F, C, kh, kw) -> (kh*kw*C, F): row = (i*kw+j)*C + c
        F, C, kh, kw = w.shape
        return jnp.transpose(w, (2, 3, 1, 0)).reshape(kh * kw * C, F)

    # fc_mu / fc_var fused into one weight; rows reordered from PyTorch flatten
    # order k = c*(H3*W3) + s to kernel order r = s*FILT + c.
    whead = jnp.concatenate([p["wmu"], p["wvar"]], axis=1)              # (512, 2z)
    whead = whead.reshape(FILT, H3 * W3, 2 * Z_DIM)
    whead = jnp.transpose(whead, (1, 0, 2)).reshape(FC_IN, 2 * Z_DIM)
    bhead = jnp.concatenate([p["bmu"], p["bvar"]], axis=1)              # (1, 2z)
    return {
        "w1": conv_w(p["w1"]), "b1": p["b1"].reshape(1, FILT),
        "w2": conv_w(p["w2"]), "b2": p["b2"].reshape(1, FILT),
        "w3": conv_w(p["w3"]), "b3": p["b3"].reshape(1, FILT),
        "whead": whead, "bhead": bhead,
    }


# ---------------------------------------------------------------------------
# Pure-JAX reference (for correctness check), uses the raw PyTorch-style params
# ---------------------------------------------------------------------------
def reference_forward(params, x_nchw, eps):
    def conv(x, w, b, stride, pad):
        y = lax.conv_general_dilated(
            x, w, (stride, stride), pad,
            dimension_numbers=("NCHW", "OIHW", "NCHW"))
        return jnp.maximum(y + b.reshape(1, -1, 1, 1), 0.0)

    h = conv(x_nchw, params["w1"], params["b1"], 2, [(1, 1), (1, 1)])
    h = conv(h, params["w2"], params["b2"], 2, [(1, 1), (1, 1)])
    h = jnp.pad(h, ((0, 0), (0, 0), (1, 2), (1, 2)))   # ZeroPad2d((1,2,1,2))
    h = conv(h, params["w3"], params["b3"], 1, [(0, 0), (0, 0)])
    h = h.reshape(h.shape[0], -1)
    mu = h @ params["wmu"] + params["bmu"].reshape(-1)
    logvar = h @ params["wvar"] + params["bvar"].reshape(-1)
    z = mu + eps * jnp.exp(0.5 * logvar)
    return z, mu, logvar


# ---------------------------------------------------------------------------
# Deterministic parameter construction + demo
# ---------------------------------------------------------------------------
def make_params(key, c_dim, filt, x_dim, z_dim):
    ks = jax.random.split(key, 10)
    fc_in = filt * x_dim // 16
    f32 = jnp.float32
    return {
        "w1": 0.05 * jax.random.normal(ks[0], (filt, c_dim, 4, 4), f32),
        "b1": 0.05 * jax.random.normal(ks[1], (filt,), f32),
        "w2": 0.05 * jax.random.normal(ks[2], (filt, filt, 4, 4), f32),
        "b2": 0.05 * jax.random.normal(ks[3], (filt,), f32),
        "w3": 0.05 * jax.random.normal(ks[4], (filt, filt, 4, 4), f32),
        "b3": 0.05 * jax.random.normal(ks[5], (filt,), f32),
        "wmu": 0.02 * jax.random.normal(ks[6], (fc_in, z_dim), f32),
        "bmu": 0.02 * jax.random.normal(ks[7], (1, z_dim), f32),
        "wvar": 0.02 * jax.random.normal(ks[8], (fc_in, z_dim), f32),
        "bvar": 0.02 * jax.random.normal(ks[9], (1, z_dim), f32),
    }


if __name__ == "__main__":
    # Small, module-consistent shapes: B=2, c_dim=4, H=W=16 (x_dim=256),
    # filt_per_layer=32, z_dim=8  ->  fc input = 32*256/16 = 512.
    B = 2
    x_dim = H_IN * W_IN

    root = jax.random.PRNGKey(0)
    k_params, k_x, k_eps = jax.random.split(root, 3)
    params = make_params(k_params, C_IN, FILT, x_dim, Z_DIM)
    kparams = prep_kernel_params(params)   # one-time layout prep, outside jit

    x = jax.random.normal(k_x, (B, C_IN, H_IN, W_IN), jnp.float32)
    # TODO(synk): torch.randn_like(std) inside reparameterize has no torch-RNG
    # equivalent in-kernel; eps is drawn deterministically host-side and fed in.
    eps = jax.random.normal(k_eps, (B, Z_DIM), jnp.float32)

    fwd = jax.jit(encoder_forward)
    z, mu, logvar = fwd(kparams, x, eps)
    jax.block_until_ready((z, mu, logvar))

    z_ref, mu_ref, logvar_ref = reference_forward(params, x, eps)
    assert jnp.allclose(mu, mu_ref, atol=1e-4, rtol=1e-4)
    assert jnp.allclose(logvar, logvar_ref, atol=1e-4, rtol=1e-4)
    assert jnp.allclose(z, z_ref, atol=1e-4, rtol=1e-4)

    print("KERNEL_OK")
</pallas_src>

<mosaic_0001>
module attributes {stable_mosaic.version = 11 : i64} {
  func.func @_encoder_kernel(%arg0: i32, %arg1: memref<1x256x4xf32, #tpu.memory_space<vmem>>, %arg2: memref<64x32xf32, #tpu.memory_space<vmem>>, %arg3: memref<1x32xf32, #tpu.memory_space<vmem>>, %arg4: memref<512x32xf32, #tpu.memory_space<vmem>>, %arg5: memref<1x32xf32, #tpu.memory_space<vmem>>, %arg6: memref<512x32xf32, #tpu.memory_space<vmem>>, %arg7: memref<1x32xf32, #tpu.memory_space<vmem>>, %arg8: memref<512x16xf32, #tpu.memory_space<vmem>>, %arg9: memref<1x16xf32, #tpu.memory_space<vmem>>, %arg10: memref<1x1x8xf32, #tpu.memory_space<vmem>>, %arg11: memref<1x1x8xf32, #tpu.memory_space<vmem>>, %arg12: memref<1x1x8xf32, #tpu.memory_space<vmem>>, %arg13: memref<1x1x8xf32, #tpu.memory_space<vmem>>, %arg14: memref<324x4xf32, #tpu.memory_space<vmem>>, %arg15: memref<64x64xf32, #tpu.memory_space<vmem>>, %arg16: memref<100x32xf32, #tpu.memory_space<vmem>>, %arg17: memref<16x512xf32, #tpu.memory_space<vmem>>, %arg18: memref<49x32xf32, #tpu.memory_space<vmem>>, %arg19: memref<16x512xf32, #tpu.memory_space<vmem>>) attributes {dimension_semantics = [#tpu.dimension_semantics<arbitrary>], iteration_bounds = array<i64: 2>, scalar_prefetch = 0 : i64, scratch_operands = 6 : i64, tpu.core_type = #tpu.core_type<tc>, window_params = [{transform_indices = @transform_0, window_bounds = array<i64: 1, 256, 4>}, {pipeline_mode = #tpu.pipeline_mode<synchronous>, transform_indices = @transform_1, window_bounds = array<i64: 64, 32>}, {pipeline_mode = #tpu.pipeline_mode<synchronous>, transform_indices = @transform_2, window_bounds = array<i64: 1, 32>}, {pipeline_mode = #tpu.pipeline_mode<synchronous>, transform_indices = @transform_3, window_bounds = array<i64: 512, 32>}, {pipeline_mode = #tpu.pipeline_mode<synchronous>, transform_indices = @transform_4, window_bounds = array<i64: 1, 32>}, {pipeline_mode = #tpu.pipeline_mode<synchronous>, transform_indices = @transform_5, window_bounds = array<i64: 512, 32>}, {pipeline_mode = #tpu.pipeline_mode<synchronous>, transform_indices = @transform_6, window_bounds = array<i64: 1, 32>}, {pipeline_mode = #tpu.pipeline_mode<synchronous>, transform_indices = @transform_7, window_bounds = array<i64: 512, 16>}, {pipeline_mode = #tpu.pipeline_mode<synchronous>, transform_indices = @transform_8, window_bounds = array<i64: 1, 16>}, {transform_indices = @transform_9, window_bounds = array<i64: 1, 1, 8>}, {transform_indices = @transform_10, window_bounds = array<i64: 1, 1, 8>}, {transform_indices = @transform_11, window_bounds = array<i64: 1, 1, 8>}, {transform_indices = @transform_12, window_bounds = array<i64: 1, 1, 8>}]} {
    %c0_i32 = arith.constant 0 : i32
    %0 = arith.cmpi eq, %arg0, %c0_i32 : i32
    %1 = arith.extui %0 : i1 to i32
    %c0_i32_0 = arith.constant 0 : i32
    %2 = arith.cmpi ne, %1, %c0_i32_0 : i32
    scf.if %2 {
      %cst_1084 = arith.constant 0.000000e+00 : f32
      %694 = vector.broadcast %cst_1084 : f32 to vector<324x4xf32>
      %c0_1085 = arith.constant 0 : index
      %c0_1086 = arith.constant 0 : index
      %695 = vector.load %arg14[%c0_1085, %c0_1086] : memref<324x4xf32, #tpu.memory_space<vmem>>, vector<324x4xf32>
      tpu.vector_store %arg14[%c0_1085, %c0_1086], %694 {strides = array<i32>} : memref<324x4xf32, #tpu.memory_space<vmem>>, vector<324x4xf32>,
      %cst_1087 = arith.constant 0.000000e+00 : f32
      %696 = vector.broadcast %cst_1087 : f32 to vector<100x32xf32>
      %c0_1088 = arith.constant 0 : index
      %c0_1089 = arith.constant 0 : index
      %697 = vector.load %arg16[%c0_1088, %c0_1089] : memref<100x32xf32, #tpu.memory_space<vmem>>, vector<100x32xf32>
      tpu.vector_store %arg16[%c0_1088, %c0_1089], %696 {strides = array<i32>} : memref<100x32xf32, #tpu.memory_space<vmem>>, vector<100x32xf32>,
      %cst_1090 = arith.constant 0.000000e+00 : f32
      %698 = vector.broadcast %cst_1090 : f32 to vector<49x32xf32>
      %c0_1091 = arith.constant 0 : index
      %c0_1092 = arith.constant 0 : index
      %699 = vector.load %arg18[%c0_1091, %c0_1092] : memref<49x32xf32, #tpu.memory_space<vmem>>, vector<49x32xf32>
      tpu.vector_store %arg18[%c0_1091, %c0_1092], %698 {strides = array<i32>} : memref<49x32xf32, #tpu.memory_space<vmem>>, vector<49x32xf32>,
    } else {
    }
    %c0 = arith.constant 0 : index
    %c0_1 = arith.constant 0 : index
    %c0_2 = arith.constant 0 : index
    %3 = vector.load %arg1[%c0, %c0_1, %c0_2] : memref<1x256x4xf32, #tpu.memory_space<vmem>>, vector<1x16x4xf32>
    %4 = vector.shape_cast %3 : vector<1x16x4xf32> to vector<16x4xf32>
    %c19 = arith.constant 19 : index
    %c0_3 = arith.constant 0 : index
    %5 = vector.load %arg14[%c19, %c0_3] : memref<324x4xf32, #tpu.memory_space<vmem>>, vector<16x4xf32>
    tpu.vector_store %arg14[%c19, %c0_3], %4 {strides = array<i32>} : memref<324x4xf32, #tpu.memory_space<vmem>>, vector<16x4xf32>,
    %c0_4 = arith.constant 0 : index
    %c16 = arith.constant 16 : index
    %c0_5 = arith.constant 0 : index
    %6 = vector.load %arg1[%c0_4, %c16, %c0_5] : memref<1x256x4xf32, #tpu.memory_space<vmem>>, vector<1x16x4xf32>
    %7 = vector.shape_cast %6 : vector<1x16x4xf32> to vector<16x4xf32>
    %c37 = arith.constant 37 : index
    %c0_6 = arith.constant 0 : index
    %8 = vector.load %arg14[%c37, %c0_6] : memref<324x4xf32, #tpu.memory_space<vmem>>, vector<16x4xf32>
    tpu.vector_store %arg14[%c37, %c0_6], %7 {strides = array<i32>} : memref<324x4xf32, #tpu.memory_space<vmem>>, vector<16x4xf32>,
    %c0_7 = arith.constant 0 : index
    %c32 = arith.constant 32 : index
    %c0_8 = arith.constant 0 : index
    %9 = vector.load %arg1[%c0_7, %c32, %c0_8] : memref<1x256x4xf32, #tpu.memory_space<vmem>>, vector<1x16x4xf32>
    %10 = vector.shape_cast %9 : vector<1x16x4xf32> to vector<16x4xf32>
    %c55 = arith.constant 55 : index
    %c0_9 = arith.constant 0 : index
    %11 = vector.load %arg14[%c55, %c0_9] : memref<324x4xf32, #tpu.memory_space<vmem>>, vector<16x4xf32>
    tpu.vector_store %arg14[%c55, %c0_9], %10 {strides = array<i32>} : memref<324x4xf32, #tpu.memory_space<vmem>>, vector<16x4xf32>,
    %c0_10 = arith.constant 0 : index
    %c48 = arith.constant 48 : index
    %c0_11 = arith.constant 0 : index
    %12 = vector.load %arg1[%c0_10, %c48, %c0_11] : memref<1x256x4xf32, #tpu.memory_space<vmem>>, vector<1x16x4xf32>
    %13 = vector.shape_cast %12 : vector<1x16x4xf32> to vector<16x4xf32>
    %c73 = arith.constant 73 : index
    %c0_12 = arith.constant 0 : index
    %14 = vector.load %arg14[%c73, %c0_12] : memref<324x4xf32, #tpu.memory_space<vmem>>, vector<16x4xf32>
    tpu.vector_store %arg14[%c73, %c0_12], %13 {strides = array<i32>} : memref<324x4xf32, #tpu.memory_space<vmem>>, vector<16x4xf32>,
    %c0_13 = arith.constant 0 : index
    %c64 = arith.constant 64 : index
    %c0_14 = arith.constant 0 : index
    %15 = vector.load %arg1[%c0_13, %c64, %c0_14] : memref<1x256x4xf32, #tpu.memory_space<vmem>>, vector<1x16x4xf32>
    %16 = vector.shape_cast %15 : vector<1x16x4xf32> to vector<16x4xf32>
    %c91 = arith.constant 91 : index
    %c0_15 = arith.constant 0 : index
    %17 = vector.load %arg14[%c91, %c0_15] : memref<324x4xf32, #tpu.memory_space<vmem>>, vector<16x4xf32>
    tpu.vector_store %arg14[%c91, %c0_15], %16 {strides = array<i32>} : memref<324x4xf32, #tpu.memory_space<vmem>>, vector<16x4xf32>,
    %c0_16 = arith.constant 0 : index
    %c80 = arith.constant 80 : index
    %c0_17 = arith.constant 0 : index
    %18 = vector.load %arg1[%c0_16, %c80, %c0_17] : memref<1x256x4xf32, #tpu.memory_space<vmem>>, vector<1x16x4xf32>
    %19 = vector.shape_cast %18 : vector<1x16x4xf32> to vector<16x4xf32>
    %c109 = arith.constant 109 : index
    %c0_18 = arith.constant 0 : index
    %20 = vector.load %arg14[%c109, %c0_18] : memref<324x4xf32, #tpu.memory_space<vmem>>, vector<16x4xf32>
    tpu.vector_store %arg14[%c109, %c0_18], %19 {strides = array<i32>} : memref<324x4xf32, #tpu.memory_space<vmem>>, vector<16x4xf32>,
    %c0_19 = arith.constant 0 : index
    %c96 = arith.constant 96 : index
    %c0_20 = arith.constant 0 : index
    %21 = vector.load %arg1[%c0_19, %c96, %c0_20] : memref<1x256x4xf32, #tpu.memory_space<vmem>>, vector<1x16x4xf32>
    %22 = vector.shape_cast %21 : vector<1x16x4xf32> to vector<16x4xf32>
    %c127 = arith.constant 127 : index
    %c0_21 = arith.constant 0 : index
    %23 = vector.load %arg14[%c127, %c0_21] : memref<324x4xf32, #tpu.memory_space<vmem>>, vector<16x4xf32>
    tpu.vector_store %arg14[%c127, %c0_21], %22 {strides = array<i32>} : memref<324x4xf32, #tpu.memory_space<vmem>>, vector<16x4xf32>,
    %c0_22 = arith.constant 0 : index
    %c112 = arith.constant 112 : index
    %c0_23 = arith.constant 0 : index
    %24 = vector.load %arg1[%c0_22, %c112, %c0_23] : memref<1x256x4xf32, #tpu.memory_space<vmem>>, vector<1x16x4xf32>
    %25 = vector.shape_cast %24 : vector<1x16x4xf32> to vector<16x4xf32>
    %c145 = arith.constant 145 : index
    %c0_24 = arith.constant 0 : index
    %26 = vector.load %arg14[%c145, %c0_24] : memref<324x4xf32, #tpu.memory_space<vmem>>, vector<16x4xf32>
    tpu.vector_store %arg14[%c145, %c0_24], %25 {strides = array<i32>} : memref<324x4xf32, #tpu.memory_space<vmem>>, vector<16x4xf32>,
    %c0_25 = arith.constant 0 : index
    %c128 = arith.constant 128 : index
    %c0_26 = arith.constant 0 : index
    %27 = vector.load %arg1[%c0_25, %c128, %c0_26] : memref<1x256x4xf32, #tpu.memory_space<vmem>>, vector<1x16x4xf32>
    %28 = vector.shape_cast %27 : vector<1x16x4xf32> to vector<16x4xf32>
    %c163 = arith.constant 163 : index
    %c0_27 = arith.constant 0 : index
    %29 = vector.load %arg14[%c163, %c0_27] : memref<324x4xf32, #tpu.memory_space<vmem>>, vector<16x4xf32>
    tpu.vector_store %arg14[%c163, %c0_27], %28 {strides = array<i32>} : memref<324x4xf32, #tpu.memory_space<vmem>>, vector<16x4xf32>,
    %c0_28 = arith.constant 0 : index
    %c144 = arith.constant 144 : index
    %c0_29 = arith.constant 0 : index
    %30 = vector.load %arg1[%c0_28, %c144, %c0_29] : memref<1x256x4xf32, #tpu.memory_space<vmem>>, vector<1x16x4xf32>
    %31 = vector.shape_cast %30 : vector<1x16x4xf32> to vector<16x4xf32>
    %c181 = arith.constant 181 : index
    %c0_30 = arith.constant 0 : index
    %32 = vector.load %arg14[%c181, %c0_30] : memref<324x4xf32, #tpu.memory_space<vmem>>, vector<16x4xf32>
    tpu.vector_store %arg14[%c181, %c0_30], %31 {strides = array<i32>} : memref<324x4xf32, #tpu.memory_space<vmem>>, vector<16x4xf32>,
    %c0_31 = arith.constant 0 : index
    %c160 = arith.constant 160 : index
    %c0_32 = arith.constant 0 : index
    %33 = vector.load %arg1[%c0_31, %c160, %c0_32] : memref<1x256x4xf32, #tpu.memory_space<vmem>>, vector<1x16x4xf32>
    %34 = vector.shape_cast %33 : vector<1x16x4xf32> to vector<16x4xf32>
    %c199 = arith.constant 199 : index
    %c0_33 = arith.constant 0 : index
    %35 = vector.load %arg14[%c199, %c0_33] : memref<324x4xf32, #tpu.memory_space<vmem>>, vector<16x4xf32>
    tpu.vector_store %arg14[%c199, %c0_33], %34 {strides = array<i32>} : memref<324x4xf32, #tpu.memory_space<vmem>>, vector<16x4xf32>,
    %c0_34 = arith.constant 0 : index
    %c176 = arith.constant 176 : index
    %c0_35 = arith.constant 0 : index
    %36 = vector.load %arg1[%c0_34, %c176, %c0_35] : memref<1x256x4xf32, #tpu.memory_space<vmem>>, vector<1x16x4xf32>
    %37 = vector.shape_cast %36 : vector<1x16x4xf32> to vector<16x4xf32>
    %c217 = arith.constant 217 : index
    %c0_36 = arith.constant 0 : index
    %38 = vector.load %arg14[%c217, %c0_36] : memref<324x4xf32, #tpu.memory_space<vmem>>, vector<16x4xf32>
    tpu.vector_store %arg14[%c217, %c0_36], %37 {strides = array<i32>} : memref<324x4xf32, #tpu.memory_space<vmem>>, vector<16x4xf32>,
    %c0_37 = arith.constant 0 : index
    %c192 = arith.constant 192 : index
    %c0_38 = arith.constant 0 : index
    %39 = vector.load %arg1[%c0_37, %c192, %c0_38] : memref<1x256x4xf32, #tpu.memory_space<vmem>>, vector<1x16x4xf32>
    %40 = vector.shape_cast %39 : vector<1x16x4xf32> to vector<16x4xf32>
    %c235 = arith.constant 235 : index
    %c0_39 = arith.constant 0 : index
    %41 = vector.load %arg14[%c235, %c0_39] : memref<324x4xf32, #tpu.memory_space<vmem>>, vector<16x4xf32>
    tpu.vector_store %arg14[%c235, %c0_39], %40 {strides = array<i32>} : memref<324x4xf32, #tpu.memory_space<vmem>>, vector<16x4xf32>,
    %c0_40 = arith.constant 0 : index
    %c208 = arith.constant 208 : index
    %c0_41 = arith.constant 0 : index
    %42 = vector.load %arg1[%c0_40, %c208, %c0_41] : memref<1x256x4xf32, #tpu.memory_space<vmem>>, vector<1x16x4xf32>
    %43 = vector.shape_cast %42 : vector<1x16x4xf32> to vector<16x4xf32>
    %c253 = arith.constant 253 : index
    %c0_42 = arith.constant 0 : index
    %44 = vector.load %arg14[%c253, %c0_42] : memref<324x4xf32, #tpu.memory_space<vmem>>, vector<16x4xf32>
    tpu.vector_store %arg14[%c253, %c0_42], %43 {strides = array<i32>} : memref<324x4xf32, #tpu.memory_space<vmem>>, vector<16x4xf32>,
    %c0_43 = arith.constant 0 : index
    %c224 = arith.constant 224 : index
    %c0_44 = arith.constant 0 : index
    %45 = vector.load %arg1[%c0_43, %c224, %c0_44] : memref<1x256x4xf32, #tpu.memory_space<vmem>>, vector<1x16x4xf32>
    %46 = vector.shape_cast %45 : vector<1x16x4xf32> to vector<16x4xf32>
    %c271 = arith.constant 271 : index
    %c0_45 = arith.constant 0 : index
    %47 = vector.load %arg14[%c271, %c0_45] : memref<324x4xf32, #tpu.memory_space<vmem>>, vector<16x4xf32>
    tpu.vector_store %arg14[%c271, %c0_45], %46 {strides = array<i32>} : memref<324x4xf32, #tpu.memory_space<vmem>>, vector<16x4xf32>,
    %c0_46 = arith.constant 0 : index
    %c240 = arith.constant 240 : index
    %c0_47 = arith.constant 0 : index
    %48 = vector.load %arg1[%c0_46, %c240, %c0_47] : memref<1x256x4xf32, #tpu.memory_space<vmem>>, vector<1x16x4xf32>
    %49 = vector.shape_cast %48 : vector<1x16x4xf32> to vector<16x4xf32>
    %c289 = arith.constant 289 : index
    %c0_48 = arith.constant 0 : index
    %50 = vector.load %arg14[%c289, %c0_48] : memref<324x4xf32, #tpu.memory_space<vmem>>, vector<16x4xf32>
    tpu.vector_store %arg14[%c289, %c0_48], %49 {strides = array<i32>} : memref<324x4xf32, #tpu.memory_space<vmem>>, vector<16x4xf32>,
    %c0_49 = arith.constant 0 : index
    %c0_50 = arith.constant 0 : index
    %51 = tpu.strided_load %arg14[%c0_49, %c0_50] {strides = array<i32: 2, 1>} : memref<324x4xf32, #tpu.memory_space<vmem>>, vector<8x4xf32>
    %c0_51 = arith.constant 0 : index
    %c0_52 = arith.constant 0 : index
    %52 = vector.load %arg15[%c0_51, %c0_52] : memref<64x64xf32, #tpu.memory_space<vmem>>, vector<8x4xf32>
    tpu.vector_store %arg15[%c0_51, %c0_52], %51 {strides = array<i32>} : memref<64x64xf32, #tpu.memory_space<vmem>>, vector<8x4xf32>,
    %c36 = arith.constant 36 : index
    %c0_53 = arith.constant 0 : index
    %53 = tpu.strided_load %arg14[%c36, %c0_53] {strides = array<i32: 2, 1>} : memref<324x4xf32, #tpu.memory_space<vmem>>, vector<8x4xf32>
    %c8 = arith.constant 8 : index
    %c0_54 = arith.constant 0 : index
    %54 = vector.load %arg15[%c8, %c0_54] : memref<64x64xf32, #tpu.memory_space<vmem>>, vector<8x4xf32>
    tpu.vector_store %arg15[%c8, %c0_54], %53 {strides = array<i32>} : memref<64x64xf32, #tpu.memory_space<vmem>>, vector<8x4xf32>,
    %c72 = arith.constant 72 : index
    %c0_55 = arith.constant 0 : index
    %55 = tpu.strided_load %arg14[%c72, %c0_55] {strides = array<i32: 2, 1>} : memref<324x4xf32, #tpu.memory_space<vmem>>, vector<8x4xf32>
    %c16_56 = arith.constant 16 : index
    %c0_57 = arith.constant 0 : index
    %56 = vector.load %arg15[%c16_56, %c0_57] : memref<64x64xf32, #tpu.memory_space<vmem>>, vector<8x4xf32>
    tpu.vector_store %arg15[%c16_56, %c0_57], %55 {strides = array<i32>} : memref<64x64xf32, #tpu.memory_space<vmem>>, vector<8x4xf32>,
    %c108 = arith.constant 108 : index
    %c0_58 = arith.constant 0 : index
    %57 = tpu.strided_load %arg14[%c108, %c0_58] {strides = array<i32: 2, 1>} : memref<324x4xf32, #tpu.memory_space<vmem>>, vector<8x4xf32>
    %c24 = arith.constant 24 : index
    %c0_59 = arith.constant 0 : index
    %58 = vector.load %arg15[%c24, %c0_59] : memref<64x64xf32, #tpu.memory_space<vmem>>, vector<8x4xf32>
    tpu.vector_store %arg15[%c24, %c0_59], %57 {strides = array<i32>} : memref<64x64xf32, #tpu.memory_space<vmem>>, vector<8x4xf32>,
    %c144_60 = arith.constant 144 : index
    %c0_61 = arith.constant 0 : index
    %59 = tpu.strided_load %arg14[%c144_60, %c0_61] {strides = array<i32: 2, 1>} : memref<324x4xf32, #tpu.memory_space<vmem>>, vector<8x4xf32>
    %c32_62 = arith.constant 32 : index
    %c0_63 = arith.constant 0 : index
    %60 = vector.load %arg15[%c32_62, %c0_63] : memref<64x64xf32, #tpu.memory_space<vmem>>, vector<8x4xf32>
    tpu.vector_store %arg15[%c32_62, %c0_63], %59 {strides = array<i32>} : memref<64x64xf32, #tpu.memory_space<vmem>>, vector<8x4xf32>,
    %c180 = arith.constant 180 : index
    %c0_64 = arith.constant 0 : index
    %61 = tpu.strided_load %arg14[%c180, %c0_64] {strides = array<i32: 2, 1>} : memref<324x4xf32, #tpu.memory_space<vmem>>, vector<8x4xf32>
    %c40 = arith.constant 40 : index
    %c0_65 = arith.constant 0 : index
    %62 = vector.load %arg15[%c40, %c0_65] : memref<64x64xf32, #tpu.memory_space<vmem>>, vector<8x4xf32>
    tpu.vector_store %arg15[%c40, %c0_65], %61 {strides = array<i32>} : memref<64x64xf32, #tpu.memory_space<vmem>>, vector<8x4xf32>,
    %c216 = arith.constant 216 : index
    %c0_66 = arith.constant 0 : index
    %63 = tpu.strided_load %arg14[%c216, %c0_66] {strides = array<i32: 2, 1>} : memref<324x4xf32, #tpu.memory_space<vmem>>, vector<8x4xf32>
    %c48_67 = arith.constant 48 : index
    %c0_68 = arith.constant 0 : index
    %64 = vector.load %arg15[%c48_67, %c0_68] : memref<64x64xf32, #tpu.memory_space<vmem>>, vector<8x4xf32>
    tpu.vector_store %arg15[%c48_67, %c0_68], %63 {strides = array<i32>} : memref<64x64xf32, #tpu.memory_space<vmem>>, vector<8x4xf32>,
    %c252 = arith.constant 252 : index
    %c0_69 = arith.constant 0 : index
    %65 = tpu.strided_load %arg14[%c252, %c0_69] {strides = array<i32: 2, 1>} : memref<324x4xf32, #tpu.memory_space<vmem>>, vector<8x4xf32>
    %c56 = arith.constant 56 : index
    %c0_70 = arith.constant 0 : index
    %66 = vector.load %arg15[%c56, %c0_70] : memref<64x64xf32, #tpu.memory_space<vmem>>, vector<8x4xf32>
    tpu.vector_store %arg15[%c56, %c0_70], %65 {strides = array<i32>} : memref<64x64xf32, #tpu.memory_space<vmem>>, vector<8x4xf32>,
    %c1 = arith.constant 1 : index
    %c0_71 = arith.constant 0 : index
    %67 = tpu.strided_load %arg14[%c1, %c0_71] {strides = array<i32: 2, 1>} : memref<324x4xf32, #tpu.memory_space<vmem>>, vector<8x4xf32>
    %c0_72 = arith.constant 0 : index
    %c4 = arith.constant 4 : index
    %68 = vector.load %arg15[%c0_72, %c4] : memref<64x64xf32, #tpu.memory_space<vmem>>, vector<8x4xf32>
    tpu.vector_store %arg15[%c0_72, %c4], %67 {strides = array<i32>} : memref<64x64xf32, #tpu.memory_space<vmem>>, vector<8x4xf32>,
    %c37_73 = arith.constant 37 : index
    %c0_74 = arith.constant 0 : index
    %69 = tpu.strided_load %arg14[%c37_73, %c0_74] {strides = array<i32: 2, 1>} : memref<324x4xf32, #tpu.memory_space<vmem>>, vector<8x4xf32>
    %c8_75 = arith.constant 8 : index
    %c4_76 = arith.constant 4 : index
    %70 = vector.load %arg15[%c8_75, %c4_76] : memref<64x64xf32, #tpu.memory_space<vmem>>, vector<8x4xf32>
    tpu.vector_store %arg15[%c8_75, %c4_76], %69 {strides = array<i32>} : memref<64x64xf32, #tpu.memory_space<vmem>>, vector<8x4xf32>,
    %c73_77 = arith.constant 73 : index
    %c0_78 = arith.constant 0 : index
    %71 = tpu.strided_load %arg14[%c73_77, %c0_78] {strides = array<i32: 2, 1>} : memref<324x4xf32, #tpu.memory_space<vmem>>, vector<8x4xf32>
    %c16_79 = arith.constant 16 : index
    %c4_80 = arith.constant 4 : index
    %72 = vector.load %arg15[%c16_79, %c4_80] : memref<64x64xf32, #tpu.memory_space<vmem>>, vector<8x4xf32>
    tpu.vector_store %arg15[%c16_79, %c4_80], %71 {strides = array<i32>} : memref<64x64xf32, #tpu.memory_space<vmem>>, vector<8x4xf32>,
    %c109_81 = arith.constant 109 : index
    %c0_82 = arith.constant 0 : index
    %73 = tpu.strided_load %arg14[%c109_81, %c0_82] {strides = array<i32: 2, 1>} : memref<324x4xf32, #tpu.memory_space<vmem>>, vector<8x4xf32>
    %c24_83 = arith.constant 24 : index
    %c4_84 = arith.constant 4 : index
    %74 = vector.load %arg15[%c24_83, %c4_84] : memref<64x64xf32, #tpu.memory_space<vmem>>, vector<8x4xf32>
    tpu.vector_store %arg15[%c24_83, %c4_84], %73 {strides = array<i32>} : memref<64x64xf32, #tpu.memory_space<vmem>>, vector<8x4xf32>,
    %c145_85 = arith.constant 145 : index
    %c0_86 = arith.constant 0 : index
    %75 = tpu.strided_load %arg14[%c145_85, %c0_86] {strides = array<i32: 2, 1>} : memref<324x4xf32, #tpu.memory_space<vmem>>, vector<8x4xf32>
    %c32_87 = arith.constant 32 : index
    %c4_88 = arith.constant 4 : index
    %76 = vector.load %arg15[%c32_87, %c4_88] : memref<64x64xf32, #tpu.memory_space<vmem>>, vector<8x4xf32>
    tpu.vector_store %arg15[%c32_87, %c4_88], %75 {strides = array<i32>} : memref<64x64xf32, #tpu.memory_space<vmem>>, vector<8x4xf32>,
    %c181_89 = arith.constant 181 : index
    %c0_90 = arith.constant 0 : index
    %77 = tpu.strided_load %arg14[%c181_89, %c0_90] {strides = array<i32: 2, 1>} : memref<324x4xf32, #tpu.memory_space<vmem>>, vector<8x4xf32>
    %c40_91 = arith.constant 40 : index
    %c4_92 = arith.constant 4 : index
    %78 = vector.load %arg15[%c40_91, %c4_92] : memref<64x64xf32, #tpu.memory_space<vmem>>, vector<8x4xf32>
    tpu.vector_store %arg15[%c40_91, %c4_92], %77 {strides = array<i32>} : memref<64x64xf32, #tpu.memory_space<vmem>>, vector<8x4xf32>,
    %c217_93 = arith.constant 217 : index
    %c0_94 = arith.constant 0 : index
    %79 = tpu.strided_load %arg14[%c217_93, %c0_94] {strides = array<i32: 2, 1>} : memref<324x4xf32, #tpu.memory_space<vmem>>, vector<8x4xf32>
    %c48_95 = arith.constant 48 : index
    %c4_96 = arith.constant 4 : index
    %80 = vector.load %arg15[%c48_95, %c4_96] : memref<64x64xf32, #tpu.memory_space<vmem>>, vector<8x4xf32>
    tpu.vector_store %arg15[%c48_95, %c4_96], %79 {strides = array<i32>} : memref<64x64xf32, #tpu.memory_space<vmem>>, vector<8x4xf32>,
    %c253_97 = arith.constant 253 : index
    %c0_98 = arith.constant 0 : index
    %81 = tpu.strided_load %arg14[%c253_97, %c0_98] {strides = array<i32: 2, 1>} : memref<324x4xf32, #tpu.memory_space<vmem>>, vector<8x4xf32>
    %c56_99 = arith.constant 56 : index
    %c4_100 = arith.constant 4 : index
    %82 = vector.load %arg15[%c56_99, %c4_100] : memref<64x64xf32, #tpu.memory_space<vmem>>, vector<8x4xf32>
    tpu.vector_store %arg15[%c56_99, %c4_100], %81 {strides = array<i32>} : memref<64x64xf32, #tpu.memory_space<vmem>>, vector<8x4xf32>,
    %c2 = arith.constant 2 : index
    %c0_101 = arith.constant 0 : index
    %83 = tpu.strided_load %arg14[%c2, %c0_101] {strides = array<i32: 2, 1>} : memref<324x4xf32, #tpu.memory_space<vmem>>, vector<8x4xf32>
    %c0_102 = arith.constant 0 : index
    %c8_103 = arith.constant 8 : index
    %84 = vector.load %arg15[%c0_102, %c8_103] : memref<64x64xf32, #tpu.memory_space<vmem>>, vector<8x4xf32>
    tpu.vector_store %arg15[%c0_102, %c8_103], %83 {strides = array<i32>} : memref<64x64xf32, #tpu.memory_space<vmem>>, vector<8x4xf32>,
    %c38 = arith.constant 38 : index
    %c0_104 = arith.constant 0 : index
    %85 = tpu.strided_load %arg14[%c38, %c0_104] {strides = array<i32: 2, 1>} : memref<324x4xf32, #tpu.memory_space<vmem>>, vector<8x4xf32>
    %c8_105 = arith.constant 8 : index
    %c8_106 = arith.constant 8 : index
    %86 = vector.load %arg15[%c8_105, %c8_106] : memref<64x64xf32, #tpu.memory_space<vmem>>, vector<8x4xf32>
    tpu.vector_store %arg15[%c8_105, %c8_106], %85 {strides = array<i32>} : memref<64x64xf32, #tpu.memory_space<vmem>>, vector<8x4xf32>,
    %c74 = arith.constant 74 : index
    %c0_107 = arith.constant 0 : index
    %87 = tpu.strided_load %arg14[%c74, %c0_107] {strides = array<i32: 2, 1>} : memref<324x4xf32, #tpu.memory_space<vmem>>, vector<8x4xf32>
    %c16_108 = arith.constant 16 : index
    %c8_109 = arith.constant 8 : index
    %88 = vector.load %arg15[%c16_108, %c8_109] : memref<64x64xf32, #tpu.memory_space<vmem>>, vector<8x4xf32>
    tpu.vector_store %arg15[%c16_108, %c8_109], %87 {strides = array<i32>} : memref<64x64xf32, #tpu.memory_space<vmem>>, vector<8x4xf32>,
    %c110 = arith.constant 110 : index
    %c0_110 = arith.constant 0 : index
    %89 = tpu.strided_load %arg14[%c110, %c0_110] {strides = array<i32: 2, 1>} : memref<324x4xf32, #tpu.memory_space<vmem>>, vector<8x4xf32>
    %c24_111 = arith.constant 24 : index
    %c8_112 = arith.constant 8 : index
    %90 = vector.load %arg15[%c24_111, %c8_112] : memref<64x64xf32, #tpu.memory_space<vmem>>, vector<8x4xf32>
    tpu.vector_store %arg15[%c24_111, %c8_112], %89 {strides = array<i32>} : memref<64x64xf32, #tpu.memory_space<vmem>>, vector<8x4xf32>,
    %c146 = arith.constant 146 : index
    %c0_113 = arith.constant 0 : index
    %91 = tpu.strided_load %arg14[%c146, %c0_113] {strides = array<i32: 2, 1>} : memref<324x4xf32, #tpu.memory_space<vmem>>, vector<8x4xf32>
    %c32_114 = arith.constant 32 : index
    %c8_115 = arith.constant 8 : index
    %92 = vector.load %arg15[%c32_114, %c8_115] : memref<64x64xf32, #tpu.memory_space<vmem>>, vector<8x4xf32>
    tpu.vector_store %arg15[%c32_114, %c8_115], %91 {strides = array<i32>} : memref<64x64xf32, #tpu.memory_space<vmem>>, vector<8x4xf32>,
    %c182 = arith.constant 182 : index
    %c0_116 = arith.constant 0 : index
    %93 = tpu.strided_load %arg14[%c182, %c0_116] {strides = array<i32: 2, 1>} : memref<324x4xf32, #tpu.memory_space<vmem>>, vector<8x4xf32>
    %c40_117 = arith.constant 40 : index
    %c8_118 = arith.constant 8 : index
    %94 = vector.load %arg15[%c40_117, %c8_118] : memref<64x64xf32, #tpu.memory_space<vmem>>, vector<8x4xf32>
    tpu.vector_store %arg15[%c40_117, %c8_118], %93 {strides = array<i32>} : memref<64x64xf32, #tpu.memory_space<vmem>>, vector<8x4xf32>,
    %c218 = arith.constant 218 : index
    %c0_119 = arith.constant 0 : index
    %95 = tpu.strided_load %arg14[%c218, %c0_119] {strides = array<i32: 2, 1>} : memref<324x4xf32, #tpu.memory_space<vmem>>, vector<8x4xf32>
    %c48_120 = arith.constant 48 : index
    %c8_121 = arith.constant 8 : index
    %96 = vector.load %arg15[%c48_120, %c8_121] : memref<64x64xf32, #tpu.memory_space<vmem>>, vector<8x4xf32>
    tpu.vector_store %arg15[%c48_120, %c8_121], %95 {strides = array<i32>} : memref<64x64xf32, #tpu.memory_space<vmem>>, vector<8x4xf32>,
    %c254 = arith.constant 254 : index
    %c0_122 = arith.constant 0 : index
    %97 = tpu.strided_load %arg14[%c254, %c0_122] {strides = array<i32: 2, 1>} : memref<324x4xf32, #tpu.memory_space<vmem>>, vector<8x4xf32>
    %c56_123 = arith.constant 56 : index
    %c8_124 = arith.constant 8 : index
    %98 = vector.load %arg15[%c56_123, %c8_124] : memref<64x64xf32, #tpu.memory_space<vmem>>, vector<8x4xf32>
    tpu.vector_store %arg15[%c56_123, %c8_124], %97 {strides = array<i32>} : memref<64x64xf32, #tpu.memory_space<vmem>>, vector<8x4xf32>,
    %c3 = arith.constant 3 : index
    %c0_125 = arith.constant 0 : index
    %99 = tpu.strided_load %arg14[%c3, %c0_125] {strides = array<i32: 2, 1>} : memref<324x4xf32, #tpu.memory_space<vmem>>, vector<8x4xf32>
    %c0_126 = arith.constant 0 : index
    %c12 = arith.constant 12 : index
    %100 = vector.load %arg15[%c0_126, %c12] : memref<64x64xf32, #tpu.memory_space<vmem>>, vector<8x4xf32>
    tpu.vector_store %arg15[%c0_126, %c12], %99 {strides = array<i32>} : memref<64x64xf32, #tpu.memory_space<vmem>>, vector<8x4xf32>,
    %c39 = arith.constant 39 : index
    %c0_127 = arith.constant 0 : index
    %101 = tpu.strided_load %arg14[%c39, %c0_127] {strides = array<i32: 2, 1>} : memref<324x4xf32, #tpu.memory_space<vmem>>, vector<8x4xf32>
    %c8_128 = arith.constant 8 : index
    %c12_129 = arith.constant 12 : index
    %102 = vector.load %arg15[%c8_128, %c12_129] : memref<64x64xf32, #tpu.memory_space<vmem>>, vector<8x4xf32>
    tpu.vector_store %arg15[%c8_128, %c12_129], %101 {strides = array<i32>} : memref<64x64xf32, #tpu.memory_space<vmem>>, vector<8x4xf32>,
    %c75 = arith.constant 75 : index
    %c0_130 = arith.constant 0 : index
    %103 = tpu.strided_load %arg14[%c75, %c0_130] {strides = array<i32: 2, 1>} : memref<324x4xf32, #tpu.memory_space<vmem>>, vector<8x4xf32>
    %c16_131 = arith.constant 16 : index
    %c12_132 = arith.constant 12 : index
    %104 = vector.load %arg15[%c16_131, %c12_132] : memref<64x64xf32, #tpu.memory_space<vmem>>, vector<8x4xf32>
    tpu.vector_store %arg15[%c16_131, %c12_132], %103 {strides = array<i32>} : memref<64x64xf32, #tpu.memory_space<vmem>>, vector<8x4xf32>,
    %c111 = arith.constant 111 : index
    %c0_133 = arith.constant 0 : index
    %105 = tpu.strided_load %arg14[%c111, %c0_133] {strides = array<i32: 2, 1>} : memref<324x4xf32, #tpu.memory_space<vmem>>, vector<8x4xf32>
    %c24_134 = arith.constant 24 : index
    %c12_135 = arith.constant 12 : index
    %106 = vector.load %arg15[%c24_134, %c12_135] : memref<64x64xf32, #tpu.memory_space<vmem>>, vector<8x4xf32>
    tpu.vector_store %arg15[%c24_134, %c12_135], %105 {strides = array<i32>} : memref<64x64xf32, #tpu.memory_space<vmem>>, vector<8x4xf32>,
    %c147 = arith.constant 147 : index
    %c0_136 = arith.constant 0 : index
    %107 = tpu.strided_load %arg14[%c147, %c0_136] {strides = array<i32: 2, 1>} : memref<324x4xf32, #tpu.memory_space<vmem>>, vector<8x4xf32>
    %c32_137 = arith.constant 32 : index
    %c12_138 = arith.constant 12 : index
    %108 = vector.load %arg15[%c32_137, %c12_138] : memref<64x64xf32, #tpu.memory_space<vmem>>, vector<8x4xf32>
    tpu.vector_store %arg15[%c32_137, %c12_138], %107 {strides = array<i32>} : memref<64x64xf32, #tpu.memory_space<vmem>>, vector<8x4xf32>,
    %c183 = arith.constant 183 : index
    %c0_139 = arith.constant 0 : index
    %109 = tpu.strided_load %arg14[%c183, %c0_139] {strides = array<i32: 2, 1>} : memref<324x4xf32, #tpu.memory_space<vmem>>, vector<8x4xf32>
    %c40_140 = arith.constant 40 : index
    %c12_141 = arith.constant 12 : index
    %110 = vector.load %arg15[%c40_140, %c12_141] : memref<64x64xf32, #tpu.memory_space<vmem>>, vector<8x4xf32>
    tpu.vector_store %arg15[%c40_140, %c12_141], %109 {strides = array<i32>} : memref<64x64xf32, #tpu.memory_space<vmem>>, vector<8x4xf32>,
    %c219 = arith.constant 219 : index
    %c0_142 = arith.constant 0 : index
    %111 = tpu.strided_load %arg14[%c219, %c0_142] {strides = array<i32: 2, 1>} : memref<324x4xf32, #tpu.memory_space<vmem>>, vector<8x4xf32>
    %c48_143 = arith.constant 48 : index
    %c12_144 = arith.constant 12 : index
    %112 = vector.load %arg15[%c48_143, %c12_144] : memref<64x64xf32, #tpu.memory_space<vmem>>, vector<8x4xf32>
    tpu.vector_store %arg15[%c48_143, %c12_144], %111 {strides = array<i32>} : memref<64x64xf32, #tpu.memory_space<vmem>>, vector<8x4xf32>,
    %c255 = arith.constant 255 : index
    %c0_145 = arith.constant 0 : index
    %113 = tpu.strided_load %arg14[%c255, %c0_145] {strides = array<i32: 2, 1>} : memref<324x4xf32, #tpu.memory_space<vmem>>, vector<8x4xf32>
    %c56_146 = arith.constant 56 : index
    %c12_147 = arith.constant 12 : index
    %114 = vector.load %arg15[%c56_146, %c12_147] : memref<64x64xf32, #tpu.memory_space<vmem>>, vector<8x4xf32>
    tpu.vector_store %arg15[%c56_146, %c12_147], %113 {strides = array<i32>} : memref<64x64xf32, #tpu.memory_space<vmem>>, vector<8x4xf32>,
    %c18 = arith.constant 18 : index
    %c0_148 = arith.constant 0 : index
    %115 = tpu.strided_load %arg14[%c18, %c0_148] {strides = array<i32: 2, 1>} : memref<324x4xf32, #tpu.memory_space<vmem>>, vector<8x4xf32>
    %c0_149 = arith.constant 0 : index
    %c16_150 = arith.constant 16 : index
    %116 = vector.load %arg15[%c0_149, %c16_150] : memref<64x64xf32, #tpu.memory_space<vmem>>, vector<8x4xf32>
    tpu.vector_store %arg15[%c0_149, %c16_150], %115 {strides = array<i32>} : memref<64x64xf32, #tpu.memory_space<vmem>>, vector<8x4xf32>,
    %c54 = arith.constant 54 : index
    %c0_151 = arith.constant 0 : index
    %117 = tpu.strided_load %arg14[%c54, %c0_151] {strides = array<i32: 2, 1>} : memref<324x4xf32, #tpu.memory_space<vmem>>, vector<8x4xf32>
    %c8_152 = arith.constant 8 : index
    %c16_153 = arith.constant 16 : index
    %118 = vector.load %arg15[%c8_152, %c16_153] : memref<64x64xf32, #tpu.memory_space<vmem>>, vector<8x4xf32>
    tpu.vector_store %arg15[%c8_152, %c16_153], %117 {strides = array<i32>} : memref<64x64xf32, #tpu.memory_space<vmem>>, vector<8x4xf32>,
    %c90 = arith.constant 90 : index
    %c0_154 = arith.constant 0 : index
    %119 = tpu.strided_load %arg14[%c90, %c0_154] {strides = array<i32: 2, 1>} : memref<324x4xf32, #tpu.memory_space<vmem>>, vector<8x4xf32>
    %c16_155 = arith.constant 16 : index
    %c16_156 = arith.constant 16 : index
    %120 = vector.load %arg15[%c16_155, %c16_156] : memref<64x64xf32, #tpu.memory_space<vmem>>, vector<8x4xf32>
    tpu.vector_store %arg15[%c16_155, %c16_156], %119 {strides = array<i32>} : memref<64x64xf32, #tpu.memory_space<vmem>>, vector<8x4xf32>,
    %c126 = arith.constant 126 : index
    %c0_157 = arith.constant 0 : index
    %121 = tpu.strided_load %arg14[%c126, %c0_157] {strides = array<i32: 2, 1>} : memref<324x4xf32, #tpu.memory_space<vmem>>, vector<8x4xf32>
    %c24_158 = arith.constant 24 : index
    %c16_159 = arith.constant 16 : index
    %122 = vector.load %arg15[%c24_158, %c16_159] : memref<64x64xf32, #tpu.memory_space<vmem>>, vector<8x4xf32>
    tpu.vector_store %arg15[%c24_158, %c16_159], %121 {strides = array<i32>} : memref<64x64xf32, #tpu.memory_space<vmem>>, vector<8x4xf32>,
    %c162 = arith.constant 162 : index
    %c0_160 = arith.constant 0 : index
    %123 = tpu.strided_load %arg14[%c162, %c0_160] {strides = array<i32: 2, 1>} : memref<324x4xf32, #tpu.memory_space<vmem>>, vector<8x4xf32>
    %c32_161 = arith.constant 32 : index
    %c16_162 = arith.constant 16 : index
    %124 = vector.load %arg15[%c32_161, %c16_162] : memref<64x64xf32, #tpu.memory_space<vmem>>, vector<8x4xf32>
    tpu.vector_store %arg15[%c32_161, %c16_162], %123 {strides = array<i32>} : memref<64x64xf32, #tpu.memory_space<vmem>>, vector<8x4xf32>,
    %c198 = arith.constant 198 : index
    %c0_163 = arith.constant 0 : index
    %125 = tpu.strided_load %arg14[%c198, %c0_163] {strides = array<i32: 2, 1>} : memref<324x4xf32, #tpu.memory_space<vmem>>, vector<8x4xf32>
    %c40_164 = arith.constant 40 : index
    %c16_165 = arith.constant 16 : index
    %126 = vector.load %arg15[%c40_164, %c16_165] : memref<64x64xf32, #tpu.memory_space<vmem>>, vector<8x4xf32>
    tpu.vector_store %arg15[%c40_164, %c16_165], %125 {strides = array<i32>} : memref<64x64xf32, #tpu.memory_space<vmem>>, vector<8x4xf32>,
    %c234 = arith.constant 234 : index
    %c0_166 = arith.constant 0 : index
    %127 = tpu.strided_load %arg14[%c234, %c0_166] {strides = array<i32: 2, 1>} : memref<324x4xf32, #tpu.memory_space<vmem>>, vector<8x4xf32>
    %c48_167 = arith.constant 48 : index
    %c16_168 = arith.constant 16 : index
    %128 = vector.load %arg15[%c48_167, %c16_168] : memref<64x64xf32, #tpu.memory_space<vmem>>, vector<8x4xf32>
    tpu.vector_store %arg15[%c48_167, %c16_168], %127 {strides = array<i32>} : memref<64x64xf32, #tpu.memory_space<vmem>>, vector<8x4xf32>,
    %c270 = arith.constant 270 : index
    %c0_169 = arith.constant 0 : index
    %129 = tpu.strided_load %arg14[%c270, %c0_169] {strides = array<i32: 2, 1>} : memref<324x4xf32, #tpu.memory_space<vmem>>, vector<8x4xf32>
    %c56_170 = arith.constant 56 : index
    %c16_171 = arith.constant 16 : index
    %130 = vector.load %arg15[%c56_170, %c16_171] : memref<64x64xf32, #tpu.memory_space<vmem>>, vector<8x4xf32>
    tpu.vector_store %arg15[%c56_170, %c16_171], %129 {strides = array<i32>} : memref<64x64xf32, #tpu.memory_space<vmem>>, vector<8x4xf32>,
    %c19_172 = arith.constant 19 : index
    %c0_173 = arith.constant 0 : index
    %131 = tpu.strided_load %arg14[%c19_172, %c0_173] {strides = array<i32: 2, 1>} : memref<324x4xf32, #tpu.memory_space<vmem>>, vector<8x4xf32>
    %c0_174 = arith.constant 0 : index
    %c20 = arith.constant 20 : index
    %132 = vector.load %arg15[%c0_174, %c20] : memref<64x64xf32, #tpu.memory_space<vmem>>, vector<8x4xf32>
    tpu.vector_store %arg15[%c0_174, %c20], %131 {strides = array<i32>} : memref<64x64xf32, #tpu.memory_space<vmem>>, vector<8x4xf32>,
    %c55_175 = arith.constant 55 : index
    %c0_176 = arith.constant 0 : index
    %133 = tpu.strided_load %arg14[%c55_175, %c0_176] {strides = array<i32: 2, 1>} : memref<324x4xf32, #tpu.memory_space<vmem>>, vector<8x4xf32>
    %c8_177 = arith.constant 8 : index
    %c20_178 = arith.constant 20 : index
    %134 = vector.load %arg15[%c8_177, %c20_178] : memref<64x64xf32, #tpu.memory_space<vmem>>, vector<8x4xf32>
    tpu.vector_store %arg15[%c8_177, %c20_178], %133 {strides = array<i32>} : memref<64x64xf32, #tpu.memory_space<vmem>>, vector<8x4xf32>,
    %c91_179 = arith.constant 91 : index
    %c0_180 = arith.constant 0 : index
    %135 = tpu.strided_load %arg14[%c91_179, %c0_180] {strides = array<i32: 2, 1>} : memref<324x4xf32, #tpu.memory_space<vmem>>, vector<8x4xf32>
    %c16_181 = arith.constant 16 : index
    %c20_182 = arith.constant 20 : index
    %136 = vector.load %arg15[%c16_181, %c20_182] : memref<64x64xf32, #tpu.memory_space<vmem>>, vector<8x4xf32>
    tpu.vector_store %arg15[%c16_181, %c20_182], %135 {strides = array<i32>} : memref<64x64xf32, #tpu.memory_space<vmem>>, vector<8x4xf32>,
    %c127_183 = arith.constant 127 : index
    %c0_184 = arith.constant 0 : index
    %137 = tpu.strided_load %arg14[%c127_183, %c0_184] {strides = array<i32: 2, 1>} : memref<324x4xf32, #tpu.memory_space<vmem>>, vector<8x4xf32>
    %c24_185 = arith.constant 24 : index
    %c20_186 = arith.constant 20 : index
    %138 = vector.load %arg15[%c24_185, %c20_186] : memref<64x64xf32, #tpu.memory_space<vmem>>, vector<8x4xf32>
    tpu.vector_store %arg15[%c24_185, %c20_186], %137 {strides = array<i32>} : memref<64x64xf32, #tpu.memory_space<vmem>>, vector<8x4xf32>,
    %c163_187 = arith.constant 163 : index
    %c0_188 = arith.constant 0 : index
    %139 = tpu.strided_load %arg14[%c163_187, %c0_188] {strides = array<i32: 2, 1>} : memref<324x4xf32, #tpu.memory_space<vmem>>, vector<8x4xf32>
    %c32_189 = arith.constant 32 : index
    %c20_190 = arith.constant 20 : index
    %140 = vector.load %arg15[%c32_189, %c20_190] : memref<64x64xf32, #tpu.memory_space<vmem>>, vector<8x4xf32>
    tpu.vector_store %arg15[%c32_189, %c20_190], %139 {strides = array<i32>} : memref<64x64xf32, #tpu.memory_space<vmem>>, vector<8x4xf32>,
    %c199_191 = arith.constant 199 : index
    %c0_192 = arith.constant 0 : index
    %141 = tpu.strided_load %arg14[%c199_191, %c0_192] {strides = array<i32: 2, 1>} : memref<324x4xf32, #tpu.memory_space<vmem>>, vector<8x4xf32>
    %c40_193 = arith.constant 40 : index
    %c20_194 = arith.constant 20 : index
    %142 = vector.load %arg15[%c40_193, %c20_194] : memref<64x64xf32, #tpu.memory_space<vmem>>, vector<8x4xf32>
    tpu.vector_store %arg15[%c40_193, %c20_194], %141 {strides = array<i32>} : memref<64x64xf32, #tpu.memory_space<vmem>>, vector<8x4xf32>,
    %c235_195 = arith.constant 235 : index
    %c0_196 = arith.constant 0 : index
    %143 = tpu.strided_load %arg14[%c235_195, %c0_196] {strides = array<i32: 2, 1>} : memref<324x4xf32, #tpu.memory_space<vmem>>, vector<8x4xf32>
    %c48_197 = arith.constant 48 : index
    %c20_198 = arith.constant 20 : index
    %144 = vector.load %arg15[%c48_197, %c20_198] : memref<64x64xf32, #tpu.memory_space<vmem>>, vector<8x4xf32>
    tpu.vector_store %arg15[%c48_197, %c20_198], %143 {strides = array<i32>} : memref<64x64xf32, #tpu.memory_space<vmem>>, vector<8x4xf32>,
    %c271_199 = arith.constant 271 : index
    %c0_200 = arith.constant 0 : index
    %145 = tpu.strided_load %arg14[%c271_199, %c0_200] {strides = array<i32: 2, 1>} : memref<324x4xf32, #tpu.memory_space<vmem>>, vector<8x4xf32>
    %c56_201 = arith.constant 56 : index
    %c20_202 = arith.constant 20 : index
    %146 = vector.load %arg15[%c56_201, %c20_202] : memref<64x64xf32, #tpu.memory_space<vmem>>, vector<8x4xf32>
    tpu.vector_store %arg15[%c56_201, %c20_202], %145 {strides = array<i32>} : memref<64x64xf32, #tpu.memory_space<vmem>>, vector<8x4xf32>,
    %c20_203 = arith.constant 20 : index
    %c0_204 = arith.constant 0 : index
    %147 = tpu.strided_load %arg14[%c20_203, %c0_204] {strides = array<i32: 2, 1>} : memref<324x4xf32, #tpu.memory_space<vmem>>, vector<8x4xf32>
    %c0_205 = arith.constant 0 : index
    %c24_206 = arith.constant 24 : index
    %148 = vector.load %arg15[%c0_205, %c24_206] : memref<64x64xf32, #tpu.memory_space<vmem>>, vector<8x4xf32>
    tpu.vector_store %arg15[%c0_205, %c24_206], %147 {strides = array<i32>} : memref<64x64xf32, #tpu.memory_space<vmem>>, vector<8x4xf32>,
    %c56_207 = arith.constant 56 : index
    %c0_208 = arith.constant 0 : index
    %149 = tpu.strided_load %arg14[%c56_207, %c0_208] {strides = array<i32: 2, 1>} : memref<324x4xf32, #tpu.memory_space<vmem>>, vector<8x4xf32>
    %c8_209 = arith.constant 8 : index
    %c24_210 = arith.constant 24 : index
    %150 = vector.load %arg15[%c8_209, %c24_210] : memref<64x64xf32, #tpu.memory_space<vmem>>, vector<8x4xf32>
    tpu.vector_store %arg15[%c8_209, %c24_210], %149 {strides = array<i32>} : memref<64x64xf32, #tpu.memory_space<vmem>>, vector<8x4xf32>,
    %c92 = arith.constant 92 : index
    %c0_211 = arith.constant 0 : index
    %151 = tpu.strided_load %arg14[%c92, %c0_211] {strides = array<i32: 2, 1>} : memref<324x4xf32, #tpu.memory_space<vmem>>, vector<8x4xf32>
    %c16_212 = arith.constant 16 : index
    %c24_213 = arith.constant 24 : index
    %152 = vector.load %arg15[%c16_212, %c24_213] : memref<64x64xf32, #tpu.memory_space<vmem>>, vector<8x4xf32>
    tpu.vector_store %arg15[%c16_212, %c24_213], %151 {strides = array<i32>} : memref<64x64xf32, #tpu.memory_space<vmem>>, vector<8x4xf32>,
    %c128_214 = arith.constant 128 : index
    %c0_215 = arith.constant 0 : index
    %153 = tpu.strided_load %arg14[%c128_214, %c0_215] {strides = array<i32: 2, 1>} : memref<324x4xf32, #tpu.memory_space<vmem>>, vector<8x4xf32>
    %c24_216 = arith.constant 24 : index
    %c24_217 = arith.constant 24 : index
    %154 = vector.load %arg15[%c24_216, %c24_217] : memref<64x64xf32, #tpu.memory_space<vmem>>, vector<8x4xf32>
    tpu.vector_store %arg15[%c24_216, %c24_217], %153 {strides = array<i32>} : memref<64x64xf32, #tpu.memory_space<vmem>>, vector<8x4xf32>,
    %c164 = arith.constant 164 : index
    %c0_218 = arith.constant 0 : index
    %155 = tpu.strided_load %arg14[%c164, %c0_218] {strides = array<i32: 2, 1>} : memref<324x4xf32, #tpu.memory_space<vmem>>, vector<8x4xf32>
    %c32_219 = arith.constant 32 : index
    %c24_220 = arith.constant 24 : index
    %156 = vector.load %arg15[%c32_219, %c24_220] : memref<64x64xf32, #tpu.memory_space<vmem>>, vector<8x4xf32>
    tpu.vector_store %arg15[%c32_219, %c24_220], %155 {strides = array<i32>} : memref<64x64xf32, #tpu.memory_space<vmem>>, vector<8x4xf32>,
    %c200 = arith.constant 200 : index
    %c0_221 = arith.constant 0 : index
    %157 = tpu.strided_load %arg14[%c200, %c0_221] {strides = array<i32: 2, 1>} : memref<324x4xf32, #tpu.memory_space<vmem>>, vector<8x4xf32>
    %c40_222 = arith.constant 40 : index
    %c24_223 = arith.constant 24 : index
    %158 = vector.load %arg15[%c40_222, %c24_223] : memref<64x64xf32, #tpu.memory_space<vmem>>, vector<8x4xf32>
    tpu.vector_store %arg15[%c40_222, %c24_223], %157 {strides = array<i32>} : memref<64x64xf32, #tpu.memory_space<vmem>>, vector<8x4xf32>,
    %c236 = arith.constant 236 : index
    %c0_224 = arith.constant 0 : index
    %159 = tpu.strided_load %arg14[%c236, %c0_224] {strides = array<i32: 2, 1>} : memref<324x4xf32, #tpu.memory_space<vmem>>, vector<8x4xf32>
    %c48_225 = arith.constant 48 : index
    %c24_226 = arith.constant 24 : index
    %160 = vector.load %arg15[%c48_225, %c24_226] : memref<64x64xf32, #tpu.memory_space<vmem>>, vector<8x4xf32>
    tpu.vector_store %arg15[%c48_225, %c24_226], %159 {strides = array<i32>} : memref<64x64xf32, #tpu.memory_space<vmem>>, vector<8x4xf32>,
    %c272 = arith.constant 272 : index
    %c0_227 = arith.constant 0 : index
    %161 = tpu.strided_load %arg14[%c272, %c0_227] {strides = array<i32: 2, 1>} : memref<324x4xf32, #tpu.memory_space<vmem>>, vector<8x4xf32>
    %c56_228 = arith.constant 56 : index
    %c24_229 = arith.constant 24 : index
    %162 = vector.load %arg15[%c56_228, %c24_229] : memref<64x64xf32, #tpu.memory_space<vmem>>, vector<8x4xf32>
    tpu.vector_store %arg15[%c56_228, %c24_229], %161 {strides = array<i32>} : memref<64x64xf32, #tpu.memory_space<vmem>>, vector<8x4xf32>,
    %c21 = arith.constant 21 : index
    %c0_230 = arith.constant 0 : index
    %163 = tpu.strided_load %arg14[%c21, %c0_230] {strides = array<i32: 2, 1>} : memref<324x4xf32, #tpu.memory_space<vmem>>, vector<8x4xf32>
    %c0_231 = arith.constant 0 : index
    %c28 = arith.constant 28 : index
    %164 = vector.load %arg15[%c0_231, %c28] : memref<64x64xf32, #tpu.memory_space<vmem>>, vector<8x4xf32>
    tpu.vector_store %arg15[%c0_231, %c28], %163 {strides = array<i32>} : memref<64x64xf32, #tpu.memory_space<vmem>>, vector<8x4xf32>,
    %c57 = arith.constant 57 : index
    %c0_232 = arith.constant 0 : index
    %165 = tpu.strided_load %arg14[%c57, %c0_232] {strides = array<i32: 2, 1>} : memref<324x4xf32, #tpu.memory_space<vmem>>, vector<8x4xf32>
    %c8_233 = arith.constant 8 : index
    %c28_234 = arith.constant 28 : index
    %166 = vector.load %arg15[%c8_233, %c28_234] : memref<64x64xf32, #tpu.memory_space<vmem>>, vector<8x4xf32>
    tpu.vector_store %arg15[%c8_233, %c28_234], %165 {strides = array<i32>} : memref<64x64xf32, #tpu.memory_space<vmem>>, vector<8x4xf32>,
    %c93 = arith.constant 93 : index
    %c0_235 = arith.constant 0 : index
    %167 = tpu.strided_load %arg14[%c93, %c0_235] {strides = array<i32: 2, 1>} : memref<324x4xf32, #tpu.memory_space<vmem>>, vector<8x4xf32>
    %c16_236 = arith.constant 16 : index
    %c28_237 = arith.constant 28 : index
    %168 = vector.load %arg15[%c16_236, %c28_237] : memref<64x64xf32, #tpu.memory_space<vmem>>, vector<8x4xf32>
    tpu.vector_store %arg15[%c16_236, %c28_237], %167 {strides = array<i32>} : memref<64x64xf32, #tpu.memory_space<vmem>>, vector<8x4xf32>,
    %c129 = arith.constant 129 : index
    %c0_238 = arith.constant 0 : index
    %169 = tpu.strided_load %arg14[%c129, %c0_238] {strides = array<i32: 2, 1>} : memref<324x4xf32, #tpu.memory_space<vmem>>, vector<8x4xf32>
    %c24_239 = arith.constant 24 : index
    %c28_240 = arith.constant 28 : index
    %170 = vector.load %arg15[%c24_239, %c28_240] : memref<64x64xf32, #tpu.memory_space<vmem>>, vector<8x4xf32>
    tpu.vector_store %arg15[%c24_239, %c28_240], %169 {strides = array<i32>} : memref<64x64xf32, #tpu.memory_space<vmem>>, vector<8x4xf32>,
    %c165 = arith.constant 165 : index
    %c0_241 = arith.constant 0 : index
    %171 = tpu.strided_load %arg14[%c165, %c0_241] {strides = array<i32: 2, 1>} : memref<324x4xf32, #tpu.memory_space<vmem>>, vector<8x4xf32>
    %c32_242 = arith.constant 32 : index
    %c28_243 = arith.constant 28 : index
    %172 = vector.load %arg15[%c32_242, %c28_243] : memref<64x64xf32, #tpu.memory_space<vmem>>, vector<8x4xf32>
    tpu.vector_store %arg15[%c32_242, %c28_243], %171 {strides = array<i32>} : memref<64x64xf32, #tpu.memory_space<vmem>>, vector<8x4xf32>,
    %c201 = arith.constant 201 : index
    %c0_244 = arith.constant 0 : index
    %173 = tpu.strided_load %arg14[%c201, %c0_244] {strides = array<i32: 2, 1>} : memref<324x4xf32, #tpu.memory_space<vmem>>, vector<8x4xf32>
    %c40_245 = arith.constant 40 : index
    %c28_246 = arith.constant 28 : index
    %174 = vector.load %arg15[%c40_245, %c28_246] : memref<64x64xf32, #tpu.memory_space<vmem>>, vector<8x4xf32>
    tpu.vector_store %arg15[%c40_245, %c28_246], %173 {strides = array<i32>} : memref<64x64xf32, #tpu.memory_space<vmem>>, vector<8x4xf32>,
    %c237 = arith.constant 237 : index
    %c0_247 = arith.constant 0 : index
    %175 = tpu.strided_load %arg14[%c237, %c0_247] {strides = array<i32: 2, 1>} : memref<324x4xf32, #tpu.memory_space<vmem>>, vector<8x4xf32>
    %c48_248 = arith.constant 48 : index
    %c28_249 = arith.constant 28 : index
    %176 = vector.load %arg15[%c48_248, %c28_249] : memref<64x64xf32, #tpu.memory_space<vmem>>, vector<8x4xf32>
    tpu.vector_store %arg15[%c48_248, %c28_249], %175 {strides = array<i32>} : memref<64x64xf32, #tpu.memory_space<vmem>>, vector<8x4xf32>,
    %c273 = arith.constant 273 : index
    %c0_250 = arith.constant 0 : index
    %177 = tpu.strided_load %arg14[%c273, %c0_250] {strides = array<i32: 2, 1>} : memref<324x4xf32, #tpu.memory_space<vmem>>, vector<8x4xf32>
    %c56_251 = arith.constant 56 : index
    %c28_252 = arith.constant 28 : index
    %178 = vector.load %arg15[%c56_251, %c28_252] : memref<64x64xf32, #tpu.memory_space<vmem>>, vector<8x4xf32>
    tpu.vector_store %arg15[%c56_251, %c28_252], %177 {strides = array<i32>} : memref<64x64xf32, #tpu.memory_space<vmem>>, vector<8x4xf32>,
    %c36_253 = arith.constant 36 : index
    %c0_254 = arith.constant 0 : index
    %179 = tpu.strided_load %arg14[%c36_253, %c0_254] {strides = array<i32: 2, 1>} : memref<324x4xf32, #tpu.memory_space<vmem>>, vector<8x4xf32>
    %c0_255 = arith.constant 0 : index
    %c32_256 = arith.constant 32 : index
    %180 = vector.load %arg15[%c0_255, %c32_256] : memref<64x64xf32, #tpu.memory_space<vmem>>, vector<8x4xf32>
    tpu.vector_store %arg15[%c0_255, %c32_256], %179 {strides = array<i32>} : memref<64x64xf32, #tpu.memory_space<vmem>>, vector<8x4xf32>,
    %c72_257 = arith.constant 72 : index
    %c0_258 = arith.constant 0 : index
    %181 = tpu.strided_load %arg14[%c72_257, %c0_258] {strides = array<i32: 2, 1>} : memref<324x4xf32, #tpu.memory_space<vmem>>, vector<8x4xf32>
    %c8_259 = arith.constant 8 : index
    %c32_260 = arith.constant 32 : index
    %182 = vector.load %arg15[%c8_259, %c32_260] : memref<64x64xf32, #tpu.memory_space<vmem>>, vector<8x4xf32>
    tpu.vector_store %arg15[%c8_259, %c32_260], %181 {strides = array<i32>} : memref<64x64xf32, #tpu.memory_space<vmem>>, vector<8x4xf32>,
    %c108_261 = arith.constant 108 : index
    %c0_262 = arith.constant 0 : index
    %183 = tpu.strided_load %arg14[%c108_261, %c0_262] {strides = array<i32: 2, 1>} : memref<324x4xf32, #tpu.memory_space<vmem>>, vector<8x4xf32>
    %c16_263 = arith.constant 16 : index
    %c32_264 = arith.constant 32 : index
    %184 = vector.load %arg15[%c16_263, %c32_264] : memref<64x64xf32, #tpu.memory_space<vmem>>, vector<8x4xf32>
    tpu.vector_store %arg15[%c16_263, %c32_264], %183 {strides = array<i32>} : memref<64x64xf32, #tpu.memory_space<vmem>>, vector<8x4xf32>,
    %c144_265 = arith.constant 144 : index
    %c0_266 = arith.constant 0 : index
    %185 = tpu.strided_load %arg14[%c144_265, %c0_266] {strides = array<i32: 2, 1>} : memref<324x4xf32, #tpu.memory_space<vmem>>, vector<8x4xf32>
    %c24_267 = arith.constant 24 : index
    %c32_268 = arith.constant 32 : index
    %186 = vector.load %arg15[%c24_267, %c32_268] : memref<64x64xf32, #tpu.memory_space<vmem>>, vector<8x4xf32>
    tpu.vector_store %arg15[%c24_267, %c32_268], %185 {strides = array<i32>} : memref<64x64xf32, #tpu.memory_space<vmem>>, vector<8x4xf32>,
    %c180_269 = arith.constant 180 : index
    %c0_270 = arith.constant 0 : index
    %187 = tpu.strided_load %arg14[%c180_269, %c0_270] {strides = array<i32: 2, 1>} : memref<324x4xf32, #tpu.memory_space<vmem>>, vector<8x4xf32>
    %c32_271 = arith.constant 32 : index
    %c32_272 = arith.constant 32 : index
    %188 = vector.load %arg15[%c32_271, %c32_272] : memref<64x64xf32, #tpu.memory_space<vmem>>, vector<8x4xf32>
    tpu.vector_store %arg15[%c32_271, %c32_272], %187 {strides = array<i32>} : memref<64x64xf32, #tpu.memory_space<vmem>>, vector<8x4xf32>,
    %c216_273 = arith.constant 216 : index
    %c0_274 = arith.constant 0 : index
    %189 = tpu.strided_load %arg14[%c216_273, %c0_274] {strides = array<i32: 2, 1>} : memref<324x4xf32, #tpu.memory_space<vmem>>, vector<8x4xf32>
    %c40_275 = arith.constant 40 : index
    %c32_276 = arith.constant 32 : index
    %190 = vector.load %arg15[%c40_275, %c32_276] : memref<64x64xf32, #tpu.memory_space<vmem>>, vector<8x4xf32>
    tpu.vector_store %arg15[%c40_275, %c32_276], %189 {strides = array<i32>} : memref<64x64xf32, #tpu.memory_space<vmem>>, vector<8x4xf32>,
    %c252_277 = arith.constant 252 : index
    %c0_278 = arith.constant 0 : index
    %191 = tpu.strided_load %arg14[%c252_277, %c0_278] {strides = array<i32: 2, 1>} : memref<324x4xf32, #tpu.memory_space<vmem>>, vector<8x4xf32>
    %c48_279 = arith.constant 48 : index
    %c32_280 = arith.constant 32 : index
    %192 = vector.load %arg15[%c48_279, %c32_280] : memref<64x64xf32, #tpu.memory_space<vmem>>, vector<8x4xf32>
    tpu.vector_store %arg15[%c48_279, %c32_280], %191 {strides = array<i32>} : memref<64x64xf32, #tpu.memory_space<vmem>>, vector<8x4xf32>,
    %c288 = arith.constant 288 : index
    %c0_281 = arith.constant 0 : index
    %193 = tpu.strided_load %arg14[%c288, %c0_281] {strides = array<i32: 2, 1>} : memref<324x4xf32, #tpu.memory_space<vmem>>, vector<8x4xf32>
    %c56_282 = arith.constant 56 : index
    %c32_283 = arith.constant 32 : index
    %194 = vector.load %arg15[%c56_282, %c32_283] : memref<64x64xf32, #tpu.memory_space<vmem>>, vector<8x4xf32>
    tpu.vector_store %arg15[%c56_282, %c32_283], %193 {strides = array<i32>} : memref<64x64xf32, #tpu.memory_space<vmem>>, vector<8x4xf32>,
    %c37_284 = arith.constant 37 : index
    %c0_285 = arith.constant 0 : index
    %195 = tpu.strided_load %arg14[%c37_284, %c0_285] {strides = array<i32: 2, 1>} : memref<324x4xf32, #tpu.memory_space<vmem>>, vector<8x4xf32>
    %c0_286 = arith.constant 0 : index
    %c36_287 = arith.constant 36 : index
    %196 = vector.load %arg15[%c0_286, %c36_287] : memref<64x64xf32, #tpu.memory_space<vmem>>, vector<8x4xf32>
    tpu.vector_store %arg15[%c0_286, %c36_287], %195 {strides = array<i32>} : memref<64x64xf32, #tpu.memory_space<vmem>>, vector<8x4xf32>,
    %c73_288 = arith.constant 73 : index
    %c0_289 = arith.constant 0 : index
    %197 = tpu.strided_load %arg14[%c73_288, %c0_289] {strides = array<i32: 2, 1>} : memref<324x4xf32, #tpu.memory_space<vmem>>, vector<8x4xf32>
    %c8_290 = arith.constant 8 : index
    %c36_291 = arith.constant 36 : index
    %198 = vector.load %arg15[%c8_290, %c36_291] : memref<64x64xf32, #tpu.memory_space<vmem>>, vector<8x4xf32>
    tpu.vector_store %arg15[%c8_290, %c36_291], %197 {strides = array<i32>} : memref<64x64xf32, #tpu.memory_space<vmem>>, vector<8x4xf32>,
    %c109_292 = arith.constant 109 : index
    %c0_293 = arith.constant 0 : index
    %199 = tpu.strided_load %arg14[%c109_292, %c0_293] {strides = array<i32: 2, 1>} : memref<324x4xf32, #tpu.memory_space<vmem>>, vector<8x4xf32>
    %c16_294 = arith.constant 16 : index
    %c36_295 = arith.constant 36 : index
    %200 = vector.load %arg15[%c16_294, %c36_295] : memref<64x64xf32, #tpu.memory_space<vmem>>, vector<8x4xf32>
    tpu.vector_store %arg15[%c16_294, %c36_295], %199 {strides = array<i32>} : memref<64x64xf32, #tpu.memory_space<vmem>>, vector<8x4xf32>,
    %c145_296 = arith.constant 145 : index
    %c0_297 = arith.constant 0 : index
    %201 = tpu.strided_load %arg14[%c145_296, %c0_297] {strides = array<i32: 2, 1>} : memref<324x4xf32, #tpu.memory_space<vmem>>, vector<8x4xf32>
    %c24_298 = arith.constant 24 : index
    %c36_299 = arith.constant 36 : index
    %202 = vector.load %arg15[%c24_298, %c36_299] : memref<64x64xf32, #tpu.memory_space<vmem>>, vector<8x4xf32>
    tpu.vector_store %arg15[%c24_298, %c36_299], %201 {strides = array<i32>} : memref<64x64xf32, #tpu.memory_space<vmem>>, vector<8x4xf32>,
    %c181_300 = arith.constant 181 : index
    %c0_301 = arith.constant 0 : index
    %203 = tpu.strided_load %arg14[%c181_300, %c0_301] {strides = array<i32: 2, 1>} : memref<324x4xf32, #tpu.memory_space<vmem>>, vector<8x4xf32>
    %c32_302 = arith.constant 32 : index
    %c36_303 = arith.constant 36 : index
    %204 = vector.load %arg15[%c32_302, %c36_303] : memref<64x64xf32, #tpu.memory_space<vmem>>, vector<8x4xf32>
    tpu.vector_store %arg15[%c32_302, %c36_303], %203 {strides = array<i32>} : memref<64x64xf32, #tpu.memory_space<vmem>>, vector<8x4xf32>,
    %c217_304 = arith.constant 217 : index
    %c0_305 = arith.constant 0 : index
    %205 = tpu.strided_load %arg14[%c217_304, %c0_305] {strides = array<i32: 2, 1>} : memref<324x4xf32, #tpu.memory_space<vmem>>, vector<8x4xf32>
    %c40_306 = arith.constant 40 : index
    %c36_307 = arith.constant 36 : index
    %206 = vector.load %arg15[%c40_306, %c36_307] : memref<64x64xf32, #tpu.memory_space<vmem>>, vector<8x4xf32>
    tpu.vector_store %arg15[%c40_306, %c36_307], %205 {strides = array<i32>} : memref<64x64xf32, #tpu.memory_space<vmem>>, vector<8x4xf32>,
    %c253_308 = arith.constant 253 : index
    %c0_309 = arith.constant 0 : index
    %207 = tpu.strided_load %arg14[%c253_308, %c0_309] {strides = array<i32: 2, 1>} : memref<324x4xf32, #tpu.memory_space<vmem>>, vector<8x4xf32>
    %c48_310 = arith.constant 48 : index
    %c36_311 = arith.constant 36 : index
    %208 = vector.load %arg15[%c48_310, %c36_311] : memref<64x64xf32, #tpu.memory_space<vmem>>, vector<8x4xf32>
    tpu.vector_store %arg15[%c48_310, %c36_311], %207 {strides = array<i32>} : memref<64x64xf32, #tpu.memory_space<vmem>>, vector<8x4xf32>,
    %c289_312 = arith.constant 289 : index
    %c0_313 = arith.constant 0 : index
    %209 = tpu.strided_load %arg14[%c289_312, %c0_313] {strides = array<i32: 2, 1>} : memref<324x4xf32, #tpu.memory_space<vmem>>, vector<8x4xf32>
    %c56_314 = arith.constant 56 : index
    %c36_315 = arith.constant 36 : index
    %210 = vector.load %arg15[%c56_314, %c36_315] : memref<64x64xf32, #tpu.memory_space<vmem>>, vector<8x4xf32>
    tpu.vector_store %arg15[%c56_314, %c36_315], %209 {strides = array<i32>} : memref<64x64xf32, #tpu.memory_space<vmem>>, vector<8x4xf32>,
    %c38_316 = arith.constant 38 : index
    %c0_317 = arith.constant 0 : index
    %211 = tpu.strided_load %arg14[%c38_316, %c0_317] {strides = array<i32: 2, 1>} : memref<324x4xf32, #tpu.memory_space<vmem>>, vector<8x4xf32>
    %c0_318 = arith.constant 0 : index
    %c40_319 = arith.constant 40 : index
    %212 = vector.load %arg15[%c0_318, %c40_319] : memref<64x64xf32, #tpu.memory_space<vmem>>, vector<8x4xf32>
    tpu.vector_store %arg15[%c0_318, %c40_319], %211 {strides = array<i32>} : memref<64x64xf32, #tpu.memory_space<vmem>>, vector<8x4xf32>,
    %c74_320 = arith.constant 74 : index
    %c0_321 = arith.constant 0 : index
    %213 = tpu.strided_load %arg14[%c74_320, %c0_321] {strides = array<i32: 2, 1>} : memref<324x4xf32, #tpu.memory_space<vmem>>, vector<8x4xf32>
    %c8_322 = arith.constant 8 : index
    %c40_323 = arith.constant 40 : index
    %214 = vector.load %arg15[%c8_322, %c40_323] : memref<64x64xf32, #tpu.memory_space<vmem>>, vector<8x4xf32>
    tpu.vector_store %arg15[%c8_322, %c40_323], %213 {strides = array<i32>} : memref<64x64xf32, #tpu.memory_space<vmem>>, vector<8x4xf32>,
    %c110_324 = arith.constant 110 : index
    %c0_325 = arith.constant 0 : index
    %215 = tpu.strided_load %arg14[%c110_324, %c0_325] {strides = array<i32: 2, 1>} : memref<324x4xf32, #tpu.memory_space<vmem>>, vector<8x4xf32>
    %c16_326 = arith.constant 16 : index
    %c40_327 = arith.constant 40 : index
    %216 = vector.load %arg15[%c16_326, %c40_327] : memref<64x64xf32, #tpu.memory_space<vmem>>, vector<8x4xf32>
    tpu.vector_store %arg15[%c16_326, %c40_327], %215 {strides = array<i32>} : memref<64x64xf32, #tpu.memory_space<vmem>>, vector<8x4xf32>,
    %c146_328 = arith.constant 146 : index
    %c0_329 = arith.constant 0 : index
    %217 = tpu.strided_load %arg14[%c146_328, %c0_329] {strides = array<i32: 2, 1>} : memref<324x4xf32, #tpu.memory_space<vmem>>, vector<8x4xf32>
    %c24_330 = arith.constant 24 : index
    %c40_331 = arith.constant 40 : index
    %218 = vector.load %arg15[%c24_330, %c40_331] : memref<64x64xf32, #tpu.memory_space<vmem>>, vector<8x4xf32>
    tpu.vector_store %arg15[%c24_330, %c40_331], %217 {strides = array<i32>} : memref<64x64xf32, #tpu.memory_space<vmem>>, vector<8x4xf32>,
    %c182_332 = arith.constant 182 : index
    %c0_333 = arith.constant 0 : index
    %219 = tpu.strided_load %arg14[%c182_332, %c0_333] {strides = array<i32: 2, 1>} : memref<324x4xf32, #tpu.memory_space<vmem>>, vector<8x4xf32>
    %c32_334 = arith.constant 32 : index
    %c40_335 = arith.constant 40 : index
    %220 = vector.load %arg15[%c32_334, %c40_335] : memref<64x64xf32, #tpu.memory_space<vmem>>, vector<8x4xf32>
    tpu.vector_store %arg15[%c32_334, %c40_335], %219 {strides = array<i32>} : memref<64x64xf32, #tpu.memory_space<vmem>>, vector<8x4xf32>,
    %c218_336 = arith.constant 218 : index
    %c0_337 = arith.constant 0 : index
    %221 = tpu.strided_load %arg14[%c218_336, %c0_337] {strides = array<i32: 2, 1>} : memref<324x4xf32, #tpu.memory_space<vmem>>, vector<8x4xf32>
    %c40_338 = arith.constant 40 : index
    %c40_339 = arith.constant 40 : index
    %222 = vector.load %arg15[%c40_338, %c40_339] : memref<64x64xf32, #tpu.memory_space<vmem>>, vector<8x4xf32>
    tpu.vector_store %arg15[%c40_338, %c40_339], %221 {strides = array<i32>} : memref<64x64xf32, #tpu.memory_space<vmem>>, vector<8x4xf32>,
    %c254_340 = arith.constant 254 : index
    %c0_341 = arith.constant 0 : index
    %223 = tpu.strided_load %arg14[%c254_340, %c0_341] {strides = array<i32: 2, 1>} : memref<324x4xf32, #tpu.memory_space<vmem>>, vector<8x4xf32>
    %c48_342 = arith.constant 48 : index
    %c40_343 = arith.constant 40 : index
    %224 = vector.load %arg15[%c48_342, %c40_343] : memref<64x64xf32, #tpu.memory_space<vmem>>, vector<8x4xf32>
    tpu.vector_store %arg15[%c48_342, %c40_343], %223 {strides = array<i32>} : memref<64x64xf32, #tpu.memory_space<vmem>>, vector<8x4xf32>,
    %c290 = arith.constant 290 : index
    %c0_344 = arith.constant 0 : index
    %225 = tpu.strided_load %arg14[%c290, %c0_344] {strides = array<i32: 2, 1>} : memref<324x4xf32, #tpu.memory_space<vmem>>, vector<8x4xf32>
    %c56_345 = arith.constant 56 : index
    %c40_346 = arith.constant 40 : index
    %226 = vector.load %arg15[%c56_345, %c40_346] : memref<64x64xf32, #tpu.memory_space<vmem>>, vector<8x4xf32>
    tpu.vector_store %arg15[%c56_345, %c40_346], %225 {strides = array<i32>} : memref<64x64xf32, #tpu.memory_space<vmem>>, vector<8x4xf32>,
    %c39_347 = arith.constant 39 : index
    %c0_348 = arith.constant 0 : index
    %227 = tpu.strided_load %arg14[%c39_347, %c0_348] {strides = array<i32: 2, 1>} : memref<324x4xf32, #tpu.memory_space<vmem>>, vector<8x4xf32>
    %c0_349 = arith.constant 0 : index
    %c44 = arith.constant 44 : index
    %228 = vector.load %arg15[%c0_349, %c44] : memref<64x64xf32, #tpu.memory_space<vmem>>, vector<8x4xf32>
    tpu.vector_store %arg15[%c0_349, %c44], %227 {strides = array<i32>} : memref<64x64xf32, #tpu.memory_space<vmem>>, vector<8x4xf32>,
    %c75_350 = arith.constant 75 : index
    %c0_351 = arith.constant 0 : index
    %229 = tpu.strided_load %arg14[%c75_350, %c0_351] {strides = array<i32: 2, 1>} : memref<324x4xf32, #tpu.memory_space<vmem>>, vector<8x4xf32>
    %c8_352 = arith.constant 8 : index
    %c44_353 = arith.constant 44 : index
    %230 = vector.load %arg15[%c8_352, %c44_353] : memref<64x64xf32, #tpu.memory_space<vmem>>, vector<8x4xf32>
    tpu.vector_store %arg15[%c8_352, %c44_353], %229 {strides = array<i32>} : memref<64x64xf32, #tpu.memory_space<vmem>>, vector<8x4xf32>,
    %c111_354 = arith.constant 111 : index
    %c0_355 = arith.constant 0 : index
    %231 = tpu.strided_load %arg14[%c111_354, %c0_355] {strides = array<i32: 2, 1>} : memref<324x4xf32, #tpu.memory_space<vmem>>, vector<8x4xf32>
    %c16_356 = arith.constant 16 : index
    %c44_357 = arith.constant 44 : index
    %232 = vector.load %arg15[%c16_356, %c44_357] : memref<64x64xf32, #tpu.memory_space<vmem>>, vector<8x4xf32>
    tpu.vector_store %arg15[%c16_356, %c44_357], %231 {strides = array<i32>} : memref<64x64xf32, #tpu.memory_space<vmem>>, vector<8x4xf32>,
    %c147_358 = arith.constant 147 : index
    %c0_359 = arith.constant 0 : index
    %233 = tpu.strided_load %arg14[%c147_358, %c0_359] {strides = array<i32: 2, 1>} : memref<324x4xf32, #tpu.memory_space<vmem>>, vector<8x4xf32>
    %c24_360 = arith.constant 24 : index
    %c44_361 = arith.constant 44 : index
    %234 = vector.load %arg15[%c24_360, %c44_361] : memref<64x64xf32, #tpu.memory_space<vmem>>, vector<8x4xf32>
    tpu.vector_store %arg15[%c24_360, %c44_361], %233 {strides = array<i32>} : memref<64x64xf32, #tpu.memory_space<vmem>>, vector<8x4xf32>,
    %c183_362 = arith.constant 183 : index
    %c0_363 = arith.constant 0 : index
    %235 = tpu.strided_load %arg14[%c183_362, %c0_363] {strides = array<i32: 2, 1>} : memref<324x4xf32, #tpu.memory_space<vmem>>, vector<8x4xf32>
    %c32_364 = arith.constant 32 : index
    %c44_365 = arith.constant 44 : index
    %236 = vector.load %arg15[%c32_364, %c44_365] : memref<64x64xf32, #tpu.memory_space<vmem>>, vector<8x4xf32>
    tpu.vector_store %arg15[%c32_364, %c44_365], %235 {strides = array<i32>} : memref<64x64xf32, #tpu.memory_space<vmem>>, vector<8x4xf32>,
    %c219_366 = arith.constant 219 : index
    %c0_367 = arith.constant 0 : index
    %237 = tpu.strided_load %arg14[%c219_366, %c0_367] {strides = array<i32: 2, 1>} : memref<324x4xf32, #tpu.memory_space<vmem>>, vector<8x4xf32>
    %c40_368 = arith.constant 40 : index
    %c44_369 = arith.constant 44 : index
    %238 = vector.load %arg15[%c40_368, %c44_369] : memref<64x64xf32, #tpu.memory_space<vmem>>, vector<8x4xf32>
    tpu.vector_store %arg15[%c40_368, %c44_369], %237 {strides = array<i32>} : memref<64x64xf32, #tpu.memory_space<vmem>>, vector<8x4xf32>,
    %c255_370 = arith.constant 255 : index
    %c0_371 = arith.constant 0 : index
    %239 = tpu.strided_load %arg14[%c255_370, %c0_371] {strides = array<i32: 2, 1>} : memref<324x4xf32, #tpu.memory_space<vmem>>, vector<8x4xf32>
    %c48_372 = arith.constant 48 : index
    %c44_373 = arith.constant 44 : index
    %240 = vector.load %arg15[%c48_372, %c44_373] : memref<64x64xf32, #tpu.memory_space<vmem>>, vector<8x4xf32>
    tpu.vector_store %arg15[%c48_372, %c44_373], %239 {strides = array<i32>} : memref<64x64xf32, #tpu.memory_space<vmem>>, vector<8x4xf32>,
    %c291 = arith.constant 291 : index
    %c0_374 = arith.constant 0 : index
    %241 = tpu.strided_load %arg14[%c291, %c0_374] {strides = array<i32: 2, 1>} : memref<324x4xf32, #tpu.memory_space<vmem>>, vector<8x4xf32>
    %c56_375 = arith.constant 56 : index
    %c44_376 = arith.constant 44 : index
    %242 = vector.load %arg15[%c56_375, %c44_376] : memref<64x64xf32, #tpu.memory_space<vmem>>, vector<8x4xf32>
    tpu.vector_store %arg15[%c56_375, %c44_376], %241 {strides = array<i32>} : memref<64x64xf32, #tpu.memory_space<vmem>>, vector<8x4xf32>,
    %c54_377 = arith.constant 54 : index
    %c0_378 = arith.constant 0 : index
    %243 = tpu.strided_load %arg14[%c54_377, %c0_378] {strides = array<i32: 2, 1>} : memref<324x4xf32, #tpu.memory_space<vmem>>, vector<8x4xf32>
    %c0_379 = arith.constant 0 : index
    %c48_380 = arith.constant 48 : index
    %244 = vector.load %arg15[%c0_379, %c48_380] : memref<64x64xf32, #tpu.memory_space<vmem>>, vector<8x4xf32>
    tpu.vector_store %arg15[%c0_379, %c48_380], %243 {strides = array<i32>} : memref<64x64xf32, #tpu.memory_space<vmem>>, vector<8x4xf32>,
    %c90_381 = arith.constant 90 : index
    %c0_382 = arith.constant 0 : index
    %245 = tpu.strided_load %arg14[%c90_381, %c0_382] {strides = array<i32: 2, 1>} : memref<324x4xf32, #tpu.memory_space<vmem>>, vector<8x4xf32>
    %c8_383 = arith.constant 8 : index
    %c48_384 = arith.constant 48 : index
    %246 = vector.load %arg15[%c8_383, %c48_384] : memref<64x64xf32, #tpu.memory_space<vmem>>, vector<8x4xf32>
    tpu.vector_store %arg15[%c8_383, %c48_384], %245 {strides = array<i32>} : memref<64x64xf32, #tpu.memory_space<vmem>>, vector<8x4xf32>,
    %c126_385 = arith.constant 126 : index
    %c0_386 = arith.constant 0 : index
    %247 = tpu.strided_load %arg14[%c126_385, %c0_386] {strides = array<i32: 2, 1>} : memref<324x4xf32, #tpu.memory_space<vmem>>, vector<8x4xf32>
    %c16_387 = arith.constant 16 : index
    %c48_388 = arith.constant 48 : index
    %248 = vector.load %arg15[%c16_387, %c48_388] : memref<64x64xf32, #tpu.memory_space<vmem>>, vector<8x4xf32>
    tpu.vector_store %arg15[%c16_387, %c48_388], %247 {strides = array<i32>} : memref<64x64xf32, #tpu.memory_space<vmem>>, vector<8x4xf32>,
    %c162_389 = arith.constant 162 : index
    %c0_390 = arith.constant 0 : index
    %249 = tpu.strided_load %arg14[%c162_389, %c0_390] {strides = array<i32: 2, 1>} : memref<324x4xf32, #tpu.memory_space<vmem>>, vector<8x4xf32>
    %c24_391 = arith.constant 24 : index
    %c48_392 = arith.constant 48 : index
    %250 = vector.load %arg15[%c24_391, %c48_392] : memref<64x64xf32, #tpu.memory_space<vmem>>, vector<8x4xf32>
    tpu.vector_store %arg15[%c24_391, %c48_392], %249 {strides = array<i32>} : memref<64x64xf32, #tpu.memory_space<vmem>>, vector<8x4xf32>,
    %c198_393 = arith.constant 198 : index
    %c0_394 = arith.constant 0 : index
    %251 = tpu.strided_load %arg14[%c198_393, %c0_394] {strides = array<i32: 2, 1>} : memref<324x4xf32, #tpu.memory_space<vmem>>, vector<8x4xf32>
    %c32_395 = arith.constant 32 : index
    %c48_396 = arith.constant 48 : index
    %252 = vector.load %arg15[%c32_395, %c48_396] : memref<64x64xf32, #tpu.memory_space<vmem>>, vector<8x4xf32>
    tpu.vector_store %arg15[%c32_395, %c48_396], %251 {strides = array<i32>} : memref<64x64xf32, #tpu.memory_space<vmem>>, vector<8x4xf32>,
    %c234_397 = arith.constant 234 : index
    %c0_398 = arith.constant 0 : index
    %253 = tpu.strided_load %arg14[%c234_397, %c0_398] {strides = array<i32: 2, 1>} : memref<324x4xf32, #tpu.memory_space<vmem>>, vector<8x4xf32>
    %c40_399 = arith.constant 40 : index
    %c48_400 = arith.constant 48 : index
    %254 = vector.load %arg15[%c40_399, %c48_400] : memref<64x64xf32, #tpu.memory_space<vmem>>, vector<8x4xf32>
    tpu.vector_store %arg15[%c40_399, %c48_400], %253 {strides = array<i32>} : memref<64x64xf32, #tpu.memory_space<vmem>>, vector<8x4xf32>,
    %c270_401 = arith.constant 270 : index
    %c0_402 = arith.constant 0 : index
    %255 = tpu.strided_load %arg14[%c270_401, %c0_402] {strides = array<i32: 2, 1>} : memref<324x4xf32, #tpu.memory_space<vmem>>, vector<8x4xf32>
    %c48_403 = arith.constant 48 : index
    %c48_404 = arith.constant 48 : index
    %256 = vector.load %arg15[%c48_403, %c48_404] : memref<64x64xf32, #tpu.memory_space<vmem>>, vector<8x4xf32>
    tpu.vector_store %arg15[%c48_403, %c48_404], %255 {strides = array<i32>} : memref<64x64xf32, #tpu.memory_space<vmem>>, vector<8x4xf32>,
    %c306 = arith.constant 306 : index
    %c0_405 = arith.constant 0 : index
    %257 = tpu.strided_load %arg14[%c306, %c0_405] {strides = array<i32: 2, 1>} : memref<324x4xf32, #tpu.memory_space<vmem>>, vector<8x4xf32>
    %c56_406 = arith.constant 56 : index
    %c48_407 = arith.constant 48 : index
    %258 = vector.load %arg15[%c56_406, %c48_407] : memref<64x64xf32, #tpu.memory_space<vmem>>, vector<8x4xf32>
    tpu.vector_store %arg15[%c56_406, %c48_407], %257 {strides = array<i32>} : memref<64x64xf32, #tpu.memory_space<vmem>>, vector<8x4xf32>,
    %c55_408 = arith.constant 55 : index
    %c0_409 = arith.constant 0 : index
    %259 = tpu.strided_load %arg14[%c55_408, %c0_409] {strides = array<i32: 2, 1>} : memref<324x4xf32, #tpu.memory_space<vmem>>, vector<8x4xf32>
    %c0_410 = arith.constant 0 : index
    %c52 = arith.constant 52 : index
    %260 = vector.load %arg15[%c0_410, %c52] : memref<64x64xf32, #tpu.memory_space<vmem>>, vector<8x4xf32>
    tpu.vector_store %arg15[%c0_410, %c52], %259 {strides = array<i32>} : memref<64x64xf32, #tpu.memory_space<vmem>>, vector<8x4xf32>,
    %c91_411 = arith.constant 91 : index
    %c0_412 = arith.constant 0 : index
    %261 = tpu.strided_load %arg14[%c91_411, %c0_412] {strides = array<i32: 2, 1>} : memref<324x4xf32, #tpu.memory_space<vmem>>, vector<8x4xf32>
    %c8_413 = arith.constant 8 : index
    %c52_414 = arith.constant 52 : index
    %262 = vector.load %arg15[%c8_413, %c52_414] : memref<64x64xf32, #tpu.memory_space<vmem>>, vector<8x4xf32>
    tpu.vector_store %arg15[%c8_413, %c52_414], %261 {strides = array<i32>} : memref<64x64xf32, #tpu.memory_space<vmem>>, vector<8x4xf32>,
    %c127_415 = arith.constant 127 : index
    %c0_416 = arith.constant 0 : index
    %263 = tpu.strided_load %arg14[%c127_415, %c0_416] {strides = array<i32: 2, 1>} : memref<324x4xf32, #tpu.memory_space<vmem>>, vector<8x4xf32>
    %c16_417 = arith.constant 16 : index
    %c52_418 = arith.constant 52 : index
    %264 = vector.load %arg15[%c16_417, %c52_418] : memref<64x64xf32, #tpu.memory_space<vmem>>, vector<8x4xf32>
    tpu.vector_store %arg15[%c16_417, %c52_418], %263 {strides = array<i32>} : memref<64x64xf32, #tpu.memory_space<vmem>>, vector<8x4xf32>,
    %c163_419 = arith.constant 163 : index
    %c0_420 = arith.constant 0 : index
    %265 = tpu.strided_load %arg14[%c163_419, %c0_420] {strides = array<i32: 2, 1>} : memref<324x4xf32, #tpu.memory_space<vmem>>, vector<8x4xf32>
    %c24_421 = arith.constant 24 : index
    %c52_422 = arith.constant 52 : index
    %266 = vector.load %arg15[%c24_421, %c52_422] : memref<64x64xf32, #tpu.memory_space<vmem>>, vector<8x4xf32>
    tpu.vector_store %arg15[%c24_421, %c52_422], %265 {strides = array<i32>} : memref<64x64xf32, #tpu.memory_space<vmem>>, vector<8x4xf32>,
    %c199_423 = arith.constant 199 : index
    %c0_424 = arith.constant 0 : index
    %267 = tpu.strided_load %arg14[%c199_423, %c0_424] {strides = array<i32: 2, 1>} : memref<324x4xf32, #tpu.memory_space<vmem>>, vector<8x4xf32>
    %c32_425 = arith.constant 32 : index
    %c52_426 = arith.constant 52 : index
    %268 = vector.load %arg15[%c32_425, %c52_426] : memref<64x64xf32, #tpu.memory_space<vmem>>, vector<8x4xf32>
    tpu.vector_store %arg15[%c32_425, %c52_426], %267 {strides = array<i32>} : memref<64x64xf32, #tpu.memory_space<vmem>>, vector<8x4xf32>,
    %c235_427 = arith.constant 235 : index
    %c0_428 = arith.constant 0 : index
    %269 = tpu.strided_load %arg14[%c235_427, %c0_428] {strides = array<i32: 2, 1>} : memref<324x4xf32, #tpu.memory_space<vmem>>, vector<8x4xf32>
    %c40_429 = arith.constant 40 : index
    %c52_430 = arith.constant 52 : index
    %270 = vector.load %arg15[%c40_429, %c52_430] : memref<64x64xf32, #tpu.memory_space<vmem>>, vector<8x4xf32>
    tpu.vector_store %arg15[%c40_429, %c52_430], %269 {strides = array<i32>} : memref<64x64xf32, #tpu.memory_space<vmem>>, vector<8x4xf32>,
    %c271_431 = arith.constant 271 : index
    %c0_432 = arith.constant 0 : index
    %271 = tpu.strided_load %arg14[%c271_431, %c0_432] {strides = array<i32: 2, 1>} : memref<324x4xf32, #tpu.memory_space<vmem>>, vector<8x4xf32>
    %c48_433 = arith.constant 48 : index
    %c52_434 = arith.constant 52 : index
    %272 = vector.load %arg15[%c48_433, %c52_434] : memref<64x64xf32, #tpu.memory_space<vmem>>, vector<8x4xf32>
    tpu.vector_store %arg15[%c48_433, %c52_434], %271 {strides = array<i32>} : memref<64x64xf32, #tpu.memory_space<vmem>>, vector<8x4xf32>,
    %c307 = arith.constant 307 : index
    %c0_435 = arith.constant 0 : index
    %273 = tpu.strided_load %arg14[%c307, %c0_435] {strides = array<i32: 2, 1>} : memref<324x4xf32, #tpu.memory_space<vmem>>, vector<8x4xf32>
    %c56_436 = arith.constant 56 : index
    %c52_437 = arith.constant 52 : index
    %274 = vector.load %arg15[%c56_436, %c52_437] : memref<64x64xf32, #tpu.memory_space<vmem>>, vector<8x4xf32>
    tpu.vector_store %arg15[%c56_436, %c52_437], %273 {strides = array<i32>} : memref<64x64xf32, #tpu.memory_space<vmem>>, vector<8x4xf32>,
    %c56_438 = arith.constant 56 : index
    %c0_439 = arith.constant 0 : index
    %275 = tpu.strided_load %arg14[%c56_438, %c0_439] {strides = array<i32: 2, 1>} : memref<324x4xf32, #tpu.memory_space<vmem>>, vector<8x4xf32>
    %c0_440 = arith.constant 0 : index
    %c56_441 = arith.constant 56 : index
    %276 = vector.load %arg15[%c0_440, %c56_441] : memref<64x64xf32, #tpu.memory_space<vmem>>, vector<8x4xf32>
    tpu.vector_store %arg15[%c0_440, %c56_441], %275 {strides = array<i32>} : memref<64x64xf32, #tpu.memory_space<vmem>>, vector<8x4xf32>,
    %c92_442 = arith.constant 92 : index
    %c0_443 = arith.constant 0 : index
    %277 = tpu.strided_load %arg14[%c92_442, %c0_443] {strides = array<i32: 2, 1>} : memref<324x4xf32, #tpu.memory_space<vmem>>, vector<8x4xf32>
    %c8_444 = arith.constant 8 : index
    %c56_445 = arith.constant 56 : index
    %278 = vector.load %arg15[%c8_444, %c56_445] : memref<64x64xf32, #tpu.memory_space<vmem>>, vector<8x4xf32>
    tpu.vector_store %arg15[%c8_444, %c56_445], %277 {strides = array<i32>} : memref<64x64xf32, #tpu.memory_space<vmem>>, vector<8x4xf32>,
    %c128_446 = arith.constant 128 : index
    %c0_447 = arith.constant 0 : index
    %279 = tpu.strided_load %arg14[%c128_446, %c0_447] {strides = array<i32: 2, 1>} : memref<324x4xf32, #tpu.memory_space<vmem>>, vector<8x4xf32>
    %c16_448 = arith.constant 16 : index
    %c56_449 = arith.constant 56 : index
    %280 = vector.load %arg15[%c16_448, %c56_449] : memref<64x64xf32, #tpu.memory_space<vmem>>, vector<8x4xf32>
    tpu.vector_store %arg15[%c16_448, %c56_449], %279 {strides = array<i32>} : memref<64x64xf32, #tpu.memory_space<vmem>>, vector<8x4xf32>,
    %c164_450 = arith.constant 164 : index
    %c0_451 = arith.constant 0 : index
    %281 = tpu.strided_load %arg14[%c164_450, %c0_451] {strides = array<i32: 2, 1>} : memref<324x4xf32, #tpu.memory_space<vmem>>, vector<8x4xf32>
    %c24_452 = arith.constant 24 : index
    %c56_453 = arith.constant 56 : index
    %282 = vector.load %arg15[%c24_452, %c56_453] : memref<64x64xf32, #tpu.memory_space<vmem>>, vector<8x4xf32>
    tpu.vector_store %arg15[%c24_452, %c56_453], %281 {strides = array<i32>} : memref<64x64xf32, #tpu.memory_space<vmem>>, vector<8x4xf32>,
    %c200_454 = arith.constant 200 : index
    %c0_455 = arith.constant 0 : index
    %283 = tpu.strided_load %arg14[%c200_454, %c0_455] {strides = array<i32: 2, 1>} : memref<324x4xf32, #tpu.memory_space<vmem>>, vector<8x4xf32>
    %c32_456 = arith.constant 32 : index
    %c56_457 = arith.constant 56 : index
    %284 = vector.load %arg15[%c32_456, %c56_457] : memref<64x64xf32, #tpu.memory_space<vmem>>, vector<8x4xf32>
    tpu.vector_store %arg15[%c32_456, %c56_457], %283 {strides = array<i32>} : memref<64x64xf32, #tpu.memory_space<vmem>>, vector<8x4xf32>,
    %c236_458 = arith.constant 236 : index
    %c0_459 = arith.constant 0 : index
    %285 = tpu.strided_load %arg14[%c236_458, %c0_459] {strides = array<i32: 2, 1>} : memref<324x4xf32, #tpu.memory_space<vmem>>, vector<8x4xf32>
    %c40_460 = arith.constant 40 : index
    %c56_461 = arith.constant 56 : index
    %286 = vector.load %arg15[%c40_460, %c56_461] : memref<64x64xf32, #tpu.memory_space<vmem>>, vector<8x4xf32>
    tpu.vector_store %arg15[%c40_460, %c56_461], %285 {strides = array<i32>} : memref<64x64xf32, #tpu.memory_space<vmem>>, vector<8x4xf32>,
    %c272_462 = arith.constant 272 : index
    %c0_463 = arith.constant 0 : index
    %287 = tpu.strided_load %arg14[%c272_462, %c0_463] {strides = array<i32: 2, 1>} : memref<324x4xf32, #tpu.memory_space<vmem>>, vector<8x4xf32>
    %c48_464 = arith.constant 48 : index
    %c56_465 = arith.constant 56 : index
    %288 = vector.load %arg15[%c48_464, %c56_465] : memref<64x64xf32, #tpu.memory_space<vmem>>, vector<8x4xf32>
    tpu.vector_store %arg15[%c48_464, %c56_465], %287 {strides = array<i32>} : memref<64x64xf32, #tpu.memory_space<vmem>>, vector<8x4xf32>,
    %c308 = arith.constant 308 : index
    %c0_466 = arith.constant 0 : index
    %289 = tpu.strided_load %arg14[%c308, %c0_466] {strides = array<i32: 2, 1>} : memref<324x4xf32, #tpu.memory_space<vmem>>, vector<8x4xf32>
    %c56_467 = arith.constant 56 : index
    %c56_468 = arith.constant 56 : index
    %290 = vector.load %arg15[%c56_467, %c56_468] : memref<64x64xf32, #tpu.memory_space<vmem>>, vector<8x4xf32>
    tpu.vector_store %arg15[%c56_467, %c56_468], %289 {strides = array<i32>} : memref<64x64xf32, #tpu.memory_space<vmem>>, vector<8x4xf32>,
    %c57_469 = arith.constant 57 : index
    %c0_470 = arith.constant 0 : index
    %291 = tpu.strided_load %arg14[%c57_469, %c0_470] {strides = array<i32: 2, 1>} : memref<324x4xf32, #tpu.memory_space<vmem>>, vector<8x4xf32>
    %c0_471 = arith.constant 0 : index
    %c60 = arith.constant 60 : index
    %292 = vector.load %arg15[%c0_471, %c60] : memref<64x64xf32, #tpu.memory_space<vmem>>, vector<8x4xf32>
    tpu.vector_store %arg15[%c0_471, %c60], %291 {strides = array<i32>} : memref<64x64xf32, #tpu.memory_space<vmem>>, vector<8x4xf32>,
    %c93_472 = arith.constant 93 : index
    %c0_473 = arith.constant 0 : index
    %293 = tpu.strided_load %arg14[%c93_472, %c0_473] {strides = array<i32: 2, 1>} : memref<324x4xf32, #tpu.memory_space<vmem>>, vector<8x4xf32>
    %c8_474 = arith.constant 8 : index
    %c60_475 = arith.constant 60 : index
    %294 = vector.load %arg15[%c8_474, %c60_475] : memref<64x64xf32, #tpu.memory_space<vmem>>, vector<8x4xf32>
    tpu.vector_store %arg15[%c8_474, %c60_475], %293 {strides = array<i32>} : memref<64x64xf32, #tpu.memory_space<vmem>>, vector<8x4xf32>,
    %c129_476 = arith.constant 129 : index
    %c0_477 = arith.constant 0 : index
    %295 = tpu.strided_load %arg14[%c129_476, %c0_477] {strides = array<i32: 2, 1>} : memref<324x4xf32, #tpu.memory_space<vmem>>, vector<8x4xf32>
    %c16_478 = arith.constant 16 : index
    %c60_479 = arith.constant 60 : index
    %296 = vector.load %arg15[%c16_478, %c60_479] : memref<64x64xf32, #tpu.memory_space<vmem>>, vector<8x4xf32>
    tpu.vector_store %arg15[%c16_478, %c60_479], %295 {strides = array<i32>} : memref<64x64xf32, #tpu.memory_space<vmem>>, vector<8x4xf32>,
    %c165_480 = arith.constant 165 : index
    %c0_481 = arith.constant 0 : index
    %297 = tpu.strided_load %arg14[%c165_480, %c0_481] {strides = array<i32: 2, 1>} : memref<324x4xf32, #tpu.memory_space<vmem>>, vector<8x4xf32>
    %c24_482 = arith.constant 24 : index
    %c60_483 = arith.constant 60 : index
    %298 = vector.load %arg15[%c24_482, %c60_483] : memref<64x64xf32, #tpu.memory_space<vmem>>, vector<8x4xf32>
    tpu.vector_store %arg15[%c24_482, %c60_483], %297 {strides = array<i32>} : memref<64x64xf32, #tpu.memory_space<vmem>>, vector<8x4xf32>,
    %c201_484 = arith.constant 201 : index
    %c0_485 = arith.constant 0 : index
    %299 = tpu.strided_load %arg14[%c201_484, %c0_485] {strides = array<i32: 2, 1>} : memref<324x4xf32, #tpu.memory_space<vmem>>, vector<8x4xf32>
    %c32_486 = arith.constant 32 : index
    %c60_487 = arith.constant 60 : index
    %300 = vector.load %arg15[%c32_486, %c60_487] : memref<64x64xf32, #tpu.memory_space<vmem>>, vector<8x4xf32>
    tpu.vector_store %arg15[%c32_486, %c60_487], %299 {strides = array<i32>} : memref<64x64xf32, #tpu.memory_space<vmem>>, vector<8x4xf32>,
    %c237_488 = arith.constant 237 : index
    %c0_489 = arith.constant 0 : index
    %301 = tpu.strided_load %arg14[%c237_488, %c0_489] {strides = array<i32: 2, 1>} : memref<324x4xf32, #tpu.memory_space<vmem>>, vector<8x4xf32>
    %c40_490 = arith.constant 40 : index
    %c60_491 = arith.constant 60 : index
    %302 = vector.load %arg15[%c40_490, %c60_491] : memref<64x64xf32, #tpu.memory_space<vmem>>, vector<8x4xf32>
    tpu.vector_store %arg15[%c40_490, %c60_491], %301 {strides = array<i32>} : memref<64x64xf32, #tpu.memory_space<vmem>>, vector<8x4xf32>,
    %c273_492 = arith.constant 273 : index
    %c0_493 = arith.constant 0 : index
    %303 = tpu.strided_load %arg14[%c273_492, %c0_493] {strides = array<i32: 2, 1>} : memref<324x4xf32, #tpu.memory_space<vmem>>, vector<8x4xf32>
    %c48_494 = arith.constant 48 : index
    %c60_495 = arith.constant 60 : index
    %304 = vector.load %arg15[%c48_494, %c60_495] : memref<64x64xf32, #tpu.memory_space<vmem>>, vector<8x4xf32>
    tpu.vector_store %arg15[%c48_494, %c60_495], %303 {strides = array<i32>} : memref<64x64xf32, #tpu.memory_space<vmem>>, vector<8x4xf32>,
    %c309 = arith.constant 309 : index
    %c0_496 = arith.constant 0 : index
    %305 = tpu.strided_load %arg14[%c309, %c0_496] {strides = array<i32: 2, 1>} : memref<324x4xf32, #tpu.memory_space<vmem>>, vector<8x4xf32>
    %c56_497 = arith.constant 56 : index
    %c60_498 = arith.constant 60 : index
    %306 = vector.load %arg15[%c56_497, %c60_498] : memref<64x64xf32, #tpu.memory_space<vmem>>, vector<8x4xf32>
    tpu.vector_store %arg15[%c56_497, %c60_498], %305 {strides = array<i32>} : memref<64x64xf32, #tpu.memory_space<vmem>>, vector<8x4xf32>,
    %c0_499 = arith.constant 0 : index
    %c0_500 = arith.constant 0 : index
    %307 = vector.load %arg15[%c0_499, %c0_500] : memref<64x64xf32, #tpu.memory_space<vmem>>, vector<64x64xf32>
    %c0_501 = arith.constant 0 : index
    %c0_502 = arith.constant 0 : index
    %308 = vector.load %arg2[%c0_501, %c0_502] : memref<64x32xf32, #tpu.memory_space<vmem>>, vector<64x32xf32>
    %cst = arith.constant dense<0.000000e+00> : vector<64x32xf32>
    %309 = tpu.matmul %307, %308, %cst {dimension_numbers = #tpu.dot_dimension_numbers<[1], [0], [0], [1], [0, 0, 1, 1], [], []>} : vector<64x64xf32>, vector<64x32xf32>, vector<64x32xf32> -> vector<64x32xf32>
    %c0_503 = arith.constant 0 : index
    %c0_504 = arith.constant 0 : index
    %310 = vector.load %arg3[%c0_503, %c0_504] : memref<1x32xf32, #tpu.memory_space<vmem>>, vector<1x32xf32>
    %311 = vector.broadcast %310 : vector<1x32xf32> to vector<64x32xf32>
    %312 = arith.addf %309, %311 : vector<64x32xf32>
    %cst_505 = arith.constant 0.000000e+00 : f32
    %313 = vector.broadcast %cst_505 : f32 to vector<64x32xf32>
    %314 = arith.maximumf %312, %313 : vector<64x32xf32>
    %315 = vector.extract_strided_slice %314 {offsets = [0, 0], sizes = [8, 32], strides = [1, 1]} : vector<64x32xf32> to vector<8x32xf32>
    %c11 = arith.constant 11 : index
    %c0_506 = arith.constant 0 : index
    %316 = vector.load %arg16[%c11, %c0_506] : memref<100x32xf32, #tpu.memory_space<vmem>>, vector<8x32xf32>
    tpu.vector_store %arg16[%c11, %c0_506], %315 {strides = array<i32>} : memref<100x32xf32, #tpu.memory_space<vmem>>, vector<8x32xf32>,
    %317 = vector.extract_strided_slice %314 {offsets = [8, 0], sizes = [8, 32], strides = [1, 1]} : vector<64x32xf32> to vector<8x32xf32>
    %c21_507 = arith.constant 21 : index
    %c0_508 = arith.constant 0 : index
    %318 = vector.load %arg16[%c21_507, %c0_508] : memref<100x32xf32, #tpu.memory_space<vmem>>, vector<8x32xf32>
    tpu.vector_store %arg16[%c21_507, %c0_508], %317 {strides = array<i32>} : memref<100x32xf32, #tpu.memory_space<vmem>>, vector<8x32xf32>,
    %319 = vector.extract_strided_slice %314 {offsets = [16, 0], sizes = [8, 32], strides = [1, 1]} : vector<64x32xf32> to vector<8x32xf32>
    %c31 = arith.constant 31 : index
    %c0_509 = arith.constant 0 : index
    %320 = vector.load %arg16[%c31, %c0_509] : memref<100x32xf32, #tpu.memory_space<vmem>>, vector<8x32xf32>
    tpu.vector_store %arg16[%c31, %c0_509], %319 {strides = array<i32>} : memref<100x32xf32, #tpu.memory_space<vmem>>, vector<8x32xf32>,
    %321 = vector.extract_strided_slice %314 {offsets = [24, 0], sizes = [8, 32], strides = [1, 1]} : vector<64x32xf32> to vector<8x32xf32>
    %c41 = arith.constant 41 : index
    %c0_510 = arith.constant 0 : index
    %322 = vector.load %arg16[%c41, %c0_510] : memref<100x32xf32, #tpu.memory_space<vmem>>, vector<8x32xf32>
    tpu.vector_store %arg16[%c41, %c0_510], %321 {strides = array<i32>} : memref<100x32xf32, #tpu.memory_space<vmem>>, vector<8x32xf32>,
    %323 = vector.extract_strided_slice %314 {offsets = [32, 0], sizes = [8, 32], strides = [1, 1]} : vector<64x32xf32> to vector<8x32xf32>
    %c51 = arith.constant 51 : index
    %c0_511 = arith.constant 0 : index
    %324 = vector.load %arg16[%c51, %c0_511] : memref<100x32xf32, #tpu.memory_space<vmem>>, vector<8x32xf32>
    tpu.vector_store %arg16[%c51, %c0_511], %323 {strides = array<i32>} : memref<100x32xf32, #tpu.memory_space<vmem>>, vector<8x32xf32>,
    %325 = vector.extract_strided_slice %314 {offsets = [40, 0], sizes = [8, 32], strides = [1, 1]} : vector<64x32xf32> to vector<8x32xf32>
    %c61 = arith.constant 61 : index
    %c0_512 = arith.constant 0 : index
    %326 = vector.load %arg16[%c61, %c0_512] : memref<100x32xf32, #tpu.memory_space<vmem>>, vector<8x32xf32>
    tpu.vector_store %arg16[%c61, %c0_512], %325 {strides = array<i32>} : memref<100x32xf32, #tpu.memory_space<vmem>>, vector<8x32xf32>,
    %327 = vector.extract_strided_slice %314 {offsets = [48, 0], sizes = [8, 32], strides = [1, 1]} : vector<64x32xf32> to vector<8x32xf32>
    %c71 = arith.constant 71 : index
    %c0_513 = arith.constant 0 : index
    %328 = vector.load %arg16[%c71, %c0_513] : memref<100x32xf32, #tpu.memory_space<vmem>>, vector<8x32xf32>
    tpu.vector_store %arg16[%c71, %c0_513], %327 {strides = array<i32>} : memref<100x32xf32, #tpu.memory_space<vmem>>, vector<8x32xf32>,
    %329 = vector.extract_strided_slice %314 {offsets = [56, 0], sizes = [8, 32], strides = [1, 1]} : vector<64x32xf32> to vector<8x32xf32>
    %c81 = arith.constant 81 : index
    %c0_514 = arith.constant 0 : index
    %330 = vector.load %arg16[%c81, %c0_514] : memref<100x32xf32, #tpu.memory_space<vmem>>, vector<8x32xf32>
    tpu.vector_store %arg16[%c81, %c0_514], %329 {strides = array<i32>} : memref<100x32xf32, #tpu.memory_space<vmem>>, vector<8x32xf32>,
    %c0_515 = arith.constant 0 : index
    %c0_516 = arith.constant 0 : index
    %331 = tpu.strided_load %arg16[%c0_515, %c0_516] {strides = array<i32: 2, 1>} : memref<100x32xf32, #tpu.memory_space<vmem>>, vector<4x32xf32>
    %c0_517 = arith.constant 0 : index
    %c0_518 = arith.constant 0 : index
    %332 = vector.load %arg17[%c0_517, %c0_518] : memref<16x512xf32, #tpu.memory_space<vmem>>, vector<4x32xf32>
    tpu.vector_store %arg17[%c0_517, %c0_518], %331 {strides = array<i32>} : memref<16x512xf32, #tpu.memory_space<vmem>>, vector<4x32xf32>,
    %c20_519 = arith.constant 20 : index
    %c0_520 = arith.constant 0 : index
    %333 = tpu.strided_load %arg16[%c20_519, %c0_520] {strides = array<i32: 2, 1>} : memref<100x32xf32, #tpu.memory_space<vmem>>, vector<4x32xf32>
    %c4_521 = arith.constant 4 : index
    %c0_522 = arith.constant 0 : index
    %334 = vector.load %arg17[%c4_521, %c0_522] : memref<16x512xf32, #tpu.memory_space<vmem>>, vector<4x32xf32>
    tpu.vector_store %arg17[%c4_521, %c0_522], %333 {strides = array<i32>} : memref<16x512xf32, #tpu.memory_space<vmem>>, vector<4x32xf32>,
    %c40_523 = arith.constant 40 : index
    %c0_524 = arith.constant 0 : index
    %335 = tpu.strided_load %arg16[%c40_523, %c0_524] {strides = array<i32: 2, 1>} : memref<100x32xf32, #tpu.memory_space<vmem>>, vector<4x32xf32>
    %c8_525 = arith.constant 8 : index
    %c0_526 = arith.constant 0 : index
    %336 = vector.load %arg17[%c8_525, %c0_526] : memref<16x512xf32, #tpu.memory_space<vmem>>, vector<4x32xf32>
    tpu.vector_store %arg17[%c8_525, %c0_526], %335 {strides = array<i32>} : memref<16x512xf32, #tpu.memory_space<vmem>>, vector<4x32xf32>,
    %c60_527 = arith.constant 60 : index
    %c0_528 = arith.constant 0 : index
    %337 = tpu.strided_load %arg16[%c60_527, %c0_528] {strides = array<i32: 2, 1>} : memref<100x32xf32, #tpu.memory_space<vmem>>, vector<4x32xf32>
    %c12_529 = arith.constant 12 : index
    %c0_530 = arith.constant 0 : index
    %338 = vector.load %arg17[%c12_529, %c0_530] : memref<16x512xf32, #tpu.memory_space<vmem>>, vector<4x32xf32>
    tpu.vector_store %arg17[%c12_529, %c0_530], %337 {strides = array<i32>} : memref<16x512xf32, #tpu.memory_space<vmem>>, vector<4x32xf32>,
    %c1_531 = arith.constant 1 : index
    %c0_532 = arith.constant 0 : index
    %339 = tpu.strided_load %arg16[%c1_531, %c0_532] {strides = array<i32: 2, 1>} : memref<100x32xf32, #tpu.memory_space<vmem>>, vector<4x32xf32>
    %c0_533 = arith.constant 0 : index
    %c32_534 = arith.constant 32 : index
    %340 = vector.load %arg17[%c0_533, %c32_534] : memref<16x512xf32, #tpu.memory_space<vmem>>, vector<4x32xf32>
    tpu.vector_store %arg17[%c0_533, %c32_534], %339 {strides = array<i32>} : memref<16x512xf32, #tpu.memory_space<vmem>>, vector<4x32xf32>,
    %c21_535 = arith.constant 21 : index
    %c0_536 = arith.constant 0 : index
    %341 = tpu.strided_load %arg16[%c21_535, %c0_536] {strides = array<i32: 2, 1>} : memref<100x32xf32, #tpu.memory_space<vmem>>, vector<4x32xf32>
    %c4_537 = arith.constant 4 : index
    %c32_538 = arith.constant 32 : index
    %342 = vector.load %arg17[%c4_537, %c32_538] : memref<16x512xf32, #tpu.memory_space<vmem>>, vector<4x32xf32>
    tpu.vector_store %arg17[%c4_537, %c32_538], %341 {strides = array<i32>} : memref<16x512xf32, #tpu.memory_space<vmem>>, vector<4x32xf32>,
    %c41_539 = arith.constant 41 : index
    %c0_540 = arith.constant 0 : index
    %343 = tpu.strided_load %arg16[%c41_539, %c0_540] {strides = array<i32: 2, 1>} : memref<100x32xf32, #tpu.memory_space<vmem>>, vector<4x32xf32>
    %c8_541 = arith.constant 8 : index
    %c32_542 = arith.constant 32 : index
    %344 = vector.load %arg17[%c8_541, %c32_542] : memref<16x512xf32, #tpu.memory_space<vmem>>, vector<4x32xf32>
    tpu.vector_store %arg17[%c8_541, %c32_542], %343 {strides = array<i32>} : memref<16x512xf32, #tpu.memory_space<vmem>>, vector<4x32xf32>,
    %c61_543 = arith.constant 61 : index
    %c0_544 = arith.constant 0 : index
    %345 = tpu.strided_load %arg16[%c61_543, %c0_544] {strides = array<i32: 2, 1>} : memref<100x32xf32, #tpu.memory_space<vmem>>, vector<4x32xf32>
    %c12_545 = arith.constant 12 : index
    %c32_546 = arith.constant 32 : index
    %346 = vector.load %arg17[%c12_545, %c32_546] : memref<16x512xf32, #tpu.memory_space<vmem>>, vector<4x32xf32>
    tpu.vector_store %arg17[%c12_545, %c32_546], %345 {strides = array<i32>} : memref<16x512xf32, #tpu.memory_space<vmem>>, vector<4x32xf32>,
    %c2_547 = arith.constant 2 : index
    %c0_548 = arith.constant 0 : index
    %347 = tpu.strided_load %arg16[%c2_547, %c0_548] {strides = array<i32: 2, 1>} : memref<100x32xf32, #tpu.memory_space<vmem>>, vector<4x32xf32>
    %c0_549 = arith.constant 0 : index
    %c64_550 = arith.constant 64 : index
    %348 = vector.load %arg17[%c0_549, %c64_550] : memref<16x512xf32, #tpu.memory_space<vmem>>, vector<4x32xf32>
    tpu.vector_store %arg17[%c0_549, %c64_550], %347 {strides = array<i32>} : memref<16x512xf32, #tpu.memory_space<vmem>>, vector<4x32xf32>,
    %c22 = arith.constant 22 : index
    %c0_551 = arith.constant 0 : index
    %349 = tpu.strided_load %arg16[%c22, %c0_551] {strides = array<i32: 2, 1>} : memref<100x32xf32, #tpu.memory_space<vmem>>, vector<4x32xf32>
    %c4_552 = arith.constant 4 : index
    %c64_553 = arith.constant 64 : index
    %350 = vector.load %arg17[%c4_552, %c64_553] : memref<16x512xf32, #tpu.memory_space<vmem>>, vector<4x32xf32>
    tpu.vector_store %arg17[%c4_552, %c64_553], %349 {strides = array<i32>} : memref<16x512xf32, #tpu.memory_space<vmem>>, vector<4x32xf32>,
    %c42 = arith.constant 42 : index
    %c0_554 = arith.constant 0 : index
    %351 = tpu.strided_load %arg16[%c42, %c0_554] {strides = array<i32: 2, 1>} : memref<100x32xf32, #tpu.memory_space<vmem>>, vector<4x32xf32>
    %c8_555 = arith.constant 8 : index
    %c64_556 = arith.constant 64 : index
    %352 = vector.load %arg17[%c8_555, %c64_556] : memref<16x512xf32, #tpu.memory_space<vmem>>, vector<4x32xf32>
    tpu.vector_store %arg17[%c8_555, %c64_556], %351 {strides = array<i32>} : memref<16x512xf32, #tpu.memory_space<vmem>>, vector<4x32xf32>,
    %c62 = arith.constant 62 : index
    %c0_557 = arith.constant 0 : index
    %353 = tpu.strided_load %arg16[%c62, %c0_557] {strides = array<i32: 2, 1>} : memref<100x32xf32, #tpu.memory_space<vmem>>, vector<4x32xf32>
    %c12_558 = arith.constant 12 : index
    %c64_559 = arith.constant 64 : index
    %354 = vector.load %arg17[%c12_558, %c64_559] : memref<16x512xf32, #tpu.memory_space<vmem>>, vector<4x32xf32>
    tpu.vector_store %arg17[%c12_558, %c64_559], %353 {strides = array<i32>} : memref<16x512xf32, #tpu.memory_space<vmem>>, vector<4x32xf32>,
    %c3_560 = arith.constant 3 : index
    %c0_561 = arith.constant 0 : index
    %355 = tpu.strided_load %arg16[%c3_560, %c0_561] {strides = array<i32: 2, 1>} : memref<100x32xf32, #tpu.memory_space<vmem>>, vector<4x32xf32>
    %c0_562 = arith.constant 0 : index
    %c96_563 = arith.constant 96 : index
    %356 = vector.load %arg17[%c0_562, %c96_563] : memref<16x512xf32, #tpu.memory_space<vmem>>, vector<4x32xf32>
    tpu.vector_store %arg17[%c0_562, %c96_563], %355 {strides = array<i32>} : memref<16x512xf32, #tpu.memory_space<vmem>>, vector<4x32xf32>,
    %c23 = arith.constant 23 : index
    %c0_564 = arith.constant 0 : index
    %357 = tpu.strided_load %arg16[%c23, %c0_564] {strides = array<i32: 2, 1>} : memref<100x32xf32, #tpu.memory_space<vmem>>, vector<4x32xf32>
    %c4_565 = arith.constant 4 : index
    %c96_566 = arith.constant 96 : index
    %358 = vector.load %arg17[%c4_565, %c96_566] : memref<16x512xf32, #tpu.memory_space<vmem>>, vector<4x32xf32>
    tpu.vector_store %arg17[%c4_565, %c96_566], %357 {strides = array<i32>} : memref<16x512xf32, #tpu.memory_space<vmem>>, vector<4x32xf32>,
    %c43 = arith.constant 43 : index
    %c0_567 = arith.constant 0 : index
    %359 = tpu.strided_load %arg16[%c43, %c0_567] {strides = array<i32: 2, 1>} : memref<100x32xf32, #tpu.memory_space<vmem>>, vector<4x32xf32>
    %c8_568 = arith.constant 8 : index
    %c96_569 = arith.constant 96 : index
    %360 = vector.load %arg17[%c8_568, %c96_569] : memref<16x512xf32, #tpu.memory_space<vmem>>, vector<4x32xf32>
    tpu.vector_store %arg17[%c8_568, %c96_569], %359 {strides = array<i32>} : memref<16x512xf32, #tpu.memory_space<vmem>>, vector<4x32xf32>,
    %c63 = arith.constant 63 : index
    %c0_570 = arith.constant 0 : index
    %361 = tpu.strided_load %arg16[%c63, %c0_570] {strides = array<i32: 2, 1>} : memref<100x32xf32, #tpu.memory_space<vmem>>, vector<4x32xf32>
    %c12_571 = arith.constant 12 : index
    %c96_572 = arith.constant 96 : index
    %362 = vector.load %arg17[%c12_571, %c96_572] : memref<16x512xf32, #tpu.memory_space<vmem>>, vector<4x32xf32>
    tpu.vector_store %arg17[%c12_571, %c96_572], %361 {strides = array<i32>} : memref<16x512xf32, #tpu.memory_space<vmem>>, vector<4x32xf32>,
    %c10 = arith.constant 10 : index
    %c0_573 = arith.constant 0 : index
    %363 = tpu.strided_load %arg16[%c10, %c0_573] {strides = array<i32: 2, 1>} : memref<100x32xf32, #tpu.memory_space<vmem>>, vector<4x32xf32>
    %c0_574 = arith.constant 0 : index
    %c128_575 = arith.constant 128 : index
    %364 = vector.load %arg17[%c0_574, %c128_575] : memref<16x512xf32, #tpu.memory_space<vmem>>, vector<4x32xf32>
    tpu.vector_store %arg17[%c0_574, %c128_575], %363 {strides = array<i32>} : memref<16x512xf32, #tpu.memory_space<vmem>>, vector<4x32xf32>,
    %c30 = arith.constant 30 : index
    %c0_576 = arith.constant 0 : index
    %365 = tpu.strided_load %arg16[%c30, %c0_576] {strides = array<i32: 2, 1>} : memref<100x32xf32, #tpu.memory_space<vmem>>, vector<4x32xf32>
    %c4_577 = arith.constant 4 : index
    %c128_578 = arith.constant 128 : index
    %366 = vector.load %arg17[%c4_577, %c128_578] : memref<16x512xf32, #tpu.memory_space<vmem>>, vector<4x32xf32>
    tpu.vector_store %arg17[%c4_577, %c128_578], %365 {strides = array<i32>} : memref<16x512xf32, #tpu.memory_space<vmem>>, vector<4x32xf32>,
    %c50 = arith.constant 50 : index
    %c0_579 = arith.constant 0 : index
    %367 = tpu.strided_load %arg16[%c50, %c0_579] {strides = array<i32: 2, 1>} : memref<100x32xf32, #tpu.memory_space<vmem>>, vector<4x32xf32>
    %c8_580 = arith.constant 8 : index
    %c128_581 = arith.constant 128 : index
    %368 = vector.load %arg17[%c8_580, %c128_581] : memref<16x512xf32, #tpu.memory_space<vmem>>, vector<4x32xf32>
    tpu.vector_store %arg17[%c8_580, %c128_581], %367 {strides = array<i32>} : memref<16x512xf32, #tpu.memory_space<vmem>>, vector<4x32xf32>,
    %c70 = arith.constant 70 : index
    %c0_582 = arith.constant 0 : index
    %369 = tpu.strided_load %arg16[%c70, %c0_582] {strides = array<i32: 2, 1>} : memref<100x32xf32, #tpu.memory_space<vmem>>, vector<4x32xf32>
    %c12_583 = arith.constant 12 : index
    %c128_584 = arith.constant 128 : index
    %370 = vector.load %arg17[%c12_583, %c128_584] : memref<16x512xf32, #tpu.memory_space<vmem>>, vector<4x32xf32>
    tpu.vector_store %arg17[%c12_583, %c128_584], %369 {strides = array<i32>} : memref<16x512xf32, #tpu.memory_space<vmem>>, vector<4x32xf32>,
    %c11_585 = arith.constant 11 : index
    %c0_586 = arith.constant 0 : index
    %371 = tpu.strided_load %arg16[%c11_585, %c0_586] {strides = array<i32: 2, 1>} : memref<100x32xf32, #tpu.memory_space<vmem>>, vector<4x32xf32>
    %c0_587 = arith.constant 0 : index
    %c160_588 = arith.constant 160 : index
    %372 = vector.load %arg17[%c0_587, %c160_588] : memref<16x512xf32, #tpu.memory_space<vmem>>, vector<4x32xf32>
    tpu.vector_store %arg17[%c0_587, %c160_588], %371 {strides = array<i32>} : memref<16x512xf32, #tpu.memory_space<vmem>>, vector<4x32xf32>,
    %c31_589 = arith.constant 31 : index
    %c0_590 = arith.constant 0 : index
    %373 = tpu.strided_load %arg16[%c31_589, %c0_590] {strides = array<i32: 2, 1>} : memref<100x32xf32, #tpu.memory_space<vmem>>, vector<4x32xf32>
    %c4_591 = arith.constant 4 : index
    %c160_592 = arith.constant 160 : index
    %374 = vector.load %arg17[%c4_591, %c160_592] : memref<16x512xf32, #tpu.memory_space<vmem>>, vector<4x32xf32>
    tpu.vector_store %arg17[%c4_591, %c160_592], %373 {strides = array<i32>} : memref<16x512xf32, #tpu.memory_space<vmem>>, vector<4x32xf32>,
    %c51_593 = arith.constant 51 : index
    %c0_594 = arith.constant 0 : index
    %375 = tpu.strided_load %arg16[%c51_593, %c0_594] {strides = array<i32: 2, 1>} : memref<100x32xf32, #tpu.memory_space<vmem>>, vector<4x32xf32>
    %c8_595 = arith.constant 8 : index
    %c160_596 = arith.constant 160 : index
    %376 = vector.load %arg17[%c8_595, %c160_596] : memref<16x512xf32, #tpu.memory_space<vmem>>, vector<4x32xf32>
    tpu.vector_store %arg17[%c8_595, %c160_596], %375 {strides = array<i32>} : memref<16x512xf32, #tpu.memory_space<vmem>>, vector<4x32xf32>,
    %c71_597 = arith.constant 71 : index
    %c0_598 = arith.constant 0 : index
    %377 = tpu.strided_load %arg16[%c71_597, %c0_598] {strides = array<i32: 2, 1>} : memref<100x32xf32, #tpu.memory_space<vmem>>, vector<4x32xf32>
    %c12_599 = arith.constant 12 : index
    %c160_600 = arith.constant 160 : index
    %378 = vector.load %arg17[%c12_599, %c160_600] : memref<16x512xf32, #tpu.memory_space<vmem>>, vector<4x32xf32>
    tpu.vector_store %arg17[%c12_599, %c160_600], %377 {strides = array<i32>} : memref<16x512xf32, #tpu.memory_space<vmem>>, vector<4x32xf32>,
    %c12_601 = arith.constant 12 : index
    %c0_602 = arith.constant 0 : index
    %379 = tpu.strided_load %arg16[%c12_601, %c0_602] {strides = array<i32: 2, 1>} : memref<100x32xf32, #tpu.memory_space<vmem>>, vector<4x32xf32>
    %c0_603 = arith.constant 0 : index
    %c192_604 = arith.constant 192 : index
    %380 = vector.load %arg17[%c0_603, %c192_604] : memref<16x512xf32, #tpu.memory_space<vmem>>, vector<4x32xf32>
    tpu.vector_store %arg17[%c0_603, %c192_604], %379 {strides = array<i32>} : memref<16x512xf32, #tpu.memory_space<vmem>>, vector<4x32xf32>,
    %c32_605 = arith.constant 32 : index
    %c0_606 = arith.constant 0 : index
    %381 = tpu.strided_load %arg16[%c32_605, %c0_606] {strides = array<i32: 2, 1>} : memref<100x32xf32, #tpu.memory_space<vmem>>, vector<4x32xf32>
    %c4_607 = arith.constant 4 : index
    %c192_608 = arith.constant 192 : index
    %382 = vector.load %arg17[%c4_607, %c192_608] : memref<16x512xf32, #tpu.memory_space<vmem>>, vector<4x32xf32>
    tpu.vector_store %arg17[%c4_607, %c192_608], %381 {strides = array<i32>} : memref<16x512xf32, #tpu.memory_space<vmem>>, vector<4x32xf32>,
    %c52_609 = arith.constant 52 : index
    %c0_610 = arith.constant 0 : index
    %383 = tpu.strided_load %arg16[%c52_609, %c0_610] {strides = array<i32: 2, 1>} : memref<100x32xf32, #tpu.memory_space<vmem>>, vector<4x32xf32>
    %c8_611 = arith.constant 8 : index
    %c192_612 = arith.constant 192 : index
    %384 = vector.load %arg17[%c8_611, %c192_612] : memref<16x512xf32, #tpu.memory_space<vmem>>, vector<4x32xf32>
    tpu.vector_store %arg17[%c8_611, %c192_612], %383 {strides = array<i32>} : memref<16x512xf32, #tpu.memory_space<vmem>>, vector<4x32xf32>,
    %c72_613 = arith.constant 72 : index
    %c0_614 = arith.constant 0 : index
    %385 = tpu.strided_load %arg16[%c72_613, %c0_614] {strides = array<i32: 2, 1>} : memref<100x32xf32, #tpu.memory_space<vmem>>, vector<4x32xf32>
    %c12_615 = arith.constant 12 : index
    %c192_616 = arith.constant 192 : index
    %386 = vector.load %arg17[%c12_615, %c192_616] : memref<16x512xf32, #tpu.memory_space<vmem>>, vector<4x32xf32>
    tpu.vector_store %arg17[%c12_615, %c192_616], %385 {strides = array<i32>} : memref<16x512xf32, #tpu.memory_space<vmem>>, vector<4x32xf32>,
    %c13 = arith.constant 13 : index
    %c0_617 = arith.constant 0 : index
    %387 = tpu.strided_load %arg16[%c13, %c0_617] {strides = array<i32: 2, 1>} : memref<100x32xf32, #tpu.memory_space<vmem>>, vector<4x32xf32>
    %c0_618 = arith.constant 0 : index
    %c224_619 = arith.constant 224 : index
    %388 = vector.load %arg17[%c0_618, %c224_619] : memref<16x512xf32, #tpu.memory_space<vmem>>, vector<4x32xf32>
    tpu.vector_store %arg17[%c0_618, %c224_619], %387 {strides = array<i32>} : memref<16x512xf32, #tpu.memory_space<vmem>>, vector<4x32xf32>,
    %c33 = arith.constant 33 : index
    %c0_620 = arith.constant 0 : index
    %389 = tpu.strided_load %arg16[%c33, %c0_620] {strides = array<i32: 2, 1>} : memref<100x32xf32, #tpu.memory_space<vmem>>, vector<4x32xf32>
    %c4_621 = arith.constant 4 : index
    %c224_622 = arith.constant 224 : index
    %390 = vector.load %arg17[%c4_621, %c224_622] : memref<16x512xf32, #tpu.memory_space<vmem>>, vector<4x32xf32>
    tpu.vector_store %arg17[%c4_621, %c224_622], %389 {strides = array<i32>} : memref<16x512xf32, #tpu.memory_space<vmem>>, vector<4x32xf32>,
    %c53 = arith.constant 53 : index
    %c0_623 = arith.constant 0 : index
    %391 = tpu.strided_load %arg16[%c53, %c0_623] {strides = array<i32: 2, 1>} : memref<100x32xf32, #tpu.memory_space<vmem>>, vector<4x32xf32>
    %c8_624 = arith.constant 8 : index
    %c224_625 = arith.constant 224 : index
    %392 = vector.load %arg17[%c8_624, %c224_625] : memref<16x512xf32, #tpu.memory_space<vmem>>, vector<4x32xf32>
    tpu.vector_store %arg17[%c8_624, %c224_625], %391 {strides = array<i32>} : memref<16x512xf32, #tpu.memory_space<vmem>>, vector<4x32xf32>,
    %c73_626 = arith.constant 73 : index
    %c0_627 = arith.constant 0 : index
    %393 = tpu.strided_load %arg16[%c73_626, %c0_627] {strides = array<i32: 2, 1>} : memref<100x32xf32, #tpu.memory_space<vmem>>, vector<4x32xf32>
    %c12_628 = arith.constant 12 : index
    %c224_629 = arith.constant 224 : index
    %394 = vector.load %arg17[%c12_628, %c224_629] : memref<16x512xf32, #tpu.memory_space<vmem>>, vector<4x32xf32>
    tpu.vector_store %arg17[%c12_628, %c224_629], %393 {strides = array<i32>} : memref<16x512xf32, #tpu.memory_space<vmem>>, vector<4x32xf32>,
    %c20_630 = arith.constant 20 : index
    %c0_631 = arith.constant 0 : index
    %395 = tpu.strided_load %arg16[%c20_630, %c0_631] {strides = array<i32: 2, 1>} : memref<100x32xf32, #tpu.memory_space<vmem>>, vector<4x32xf32>
    %c0_632 = arith.constant 0 : index
    %c256 = arith.constant 256 : index
    %396 = vector.load %arg17[%c0_632, %c256] : memref<16x512xf32, #tpu.memory_space<vmem>>, vector<4x32xf32>
    tpu.vector_store %arg17[%c0_632, %c256], %395 {strides = array<i32>} : memref<16x512xf32, #tpu.memory_space<vmem>>, vector<4x32xf32>,
    %c40_633 = arith.constant 40 : index
    %c0_634 = arith.constant 0 : index
    %397 = tpu.strided_load %arg16[%c40_633, %c0_634] {strides = array<i32: 2, 1>} : memref<100x32xf32, #tpu.memory_space<vmem>>, vector<4x32xf32>
    %c4_635 = arith.constant 4 : index
    %c256_636 = arith.constant 256 : index
    %398 = vector.load %arg17[%c4_635, %c256_636] : memref<16x512xf32, #tpu.memory_space<vmem>>, vector<4x32xf32>
    tpu.vector_store %arg17[%c4_635, %c256_636], %397 {strides = array<i32>} : memref<16x512xf32, #tpu.memory_space<vmem>>, vector<4x32xf32>,
    %c60_637 = arith.constant 60 : index
    %c0_638 = arith.constant 0 : index
    %399 = tpu.strided_load %arg16[%c60_637, %c0_638] {strides = array<i32: 2, 1>} : memref<100x32xf32, #tpu.memory_space<vmem>>, vector<4x32xf32>
    %c8_639 = arith.constant 8 : index
    %c256_640 = arith.constant 256 : index
    %400 = vector.load %arg17[%c8_639, %c256_640] : memref<16x512xf32, #tpu.memory_space<vmem>>, vector<4x32xf32>
    tpu.vector_store %arg17[%c8_639, %c256_640], %399 {strides = array<i32>} : memref<16x512xf32, #tpu.memory_space<vmem>>, vector<4x32xf32>,
    %c80_641 = arith.constant 80 : index
    %c0_642 = arith.constant 0 : index
    %401 = tpu.strided_load %arg16[%c80_641, %c0_642] {strides = array<i32: 2, 1>} : memref<100x32xf32, #tpu.memory_space<vmem>>, vector<4x32xf32>
    %c12_643 = arith.constant 12 : index
    %c256_644 = arith.constant 256 : index
    %402 = vector.load %arg17[%c12_643, %c256_644] : memref<16x512xf32, #tpu.memory_space<vmem>>, vector<4x32xf32>
    tpu.vector_store %arg17[%c12_643, %c256_644], %401 {strides = array<i32>} : memref<16x512xf32, #tpu.memory_space<vmem>>, vector<4x32xf32>,
    %c21_645 = arith.constant 21 : index
    %c0_646 = arith.constant 0 : index
    %403 = tpu.strided_load %arg16[%c21_645, %c0_646] {strides = array<i32: 2, 1>} : memref<100x32xf32, #tpu.memory_space<vmem>>, vector<4x32xf32>
    %c0_647 = arith.constant 0 : index
    %c288_648 = arith.constant 288 : index
    %404 = vector.load %arg17[%c0_647, %c288_648] : memref<16x512xf32, #tpu.memory_space<vmem>>, vector<4x32xf32>
    tpu.vector_store %arg17[%c0_647, %c288_648], %403 {strides = array<i32>} : memref<16x512xf32, #tpu.memory_space<vmem>>, vector<4x32xf32>,
    %c41_649 = arith.constant 41 : index
    %c0_650 = arith.constant 0 : index
    %405 = tpu.strided_load %arg16[%c41_649, %c0_650] {strides = array<i32: 2, 1>} : memref<100x32xf32, #tpu.memory_space<vmem>>, vector<4x32xf32>
    %c4_651 = arith.constant 4 : index
    %c288_652 = arith.constant 288 : index
    %406 = vector.load %arg17[%c4_651, %c288_652] : memref<16x512xf32, #tpu.memory_space<vmem>>, vector<4x32xf32>
    tpu.vector_store %arg17[%c4_651, %c288_652], %405 {strides = array<i32>} : memref<16x512xf32, #tpu.memory_space<vmem>>, vector<4x32xf32>,
    %c61_653 = arith.constant 61 : index
    %c0_654 = arith.constant 0 : index
    %407 = tpu.strided_load %arg16[%c61_653, %c0_654] {strides = array<i32: 2, 1>} : memref<100x32xf32, #tpu.memory_space<vmem>>, vector<4x32xf32>
    %c8_655 = arith.constant 8 : index
    %c288_656 = arith.constant 288 : index
    %408 = vector.load %arg17[%c8_655, %c288_656] : memref<16x512xf32, #tpu.memory_space<vmem>>, vector<4x32xf32>
    tpu.vector_store %arg17[%c8_655, %c288_656], %407 {strides = array<i32>} : memref<16x512xf32, #tpu.memory_space<vmem>>, vector<4x32xf32>,
    %c81_657 = arith.constant 81 : index
    %c0_658 = arith.constant 0 : index
    %409 = tpu.strided_load %arg16[%c81_657, %c0_658] {strides = array<i32: 2, 1>} : memref<100x32xf32, #tpu.memory_space<vmem>>, vector<4x32xf32>
    %c12_659 = arith.constant 12 : index
    %c288_660 = arith.constant 288 : index
    %410 = vector.load %arg17[%c12_659, %c288_660] : memref<16x512xf32, #tpu.memory_space<vmem>>, vector<4x32xf32>
    tpu.vector_store %arg17[%c12_659, %c288_660], %409 {strides = array<i32>} : memref<16x512xf32, #tpu.memory_space<vmem>>, vector<4x32xf32>,
    %c22_661 = arith.constant 22 : index
    %c0_662 = arith.constant 0 : index
    %411 = tpu.strided_load %arg16[%c22_661, %c0_662] {strides = array<i32: 2, 1>} : memref<100x32xf32, #tpu.memory_space<vmem>>, vector<4x32xf32>
    %c0_663 = arith.constant 0 : index
    %c320 = arith.constant 320 : index
    %412 = vector.load %arg17[%c0_663, %c320] : memref<16x512xf32, #tpu.memory_space<vmem>>, vector<4x32xf32>
    tpu.vector_store %arg17[%c0_663, %c320], %411 {strides = array<i32>} : memref<16x512xf32, #tpu.memory_space<vmem>>, vector<4x32xf32>,
    %c42_664 = arith.constant 42 : index
    %c0_665 = arith.constant 0 : index
    %413 = tpu.strided_load %arg16[%c42_664, %c0_665] {strides = array<i32: 2, 1>} : memref<100x32xf32, #tpu.memory_space<vmem>>, vector<4x32xf32>
    %c4_666 = arith.constant 4 : index
    %c320_667 = arith.constant 320 : index
    %414 = vector.load %arg17[%c4_666, %c320_667] : memref<16x512xf32, #tpu.memory_space<vmem>>, vector<4x32xf32>
    tpu.vector_store %arg17[%c4_666, %c320_667], %413 {strides = array<i32>} : memref<16x512xf32, #tpu.memory_space<vmem>>, vector<4x32xf32>,
    %c62_668 = arith.constant 62 : index
    %c0_669 = arith.constant 0 : index
    %415 = tpu.strided_load %arg16[%c62_668, %c0_669] {strides = array<i32: 2, 1>} : memref<100x32xf32, #tpu.memory_space<vmem>>, vector<4x32xf32>
    %c8_670 = arith.constant 8 : index
    %c320_671 = arith.constant 320 : index
    %416 = vector.load %arg17[%c8_670, %c320_671] : memref<16x512xf32, #tpu.memory_space<vmem>>, vector<4x32xf32>
    tpu.vector_store %arg17[%c8_670, %c320_671], %415 {strides = array<i32>} : memref<16x512xf32, #tpu.memory_space<vmem>>, vector<4x32xf32>,
    %c82 = arith.constant 82 : index
    %c0_672 = arith.constant 0 : index
    %417 = tpu.strided_load %arg16[%c82, %c0_672] {strides = array<i32: 2, 1>} : memref<100x32xf32, #tpu.memory_space<vmem>>, vector<4x32xf32>
    %c12_673 = arith.constant 12 : index
    %c320_674 = arith.constant 320 : index
    %418 = vector.load %arg17[%c12_673, %c320_674] : memref<16x512xf32, #tpu.memory_space<vmem>>, vector<4x32xf32>
    tpu.vector_store %arg17[%c12_673, %c320_674], %417 {strides = array<i32>} : memref<16x512xf32, #tpu.memory_space<vmem>>, vector<4x32xf32>,
    %c23_675 = arith.constant 23 : index
    %c0_676 = arith.constant 0 : index
    %419 = tpu.strided_load %arg16[%c23_675, %c0_676] {strides = array<i32: 2, 1>} : memref<100x32xf32, #tpu.memory_space<vmem>>, vector<4x32xf32>
    %c0_677 = arith.constant 0 : index
    %c352 = arith.constant 352 : index
    %420 = vector.load %arg17[%c0_677, %c352] : memref<16x512xf32, #tpu.memory_space<vmem>>, vector<4x32xf32>
    tpu.vector_store %arg17[%c0_677, %c352], %419 {strides = array<i32>} : memref<16x512xf32, #tpu.memory_space<vmem>>, vector<4x32xf32>,
    %c43_678 = arith.constant 43 : index
    %c0_679 = arith.constant 0 : index
    %421 = tpu.strided_load %arg16[%c43_678, %c0_679] {strides = array<i32: 2, 1>} : memref<100x32xf32, #tpu.memory_space<vmem>>, vector<4x32xf32>
    %c4_680 = arith.constant 4 : index
    %c352_681 = arith.constant 352 : index
    %422 = vector.load %arg17[%c4_680, %c352_681] : memref<16x512xf32, #tpu.memory_space<vmem>>, vector<4x32xf32>
    tpu.vector_store %arg17[%c4_680, %c352_681], %421 {strides = array<i32>} : memref<16x512xf32, #tpu.memory_space<vmem>>, vector<4x32xf32>,
    %c63_682 = arith.constant 63 : index
    %c0_683 = arith.constant 0 : index
    %423 = tpu.strided_load %arg16[%c63_682, %c0_683] {strides = array<i32: 2, 1>} : memref<100x32xf32, #tpu.memory_space<vmem>>, vector<4x32xf32>
    %c8_684 = arith.constant 8 : index
    %c352_685 = arith.constant 352 : index
    %424 = vector.load %arg17[%c8_684, %c352_685] : memref<16x512xf32, #tpu.memory_space<vmem>>, vector<4x32xf32>
    tpu.vector_store %arg17[%c8_684, %c352_685], %423 {strides = array<i32>} : memref<16x512xf32, #tpu.memory_space<vmem>>, vector<4x32xf32>,
    %c83 = arith.constant 83 : index
    %c0_686 = arith.constant 0 : index
    %425 = tpu.strided_load %arg16[%c83, %c0_686] {strides = array<i32: 2, 1>} : memref<100x32xf32, #tpu.memory_space<vmem>>, vector<4x32xf32>
    %c12_687 = arith.constant 12 : index
    %c352_688 = arith.constant 352 : index
    %426 = vector.load %arg17[%c12_687, %c352_688] : memref<16x512xf32, #tpu.memory_space<vmem>>, vector<4x32xf32>
    tpu.vector_store %arg17[%c12_687, %c352_688], %425 {strides = array<i32>} : memref<16x512xf32, #tpu.memory_space<vmem>>, vector<4x32xf32>,
    %c30_689 = arith.constant 30 : index
    %c0_690 = arith.constant 0 : index
    %427 = tpu.strided_load %arg16[%c30_689, %c0_690] {strides = array<i32: 2, 1>} : memref<100x32xf32, #tpu.memory_space<vmem>>, vector<4x32xf32>
    %c0_691 = arith.constant 0 : index
    %c384 = arith.constant 384 : index
    %428 = vector.load %arg17[%c0_691, %c384] : memref<16x512xf32, #tpu.memory_space<vmem>>, vector<4x32xf32>
    tpu.vector_store %arg17[%c0_691, %c384], %427 {strides = array<i32>} : memref<16x512xf32, #tpu.memory_space<vmem>>, vector<4x32xf32>,
    %c50_692 = arith.constant 50 : index
    %c0_693 = arith.constant 0 : index
    %429 = tpu.strided_load %arg16[%c50_692, %c0_693] {strides = array<i32: 2, 1>} : memref<100x32xf32, #tpu.memory_space<vmem>>, vector<4x32xf32>
    %c4_694 = arith.constant 4 : index
    %c384_695 = arith.constant 384 : index
    %430 = vector.load %arg17[%c4_694, %c384_695] : memref<16x512xf32, #tpu.memory_space<vmem>>, vector<4x32xf32>
    tpu.vector_store %arg17[%c4_694, %c384_695], %429 {strides = array<i32>} : memref<16x512xf32, #tpu.memory_space<vmem>>, vector<4x32xf32>,
    %c70_696 = arith.constant 70 : index
    %c0_697 = arith.constant 0 : index
    %431 = tpu.strided_load %arg16[%c70_696, %c0_697] {strides = array<i32: 2, 1>} : memref<100x32xf32, #tpu.memory_space<vmem>>, vector<4x32xf32>
    %c8_698 = arith.constant 8 : index
    %c384_699 = arith.constant 384 : index
    %432 = vector.load %arg17[%c8_698, %c384_699] : memref<16x512xf32, #tpu.memory_space<vmem>>, vector<4x32xf32>
    tpu.vector_store %arg17[%c8_698, %c384_699], %431 {strides = array<i32>} : memref<16x512xf32, #tpu.memory_space<vmem>>, vector<4x32xf32>,
    %c90_700 = arith.constant 90 : index
    %c0_701 = arith.constant 0 : index
    %433 = tpu.strided_load %arg16[%c90_700, %c0_701] {strides = array<i32: 2, 1>} : memref<100x32xf32, #tpu.memory_space<vmem>>, vector<4x32xf32>
    %c12_702 = arith.constant 12 : index
    %c384_703 = arith.constant 384 : index
    %434 = vector.load %arg17[%c12_702, %c384_703] : memref<16x512xf32, #tpu.memory_space<vmem>>, vector<4x32xf32>
    tpu.vector_store %arg17[%c12_702, %c384_703], %433 {strides = array<i32>} : memref<16x512xf32, #tpu.memory_space<vmem>>, vector<4x32xf32>,
    %c31_704 = arith.constant 31 : index
    %c0_705 = arith.constant 0 : index
    %435 = tpu.strided_load %arg16[%c31_704, %c0_705] {strides = array<i32: 2, 1>} : memref<100x32xf32, #tpu.memory_space<vmem>>, vector<4x32xf32>
    %c0_706 = arith.constant 0 : index
    %c416 = arith.constant 416 : index
    %436 = vector.load %arg17[%c0_706, %c416] : memref<16x512xf32, #tpu.memory_space<vmem>>, vector<4x32xf32>
    tpu.vector_store %arg17[%c0_706, %c416], %435 {strides = array<i32>} : memref<16x512xf32, #tpu.memory_space<vmem>>, vector<4x32xf32>,
    %c51_707 = arith.constant 51 : index
    %c0_708 = arith.constant 0 : index
    %437 = tpu.strided_load %arg16[%c51_707, %c0_708] {strides = array<i32: 2, 1>} : memref<100x32xf32, #tpu.memory_space<vmem>>, vector<4x32xf32>
    %c4_709 = arith.constant 4 : index
    %c416_710 = arith.constant 416 : index
    %438 = vector.load %arg17[%c4_709, %c416_710] : memref<16x512xf32, #tpu.memory_space<vmem>>, vector<4x32xf32>
    tpu.vector_store %arg17[%c4_709, %c416_710], %437 {strides = array<i32>} : memref<16x512xf32, #tpu.memory_space<vmem>>, vector<4x32xf32>,
    %c71_711 = arith.constant 71 : index
    %c0_712 = arith.constant 0 : index
    %439 = tpu.strided_load %arg16[%c71_711, %c0_712] {strides = array<i32: 2, 1>} : memref<100x32xf32, #tpu.memory_space<vmem>>, vector<4x32xf32>
    %c8_713 = arith.constant 8 : index
    %c416_714 = arith.constant 416 : index
    %440 = vector.load %arg17[%c8_713, %c416_714] : memref<16x512xf32, #tpu.memory_space<vmem>>, vector<4x32xf32>
    tpu.vector_store %arg17[%c8_713, %c416_714], %439 {strides = array<i32>} : memref<16x512xf32, #tpu.memory_space<vmem>>, vector<4x32xf32>,
    %c91_715 = arith.constant 91 : index
    %c0_716 = arith.constant 0 : index
    %441 = tpu.strided_load %arg16[%c91_715, %c0_716] {strides = array<i32: 2, 1>} : memref<100x32xf32, #tpu.memory_space<vmem>>, vector<4x32xf32>
    %c12_717 = arith.constant 12 : index
    %c416_718 = arith.constant 416 : index
    %442 = vector.load %arg17[%c12_717, %c416_718] : memref<16x512xf32, #tpu.memory_space<vmem>>, vector<4x32xf32>
    tpu.vector_store %arg17[%c12_717, %c416_718], %441 {strides = array<i32>} : memref<16x512xf32, #tpu.memory_space<vmem>>, vector<4x32xf32>,
    %c32_719 = arith.constant 32 : index
    %c0_720 = arith.constant 0 : index
    %443 = tpu.strided_load %arg16[%c32_719, %c0_720] {strides = array<i32: 2, 1>} : memref<100x32xf32, #tpu.memory_space<vmem>>, vector<4x32xf32>
    %c0_721 = arith.constant 0 : index
    %c448 = arith.constant 448 : index
    %444 = vector.load %arg17[%c0_721, %c448] : memref<16x512xf32, #tpu.memory_space<vmem>>, vector<4x32xf32>
    tpu.vector_store %arg17[%c0_721, %c448], %443 {strides = array<i32>} : memref<16x512xf32, #tpu.memory_space<vmem>>, vector<4x32xf32>,
    %c52_722 = arith.constant 52 : index
    %c0_723 = arith.constant 0 : index
    %445 = tpu.strided_load %arg16[%c52_722, %c0_723] {strides = array<i32: 2, 1>} : memref<100x32xf32, #tpu.memory_space<vmem>>, vector<4x32xf32>
    %c4_724 = arith.constant 4 : index
    %c448_725 = arith.constant 448 : index
    %446 = vector.load %arg17[%c4_724, %c448_725] : memref<16x512xf32, #tpu.memory_space<vmem>>, vector<4x32xf32>
    tpu.vector_store %arg17[%c4_724, %c448_725], %445 {strides = array<i32>} : memref<16x512xf32, #tpu.memory_space<vmem>>, vector<4x32xf32>,
    %c72_726 = arith.constant 72 : index
    %c0_727 = arith.constant 0 : index
    %447 = tpu.strided_load %arg16[%c72_726, %c0_727] {strides = array<i32: 2, 1>} : memref<100x32xf32, #tpu.memory_space<vmem>>, vector<4x32xf32>
    %c8_728 = arith.constant 8 : index
    %c448_729 = arith.constant 448 : index
    %448 = vector.load %arg17[%c8_728, %c448_729] : memref<16x512xf32, #tpu.memory_space<vmem>>, vector<4x32xf32>
    tpu.vector_store %arg17[%c8_728, %c448_729], %447 {strides = array<i32>} : memref<16x512xf32, #tpu.memory_space<vmem>>, vector<4x32xf32>,
    %c92_730 = arith.constant 92 : index
    %c0_731 = arith.constant 0 : index
    %449 = tpu.strided_load %arg16[%c92_730, %c0_731] {strides = array<i32: 2, 1>} : memref<100x32xf32, #tpu.memory_space<vmem>>, vector<4x32xf32>
    %c12_732 = arith.constant 12 : index
    %c448_733 = arith.constant 448 : index
    %450 = vector.load %arg17[%c12_732, %c448_733] : memref<16x512xf32, #tpu.memory_space<vmem>>, vector<4x32xf32>
    tpu.vector_store %arg17[%c12_732, %c448_733], %449 {strides = array<i32>} : memref<16x512xf32, #tpu.memory_space<vmem>>, vector<4x32xf32>,
    %c33_734 = arith.constant 33 : index
    %c0_735 = arith.constant 0 : index
    %451 = tpu.strided_load %arg16[%c33_734, %c0_735] {strides = array<i32: 2, 1>} : memref<100x32xf32, #tpu.memory_space<vmem>>, vector<4x32xf32>
    %c0_736 = arith.constant 0 : index
    %c480 = arith.constant 480 : index
    %452 = vector.load %arg17[%c0_736, %c480] : memref<16x512xf32, #tpu.memory_space<vmem>>, vector<4x32xf32>
    tpu.vector_store %arg17[%c0_736, %c480], %451 {strides = array<i32>} : memref<16x512xf32, #tpu.memory_space<vmem>>, vector<4x32xf32>,
    %c53_737 = arith.constant 53 : index
    %c0_738 = arith.constant 0 : index
    %453 = tpu.strided_load %arg16[%c53_737, %c0_738] {strides = array<i32: 2, 1>} : memref<100x32xf32, #tpu.memory_space<vmem>>, vector<4x32xf32>
    %c4_739 = arith.constant 4 : index
    %c480_740 = arith.constant 480 : index
    %454 = vector.load %arg17[%c4_739, %c480_740] : memref<16x512xf32, #tpu.memory_space<vmem>>, vector<4x32xf32>
    tpu.vector_store %arg17[%c4_739, %c480_740], %453 {strides = array<i32>} : memref<16x512xf32, #tpu.memory_space<vmem>>, vector<4x32xf32>,
    %c73_741 = arith.constant 73 : index
    %c0_742 = arith.constant 0 : index
    %455 = tpu.strided_load %arg16[%c73_741, %c0_742] {strides = array<i32: 2, 1>} : memref<100x32xf32, #tpu.memory_space<vmem>>, vector<4x32xf32>
    %c8_743 = arith.constant 8 : index
    %c480_744 = arith.constant 480 : index
    %456 = vector.load %arg17[%c8_743, %c480_744] : memref<16x512xf32, #tpu.memory_space<vmem>>, vector<4x32xf32>
    tpu.vector_store %arg17[%c8_743, %c480_744], %455 {strides = array<i32>} : memref<16x512xf32, #tpu.memory_space<vmem>>, vector<4x32xf32>,
    %c93_745 = arith.constant 93 : index
    %c0_746 = arith.constant 0 : index
    %457 = tpu.strided_load %arg16[%c93_745, %c0_746] {strides = array<i32: 2, 1>} : memref<100x32xf32, #tpu.memory_space<vmem>>, vector<4x32xf32>
    %c12_747 = arith.constant 12 : index
    %c480_748 = arith.constant 480 : index
    %458 = vector.load %arg17[%c12_747, %c480_748] : memref<16x512xf32, #tpu.memory_space<vmem>>, vector<4x32xf32>
    tpu.vector_store %arg17[%c12_747, %c480_748], %457 {strides = array<i32>} : memref<16x512xf32, #tpu.memory_space<vmem>>, vector<4x32xf32>,
    %c0_749 = arith.constant 0 : index
    %c0_750 = arith.constant 0 : index
    %459 = vector.load %arg17[%c0_749, %c0_750] : memref<16x512xf32, #tpu.memory_space<vmem>>, vector<16x512xf32>
    %c0_751 = arith.constant 0 : index
    %c0_752 = arith.constant 0 : index
    %460 = vector.load %arg4[%c0_751, %c0_752] : memref<512x32xf32, #tpu.memory_space<vmem>>, vector<512x32xf32>
    %cst_753 = arith.constant dense<0.000000e+00> : vector<16x32xf32>
    %461 = tpu.matmul %459, %460, %cst_753 {dimension_numbers = #tpu.dot_dimension_numbers<[1], [0], [0], [1], [0, 0, 1, 1], [], []>} : vector<16x512xf32>, vector<512x32xf32>, vector<16x32xf32> -> vector<16x32xf32>
    %c0_754 = arith.constant 0 : index
    %c0_755 = arith.constant 0 : index
    %462 = vector.load %arg5[%c0_754, %c0_755] : memref<1x32xf32, #tpu.memory_space<vmem>>, vector<1x32xf32>
    %463 = vector.broadcast %462 : vector<1x32xf32> to vector<16x32xf32>
    %464 = arith.addf %461, %463 : vector<16x32xf32>
    %cst_756 = arith.constant 0.000000e+00 : f32
    %465 = vector.broadcast %cst_756 : f32 to vector<16x32xf32>
    %466 = arith.maximumf %464, %465 : vector<16x32xf32>
    %467 = vector.extract_strided_slice %466 {offsets = [0, 0], sizes = [4, 32], strides = [1, 1]} : vector<16x32xf32> to vector<4x32xf32>
    %c8_757 = arith.constant 8 : index
    %c0_758 = arith.constant 0 : index
    %468 = vector.load %arg18[%c8_757, %c0_758] : memref<49x32xf32, #tpu.memory_space<vmem>>, vector<4x32xf32>
    tpu.vector_store %arg18[%c8_757, %c0_758], %467 {strides = array<i32>} : memref<49x32xf32, #tpu.memory_space<vmem>>, vector<4x32xf32>,
    %469 = vector.extract_strided_slice %466 {offsets = [4, 0], sizes = [4, 32], strides = [1, 1]} : vector<16x32xf32> to vector<4x32xf32>
    %c15 = arith.constant 15 : index
    %c0_759 = arith.constant 0 : index
    %470 = vector.load %arg18[%c15, %c0_759] : memref<49x32xf32, #tpu.memory_space<vmem>>, vector<4x32xf32>
    tpu.vector_store %arg18[%c15, %c0_759], %469 {strides = array<i32>} : memref<49x32xf32, #tpu.memory_space<vmem>>, vector<4x32xf32>,
    %471 = vector.extract_strided_slice %466 {offsets = [8, 0], sizes = [4, 32], strides = [1, 1]} : vector<16x32xf32> to vector<4x32xf32>
    %c22_760 = arith.constant 22 : index
    %c0_761 = arith.constant 0 : index
    %472 = vector.load %arg18[%c22_760, %c0_761] : memref<49x32xf32, #tpu.memory_space<vmem>>, vector<4x32xf32>
    tpu.vector_store %arg18[%c22_760, %c0_761], %471 {strides = array<i32>} : memref<49x32xf32, #tpu.memory_space<vmem>>, vector<4x32xf32>,
    %473 = vector.extract_strided_slice %466 {offsets = [12, 0], sizes = [4, 32], strides = [1, 1]} : vector<16x32xf32> to vector<4x32xf32>
    %c29 = arith.constant 29 : index
    %c0_762 = arith.constant 0 : index
    %474 = vector.load %arg18[%c29, %c0_762] : memref<49x32xf32, #tpu.memory_space<vmem>>, vector<4x32xf32>
    tpu.vector_store %arg18[%c29, %c0_762], %473 {strides = array<i32>} : memref<49x32xf32, #tpu.memory_space<vmem>>, vector<4x32xf32>,
    %c0_763 = arith.constant 0 : index
    %c0_764 = arith.constant 0 : index
    %475 = vector.load %arg18[%c0_763, %c0_764] : memref<49x32xf32, #tpu.memory_space<vmem>>, vector<4x32xf32>
    %c0_765 = arith.constant 0 : index
    %c0_766 = arith.constant 0 : index
    %476 = vector.load %arg19[%c0_765, %c0_766] : memref<16x512xf32, #tpu.memory_space<vmem>>, vector<4x32xf32>
    tpu.vector_store %arg19[%c0_765, %c0_766], %475 {strides = array<i32>} : memref<16x512xf32, #tpu.memory_space<vmem>>, vector<4x32xf32>,
    %c7 = arith.constant 7 : index
    %c0_767 = arith.constant 0 : index
    %477 = vector.load %arg18[%c7, %c0_767] : memref<49x32xf32, #tpu.memory_space<vmem>>, vector<4x32xf32>
    %c4_768 = arith.constant 4 : index
    %c0_769 = arith.constant 0 : index
    %478 = vector.load %arg19[%c4_768, %c0_769] : memref<16x512xf32, #tpu.memory_space<vmem>>, vector<4x32xf32>
    tpu.vector_store %arg19[%c4_768, %c0_769], %477 {strides = array<i32>} : memref<16x512xf32, #tpu.memory_space<vmem>>, vector<4x32xf32>,
    %c14 = arith.constant 14 : index
    %c0_770 = arith.constant 0 : index
    %479 = vector.load %arg18[%c14, %c0_770] : memref<49x32xf32, #tpu.memory_space<vmem>>, vector<4x32xf32>
    %c8_771 = arith.constant 8 : index
    %c0_772 = arith.constant 0 : index
    %480 = vector.load %arg19[%c8_771, %c0_772] : memref<16x512xf32, #tpu.memory_space<vmem>>, vector<4x32xf32>
    tpu.vector_store %arg19[%c8_771, %c0_772], %479 {strides = array<i32>} : memref<16x512xf32, #tpu.memory_space<vmem>>, vector<4x32xf32>,
    %c21_773 = arith.constant 21 : index
    %c0_774 = arith.constant 0 : index
    %481 = vector.load %arg18[%c21_773, %c0_774] : memref<49x32xf32, #tpu.memory_space<vmem>>, vector<4x32xf32>
    %c12_775 = arith.constant 12 : index
    %c0_776 = arith.constant 0 : index
    %482 = vector.load %arg19[%c12_775, %c0_776] : memref<16x512xf32, #tpu.memory_space<vmem>>, vector<4x32xf32>
    tpu.vector_store %arg19[%c12_775, %c0_776], %481 {strides = array<i32>} : memref<16x512xf32, #tpu.memory_space<vmem>>, vector<4x32xf32>,
    %c1_777 = arith.constant 1 : index
    %c0_778 = arith.constant 0 : index
    %483 = vector.load %arg18[%c1_777, %c0_778] : memref<49x32xf32, #tpu.memory_space<vmem>>, vector<4x32xf32>
    %c0_779 = arith.constant 0 : index
    %c32_780 = arith.constant 32 : index
    %484 = vector.load %arg19[%c0_779, %c32_780] : memref<16x512xf32, #tpu.memory_space<vmem>>, vector<4x32xf32>
    tpu.vector_store %arg19[%c0_779, %c32_780], %483 {strides = array<i32>} : memref<16x512xf32, #tpu.memory_space<vmem>>, vector<4x32xf32>,
    %c8_781 = arith.constant 8 : index
    %c0_782 = arith.constant 0 : index
    %485 = vector.load %arg18[%c8_781, %c0_782] : memref<49x32xf32, #tpu.memory_space<vmem>>, vector<4x32xf32>
    %c4_783 = arith.constant 4 : index
    %c32_784 = arith.constant 32 : index
    %486 = vector.load %arg19[%c4_783, %c32_784] : memref<16x512xf32, #tpu.memory_space<vmem>>, vector<4x32xf32>
    tpu.vector_store %arg19[%c4_783, %c32_784], %485 {strides = array<i32>} : memref<16x512xf32, #tpu.memory_space<vmem>>, vector<4x32xf32>,
    %c15_785 = arith.constant 15 : index
    %c0_786 = arith.constant 0 : index
    %487 = vector.load %arg18[%c15_785, %c0_786] : memref<49x32xf32, #tpu.memory_space<vmem>>, vector<4x32xf32>
    %c8_787 = arith.constant 8 : index
    %c32_788 = arith.constant 32 : index
    %488 = vector.load %arg19[%c8_787, %c32_788] : memref<16x512xf32, #tpu.memory_space<vmem>>, vector<4x32xf32>
    tpu.vector_store %arg19[%c8_787, %c32_788], %487 {strides = array<i32>} : memref<16x512xf32, #tpu.memory_space<vmem>>, vector<4x32xf32>,
    %c22_789 = arith.constant 22 : index
    %c0_790 = arith.constant 0 : index
    %489 = vector.load %arg18[%c22_789, %c0_790] : memref<49x32xf32, #tpu.memory_space<vmem>>, vector<4x32xf32>
    %c12_791 = arith.constant 12 : index
    %c32_792 = arith.constant 32 : index
    %490 = vector.load %arg19[%c12_791, %c32_792] : memref<16x512xf32, #tpu.memory_space<vmem>>, vector<4x32xf32>
    tpu.vector_store %arg19[%c12_791, %c32_792], %489 {strides = array<i32>} : memref<16x512xf32, #tpu.memory_space<vmem>>, vector<4x32xf32>,
    %c2_793 = arith.constant 2 : index
    %c0_794 = arith.constant 0 : index
    %491 = vector.load %arg18[%c2_793, %c0_794] : memref<49x32xf32, #tpu.memory_space<vmem>>, vector<4x32xf32>
    %c0_795 = arith.constant 0 : index
    %c64_796 = arith.constant 64 : index
    %492 = vector.load %arg19[%c0_795, %c64_796] : memref<16x512xf32, #tpu.memory_space<vmem>>, vector<4x32xf32>
    tpu.vector_store %arg19[%c0_795, %c64_796], %491 {strides = array<i32>} : memref<16x512xf32, #tpu.memory_space<vmem>>, vector<4x32xf32>,
    %c9 = arith.constant 9 : index
    %c0_797 = arith.constant 0 : index
    %493 = vector.load %arg18[%c9, %c0_797] : memref<49x32xf32, #tpu.memory_space<vmem>>, vector<4x32xf32>
    %c4_798 = arith.constant 4 : index
    %c64_799 = arith.constant 64 : index
    %494 = vector.load %arg19[%c4_798, %c64_799] : memref<16x512xf32, #tpu.memory_space<vmem>>, vector<4x32xf32>
    tpu.vector_store %arg19[%c4_798, %c64_799], %493 {strides = array<i32>} : memref<16x512xf32, #tpu.memory_space<vmem>>, vector<4x32xf32>,
    %c16_800 = arith.constant 16 : index
    %c0_801 = arith.constant 0 : index
    %495 = vector.load %arg18[%c16_800, %c0_801] : memref<49x32xf32, #tpu.memory_space<vmem>>, vector<4x32xf32>
    %c8_802 = arith.constant 8 : index
    %c64_803 = arith.constant 64 : index
    %496 = vector.load %arg19[%c8_802, %c64_803] : memref<16x512xf32, #tpu.memory_space<vmem>>, vector<4x32xf32>
    tpu.vector_store %arg19[%c8_802, %c64_803], %495 {strides = array<i32>} : memref<16x512xf32, #tpu.memory_space<vmem>>, vector<4x32xf32>,
    %c23_804 = arith.constant 23 : index
    %c0_805 = arith.constant 0 : index
    %497 = vector.load %arg18[%c23_804, %c0_805] : memref<49x32xf32, #tpu.memory_space<vmem>>, vector<4x32xf32>
    %c12_806 = arith.constant 12 : index
    %c64_807 = arith.constant 64 : index
    %498 = vector.load %arg19[%c12_806, %c64_807] : memref<16x512xf32, #tpu.memory_space<vmem>>, vector<4x32xf32>
    tpu.vector_store %arg19[%c12_806, %c64_807], %497 {strides = array<i32>} : memref<16x512xf32, #tpu.memory_space<vmem>>, vector<4x32xf32>,
    %c3_808 = arith.constant 3 : index
    %c0_809 = arith.constant 0 : index
    %499 = vector.load %arg18[%c3_808, %c0_809] : memref<49x32xf32, #tpu.memory_space<vmem>>, vector<4x32xf32>
    %c0_810 = arith.constant 0 : index
    %c96_811 = arith.constant 96 : index
    %500 = vector.load %arg19[%c0_810, %c96_811] : memref<16x512xf32, #tpu.memory_space<vmem>>, vector<4x32xf32>
    tpu.vector_store %arg19[%c0_810, %c96_811], %499 {strides = array<i32>} : memref<16x512xf32, #tpu.memory_space<vmem>>, vector<4x32xf32>,
    %c10_812 = arith.constant 10 : index
    %c0_813 = arith.constant 0 : index
    %501 = vector.load %arg18[%c10_812, %c0_813] : memref<49x32xf32, #tpu.memory_space<vmem>>, vector<4x32xf32>
    %c4_814 = arith.constant 4 : index
    %c96_815 = arith.constant 96 : index
    %502 = vector.load %arg19[%c4_814, %c96_815] : memref<16x512xf32, #tpu.memory_space<vmem>>, vector<4x32xf32>
    tpu.vector_store %arg19[%c4_814, %c96_815], %501 {strides = array<i32>} : memref<16x512xf32, #tpu.memory_space<vmem>>, vector<4x32xf32>,
    %c17 = arith.constant 17 : index
    %c0_816 = arith.constant 0 : index
    %503 = vector.load %arg18[%c17, %c0_816] : memref<49x32xf32, #tpu.memory_space<vmem>>, vector<4x32xf32>
    %c8_817 = arith.constant 8 : index
    %c96_818 = arith.constant 96 : index
    %504 = vector.load %arg19[%c8_817, %c96_818] : memref<16x512xf32, #tpu.memory_space<vmem>>, vector<4x32xf32>
    tpu.vector_store %arg19[%c8_817, %c96_818], %503 {strides = array<i32>} : memref<16x512xf32, #tpu.memory_space<vmem>>, vector<4x32xf32>,
    %c24_819 = arith.constant 24 : index
    %c0_820 = arith.constant 0 : index
    %505 = vector.load %arg18[%c24_819, %c0_820] : memref<49x32xf32, #tpu.memory_space<vmem>>, vector<4x32xf32>
    %c12_821 = arith.constant 12 : index
    %c96_822 = arith.constant 96 : index
    %506 = vector.load %arg19[%c12_821, %c96_822] : memref<16x512xf32, #tpu.memory_space<vmem>>, vector<4x32xf32>
    tpu.vector_store %arg19[%c12_821, %c96_822], %505 {strides = array<i32>} : memref<16x512xf32, #tpu.memory_space<vmem>>, vector<4x32xf32>,
    %c7_823 = arith.constant 7 : index
    %c0_824 = arith.constant 0 : index
    %507 = vector.load %arg18[%c7_823, %c0_824] : memref<49x32xf32, #tpu.memory_space<vmem>>, vector<4x32xf32>
    %c0_825 = arith.constant 0 : index
    %c128_826 = arith.constant 128 : index
    %508 = vector.load %arg19[%c0_825, %c128_826] : memref<16x512xf32, #tpu.memory_space<vmem>>, vector<4x32xf32>
    tpu.vector_store %arg19[%c0_825, %c128_826], %507 {strides = array<i32>} : memref<16x512xf32, #tpu.memory_space<vmem>>, vector<4x32xf32>,
    %c14_827 = arith.constant 14 : index
    %c0_828 = arith.constant 0 : index
    %509 = vector.load %arg18[%c14_827, %c0_828] : memref<49x32xf32, #tpu.memory_space<vmem>>, vector<4x32xf32>
    %c4_829 = arith.constant 4 : index
    %c128_830 = arith.constant 128 : index
    %510 = vector.load %arg19[%c4_829, %c128_830] : memref<16x512xf32, #tpu.memory_space<vmem>>, vector<4x32xf32>
    tpu.vector_store %arg19[%c4_829, %c128_830], %509 {strides = array<i32>} : memref<16x512xf32, #tpu.memory_space<vmem>>, vector<4x32xf32>,
    %c21_831 = arith.constant 21 : index
    %c0_832 = arith.constant 0 : index
    %511 = vector.load %arg18[%c21_831, %c0_832] : memref<49x32xf32, #tpu.memory_space<vmem>>, vector<4x32xf32>
    %c8_833 = arith.constant 8 : index
    %c128_834 = arith.constant 128 : index
    %512 = vector.load %arg19[%c8_833, %c128_834] : memref<16x512xf32, #tpu.memory_space<vmem>>, vector<4x32xf32>
    tpu.vector_store %arg19[%c8_833, %c128_834], %511 {strides = array<i32>} : memref<16x512xf32, #tpu.memory_space<vmem>>, vector<4x32xf32>,
    %c28_835 = arith.constant 28 : index
    %c0_836 = arith.constant 0 : index
    %513 = vector.load %arg18[%c28_835, %c0_836] : memref<49x32xf32, #tpu.memory_space<vmem>>, vector<4x32xf32>
    %c12_837 = arith.constant 12 : index
    %c128_838 = arith.constant 128 : index
    %514 = vector.load %arg19[%c12_837, %c128_838] : memref<16x512xf32, #tpu.memory_space<vmem>>, vector<4x32xf32>
    tpu.vector_store %arg19[%c12_837, %c128_838], %513 {strides = array<i32>} : memref<16x512xf32, #tpu.memory_space<vmem>>, vector<4x32xf32>,
    %c8_839 = arith.constant 8 : index
    %c0_840 = arith.constant 0 : index
    %515 = vector.load %arg18[%c8_839, %c0_840] : memref<49x32xf32, #tpu.memory_space<vmem>>, vector<4x32xf32>
    %c0_841 = arith.constant 0 : index
    %c160_842 = arith.constant 160 : index
    %516 = vector.load %arg19[%c0_841, %c160_842] : memref<16x512xf32, #tpu.memory_space<vmem>>, vector<4x32xf32>
    tpu.vector_store %arg19[%c0_841, %c160_842], %515 {strides = array<i32>} : memref<16x512xf32, #tpu.memory_space<vmem>>, vector<4x32xf32>,
    %c15_843 = arith.constant 15 : index
    %c0_844 = arith.constant 0 : index
    %517 = vector.load %arg18[%c15_843, %c0_844] : memref<49x32xf32, #tpu.memory_space<vmem>>, vector<4x32xf32>
    %c4_845 = arith.constant 4 : index
    %c160_846 = arith.constant 160 : index
    %518 = vector.load %arg19[%c4_845, %c160_846] : memref<16x512xf32, #tpu.memory_space<vmem>>, vector<4x32xf32>
    tpu.vector_store %arg19[%c4_845, %c160_846], %517 {strides = array<i32>} : memref<16x512xf32, #tpu.memory_space<vmem>>, vector<4x32xf32>,
    %c22_847 = arith.constant 22 : index
    %c0_848 = arith.constant 0 : index
    %519 = vector.load %arg18[%c22_847, %c0_848] : memref<49x32xf32, #tpu.memory_space<vmem>>, vector<4x32xf32>
    %c8_849 = arith.constant 8 : index
    %c160_850 = arith.constant 160 : index
    %520 = vector.load %arg19[%c8_849, %c160_850] : memref<16x512xf32, #tpu.memory_space<vmem>>, vector<4x32xf32>
    tpu.vector_store %arg19[%c8_849, %c160_850], %519 {strides = array<i32>} : memref<16x512xf32, #tpu.memory_space<vmem>>, vector<4x32xf32>,
    %c29_851 = arith.constant 29 : index
    %c0_852 = arith.constant 0 : index
    %521 = vector.load %arg18[%c29_851, %c0_852] : memref<49x32xf32, #tpu.memory_space<vmem>>, vector<4x32xf32>
    %c12_853 = arith.constant 12 : index
    %c160_854 = arith.constant 160 : index
    %522 = vector.load %arg19[%c12_853, %c160_854] : memref<16x512xf32, #tpu.memory_space<vmem>>, vector<4x32xf32>
    tpu.vector_store %arg19[%c12_853, %c160_854], %521 {strides = array<i32>} : memref<16x512xf32, #tpu.memory_space<vmem>>, vector<4x32xf32>,
    %c9_855 = arith.constant 9 : index
    %c0_856 = arith.constant 0 : index
    %523 = vector.load %arg18[%c9_855, %c0_856] : memref<49x32xf32, #tpu.memory_space<vmem>>, vector<4x32xf32>
    %c0_857 = arith.constant 0 : index
    %c192_858 = arith.constant 192 : index
    %524 = vector.load %arg19[%c0_857, %c192_858] : memref<16x512xf32, #tpu.memory_space<vmem>>, vector<4x32xf32>
    tpu.vector_store %arg19[%c0_857, %c192_858], %523 {strides = array<i32>} : memref<16x512xf32, #tpu.memory_space<vmem>>, vector<4x32xf32>,
    %c16_859 = arith.constant 16 : index
    %c0_860 = arith.constant 0 : index
    %525 = vector.load %arg18[%c16_859, %c0_860] : memref<49x32xf32, #tpu.memory_space<vmem>>, vector<4x32xf32>
    %c4_861 = arith.constant 4 : index
    %c192_862 = arith.constant 192 : index
    %526 = vector.load %arg19[%c4_861, %c192_862] : memref<16x512xf32, #tpu.memory_space<vmem>>, vector<4x32xf32>
    tpu.vector_store %arg19[%c4_861, %c192_862], %525 {strides = array<i32>} : memref<16x512xf32, #tpu.memory_space<vmem>>, vector<4x32xf32>,
    %c23_863 = arith.constant 23 : index
    %c0_864 = arith.constant 0 : index
    %527 = vector.load %arg18[%c23_863, %c0_864] : memref<49x32xf32, #tpu.memory_space<vmem>>, vector<4x32xf32>
    %c8_865 = arith.constant 8 : index
    %c192_866 = arith.constant 192 : index
    %528 = vector.load %arg19[%c8_865, %c192_866] : memref<16x512xf32, #tpu.memory_space<vmem>>, vector<4x32xf32>
    tpu.vector_store %arg19[%c8_865, %c192_866], %527 {strides = array<i32>} : memref<16x512xf32, #tpu.memory_space<vmem>>, vector<4x32xf32>,
    %c30_867 = arith.constant 30 : index
    %c0_868 = arith.constant 0 : index
    %529 = vector.load %arg18[%c30_867, %c0_868] : memref<49x32xf32, #tpu.memory_space<vmem>>, vector<4x32xf32>
    %c12_869 = arith.constant 12 : index
    %c192_870 = arith.constant 192 : index
    %530 = vector.load %arg19[%c12_869, %c192_870] : memref<16x512xf32, #tpu.memory_space<vmem>>, vector<4x32xf32>
    tpu.vector_store %arg19[%c12_869, %c192_870], %529 {strides = array<i32>} : memref<16x512xf32, #tpu.memory_space<vmem>>, vector<4x32xf32>,
    %c10_871 = arith.constant 10 : index
    %c0_872 = arith.constant 0 : index
    %531 = vector.load %arg18[%c10_871, %c0_872] : memref<49x32xf32, #tpu.memory_space<vmem>>, vector<4x32xf32>
    %c0_873 = arith.constant 0 : index
    %c224_874 = arith.constant 224 : index
    %532 = vector.load %arg19[%c0_873, %c224_874] : memref<16x512xf32, #tpu.memory_space<vmem>>, vector<4x32xf32>
    tpu.vector_store %arg19[%c0_873, %c224_874], %531 {strides = array<i32>} : memref<16x512xf32, #tpu.memory_space<vmem>>, vector<4x32xf32>,
    %c17_875 = arith.constant 17 : index
    %c0_876 = arith.constant 0 : index
    %533 = vector.load %arg18[%c17_875, %c0_876] : memref<49x32xf32, #tpu.memory_space<vmem>>, vector<4x32xf32>
    %c4_877 = arith.constant 4 : index
    %c224_878 = arith.constant 224 : index
    %534 = vector.load %arg19[%c4_877, %c224_878] : memref<16x512xf32, #tpu.memory_space<vmem>>, vector<4x32xf32>
    tpu.vector_store %arg19[%c4_877, %c224_878], %533 {strides = array<i32>} : memref<16x512xf32, #tpu.memory_space<vmem>>, vector<4x32xf32>,
    %c24_879 = arith.constant 24 : index
    %c0_880 = arith.constant 0 : index
    %535 = vector.load %arg18[%c24_879, %c0_880] : memref<49x32xf32, #tpu.memory_space<vmem>>, vector<4x32xf32>
    %c8_881 = arith.constant 8 : index
    %c224_882 = arith.constant 224 : index
    %536 = vector.load %arg19[%c8_881, %c224_882] : memref<16x512xf32, #tpu.memory_space<vmem>>, vector<4x32xf32>
    tpu.vector_store %arg19[%c8_881, %c224_882], %535 {strides = array<i32>} : memref<16x512xf32, #tpu.memory_space<vmem>>, vector<4x32xf32>,
    %c31_883 = arith.constant 31 : index
    %c0_884 = arith.constant 0 : index
    %537 = vector.load %arg18[%c31_883, %c0_884] : memref<49x32xf32, #tpu.memory_space<vmem>>, vector<4x32xf32>
    %c12_885 = arith.constant 12 : index
    %c224_886 = arith.constant 224 : index
    %538 = vector.load %arg19[%c12_885, %c224_886] : memref<16x512xf32, #tpu.memory_space<vmem>>, vector<4x32xf32>
    tpu.vector_store %arg19[%c12_885, %c224_886], %537 {strides = array<i32>} : memref<16x512xf32, #tpu.memory_space<vmem>>, vector<4x32xf32>,
    %c14_887 = arith.constant 14 : index
    %c0_888 = arith.constant 0 : index
    %539 = vector.load %arg18[%c14_887, %c0_888] : memref<49x32xf32, #tpu.memory_space<vmem>>, vector<4x32xf32>
    %c0_889 = arith.constant 0 : index
    %c256_890 = arith.constant 256 : index
    %540 = vector.load %arg19[%c0_889, %c256_890] : memref<16x512xf32, #tpu.memory_space<vmem>>, vector<4x32xf32>
    tpu.vector_store %arg19[%c0_889, %c256_890], %539 {strides = array<i32>} : memref<16x512xf32, #tpu.memory_space<vmem>>, vector<4x32xf32>,
    %c21_891 = arith.constant 21 : index
    %c0_892 = arith.constant 0 : index
    %541 = vector.load %arg18[%c21_891, %c0_892] : memref<49x32xf32, #tpu.memory_space<vmem>>, vector<4x32xf32>
    %c4_893 = arith.constant 4 : index
    %c256_894 = arith.constant 256 : index
    %542 = vector.load %arg19[%c4_893, %c256_894] : memref<16x512xf32, #tpu.memory_space<vmem>>, vector<4x32xf32>
    tpu.vector_store %arg19[%c4_893, %c256_894], %541 {strides = array<i32>} : memref<16x512xf32, #tpu.memory_space<vmem>>, vector<4x32xf32>,
    %c28_895 = arith.constant 28 : index
    %c0_896 = arith.constant 0 : index
    %543 = vector.load %arg18[%c28_895, %c0_896] : memref<49x32xf32, #tpu.memory_space<vmem>>, vector<4x32xf32>
    %c8_897 = arith.constant 8 : index
    %c256_898 = arith.constant 256 : index
    %544 = vector.load %arg19[%c8_897, %c256_898] : memref<16x512xf32, #tpu.memory_space<vmem>>, vector<4x32xf32>
    tpu.vector_store %arg19[%c8_897, %c256_898], %543 {strides = array<i32>} : memref<16x512xf32, #tpu.memory_space<vmem>>, vector<4x32xf32>,
    %c35 = arith.constant 35 : index
    %c0_899 = arith.constant 0 : index
    %545 = vector.load %arg18[%c35, %c0_899] : memref<49x32xf32, #tpu.memory_space<vmem>>, vector<4x32xf32>
    %c12_900 = arith.constant 12 : index
    %c256_901 = arith.constant 256 : index
    %546 = vector.load %arg19[%c12_900, %c256_901] : memref<16x512xf32, #tpu.memory_space<vmem>>, vector<4x32xf32>
    tpu.vector_store %arg19[%c12_900, %c256_901], %545 {strides = array<i32>} : memref<16x512xf32, #tpu.memory_space<vmem>>, vector<4x32xf32>,
    %c15_902 = arith.constant 15 : index
    %c0_903 = arith.constant 0 : index
    %547 = vector.load %arg18[%c15_902, %c0_903] : memref<49x32xf32, #tpu.memory_space<vmem>>, vector<4x32xf32>
    %c0_904 = arith.constant 0 : index
    %c288_905 = arith.constant 288 : index
    %548 = vector.load %arg19[%c0_904, %c288_905] : memref<16x512xf32, #tpu.memory_space<vmem>>, vector<4x32xf32>
    tpu.vector_store %arg19[%c0_904, %c288_905], %547 {strides = array<i32>} : memref<16x512xf32, #tpu.memory_space<vmem>>, vector<4x32xf32>,
    %c22_906 = arith.constant 22 : index
    %c0_907 = arith.constant 0 : index
    %549 = vector.load %arg18[%c22_906, %c0_907] : memref<49x32xf32, #tpu.memory_space<vmem>>, vector<4x32xf32>
    %c4_908 = arith.constant 4 : index
    %c288_909 = arith.constant 288 : index
    %550 = vector.load %arg19[%c4_908, %c288_909] : memref<16x512xf32, #tpu.memory_space<vmem>>, vector<4x32xf32>
    tpu.vector_store %arg19[%c4_908, %c288_909], %549 {strides = array<i32>} : memref<16x512xf32, #tpu.memory_space<vmem>>, vector<4x32xf32>,
    %c29_910 = arith.constant 29 : index
    %c0_911 = arith.constant 0 : index
    %551 = vector.load %arg18[%c29_910, %c0_911] : memref<49x32xf32, #tpu.memory_space<vmem>>, vector<4x32xf32>
    %c8_912 = arith.constant 8 : index
    %c288_913 = arith.constant 288 : index
    %552 = vector.load %arg19[%c8_912, %c288_913] : memref<16x512xf32, #tpu.memory_space<vmem>>, vector<4x32xf32>
    tpu.vector_store %arg19[%c8_912, %c288_913], %551 {strides = array<i32>} : memref<16x512xf32, #tpu.memory_space<vmem>>, vector<4x32xf32>,
    %c36_914 = arith.constant 36 : index
    %c0_915 = arith.constant 0 : index
    %553 = vector.load %arg18[%c36_914, %c0_915] : memref<49x32xf32, #tpu.memory_space<vmem>>, vector<4x32xf32>
    %c12_916 = arith.constant 12 : index
    %c288_917 = arith.constant 288 : index
    %554 = vector.load %arg19[%c12_916, %c288_917] : memref<16x512xf32, #tpu.memory_space<vmem>>, vector<4x32xf32>
    tpu.vector_store %arg19[%c12_916, %c288_917], %553 {strides = array<i32>} : memref<16x512xf32, #tpu.memory_space<vmem>>, vector<4x32xf32>,
    %c16_918 = arith.constant 16 : index
    %c0_919 = arith.constant 0 : index
    %555 = vector.load %arg18[%c16_918, %c0_919] : memref<49x32xf32, #tpu.memory_space<vmem>>, vector<4x32xf32>
    %c0_920 = arith.constant 0 : index
    %c320_921 = arith.constant 320 : index
    %556 = vector.load %arg19[%c0_920, %c320_921] : memref<16x512xf32, #tpu.memory_space<vmem>>, vector<4x32xf32>
    tpu.vector_store %arg19[%c0_920, %c320_921], %555 {strides = array<i32>} : memref<16x512xf32, #tpu.memory_space<vmem>>, vector<4x32xf32>,
    %c23_922 = arith.constant 23 : index
    %c0_923 = arith.constant 0 : index
    %557 = vector.load %arg18[%c23_922, %c0_923] : memref<49x32xf32, #tpu.memory_space<vmem>>, vector<4x32xf32>
    %c4_924 = arith.constant 4 : index
    %c320_925 = arith.constant 320 : index
    %558 = vector.load %arg19[%c4_924, %c320_925] : memref<16x512xf32, #tpu.memory_space<vmem>>, vector<4x32xf32>
    tpu.vector_store %arg19[%c4_924, %c320_925], %557 {strides = array<i32>} : memref<16x512xf32, #tpu.memory_space<vmem>>, vector<4x32xf32>,
    %c30_926 = arith.constant 30 : index
    %c0_927 = arith.constant 0 : index
    %559 = vector.load %arg18[%c30_926, %c0_927] : memref<49x32xf32, #tpu.memory_space<vmem>>, vector<4x32xf32>
    %c8_928 = arith.constant 8 : index
    %c320_929 = arith.constant 320 : index
    %560 = vector.load %arg19[%c8_928, %c320_929] : memref<16x512xf32, #tpu.memory_space<vmem>>, vector<4x32xf32>
    tpu.vector_store %arg19[%c8_928, %c320_929], %559 {strides = array<i32>} : memref<16x512xf32, #tpu.memory_space<vmem>>, vector<4x32xf32>,
    %c37_930 = arith.constant 37 : index
    %c0_931 = arith.constant 0 : index
    %561 = vector.load %arg18[%c37_930, %c0_931] : memref<49x32xf32, #tpu.memory_space<vmem>>, vector<4x32xf32>
    %c12_932 = arith.constant 12 : index
    %c320_933 = arith.constant 320 : index
    %562 = vector.load %arg19[%c12_932, %c320_933] : memref<16x512xf32, #tpu.memory_space<vmem>>, vector<4x32xf32>
    tpu.vector_store %arg19[%c12_932, %c320_933], %561 {strides = array<i32>} : memref<16x512xf32, #tpu.memory_space<vmem>>, vector<4x32xf32>,
    %c17_934 = arith.constant 17 : index
    %c0_935 = arith.constant 0 : index
    %563 = vector.load %arg18[%c17_934, %c0_935] : memref<49x32xf32, #tpu.memory_space<vmem>>, vector<4x32xf32>
    %c0_936 = arith.constant 0 : index
    %c352_937 = arith.constant 352 : index
    %564 = vector.load %arg19[%c0_936, %c352_937] : memref<16x512xf32, #tpu.memory_space<vmem>>, vector<4x32xf32>
    tpu.vector_store %arg19[%c0_936, %c352_937], %563 {strides = array<i32>} : memref<16x512xf32, #tpu.memory_space<vmem>>, vector<4x32xf32>,
    %c24_938 = arith.constant 24 : index
    %c0_939 = arith.constant 0 : index
    %565 = vector.load %arg18[%c24_938, %c0_939] : memref<49x32xf32, #tpu.memory_space<vmem>>, vector<4x32xf32>
    %c4_940 = arith.constant 4 : index
    %c352_941 = arith.constant 352 : index
    %566 = vector.load %arg19[%c4_940, %c352_941] : memref<16x512xf32, #tpu.memory_space<vmem>>, vector<4x32xf32>
    tpu.vector_store %arg19[%c4_940, %c352_941], %565 {strides = array<i32>} : memref<16x512xf32, #tpu.memory_space<vmem>>, vector<4x32xf32>,
    %c31_942 = arith.constant 31 : index
    %c0_943 = arith.constant 0 : index
    %567 = vector.load %arg18[%c31_942, %c0_943] : memref<49x32xf32, #tpu.memory_space<vmem>>, vector<4x32xf32>
    %c8_944 = arith.constant 8 : index
    %c352_945 = arith.constant 352 : index
    %568 = vector.load %arg19[%c8_944, %c352_945] : memref<16x512xf32, #tpu.memory_space<vmem>>, vector<4x32xf32>
    tpu.vector_store %arg19[%c8_944, %c352_945], %567 {strides = array<i32>} : memref<16x512xf32, #tpu.memory_space<vmem>>, vector<4x32xf32>,
    %c38_946 = arith.constant 38 : index
    %c0_947 = arith.constant 0 : index
    %569 = vector.load %arg18[%c38_946, %c0_947] : memref<49x32xf32, #tpu.memory_space<vmem>>, vector<4x32xf32>
    %c12_948 = arith.constant 12 : index
    %c352_949 = arith.constant 352 : index
    %570 = vector.load %arg19[%c12_948, %c352_949] : memref<16x512xf32, #tpu.memory_space<vmem>>, vector<4x32xf32>
    tpu.vector_store %arg19[%c12_948, %c352_949], %569 {strides = array<i32>} : memref<16x512xf32, #tpu.memory_space<vmem>>, vector<4x32xf32>,
    %c21_950 = arith.constant 21 : index
    %c0_951 = arith.constant 0 : index
    %571 = vector.load %arg18[%c21_950, %c0_951] : memref<49x32xf32, #tpu.memory_space<vmem>>, vector<4x32xf32>
    %c0_952 = arith.constant 0 : index
    %c384_953 = arith.constant 384 : index
    %572 = vector.load %arg19[%c0_952, %c384_953] : memref<16x512xf32, #tpu.memory_space<vmem>>, vector<4x32xf32>
    tpu.vector_store %arg19[%c0_952, %c384_953], %571 {strides = array<i32>} : memref<16x512xf32, #tpu.memory_space<vmem>>, vector<4x32xf32>,
    %c28_954 = arith.constant 28 : index
    %c0_955 = arith.constant 0 : index
    %573 = vector.load %arg18[%c28_954, %c0_955] : memref<49x32xf32, #tpu.memory_space<vmem>>, vector<4x32xf32>
    %c4_956 = arith.constant 4 : index
    %c384_957 = arith.constant 384 : index
    %574 = vector.load %arg19[%c4_956, %c384_957] : memref<16x512xf32, #tpu.memory_space<vmem>>, vector<4x32xf32>
    tpu.vector_store %arg19[%c4_956, %c384_957], %573 {strides = array<i32>} : memref<16x512xf32, #tpu.memory_space<vmem>>, vector<4x32xf32>,
    %c35_958 = arith.constant 35 : index
    %c0_959 = arith.constant 0 : index
    %575 = vector.load %arg18[%c35_958, %c0_959] : memref<49x32xf32, #tpu.memory_space<vmem>>, vector<4x32xf32>
    %c8_960 = arith.constant 8 : index
    %c384_961 = arith.constant 384 : index
    %576 = vector.load %arg19[%c8_960, %c384_961] : memref<16x512xf32, #tpu.memory_space<vmem>>, vector<4x32xf32>
    tpu.vector_store %arg19[%c8_960, %c384_961], %575 {strides = array<i32>} : memref<16x512xf32, #tpu.memory_space<vmem>>, vector<4x32xf32>,
    %c42_962 = arith.constant 42 : index
    %c0_963 = arith.constant 0 : index
    %577 = vector.load %arg18[%c42_962, %c0_963] : memref<49x32xf32, #tpu.memory_space<vmem>>, vector<4x32xf32>
    %c12_964 = arith.constant 12 : index
    %c384_965 = arith.constant 384 : index
    %578 = vector.load %arg19[%c12_964, %c384_965] : memref<16x512xf32, #tpu.memory_space<vmem>>, vector<4x32xf32>
    tpu.vector_store %arg19[%c12_964, %c384_965], %577 {strides = array<i32>} : memref<16x512xf32, #tpu.memory_space<vmem>>, vector<4x32xf32>,
    %c22_966 = arith.constant 22 : index
    %c0_967 = arith.constant 0 : index
    %579 = vector.load %arg18[%c22_966, %c0_967] : memref<49x32xf32, #tpu.memory_space<vmem>>, vector<4x32xf32>
    %c0_968 = arith.constant 0 : index
    %c416_969 = arith.constant 416 : index
    %580 = vector.load %arg19[%c0_968, %c416_969] : memref<16x512xf32, #tpu.memory_space<vmem>>, vector<4x32xf32>
    tpu.vector_store %arg19[%c0_968, %c416_969], %579 {strides = array<i32>} : memref<16x512xf32, #tpu.memory_space<vmem>>, vector<4x32xf32>,
    %c29_970 = arith.constant 29 : index
    %c0_971 = arith.constant 0 : index
    %581 = vector.load %arg18[%c29_970, %c0_971] : memref<49x32xf32, #tpu.memory_space<vmem>>, vector<4x32xf32>
    %c4_972 = arith.constant 4 : index
    %c416_973 = arith.constant 416 : index
    %582 = vector.load %arg19[%c4_972, %c416_973] : memref<16x512xf32, #tpu.memory_space<vmem>>, vector<4x32xf32>
    tpu.vector_store %arg19[%c4_972, %c416_973], %581 {strides = array<i32>} : memref<16x512xf32, #tpu.memory_space<vmem>>, vector<4x32xf32>,
    %c36_974 = arith.constant 36 : index
    %c0_975 = arith.constant 0 : index
    %583 = vector.load %arg18[%c36_974, %c0_975] : memref<49x32xf32, #tpu.memory_space<vmem>>, vector<4x32xf32>
    %c8_976 = arith.constant 8 : index
    %c416_977 = arith.constant 416 : index
    %584 = vector.load %arg19[%c8_976, %c416_977] : memref<16x512xf32, #tpu.memory_space<vmem>>, vector<4x32xf32>
    tpu.vector_store %arg19[%c8_976, %c416_977], %583 {strides = array<i32>} : memref<16x512xf32, #tpu.memory_space<vmem>>, vector<4x32xf32>,
    %c43_978 = arith.constant 43 : index
    %c0_979 = arith.constant 0 : index
    %585 = vector.load %arg18[%c43_978, %c0_979] : memref<49x32xf32, #tpu.memory_space<vmem>>, vector<4x32xf32>
    %c12_980 = arith.constant 12 : index
    %c416_981 = arith.constant 416 : index
    %586 = vector.load %arg19[%c12_980, %c416_981] : memref<16x512xf32, #tpu.memory_space<vmem>>, vector<4x32xf32>
    tpu.vector_store %arg19[%c12_980, %c416_981], %585 {strides = array<i32>} : memref<16x512xf32, #tpu.memory_space<vmem>>, vector<4x32xf32>,
    %c23_982 = arith.constant 23 : index
    %c0_983 = arith.constant 0 : index
    %587 = vector.load %arg18[%c23_982, %c0_983] : memref<49x32xf32, #tpu.memory_space<vmem>>, vector<4x32xf32>
    %c0_984 = arith.constant 0 : index
    %c448_985 = arith.constant 448 : index
    %588 = vector.load %arg19[%c0_984, %c448_985] : memref<16x512xf32, #tpu.memory_space<vmem>>, vector<4x32xf32>
    tpu.vector_store %arg19[%c0_984, %c448_985], %587 {strides = array<i32>} : memref<16x512xf32, #tpu.memory_space<vmem>>, vector<4x32xf32>,
    %c30_986 = arith.constant 30 : index
    %c0_987 = arith.constant 0 : index
    %589 = vector.load %arg18[%c30_986, %c0_987] : memref<49x32xf32, #tpu.memory_space<vmem>>, vector<4x32xf32>
    %c4_988 = arith.constant 4 : index
    %c448_989 = arith.constant 448 : index
    %590 = vector.load %arg19[%c4_988, %c448_989] : memref<16x512xf32, #tpu.memory_space<vmem>>, vector<4x32xf32>
    tpu.vector_store %arg19[%c4_988, %c448_989], %589 {strides = array<i32>} : memref<16x512xf32, #tpu.memory_space<vmem>>, vector<4x32xf32>,
    %c37_990 = arith.constant 37 : index
    %c0_991 = arith.constant 0 : index
    %591 = vector.load %arg18[%c37_990, %c0_991] : memref<49x32xf32, #tpu.memory_space<vmem>>, vector<4x32xf32>
    %c8_992 = arith.constant 8 : index
    %c448_993 = arith.constant 448 : index
    %592 = vector.load %arg19[%c8_992, %c448_993] : memref<16x512xf32, #tpu.memory_space<vmem>>, vector<4x32xf32>
    tpu.vector_store %arg19[%c8_992, %c448_993], %591 {strides = array<i32>} : memref<16x512xf32, #tpu.memory_space<vmem>>, vector<4x32xf32>,
    %c44_994 = arith.constant 44 : index
    %c0_995 = arith.constant 0 : index
    %593 = vector.load %arg18[%c44_994, %c0_995] : memref<49x32xf32, #tpu.memory_space<vmem>>, vector<4x32xf32>
    %c12_996 = arith.constant 12 : index
    %c448_997 = arith.constant 448 : index
    %594 = vector.load %arg19[%c12_996, %c448_997] : memref<16x512xf32, #tpu.memory_space<vmem>>, vector<4x32xf32>
    tpu.vector_store %arg19[%c12_996, %c448_997], %593 {strides = array<i32>} : memref<16x512xf32, #tpu.memory_space<vmem>>, vector<4x32xf32>,
    %c24_998 = arith.constant 24 : index
    %c0_999 = arith.constant 0 : index
    %595 = vector.load %arg18[%c24_998, %c0_999] : memref<49x32xf32, #tpu.memory_space<vmem>>, vector<4x32xf32>
    %c0_1000 = arith.constant 0 : index
    %c480_1001 = arith.constant 480 : index
    %596 = vector.load %arg19[%c0_1000, %c480_1001] : memref<16x512xf32, #tpu.memory_space<vmem>>, vector<4x32xf32>
    tpu.vector_store %arg19[%c0_1000, %c480_1001], %595 {strides = array<i32>} : memref<16x512xf32, #tpu.memory_space<vmem>>, vector<4x32xf32>,
    %c31_1002 = arith.constant 31 : index
    %c0_1003 = arith.constant 0 : index
    %597 = vector.load %arg18[%c31_1002, %c0_1003] : memref<49x32xf32, #tpu.memory_space<vmem>>, vector<4x32xf32>
    %c4_1004 = arith.constant 4 : index
    %c480_1005 = arith.constant 480 : index
    %598 = vector.load %arg19[%c4_1004, %c480_1005] : memref<16x512xf32, #tpu.memory_space<vmem>>, vector<4x32xf32>
    tpu.vector_store %arg19[%c4_1004, %c480_1005], %597 {strides = array<i32>} : memref<16x512xf32, #tpu.memory_space<vmem>>, vector<4x32xf32>,
    %c38_1006 = arith.constant 38 : index
    %c0_1007 = arith.constant 0 : index
    %599 = vector.load %arg18[%c38_1006, %c0_1007] : memref<49x32xf32, #tpu.memory_space<vmem>>, vector<4x32xf32>
    %c8_1008 = arith.constant 8 : index
    %c480_1009 = arith.constant 480 : index
    %600 = vector.load %arg19[%c8_1008, %c480_1009] : memref<16x512xf32, #tpu.memory_space<vmem>>, vector<4x32xf32>
    tpu.vector_store %arg19[%c8_1008, %c480_1009], %599 {strides = array<i32>} : memref<16x512xf32, #tpu.memory_space<vmem>>, vector<4x32xf32>,
    %c45 = arith.constant 45 : index
    %c0_1010 = arith.constant 0 : index
    %601 = vector.load %arg18[%c45, %c0_1010] : memref<49x32xf32, #tpu.memory_space<vmem>>, vector<4x32xf32>
    %c12_1011 = arith.constant 12 : index
    %c480_1012 = arith.constant 480 : index
    %602 = vector.load %arg19[%c12_1011, %c480_1012] : memref<16x512xf32, #tpu.memory_space<vmem>>, vector<4x32xf32>
    tpu.vector_store %arg19[%c12_1011, %c480_1012], %601 {strides = array<i32>} : memref<16x512xf32, #tpu.memory_space<vmem>>, vector<4x32xf32>,
    %c0_1013 = arith.constant 0 : index
    %c0_1014 = arith.constant 0 : index
    %603 = vector.load %arg19[%c0_1013, %c0_1014] : memref<16x512xf32, #tpu.memory_space<vmem>>, vector<16x512xf32>
    %c0_1015 = arith.constant 0 : index
    %c0_1016 = arith.constant 0 : index
    %604 = vector.load %arg6[%c0_1015, %c0_1016] : memref<512x32xf32, #tpu.memory_space<vmem>>, vector<512x32xf32>
    %cst_1017 = arith.constant dense<0.000000e+00> : vector<16x32xf32>
    %605 = tpu.matmul %603, %604, %cst_1017 {dimension_numbers = #tpu.dot_dimension_numbers<[1], [0], [0], [1], [0, 0, 1, 1], [], []>} : vector<16x512xf32>, vector<512x32xf32>, vector<16x32xf32> -> vector<16x32xf32>
    %c0_1018 = arith.constant 0 : index
    %c0_1019 = arith.constant 0 : index
    %606 = vector.load %arg7[%c0_1018, %c0_1019] : memref<1x32xf32, #tpu.memory_space<vmem>>, vector<1x32xf32>
    %607 = vector.broadcast %606 : vector<1x32xf32> to vector<16x32xf32>
    %608 = arith.addf %605, %607 : vector<16x32xf32>
    %cst_1020 = arith.constant 0.000000e+00 : f32
    %609 = vector.broadcast %cst_1020 : f32 to vector<16x32xf32>
    %610 = arith.maximumf %608, %609 : vector<16x32xf32>
    %c0_1021 = arith.constant 0 : index
    %c0_1022 = arith.constant 0 : index
    %611 = vector.load %arg9[%c0_1021, %c0_1022] : memref<1x16xf32, #tpu.memory_space<vmem>>, vector<1x16xf32>
    %612 = vector.extract_strided_slice %610 {offsets = [0, 0], sizes = [1, 32], strides = [1, 1]} : vector<16x32xf32> to vector<1x32xf32>
    %c0_1023 = arith.constant 0 : index
    %c0_1024 = arith.constant 0 : index
    %613 = vector.load %arg8[%c0_1023, %c0_1024] : memref<512x16xf32, #tpu.memory_space<vmem>>, vector<32x16xf32>
    %cst_1025 = arith.constant dense<0.000000e+00> : vector<1x16xf32>
    %614 = tpu.matmul %612, %613, %cst_1025 {dimension_numbers = #tpu.dot_dimension_numbers<[1], [0], [0], [1], [0, 0, 1, 1], [], []>} : vector<1x32xf32>, vector<32x16xf32>, vector<1x16xf32> -> vector<1x16xf32>
    %615 = arith.addf %611, %614 : vector<1x16xf32>
    %616 = vector.extract_strided_slice %610 {offsets = [1, 0], sizes = [1, 32], strides = [1, 1]} : vector<16x32xf32> to vector<1x32xf32>
    %c32_1026 = arith.constant 32 : index
    %c0_1027 = arith.constant 0 : index
    %617 = vector.load %arg8[%c32_1026, %c0_1027] : memref<512x16xf32, #tpu.memory_space<vmem>>, vector<32x16xf32>
    %cst_1028 = arith.constant dense<0.000000e+00> : vector<1x16xf32>
    %618 = tpu.matmul %616, %617, %cst_1028 {dimension_numbers = #tpu.dot_dimension_numbers<[1], [0], [0], [1], [0, 0, 1, 1], [], []>} : vector<1x32xf32>, vector<32x16xf32>, vector<1x16xf32> -> vector<1x16xf32>
    %619 = arith.addf %615, %618 : vector<1x16xf32>
    %620 = vector.extract_strided_slice %610 {offsets = [2, 0], sizes = [1, 32], strides = [1, 1]} : vector<16x32xf32> to vector<1x32xf32>
    %c64_1029 = arith.constant 64 : index
    %c0_1030 = arith.constant 0 : index
    %621 = vector.load %arg8[%c64_1029, %c0_1030] : memref<512x16xf32, #tpu.memory_space<vmem>>, vector<32x16xf32>
    %cst_1031 = arith.constant dense<0.000000e+00> : vector<1x16xf32>
    %622 = tpu.matmul %620, %621, %cst_1031 {dimension_numbers = #tpu.dot_dimension_numbers<[1], [0], [0], [1], [0, 0, 1, 1], [], []>} : vector<1x32xf32>, vector<32x16xf32>, vector<1x16xf32> -> vector<1x16xf32>
    %623 = arith.addf %619, %622 : vector<1x16xf32>
    %624 = vector.extract_strided_slice %610 {offsets = [3, 0], sizes = [1, 32], strides = [1, 1]} : vector<16x32xf32> to vector<1x32xf32>
    %c96_1032 = arith.constant 96 : index
    %c0_1033 = arith.constant 0 : index
    %625 = vector.load %arg8[%c96_1032, %c0_1033] : memref<512x16xf32, #tpu.memory_space<vmem>>, vector<32x16xf32>
    %cst_1034 = arith.constant dense<0.000000e+00> : vector<1x16xf32>
    %626 = tpu.matmul %624, %625, %cst_1034 {dimension_numbers = #tpu.dot_dimension_numbers<[1], [0], [0], [1], [0, 0, 1, 1], [], []>} : vector<1x32xf32>, vector<32x16xf32>, vector<1x16xf32> -> vector<1x16xf32>
    %627 = arith.addf %623, %626 : vector<1x16xf32>
    %628 = vector.extract_strided_slice %610 {offsets = [4, 0], sizes = [1, 32], strides = [1, 1]} : vector<16x32xf32> to vector<1x32xf32>
    %c128_1035 = arith.constant 128 : index
    %c0_1036 = arith.constant 0 : index
    %629 = vector.load %arg8[%c128_1035, %c0_1036] : memref<512x16xf32, #tpu.memory_space<vmem>>, vector<32x16xf32>
    %cst_1037 = arith.constant dense<0.000000e+00> : vector<1x16xf32>
    %630 = tpu.matmul %628, %629, %cst_1037 {dimension_numbers = #tpu.dot_dimension_numbers<[1], [0], [0], [1], [0, 0, 1, 1], [], []>} : vector<1x32xf32>, vector<32x16xf32>, vector<1x16xf32> -> vector<1x16xf32>
    %631 = arith.addf %627, %630 : vector<1x16xf32>
    %632 = vector.extract_strided_slice %610 {offsets = [5, 0], sizes = [1, 32], strides = [1, 1]} : vector<16x32xf32> to vector<1x32xf32>
    %c160_1038 = arith.constant 160 : index
    %c0_1039 = arith.constant 0 : index
    %633 = vector.load %arg8[%c160_1038, %c0_1039] : memref<512x16xf32, #tpu.memory_space<vmem>>, vector<32x16xf32>
    %cst_1040 = arith.constant dense<0.000000e+00> : vector<1x16xf32>
    %634 = tpu.matmul %632, %633, %cst_1040 {dimension_numbers = #tpu.dot_dimension_numbers<[1], [0], [0], [1], [0, 0, 1, 1], [], []>} : vector<1x32xf32>, vector<32x16xf32>, vector<1x16xf32> -> vector<1x16xf32>
    %635 = arith.addf %631, %634 : vector<1x16xf32>
    %636 = vector.extract_strided_slice %610 {offsets = [6, 0], sizes = [1, 32], strides = [1, 1]} : vector<16x32xf32> to vector<1x32xf32>
    %c192_1041 = arith.constant 192 : index
    %c0_1042 = arith.constant 0 : index
    %637 = vector.load %arg8[%c192_1041, %c0_1042] : memref<512x16xf32, #tpu.memory_space<vmem>>, vector<32x16xf32>
    %cst_1043 = arith.constant dense<0.000000e+00> : vector<1x16xf32>
    %638 = tpu.matmul %636, %637, %cst_1043 {dimension_numbers = #tpu.dot_dimension_numbers<[1], [0], [0], [1], [0, 0, 1, 1], [], []>} : vector<1x32xf32>, vector<32x16xf32>, vector<1x16xf32> -> vector<1x16xf32>
    %639 = arith.addf %635, %638 : vector<1x16xf32>
    %640 = vector.extract_strided_slice %610 {offsets = [7, 0], sizes = [1, 32], strides = [1, 1]} : vector<16x32xf32> to vector<1x32xf32>
    %c224_1044 = arith.constant 224 : index
    %c0_1045 = arith.constant 0 : index
    %641 = vector.load %arg8[%c224_1044, %c0_1045] : memref<512x16xf32, #tpu.memory_space<vmem>>, vector<32x16xf32>
    %cst_1046 = arith.constant dense<0.000000e+00> : vector<1x16xf32>
    %642 = tpu.matmul %640, %641, %cst_1046 {dimension_numbers = #tpu.dot_dimension_numbers<[1], [0], [0], [1], [0, 0, 1, 1], [], []>} : vector<1x32xf32>, vector<32x16xf32>, vector<1x16xf32> -> vector<1x16xf32>
    %643 = arith.addf %639, %642 : vector<1x16xf32>
    %644 = vector.extract_strided_slice %610 {offsets = [8, 0], sizes = [1, 32], strides = [1, 1]} : vector<16x32xf32> to vector<1x32xf32>
    %c256_1047 = arith.constant 256 : index
    %c0_1048 = arith.constant 0 : index
    %645 = vector.load %arg8[%c256_1047, %c0_1048] : memref<512x16xf32, #tpu.memory_space<vmem>>, vector<32x16xf32>
    %cst_1049 = arith.constant dense<0.000000e+00> : vector<1x16xf32>
    %646 = tpu.matmul %644, %645, %cst_1049 {dimension_numbers = #tpu.dot_dimension_numbers<[1], [0], [0], [1], [0, 0, 1, 1], [], []>} : vector<1x32xf32>, vector<32x16xf32>, vector<1x16xf32> -> vector<1x16xf32>
    %647 = arith.addf %643, %646 : vector<1x16xf32>
    %648 = vector.extract_strided_slice %610 {offsets = [9, 0], sizes = [1, 32], strides = [1, 1]} : vector<16x32xf32> to vector<1x32xf32>
    %c288_1050 = arith.constant 288 : index
    %c0_1051 = arith.constant 0 : index
    %649 = vector.load %arg8[%c288_1050, %c0_1051] : memref<512x16xf32, #tpu.memory_space<vmem>>, vector<32x16xf32>
    %cst_1052 = arith.constant dense<0.000000e+00> : vector<1x16xf32>
    %650 = tpu.matmul %648, %649, %cst_1052 {dimension_numbers = #tpu.dot_dimension_numbers<[1], [0], [0], [1], [0, 0, 1, 1], [], []>} : vector<1x32xf32>, vector<32x16xf32>, vector<1x16xf32> -> vector<1x16xf32>
    %651 = arith.addf %647, %650 : vector<1x16xf32>
    %652 = vector.extract_strided_slice %610 {offsets = [10, 0], sizes = [1, 32], strides = [1, 1]} : vector<16x32xf32> to vector<1x32xf32>
    %c320_1053 = arith.constant 320 : index
    %c0_1054 = arith.constant 0 : index
    %653 = vector.load %arg8[%c320_1053, %c0_1054] : memref<512x16xf32, #tpu.memory_space<vmem>>, vector<32x16xf32>
    %cst_1055 = arith.constant dense<0.000000e+00> : vector<1x16xf32>
    %654 = tpu.matmul %652, %653, %cst_1055 {dimension_numbers = #tpu.dot_dimension_numbers<[1], [0], [0], [1], [0, 0, 1, 1], [], []>} : vector<1x32xf32>, vector<32x16xf32>, vector<1x16xf32> -> vector<1x16xf32>
    %655 = arith.addf %651, %654 : vector<1x16xf32>
    %656 = vector.extract_strided_slice %610 {offsets = [11, 0], sizes = [1, 32], strides = [1, 1]} : vector<16x32xf32> to vector<1x32xf32>
    %c352_1056 = arith.constant 352 : index
    %c0_1057 = arith.constant 0 : index
    %657 = vector.load %arg8[%c352_1056, %c0_1057] : memref<512x16xf32, #tpu.memory_space<vmem>>, vector<32x16xf32>
    %cst_1058 = arith.constant dense<0.000000e+00> : vector<1x16xf32>
    %658 = tpu.matmul %656, %657, %cst_1058 {dimension_numbers = #tpu.dot_dimension_numbers<[1], [0], [0], [1], [0, 0, 1, 1], [], []>} : vector<1x32xf32>, vector<32x16xf32>, vector<1x16xf32> -> vector<1x16xf32>
    %659 = arith.addf %655, %658 : vector<1x16xf32>
    %660 = vector.extract_strided_slice %610 {offsets = [12, 0], sizes = [1, 32], strides = [1, 1]} : vector<16x32xf32> to vector<1x32xf32>
    %c384_1059 = arith.constant 384 : index
    %c0_1060 = arith.constant 0 : index
    %661 = vector.load %arg8[%c384_1059, %c0_1060] : memref<512x16xf32, #tpu.memory_space<vmem>>, vector<32x16xf32>
    %cst_1061 = arith.constant dense<0.000000e+00> : vector<1x16xf32>
    %662 = tpu.matmul %660, %661, %cst_1061 {dimension_numbers = #tpu.dot_dimension_numbers<[1], [0], [0], [1], [0, 0, 1, 1], [], []>} : vector<1x32xf32>, vector<32x16xf32>, vector<1x16xf32> -> vector<1x16xf32>
    %663 = arith.addf %659, %662 : vector<1x16xf32>
    %664 = vector.extract_strided_slice %610 {offsets = [13, 0], sizes = [1, 32], strides = [1, 1]} : vector<16x32xf32> to vector<1x32xf32>
    %c416_1062 = arith.constant 416 : index
    %c0_1063 = arith.constant 0 : index
    %665 = vector.load %arg8[%c416_1062, %c0_1063] : memref<512x16xf32, #tpu.memory_space<vmem>>, vector<32x16xf32>
    %cst_1064 = arith.constant dense<0.000000e+00> : vector<1x16xf32>
    %666 = tpu.matmul %664, %665, %cst_1064 {dimension_numbers = #tpu.dot_dimension_numbers<[1], [0], [0], [1], [0, 0, 1, 1], [], []>} : vector<1x32xf32>, vector<32x16xf32>, vector<1x16xf32> -> vector<1x16xf32>
    %667 = arith.addf %663, %666 : vector<1x16xf32>
    %668 = vector.extract_strided_slice %610 {offsets = [14, 0], sizes = [1, 32], strides = [1, 1]} : vector<16x32xf32> to vector<1x32xf32>
    %c448_1065 = arith.constant 448 : index
    %c0_1066 = arith.constant 0 : index
    %669 = vector.load %arg8[%c448_1065, %c0_1066] : memref<512x16xf32, #tpu.memory_space<vmem>>, vector<32x16xf32>
    %cst_1067 = arith.constant dense<0.000000e+00> : vector<1x16xf32>
    %670 = tpu.matmul %668, %669, %cst_1067 {dimension_numbers = #tpu.dot_dimension_numbers<[1], [0], [0], [1], [0, 0, 1, 1], [], []>} : vector<1x32xf32>, vector<32x16xf32>, vector<1x16xf32> -> vector<1x16xf32>
    %671 = arith.addf %667, %670 : vector<1x16xf32>
    %672 = vector.extract_strided_slice %610 {offsets = [15, 0], sizes = [1, 32], strides = [1, 1]} : vector<16x32xf32> to vector<1x32xf32>
    %c480_1068 = arith.constant 480 : index
    %c0_1069 = arith.constant 0 : index
    %673 = vector.load %arg8[%c480_1068, %c0_1069] : memref<512x16xf32, #tpu.memory_space<vmem>>, vector<32x16xf32>
    %cst_1070 = arith.constant dense<0.000000e+00> : vector<1x16xf32>
    %674 = tpu.matmul %672, %673, %cst_1070 {dimension_numbers = #tpu.dot_dimension_numbers<[1], [0], [0], [1], [0, 0, 1, 1], [], []>} : vector<1x32xf32>, vector<32x16xf32>, vector<1x16xf32> -> vector<1x16xf32>
    %675 = arith.addf %671, %674 : vector<1x16xf32>
    %676 = vector.extract_strided_slice %675 {offsets = [0, 0], sizes = [1, 8], strides = [1, 1]} : vector<1x16xf32> to vector<1x8xf32>
    %677 = vector.extract_strided_slice %675 {offsets = [0, 8], sizes = [1, 8], strides = [1, 1]} : vector<1x16xf32> to vector<1x8xf32>
    %cst_1071 = arith.constant 5.000000e-01 : f32
    %678 = vector.broadcast %cst_1071 : f32 to vector<1x8xf32>
    %679 = arith.mulf %678, %677 : vector<1x8xf32>
    %680 = math.exp %679 : vector<1x8xf32>
    %c0_1072 = arith.constant 0 : index
    %c0_1073 = arith.constant 0 : index
    %c0_1074 = arith.constant 0 : index
    %681 = vector.load %arg10[%c0_1072, %c0_1073, %c0_1074] : memref<1x1x8xf32, #tpu.memory_space<vmem>>, vector<1x1x8xf32>
    %682 = vector.shape_cast %681 : vector<1x1x8xf32> to vector<1x8xf32>
    %683 = arith.mulf %682, %680 : vector<1x8xf32>
    %684 = arith.addf %676, %683 : vector<1x8xf32>
    %c0_1075 = arith.constant 0 : index
    %c0_1076 = arith.constant 0 : index
    %c0_1077 = arith.constant 0 : index
    %685 = vector.load %arg11[%c0_1075, %c0_1076, %c0_1077] : memref<1x1x8xf32, #tpu.memory_space<vmem>>, vector<1x1x8xf32>
    %686 = vector.shape_cast %685 : vector<1x1x8xf32> to vector<1x8xf32>
    %687 = vector.shape_cast %684 : vector<1x8xf32> to vector<1x1x8xf32>
    tpu.vector_store %arg11[%c0_1075, %c0_1076, %c0_1077], %687 {strides = array<i32>} : memref<1x1x8xf32, #tpu.memory_space<vmem>>, vector<1x1x8xf32>,
    %c0_1078 = arith.constant 0 : index
    %c0_1079 = arith.constant 0 : index
    %c0_1080 = arith.constant 0 : index
    %688 = vector.load %arg12[%c0_1078, %c0_1079, %c0_1080] : memref<1x1x8xf32, #tpu.memory_space<vmem>>, vector<1x1x8xf32>
    %689 = vector.shape_cast %688 : vector<1x1x8xf32> to vector<1x8xf32>
    %690 = vector.shape_cast %676 : vector<1x8xf32> to vector<1x1x8xf32>
    tpu.vector_store %arg12[%c0_1078, %c0_1079, %c0_1080], %690 {strides = array<i32>} : memref<1x1x8xf32, #tpu.memory_space<vmem>>, vector<1x1x8xf32>,
    %c0_1081 = arith.constant 0 : index
    %c0_1082 = arith.constant 0 : index
    %c0_1083 = arith.constant 0 : index
    %691 = vector.load %arg13[%c0_1081, %c0_1082, %c0_1083] : memref<1x1x8xf32, #tpu.memory_space<vmem>>, vector<1x1x8xf32>
    %692 = vector.shape_cast %691 : vector<1x1x8xf32> to vector<1x8xf32>
    %693 = vector.shape_cast %677 : vector<1x8xf32> to vector<1x1x8xf32>
    tpu.vector_store %arg13[%c0_1081, %c0_1082, %c0_1083], %693 {strides = array<i32>} : memref<1x1x8xf32, #tpu.memory_space<vmem>>, vector<1x1x8xf32>,
    return
  }
  func.func @transform_0(%arg0: i32) -> (i32, i32, i32) {
    %c0_i32 = arith.constant 0 : i32
    %c0_i32_0 = arith.constant 0 : i32
    %c0_i32_1 = arith.constant 0 : i32
    return %arg0, %c0_i32, %c0_i32_0 : i32, i32, i32
  }
  func.func @transform_1(%arg0: i32) -> (i32, i32) {
    %c0_i32 = arith.constant 0 : i32
    %c0_i32_0 = arith.constant 0 : i32
    %c0_i32_1 = arith.constant 0 : i32
    return %c0_i32, %c0_i32_0 : i32, i32
  }
  func.func @transform_2(%arg0: i32) -> (i32, i32) {
    %c0_i32 = arith.constant 0 : i32
    %c0_i32_0 = arith.constant 0 : i32
    %c0_i32_1 = arith.constant 0 : i32
    return %c0_i32, %c0_i32_0 : i32, i32
  }
  func.func @transform_3(%arg0: i32) -> (i32, i32) {
    %c0_i32 = arith.constant 0 : i32
    %c0_i32_0 = arith.constant 0 : i32
    %c0_i32_1 = arith.constant 0 : i32
    return %c0_i32, %c0_i32_0 : i32, i32
  }
  func.func @transform_4(%arg0: i32) -> (i32, i32) {
    %c0_i32 = arith.constant 0 : i32
    %c0_i32_0 = arith.constant 0 : i32
    %c0_i32_1 = arith.constant 0 : i32
    return %c0_i32, %c0_i32_0 : i32, i32
  }
  func.func @transform_5(%arg0: i32) -> (i32, i32) {
    %c0_i32 = arith.constant 0 : i32
    %c0_i32_0 = arith.constant 0 : i32
    %c0_i32_1 = arith.constant 0 : i32
    return %c0_i32, %c0_i32_0 : i32, i32
  }
  func.func @transform_6(%arg0: i32) -> (i32, i32) {
    %c0_i32 = arith.constant 0 : i32
    %c0_i32_0 = arith.constant 0 : i32
    %c0_i32_1 = arith.constant 0 : i32
    return %c0_i32, %c0_i32_0 : i32, i32
  }
  func.func @transform_7(%arg0: i32) -> (i32, i32) {
    %c0_i32 = arith.constant 0 : i32
    %c0_i32_0 = arith.constant 0 : i32
    %c0_i32_1 = arith.constant 0 : i32
    return %c0_i32, %c0_i32_0 : i32, i32
  }
  func.func @transform_8(%arg0: i32) -> (i32, i32) {
    %c0_i32 = arith.constant 0 : i32
    %c0_i32_0 = arith.constant 0 : i32
    %c0_i32_1 = arith.constant 0 : i32
    return %c0_i32, %c0_i32_0 : i32, i32
  }
  func.func @transform_9(%arg0: i32) -> (i32, i32, i32) {
    %c0_i32 = arith.constant 0 : i32
    %c0_i32_0 = arith.constant 0 : i32
    %c0_i32_1 = arith.constant 0 : i32
    return %arg0, %c0_i32, %c0_i32_0 : i32, i32, i32
  }
  func.func @transform_10(%arg0: i32) -> (i32, i32, i32) {
    %c0_i32 = arith.constant 0 : i32
    %c0_i32_0 = arith.constant 0 : i32
    %c0_i32_1 = arith.constant 0 : i32
    return %arg0, %c0_i32, %c0_i32_0 : i32, i32, i32
  }
  func.func @transform_11(%arg0: i32) -> (i32, i32, i32) {
    %c0_i32 = arith.constant 0 : i32
    %c0_i32_0 = arith.constant 0 : i32
    %c0_i32_1 = arith.constant 0 : i32
    return %arg0, %c0_i32, %c0_i32_0 : i32, i32, i32
  }
  func.func @transform_12(%arg0: i32) -> (i32, i32, i32) {
    %c0_i32 = arith.constant 0 : i32
    %c0_i32_0 = arith.constant 0 : i32
    %c0_i32_1 = arith.constant 0 : i32
    return %arg0, %c0_i32, %c0_i32_0 : i32, i32, i32
  }
}

</mosaic_0001>

<bundles_post_ra>
// kernel: encoder_forward.1
= control target key start
LH: loop header
LB: loop body
LE: loop exit
PB: predicated region body
PF: predicated region fallthrough
CT: control target
= control target key end

     0   :  { %s6636_s0 = inlined_call_operand.vmem [shape: f32[2,256,4], index: 0, kind: input, shape index: {}]   ;;  %s6637_s1 = inlined_call_operand.vmem [shape: f32[64,32], index: 1, kind: input, shape index: {}]   ;;  %s6638_s2 = inlined_call_operand.vmem [shape: f32[1,32], index: 2, kind: input, shape index: {}]   ;;  %s6639_s3 = inlined_call_operand.vmem [shape: f32[512,32], index: 3, kind: input, shape index: {}]   ;;  %s6640_s4 = inlined_call_operand.vmem [shape: f32[1,32], index: 4, kind: input, shape index: {}]   ;;  %s6641_s5 = inlined_call_operand.vmem [shape: f32[512,32], index: 5, kind: input, shape index: {}]   ;;  %s6642_s6 = inlined_call_operand.vmem [shape: f32[1,32], index: 6, kind: input, shape index: {}]   ;;  %s6643_s7 = inlined_call_operand.vmem [shape: f32[512,16], index: 7, kind: input, shape index: {}]   ;;  %s6644_s8 = inlined_call_operand.vmem [shape: f32[1,16], index: 8, kind: input, shape index: {}]   ;;  %s6645_s9 = inlined_call_operand.vmem [shape: f32[2,1,8], index: 9, kind: input, shape index: {}]   ;;  %s6646_s10 = inlined_call_operand.hbm [shape: f32[2,1,8], index: 10, kind: output, shape index: {0}]   ;;  %s6647_s11 = inlined_call_operand.hbm [shape: f32[2,1,8], index: 11, kind: output, shape index: {1}]   ;;  %s6648_s12 = inlined_call_operand.hbm [shape: f32[2,1,8], index: 12, kind: output, shape index: {2}]  }
   0x1   :  { %6681 = sst [smem:[#allocation18_spill]] %s6636_s0 }
   0x2   :  { %6682 = sst [smem:[#allocation19_spill]] %s6637_s1 }
   0x3   :  { %6683 = sst [smem:[#allocation20_spill]] %s6638_s2 }
   0x4   :  { %18 = vsyncpa [#allocation9], 0 }
   0x5   :  { %20 = vsyncpa [#allocation9 + $0x1], 0 }
   0x6   :  { %21 = vsyncpa [#allocation11], 0 }
   0x7   :  { %23 = vsyncpa [#allocation11 + $0x1], 0  ;;  %s5023_s21 = smov 0   ;;  %s5025_s22 = smov 0  }
   0x8   :  { %s5027_s23 = smov 0   ;;  %s5029_s24 = smov 0  }
   0x9 LB: > { %6684 = sst [smem:[#allocation15_spill]] %s4924_s22  ;;  %s5044_s25 = sadd.s32 4294967295, %s4932_s24   ;;  %s4932_s24 = sphi %s5029_s24, %s6718_s24   ;;  %s4928_s23 = sphi %s5027_s23, %s6717_s23   ;;  %s4924_s22 = sphi %s5025_s22, %s6716_s22   ;;  %s4920_s21 = sphi %s5023_s21, %s6715_s21  }
   0xa   : > { %6685 = sst [smem:[#allocation16_spill]] %s4928_s23  ;;  %s6649_s26 = sadd.s32 4294967294, %s4932_s24  }
   0xb   : > { %s5048_s27 = sadd.s32 1, %s4932_s24   ;;  %s256_s28 = sadd.s32 1, %s4928_s23 }
   0xc   : > { %s253_s29 = ssub.s32 %s4932_s24, %s5048_s27  ;;  %p266_p0 = scmp.ne.s32.totalorder %s4928_s23, %s4924_s22 }
   0xd   : > { %p254_p1 = scmp.eq.s32.totalorder %s253_s29, 0  ;;  %p267_p2 = scmp.eq.s32.totalorder %s5044_s25, 1 }
   0xe   : > { %p272_p3 = scmp.ne.s32.totalorder %s4924_s22, %s4920_s21  ;;  %p273_p4 = scmp.eq.s32.totalorder %s6649_s26, 1 }
   0xf   : > { %s5061_s30 = scalar_select %p254_p1, %s4928_s23, %s256_s28  }
  0x10   : > { %p5063_p5 = por %p267_p2, %p266_p0  ;;  %p5067_p6 = por %p273_p4, %p272_p3 }
  0x11   : > { %6686 = sst [smem:[#allocation17_spill]] %s5061_s30  ;;  %p4255_p7 = scmp.ge.s32.totalorder %s4932_s24, 1 }
  0x12   : > { %p381_p8 = scmp.lt.s32.totalorder %s4932_s24, 3 }
  0x14   : > { %p382_p9 = pnand %p4255_p7, %p381_p8 }
  0x15   : > { %s5074_s15 = sand.u32 (!%p382_p9), 1, %s4924_s22   ;;  %p433_p10 = scmp.lt.s32.totalorder (!%p382_p9), %s5044_s25, 1 }
  0x16   : > { %385 = sbr.rel (%p382_p9) target bundleno = 1780 (0x6f4), region = 60  ;;  %s6689_s0 = sld [smem:[#allocation18_spill]] (!%p382_p9) }
  0x17   : > { %p4258_p11 = scmp.ne.s32.totalorder (!%p382_p9), %s5044_s25, 0 }
  0x1b   : > { %s5078_s16 = scalar_select %p433_p10, %s5044_s25, 1 }
  0x1c   : > { %444 = sbr.rel (%p4258_p11) target bundleno = 66 (0x42), region = 64 }
  0x1d   : > { %s4291_s17 = sshll.u32 %s5078_s16, 8 }
  0x1e   : > { %s5088_s26 = scalar_lea.vmem %s6689_s0, %s4291_s17 }
  0x21   : > { %vm445_vm0 = vcmask 31744   ;;  %vm486_vm1 = vcmask 27648   ;;  %vm488_vm2 = vcmask 261120   ;;  %v4934_v0 = vmov 0.0  }
  0x22   : > { %446 = vst.msk [vmem:[#allocation2] sm:$0xff] %vm445_vm0, %v4934_v0  ;;  %447 = vst.msk [vmem:[#allocation2 + $0x8] sm:$0xff] %vm445_vm0, %v4934_v0  ;;  %vm501_vm3 = vcmask 257024   ;;  %vm509_vm4 = vcmask 253952  }
  0x23   : > { %448 = vst.msk [vmem:[#allocation2 + $0x10] sm:$0xff] %vm445_vm0, %v4934_v0  ;;  %449 = vst.msk [vmem:[#allocation2 + $0x18] sm:$0xff] %vm445_vm0, %v4934_v0 }
  0x24   : > { %450 = vst.msk [vmem:[#allocation2 + $0x20] sm:$0xff] %vm445_vm0, %v4934_v0  ;;  %451 = vst.msk [vmem:[#allocation2 + $0x28] sm:$0xff] %vm445_vm0, %v4934_v0 }
  0x25   : > { %452 = vst.msk [vmem:[#allocation2 + $0x30] sm:$0xff] %vm445_vm0, %v4934_v0  ;;  %453 = vst.msk [vmem:[#allocation2 + $0x38] sm:$0xff] %vm445_vm0, %v4934_v0 }
  0x26   : > { %454 = vst.msk [vmem:[#allocation2 + $0x40] sm:$0xff] %vm445_vm0, %v4934_v0  ;;  %455 = vst.msk [vmem:[#allocation2 + $0x48] sm:$0xff] %vm445_vm0, %v4934_v0 }
  0x27   : > { %456 = vst.msk [vmem:[#allocation2 + $0x50] sm:$0xff] %vm445_vm0, %v4934_v0  ;;  %457 = vst.msk [vmem:[#allocation2 + $0x58] sm:$0xff] %vm445_vm0, %v4934_v0 }
  0x28   : > { %458 = vst.msk [vmem:[#allocation2 + $0x60] sm:$0xff] %vm445_vm0, %v4934_v0  ;;  %459 = vst.msk [vmem:[#allocation2 + $0x68] sm:$0xff] %vm445_vm0, %v4934_v0 }
  0x29   : > { %460 = vst.msk [vmem:[#allocation2 + $0x70] sm:$0xff] %vm445_vm0, %v4934_v0  ;;  %461 = vst.msk [vmem:[#allocation2 + $0x78] sm:$0xff] %vm445_vm0, %v4934_v0 }
  0x2a   : > { %462 = vst.msk [vmem:[#allocation2 + $0x80] sm:$0xff] %vm445_vm0, %v4934_v0  ;;  %463 = vst.msk [vmem:[#allocation2 + $0x88] sm:$0xff] %vm445_vm0, %v4934_v0 }
  0x2b   : > { %464 = vst.msk [vmem:[#allocation2 + $0x90] sm:$0xff] %vm445_vm0, %v4934_v0  ;;  %465 = vst.msk [vmem:[#allocation2 + $0x98] sm:$0xff] %vm445_vm0, %v4934_v0 }
  0x2c   : > { %466 = vst.msk [vmem:[#allocation2 + $0xa0] sm:$0xff] %vm445_vm0, %v4934_v0  ;;  %467 = vst.msk [vmem:[#allocation2 + $0xa8] sm:$0xff] %vm445_vm0, %v4934_v0 }
  0x2d   : > { %468 = vst.msk [vmem:[#allocation2 + $0xb0] sm:$0xff] %vm445_vm0, %v4934_v0  ;;  %469 = vst.msk [vmem:[#allocation2 + $0xb8] sm:$0xff] %vm445_vm0, %v4934_v0 }
  0x2e   : > { %470 = vst.msk [vmem:[#allocation2 + $0xc0] sm:$0xff] %vm445_vm0, %v4934_v0  ;;  %471 = vst.msk [vmem:[#allocation2 + $0xc8] sm:$0xff] %vm445_vm0, %v4934_v0 }
  0x2f   : > { %472 = vst.msk [vmem:[#allocation2 + $0xd0] sm:$0xff] %vm445_vm0, %v4934_v0  ;;  %473 = vst.msk [vmem:[#allocation2 + $0xd8] sm:$0xff] %vm445_vm0, %v4934_v0 }
  0x30   : > { %474 = vst.msk [vmem:[#allocation2 + $0xe0] sm:$0xff] %vm445_vm0, %v4934_v0  ;;  %475 = vst.msk [vmem:[#allocation2 + $0xe8] sm:$0xff] %vm445_vm0, %v4934_v0 }
  0x31   : > { %476 = vst.msk [vmem:[#allocation2 + $0xf0] sm:$0xff] %vm445_vm0, %v4934_v0  ;;  %477 = vst.msk [vmem:[#allocation2 + $0xf8] sm:$0xff] %vm445_vm0, %v4934_v0 }
  0x32   : > { %478 = vst.msk [vmem:[#allocation2 + $0x100] sm:$0xff] %vm445_vm0, %v4934_v0  ;;  %479 = vst.msk [vmem:[#allocation2 + $0x108] sm:$0xff] %vm445_vm0, %v4934_v0 }
  0x33   : > { %480 = vst.msk [vmem:[#allocation2 + $0x110] sm:$0xff] %vm445_vm0, %v4934_v0  ;;  %481 = vst.msk [vmem:[#allocation2 + $0x118] sm:$0xff] %vm445_vm0, %v4934_v0 }
  0x34   : > { %482 = vst.msk [vmem:[#allocation2 + $0x120] sm:$0xff] %vm445_vm0, %v4934_v0  ;;  %483 = vst.msk [vmem:[#allocation2 + $0x128] sm:$0xff] %vm445_vm0, %v4934_v0 }
  0x35   : > { %484 = vst.msk [vmem:[#allocation2 + $0x130] sm:$0xff] %vm445_vm0, %v4934_v0  ;;  %485 = vst.msk [vmem:[#allocation2 + $0x138] sm:$0xff] %vm445_vm0, %v4934_v0 }
  0x36   : > { %487 = vst.msk [vmem:[#allocation2 + $0x140] sm:$0xf] %vm486_vm1, %v4934_v0 }
  0x37   : > { %489 = vst.msk [vmem:[#allocation4] sm:$0xff] %vm488_vm2, %v4934_v0  ;;  %490 = vst.msk [vmem:[#allocation4 + $0x8] sm:$0xff] %vm488_vm2, %v4934_v0 }
  0x38   : > { %491 = vst.msk [vmem:[#allocation4 + $0x10] sm:$0xff] %vm488_vm2, %v4934_v0  ;;  %492 = vst.msk [vmem:[#allocation4 + $0x18] sm:$0xff] %vm488_vm2, %v4934_v0 }
  0x39   : > { %493 = vst.msk [vmem:[#allocation4 + $0x20] sm:$0xff] %vm488_vm2, %v4934_v0  ;;  %494 = vst.msk [vmem:[#allocation4 + $0x28] sm:$0xff] %vm488_vm2, %v4934_v0 }
  0x3a   : > { %495 = vst.msk [vmem:[#allocation4 + $0x30] sm:$0xff] %vm488_vm2, %v4934_v0  ;;  %496 = vst.msk [vmem:[#allocation4 + $0x38] sm:$0xff] %vm488_vm2, %v4934_v0 }
  0x3b   : > { %497 = vst.msk [vmem:[#allocation4 + $0x40] sm:$0xff] %vm488_vm2, %v4934_v0  ;;  %498 = vst.msk [vmem:[#allocation4 + $0x48] sm:$0xff] %vm488_vm2, %v4934_v0 }
  0x3c   : > { %499 = vst.msk [vmem:[#allocation4 + $0x50] sm:$0xff] %vm488_vm2, %v4934_v0  ;;  %500 = vst.msk [vmem:[#allocation4 + $0x58] sm:$0xff] %vm488_vm2, %v4934_v0 }
  0x3d   : > { %503 = vst.msk [vmem:[#allocation6] sm:$0xff] %vm488_vm2, %v4934_v0  ;;  %504 = vst.msk [vmem:[#allocation6 + $0x8] sm:$0xff] %vm488_vm2, %v4934_v0 }
  0x3e   : > { %505 = vst.msk [vmem:[#allocation6 + $0x10] sm:$0xff] %vm488_vm2, %v4934_v0  ;;  %506 = vst.msk [vmem:[#allocation6 + $0x18] sm:$0xff] %vm488_vm2, %v4934_v0 }
  0x3f   : > { %507 = vst.msk [vmem:[#allocation6 + $0x20] sm:$0xff] %vm488_vm2, %v4934_v0  ;;  %508 = vst.msk [vmem:[#allocation6 + $0x28] sm:$0xff] %vm488_vm2, %v4934_v0 }
  0x40   : > { %502 = vst.msk [vmem:[#allocation4 + $0x60] sm:$0xf] %vm501_vm3, %v4934_v0 }
  0x41   : > { %510 = vst.msk [vmem:[#allocation6 + $0x30] sm:$0x1] %vm509_vm4, %v4934_v0 }
  0x42 PF: > { %v600_v1 = vld [vmem:[#allocation2 + $0x1] ss:$2 sm:$0xff]  ;;  %v657_v2 = vld [vmem:[#allocation2 + $0x2] ss:$2 sm:$0xff]  ;;  %s4935_s17 = smov 4   ;;  %s4936_s18 = smov 8  }
  0x43   : > { %602 = vrot.lane.b32.xlu0 %v600_v1, %s4935_s17  ;;  %659 = vrot.lane.b32.xlu1 %v657_v2, %s4936_s18  ;;  %v714_v3 = vld [vmem:[#allocation2 + $0x3] ss:$2 sm:$0xff]  ;;  %vm513_vm5 = vcmask 31744   ;;  %v517_v5 = vld [vmem:[%s5088_s26 + $0x18] sm:$0xff]  ;;  %s4937_s19 = smov 12   ;;  %s6660_s28 = smov 16  }
  0x44   : > { %v516_v4 = vld [vmem:[%s5088_s26 + $0x10] sm:$0xff]  ;;  %519 = vst.msk [vmem:[#allocation2 + $0x2d] sm:$0xff] %vm513_vm5, %v517_v5  ;;  %v511_v6 = vld [vmem:[%s5088_s26] sm:$0xff]  ;;  %v512_v7 = vld [vmem:[%s5088_s26 + $0x8] sm:$0xff]  ;;  %s6666_s29 = smov 20   ;;  %s6654_s30 = smov 24  }
  0x45   : > { %518 = vst.msk [vmem:[#allocation2 + $0x25] sm:$0xff] %vm513_vm5, %v516_v4  ;;  %v524_v8 = vld [vmem:[%s5088_s26 + $0x30] sm:$0xff]  ;;  %514 = vst.msk [vmem:[#allocation2 + $0x13] sm:$0xff] %vm513_vm5, %v511_v6  ;;  %v525_v9 = vld [vmem:[%s5088_s26 + $0x38] sm:$0xff]  ;;  %s6670_s20 = smov 28   ;;  %s6652_s22 = smov 32  }
  0x46   : > { %515 = vst.msk [vmem:[#allocation2 + $0x1b] sm:$0xff] %vm513_vm5, %v512_v7  ;;  %526 = vst.msk [vmem:[#allocation2 + $0x49] sm:$0xff] %vm513_vm5, %v524_v8  ;;  %v520_v10 = vld [vmem:[%s5088_s26 + $0x20] sm:$0xff]  ;;  %v521_v11 = vld [vmem:[%s5088_s26 + $0x28] sm:$0xff]  ;;  %s6662_s23 = smov 36   ;;  %vm605_vm6 = vcmask 64544  }
  0x47   : > { %527 = vst.msk [vmem:[#allocation2 + $0x51] sm:$0xff] %vm513_vm5, %v525_v9  ;;  %522 = vst.msk [vmem:[#allocation2 + $0x37] sm:$0xff] %vm513_vm5, %v520_v10  ;;  %v532_v12 = vld [vmem:[%s5088_s26 + $0x50] sm:$0xff]  ;;  %v533_v13 = vld [vmem:[%s5088_s26 + $0x58] sm:$0xff]  ;;  %716 = vrot.lane.b32.xlu0 %v714_v3, %s4937_s19  ;;  %vm662_vm7 = vcmask 97344   ;;  %vm719_vm8 = vcmask 130144  }
  0x48   : > { %523 = vst.msk [vmem:[#allocation2 + $0x3f] sm:$0xff] %vm513_vm5, %v521_v11  ;;  %v528_v14 = vld [vmem:[%s5088_s26 + $0x40] sm:$0xff]  ;;  %534 = vst.msk [vmem:[#allocation2 + $0x6d] sm:$0xff] %vm513_vm5, %v532_v12  ;;  %v529_v15 = vld [vmem:[%s5088_s26 + $0x48] sm:$0xff]  ;;  %vm776_vm9 = vcmask 162944   ;;  %s6693_s1 = sld [smem:[#allocation19_spill]] }
  0x49   : > { %535 = vst.msk [vmem:[#allocation2 + $0x75] sm:$0xff] %vm513_vm5, %v533_v13  ;;  %530 = vst.msk [vmem:[#allocation2 + $0x5b] sm:$0xff] %vm513_vm5, %v528_v14  ;;  %v540_v16 = vld [vmem:[%s5088_s26 + $0x70] sm:$0xff]  ;;  %v541_v17 = vld [vmem:[%s5088_s26 + $0x78] sm:$0xff]  ;;  %vm833_vm10 = vcmask 195744   ;;  %vm890_vm11 = vcmask 228544  }
  0x4a   : > { %531 = vst.msk [vmem:[#allocation2 + $0x63] sm:$0xff] %vm513_vm5, %v529_v15  ;;  %542 = vst.msk [vmem:[#allocation2 + $0x91] sm:$0xff] %vm513_vm5, %v540_v16  ;;  %v536_v18 = vld [vmem:[%s5088_s26 + $0x60] sm:$0xff]  ;;  %v537_v19 = vld [vmem:[%s5088_s26 + $0x68] sm:$0xff]  ;;  %vm947_vm12 = vcmask 261344   ;;  %vm1003_vm13 = vcmask 294144  }
  0x4b   : > { %543 = vst.msk [vmem:[#allocation2 + $0x99] sm:$0xff] %vm513_vm5, %v541_v17  ;;  %v548_v20 = vld [vmem:[%s5088_s26 + $0x90] sm:$0xff]  ;;  %538 = vst.msk [vmem:[#allocation2 + $0x7f] sm:$0xff] %vm513_vm5, %v536_v18  ;;  %v549_v21 = vld [vmem:[%s5088_s26 + $0x98] sm:$0xff]  ;;  %vm1053_vm14 = vcmask 326944   ;;  %vm1103_vm15 = vcmask 359744  }
  0x4c   : > { %539 = vst.msk [vmem:[#allocation2 + $0x87] sm:$0xff] %vm513_vm5, %v537_v19  ;;  %550 = vst.msk [vmem:[#allocation2 + $0xb5] sm:$0xff] %vm513_vm5, %v548_v20  ;;  %v544_v22 = vld [vmem:[%s5088_s26 + $0x80] sm:$0xff]  ;;  %v545_v23 = vld [vmem:[%s5088_s26 + $0x88] sm:$0xff]  ;;  %vm1153_vm0 = vcmask 392544   ;;  %vm1203_vm1 = vcmask 425344  }
  0x4d   : > { %551 = vst.msk [vmem:[#allocation2 + $0xbd] sm:$0xff] %vm513_vm5, %v549_v21  ;;  %546 = vst.msk [vmem:[#allocation2 + $0xa3] sm:$0xff] %vm513_vm5, %v544_v22  ;;  %v556_v24 = vld [vmem:[%s5088_s26 + $0xb0] sm:$0xff]  ;;  %v557_v25 = vld [vmem:[%s5088_s26 + $0xb8] sm:$0xff]  ;;  %vm1253_vm2 = vcmask 458144   ;;  %vm1303_vm3 = vcmask 490944  }
  0x4e   : > { %547 = vst.msk [vmem:[#allocation2 + $0xab] sm:$0xff] %vm513_vm5, %v545_v23  ;;  %v552_v26 = vld [vmem:[%s5088_s26 + $0xa0] sm:$0xff]  ;;  %558 = vst.msk [vmem:[#allocation2 + $0xd9] sm:$0xff] %vm513_vm5, %v556_v24  ;;  %v615_v31 = vld [vmem:[#allocation2 + $0x49] ss:$2 sm:$0xff]  ;;  %vm1353_vm4 = vcmask 523744  }
  0x4f   : > { %v665_v27 = vld [vmem:[#allocation2 + $0x26] ss:$2 sm:$0xff]  ;;  %v608_v28 = vld [vmem:[#allocation2 + $0x25] ss:$2 sm:$0xff]  ;;  %559 = vst.msk [vmem:[#allocation2 + $0xe1] sm:$0xff] %vm513_vm5, %v557_v25  ;;  %554 = vst.msk [vmem:[#allocation2 + $0xc7] sm:$0xff] %vm513_vm5, %v552_v26 }
  0x50   : > { %667 = vrot.lane.b32.xlu1 %v665_v27, %s4936_s18  ;;  %610 = vrot.lane.b32.xlu0 %v608_v28, %s4935_s17  ;;  %v722_v29 = vld [vmem:[#allocation2 + $0x27] ss:$2 sm:$0xff]  ;;  %v771_v30 = vld [vmem:[#allocation2 + $0x12] ss:$2 sm:$0xff]  ;;  %v836_v36 = vld [vmem:[#allocation2 + $0x37] ss:$2 sm:$0xff] }
  0x51   : > { %v779_v32 = vld [vmem:[#allocation2 + $0x36] ss:$2 sm:$0xff]  ;;  %v828_v33 = vld [vmem:[#allocation2 + $0x13] ss:$2 sm:$0xff]  ;;  %v553_v37 = vld [vmem:[%s5088_s26 + $0xa8] sm:$0xff]  ;;  %s6703_s2 = sld [smem:[#allocation20_spill]] }
  0x52   : > { %v622_v34 = vld [vmem:[#allocation2 + $0x6d] ss:$2 sm:$0xff]  ;;  %v672_v35 = vld [vmem:[#allocation2 + $0x4a] ss:$2 sm:$0xff]  ;;  %555 = vst.msk [vmem:[#allocation2 + $0xcf] sm:$0xff] %vm513_vm5, %v553_v37  ;;  %v560_v48 = vld [vmem:[%s5088_s26 + $0xc0] sm:$0xff] }
  0x53   : > { %v564_v38 = vld [vmem:[%s5088_s26 + $0xd0] sm:$0xff]  ;;  %v565_v39 = vld [vmem:[%s5088_s26 + $0xd8] sm:$0xff]  ;;  %v576_v42 = vld [vmem:[#allocation2] ss:$2 sm:$0xff]  ;;  %562 = vst.msk [vmem:[#allocation2 + $0xeb] sm:$0xff] %vm513_vm5, %v560_v48  ;;  %s6543_s0 = sshll.u32 %s5044_s25, 4 }
  0x54   : > { %724 = vrot.lane.b32.xlu1 %v722_v29, %s4937_s19  ;;  %773 = vrot.lane.b32.xlu0 %v771_v30, %s6660_s28  ;;  %566 = vst.msk [vmem:[#allocation2 + $0xfd] sm:$0xff] %vm513_vm5, %v564_v38  ;;  %567 = vst.msk [vmem:[#allocation2 + $0x105] sm:$0xff] %vm513_vm5, %v565_v39  ;;  %v885_v40 = vld [vmem:[#allocation2 + $0x14] ss:$2 sm:$0xff]  ;;  %v579_v43 = vld [vmem:[#allocation2 + $0x24] ss:$2 sm:$0xff] }
  0x55   : > { %v679_v41 = vld [vmem:[#allocation2 + $0x6e] ss:$2 sm:$0xff]  ;;  %577 = vst.msk [vmem:[#allocation3] sm:$0xff] %vm513_vm5, %v576_v42  ;;  %580 = vst.msk [vmem:[#allocation3 + $0x8] sm:$0xff] %vm513_vm5, %v579_v43  ;;  %v729_v46 = vld [vmem:[#allocation2 + $0x4b] ss:$2 sm:$0xff] }
  0x56   : > { %v582_v44 = vld [vmem:[#allocation2 + $0x48] ss:$2 sm:$0xff]  ;;  %v893_v47 = vld [vmem:[#allocation2 + $0x38] ss:$2 sm:$0xff]  ;;  %v942_v50 = vld [vmem:[#allocation2 + $0x15] ss:$2 sm:$0xff] }
  0x57   : > { %583 = vst.msk [vmem:[#allocation3 + $0x10] sm:$0xff] %vm513_vm5, %v582_v44  ;;  %v585_v45 = vld [vmem:[#allocation2 + $0x6c] ss:$2 sm:$0xff]  ;;  %v736_v51 = vld [vmem:[#allocation2 + $0x6f] ss:$2 sm:$0xff]  ;;  %v568_v52 = vld [vmem:[%s5088_s26 + $0xe0] sm:$0xff] }
  0x58   : > { %617 = vrot.lane.b32.xlu1 %v615_v31, %s4935_s17  ;;  %781 = vrot.lane.b32.xlu0 %v779_v32, %s6660_s28  ;;  %586 = vst.msk [vmem:[#allocation3 + $0x18] sm:$0xff] %vm513_vm5, %v585_v45  ;;  %v561_v49 = vld [vmem:[%s5088_s26 + $0xc8] sm:$0xff]  ;;  %570 = vst.msk [vmem:[#allocation2 + $0x10f] sm:$0xff] %vm513_vm5, %v568_v52  ;;  %v588_v54 = vld [vmem:[#allocation2 + $0x90] ss:$2 sm:$0xff] }
  0x59   : > { %563 = vst.msk [vmem:[#allocation2 + $0xf3] sm:$0xff] %vm513_vm5, %v561_v49  ;;  %v569_v53 = vld [vmem:[%s5088_s26 + $0xe8] sm:$0xff]  ;;  %589 = vst.msk [vmem:[#allocation3 + $0x20] sm:$0xff] %vm513_vm5, %v588_v54  ;;  %v950_v56 = vld [vmem:[#allocation2 + $0x39] ss:$2 sm:$0xff] }
  0x5a   : > { %571 = vst.msk [vmem:[#allocation2 + $0x117] sm:$0xff] %vm513_vm5, %v569_v53  ;;  %v786_v55 = vld [vmem:[#allocation2 + $0x5a] ss:$2 sm:$0xff]  ;;  %v629_v59 = vld [vmem:[#allocation2 + $0x91] ss:$2 sm:$0xff] }
  0x5b   : > { %v591_v57 = vld [vmem:[#allocation2 + $0xb4] ss:$2 sm:$0xff]  ;;  %v998_v58 = vld [vmem:[#allocation2 + $0x24] ss:$2 sm:$0xff]  ;;  %v843_v61 = vld [vmem:[#allocation2 + $0x5b] ss:$2 sm:$0xff] }
  0x5c   : > { %830 = vrot.lane.b32.xlu1 %v828_v33, %s6666_s29  ;;  %624 = vrot.lane.b32.xlu0 %v622_v34, %s4935_s17  ;;  %592 = vst.msk [vmem:[#allocation3 + $0x28] sm:$0xff] %vm513_vm5, %v591_v57  ;;  %v793_v60 = vld [vmem:[#allocation2 + $0x7e] ss:$2 sm:$0xff]  ;;  %v1048_v63 = vld [vmem:[#allocation2 + $0x25] ss:$2 sm:$0xff] }
  0x5d   : > { %v1005_v62 = vld [vmem:[#allocation2 + $0x48] ss:$2 sm:$0xff]  ;;  %v636_v0 = vld [vmem:[#allocation2 + $0xb5] ss:$2 sm:$0xff]  ;;  %v594_v14 = vld [vmem:[#allocation2 + $0xd8] ss:$2 sm:$0xff] }
  0x5e   : > { %v686_v1 = vld [vmem:[#allocation2 + $0x92] ss:$2 sm:$0xff]  ;;  %v850_v2 = vld [vmem:[#allocation2 + $0x7f] ss:$2 sm:$0xff]  ;;  %v800_v16 = vld [vmem:[#allocation2 + $0xa2] ss:$2 sm:$0xff] }
  0x5f   : > { %v900_v3 = vld [vmem:[#allocation2 + $0x5c] ss:$2 sm:$0xff]  ;;  %v572_v4 = vld [vmem:[%s5088_s26 + $0xf0] sm:$0xff]  ;;  %v957_v11 = vld [vmem:[#allocation2 + $0x5d] ss:$2 sm:$0xff]  ;;  %595 = vst.msk [vmem:[#allocation3 + $0x30] sm:$0xff] %vm513_vm5, %v594_v14 }
  0x60   : > { %674 = vrot.lane.b32.xlu1 %v672_v35, %s4936_s18  ;;  %838 = vrot.lane.b32.xlu0 %v836_v36, %s6666_s29  ;;  %v573_v5 = vld [vmem:[%s5088_s26 + $0xf8] sm:$0xff]  ;;  %574 = vst.msk [vmem:[#allocation2 + $0x121] sm:$0xff] %vm513_vm5, %v572_v4  ;;  %v1055_v6 = vld [vmem:[#allocation2 + $0x49] ss:$2 sm:$0xff]  ;;  %v1098_v7 = vld [vmem:[#allocation2 + $0x26] ss:$2 sm:$0xff] }
  0x61   : > { %575 = vst.msk [vmem:[#allocation2 + $0x129] sm:$0xff] %vm513_vm5, %v573_v5  ;;  %v693_v8 = vld [vmem:[#allocation2 + $0xb6] ss:$2 sm:$0xff]  ;;  %v743_v9 = vld [vmem:[#allocation2 + $0x93] ss:$2 sm:$0xff]  ;;  %s6658_s26 = smov 44  }
  0x62   : > { %v907_v10 = vld [vmem:[#allocation2 + $0x80] ss:$2 sm:$0xff]  ;;  %v1148_v13 = vld [vmem:[#allocation2 + $0x27] ss:$2 sm:$0xff]  ;;  %v750_v15 = vld [vmem:[#allocation2 + $0xb7] ss:$2 sm:$0xff] }
  0x63   : > { %v1105_v12 = vld [vmem:[#allocation2 + $0x4a] ss:$2 sm:$0xff]  ;;  %v964_v17 = vld [vmem:[#allocation2 + $0x81] ss:$2 sm:$0xff]  ;;  %v1205_v27 = vld [vmem:[#allocation2 + $0x5a] ss:$2 sm:$0xff] }
  0x64   : > { %887 = vrot.lane.b32.xlu1 %v885_v40, %s6654_s30  ;;  %681 = vrot.lane.b32.xlu0 %v679_v41, %s4936_s18  ;;  %v1011_v18 = vld [vmem:[#allocation2 + $0x6c] ss:$2 sm:$0xff]  ;;  %v1155_v19 = vld [vmem:[#allocation2 + $0x4b] ss:$2 sm:$0xff]  ;;  %v597_v23 = vld [vmem:[#allocation2 + $0xfc] ss:$2 sm:$0xff] }
  0x65   : > { %v1198_v20 = vld [vmem:[#allocation2 + $0x36] ss:$2 sm:$0xff]  ;;  %v643_v21 = vld [vmem:[#allocation2 + $0xd9] ss:$2 sm:$0xff]  ;;  %v807_v22 = vld [vmem:[#allocation2 + $0xc6] ss:$2 sm:$0xff] }
  0x66   : > { %598 = vst.msk [vmem:[#allocation3 + $0x38] sm:$0xff] %vm513_vm5, %v597_v23  ;;  %v857_v24 = vld [vmem:[#allocation2 + $0xa3] ss:$2 sm:$0xff]  ;;  %v1017_v25 = vld [vmem:[#allocation2 + $0x90] ss:$2 sm:$0xff]  ;;  %vm1421_vm5 = vcmask 523264  }
  0x67   : > { %v1061_v26 = vld [vmem:[#allocation2 + $0x6d] ss:$2 sm:$0xff]  ;;  %v650_v29 = vld [vmem:[#allocation2 + $0xfd] ss:$2 sm:$0xff]  ;;  %v700_v30 = vld [vmem:[#allocation2 + $0xda] ss:$2 sm:$0xff] }
  0x68   : > { %731 = vrot.lane.b32.xlu1 %v729_v46, %s4937_s19  ;;  %895 = vrot.lane.b32.xlu0 %v893_v47, %s6654_s30  ;;  %v1248_v28 = vld [vmem:[#allocation2 + $0x37] ss:$2 sm:$0xff]  ;;  %v864_v31 = vld [vmem:[#allocation2 + $0xc7] ss:$2 sm:$0xff]  ;;  %v914_v32 = vld [vmem:[#allocation2 + $0xa4] ss:$2 sm:$0xff] }
  0x69   : > { %v1067_v33 = vld [vmem:[#allocation2 + $0x91] ss:$2 sm:$0xff]  ;;  %v1111_v35 = vld [vmem:[#allocation2 + $0x6e] ss:$2 sm:$0xff]  ;;  %v707_v40 = vld [vmem:[#allocation2 + $0xfe] ss:$2 sm:$0xff] }
  0x6a   : > { %v1255_v36 = vld [vmem:[#allocation2 + $0x5b] ss:$2 sm:$0xff]  ;;  %v1298_v39 = vld [vmem:[#allocation2 + $0x38] ss:$2 sm:$0xff]  ;;  %v921_v42 = vld [vmem:[#allocation2 + $0xc8] ss:$2 sm:$0xff] }
  0x6b   : > { %v757_v41 = vld [vmem:[#allocation2 + $0xdb] ss:$2 sm:$0xff]  ;;  %v1117_v46 = vld [vmem:[#allocation2 + $0x92] ss:$2 sm:$0xff]  ;;  %v871_v14 = vld [vmem:[#allocation2 + $0xeb] ss:$2 sm:$0xff] }
  0x6c   : > { %944 = vrot.lane.b32.xlu1 %v942_v50, %s6670_s20  ;;  %738 = vrot.lane.b32.xlu0 %v736_v51, %s4937_s19  ;;  %v971_v45 = vld [vmem:[#allocation2 + $0xa5] ss:$2 sm:$0xff]  ;;  %v1413_v49 = vld [vmem:[%s6693_s1 + $0x38] sm:$0xff] }
  0x6d   : > { %4540 = vmatprep.subr.mxu0 %v1413_v49  ;;  %v1412_v50 = vld [vmem:[%s6693_s1 + $0x30] sm:$0xff]  ;;  %v1305_v52 = vld [vmem:[#allocation2 + $0x5c] ss:$2 sm:$0xff]  ;;  %v1348_v57 = vld [vmem:[#allocation2 + $0x39] ss:$2 sm:$0xff] }
  0x6e   : > { %v1161_v51 = vld [vmem:[#allocation2 + $0x6f] ss:$2 sm:$0xff]  ;;  %4541 = vmatpush3.msra.mxu0 %v1413_v49  ;;  %v1023_v4 = vld [vmem:[#allocation2 + $0xb4] ss:$2 sm:$0xff] }
  0x6f   : > { %4542 = vmatprep.subr.mxu0 %v1412_v50  ;;  %v1167_v5 = vld [vmem:[#allocation2 + $0x93] ss:$2 sm:$0xff] }
  0x70   : > { %788 = vrot.lane.b32.xlu1 %v786_v55, %s6660_s28  ;;  %952 = vrot.lane.b32.xlu0 %v950_v56, %s6670_s20  ;;  %v1411_v55 = vld [vmem:[%s6693_s1 + $0x28] sm:$0xff]  ;;  %v1410_v56 = vld [vmem:[%s6693_s1 + $0x20] sm:$0xff]  ;;  %v992_v49 = vld [vmem:[#allocation2 + $0x111] ss:$2 sm:$0xff] }
  0x71   : > { %4543 = vmatpush3.msra.mxu0 %v1412_v50  ;;  %v1035_v50 = vld [vmem:[#allocation2 + $0xfc] ss:$2 sm:$0xff] }
  0x72   : > { %4544 = vmatprep.subr.mxu0 %v1411_v55 }
  0x73   : > { %4545 = vmatpush3.msra.mxu0 %v1411_v55 }
  0x74   : > { %1000 = vrot.lane.b32.xlu1 %v998_v58, %s6652_s22  ;;  %631 = vrot.lane.b32.xlu0 %v629_v59, %s4935_s17  ;;  %v764_v58 = vld [vmem:[#allocation2 + $0xff] ss:$2 sm:$0xff] }
  0x75   : > { %4546 = vmatprep.subr.mxu0 %v1410_v56 }
  0x76   : > { %4547 = vmatpush3.msra.mxu0 %v1410_v56 }
  0x78   : > { %795 = vrot.lane.b32.xlu1 %v793_v60, %s6660_s28  ;;  %845 = vrot.lane.b32.xlu0 %v843_v61, %s6666_s29  ;;  %v1409_v61 = vld [vmem:[%s6693_s1 + $0x18] sm:$0xff] }
  0x79   : > { %4548 = vmatprep.subr.mxu0 %v1409_v61 }
  0x7a   : > { %4549 = vmatpush3.msra.mxu0 %v1409_v61  ;;  %v1229_v61 = vld [vmem:[#allocation2 + $0xea] ss:$2 sm:$0xff] }
  0x7c   : > { %1007 = vrot.lane.b32.xlu1 %v1005_v62, %s6652_s22  ;;  %1050 = vrot.lane.b32.xlu0 %v1048_v63, %s6662_s23  ;;  %s6656_s22 = smov 40   ;;  %v814_v62 = vld [vmem:[#allocation2 + $0xea] ss:$2 sm:$0xff]  ;;  %v978_v63 = vld [vmem:[#allocation2 + $0xc9] ss:$2 sm:$0xff] }
  0x80   : > { %638 = vrot.lane.b32.xlu1 %v636_v0, %s4935_s17  ;;  %688 = vrot.lane.b32.xlu0 %v686_v1, %s4936_s18 }
  0x84   : > { %852 = vrot.lane.b32.xlu1 %v850_v2, %s6666_s29  ;;  %902 = vrot.lane.b32.xlu0 %v900_v3, %s6654_s30  ;;  %v1408_v2 = vld [vmem:[%s6693_s1 + $0x10] sm:$0xff]  ;;  %v1407_v3 = vld [vmem:[%s6693_s1 + $0x8] sm:$0xff] }
  0x85   : > { %4550 = vmatprep.subr.mxu0 %v1408_v2 }
  0x86   : > { %4551 = vmatpush3.msra.mxu0 %v1408_v2  ;;  %v1273_v2 = vld [vmem:[#allocation2 + $0xc7] ss:$2 sm:$0xff] }
  0x87   : > { %4552 = vmatprep.subr.mxu0 %v1407_v3 }
  0x88   : > { %1057 = vrot.lane.b32.xlu1 %v1055_v6, %s6662_s23  ;;  %1100 = vrot.lane.b32.xlu0 %v1098_v7, %s6656_s22 }
  0x89   : > { %4553 = vmatpush3.msra.mxu0 %v1407_v3 }
  0x8c   : > { %695 = vrot.lane.b32.xlu1 %v693_v8, %s4936_s18  ;;  %745 = vrot.lane.b32.xlu0 %v743_v9, %s4937_s19  ;;  %v1406_v8 = vld [vmem:[%s6693_s1] sm:$0xff] }
  0x8d   : > { %v1211_v9 = vld [vmem:[#allocation2 + $0x7e] ss:$2 sm:$0xff]  ;;  %4554 = vmatprep.subr.mxu0 %v1406_v8 }
  0x8e   : > { %4555 = vmatpush3.msra.mxu0 %v1406_v8 }
  0x90   : > { %909 = vrot.lane.b32.xlu1 %v907_v10, %s6654_s30  ;;  %959 = vrot.lane.b32.xlu0 %v957_v11, %s6670_s20  ;;  %s6690_s30 = smov 32   ;;  %v1355_v10 = vld [vmem:[#allocation2 + $0x5d] ss:$2 sm:$0xff] }
  0x94   : > { %1107 = vrot.lane.b32.xlu1 %v1105_v12, %s6656_s22  ;;  %1150 = vrot.lane.b32.xlu0 %v1148_v13, %s6658_s26  ;;  %s6668_s22 = smov 48   ;;  %v821_v13 = vld [vmem:[#allocation2 + $0x10e] ss:$2 sm:$0xff] }
  0x98   : > { %752 = vrot.lane.b32.xlu1 %v750_v15, %s4937_s19  ;;  %802 = vrot.lane.b32.xlu0 %v800_v16, %s6660_s28 }
  0x9c   : > { %966 = vrot.lane.b32.xlu1 %v964_v17, %s6670_s20  ;;  %1013 = vrot.lane.b32.xlu0 %v1011_v18, %s6690_s30  ;;  %v1029_v17 = vld [vmem:[#allocation2 + $0xd8] ss:$2 sm:$0xff]  ;;  %v1073_v18 = vld [vmem:[#allocation2 + $0xb5] ss:$2 sm:$0xff] }
  0xa0   : > { %1157 = vrot.lane.b32.xlu1 %v1155_v19, %s6658_s26  ;;  %1200 = vrot.lane.b32.xlu0 %v1198_v20, %s6668_s22  ;;  %s6664_s26 = smov 52  }
  0xa4   : > { %645 = vrot.lane.b32.xlu1 %v643_v21, %s4935_s17  ;;  %809 = vrot.lane.b32.xlu0 %v807_v22, %s6660_s28  ;;  %s6691_s28 = smov 24   ;;  %v1217_v21 = vld [vmem:[#allocation2 + $0xa2] ss:$2 sm:$0xff]  ;;  %v1261_v22 = vld [vmem:[#allocation2 + $0x7f] ss:$2 sm:$0xff] }
  0xa8   : > { %859 = vrot.lane.b32.xlu1 %v857_v24, %s6666_s29  ;;  %1019 = vrot.lane.b32.xlu0 %v1017_v25, %s6690_s30  ;;  %v878_v25 = vld [vmem:[#allocation2 + $0x10f] ss:$2 sm:$0xff] }
  0xac   : > { %1063 = vrot.lane.b32.xlu1 %v1061_v26, %s6662_s23  ;;  %1207 = vrot.lane.b32.xlu0 %v1205_v27, %s6668_s22  ;;  %s6694_s22 = smov 44   ;;  %v928_v26 = vld [vmem:[#allocation2 + $0xec] ss:$2 sm:$0xff] }
  0xb0   : > { %1250 = vrot.lane.b32.xlu1 %v1248_v28, %s6664_s26  ;;  %652 = vrot.lane.b32.xlu0 %v650_v29, %s4935_s17  ;;  %s6692_s17 = smov 40   ;;  %v1079_v29 = vld [vmem:[#allocation2 + $0xd9] ss:$2 sm:$0xff] }
  0xb4   : > { %702 = vrot.lane.b32.xlu1 %v700_v30, %s4936_s18  ;;  %866 = vrot.lane.b32.xlu0 %v864_v31, %s6666_s29  ;;  %s6695_s29 = smov 16   ;;  %v1123_v30 = vld [vmem:[#allocation2 + $0xb6] ss:$2 sm:$0xff] }
  0xb5   : > { %v603_v34 = vpop.permute.xlu0 %602  ;;  %v660_v37 = vpop.permute.xlu1 %659 }
  0xb6   : > { %606 = vst.msk [vmem:[#allocation3] sm:$0xff] %vm605_vm6, %v603_v34  ;;  %v1311_v34 = vld [vmem:[#allocation2 + $0x80] ss:$2 sm:$0xff] }
  0xb7   : > { %663 = vst.msk [vmem:[#allocation3] sm:$0xff] %vm662_vm7, %v660_v37  ;;  %v935_v37 = vld [vmem:[#allocation2 + $0x110] ss:$2 sm:$0xff] }
  0xb8   : > { %916 = vrot.lane.b32.xlu1 %v914_v32, %s6691_s28  ;;  %1069 = vrot.lane.b32.xlu0 %v1067_v33, %s6662_s23  ;;  %s6672_s23 = smov 56   ;;  %v1267_v33 = vld [vmem:[#allocation2 + $0xa3] ss:$2 sm:$0xff] }
  0xb9   : > { %v717_v38 = vpop.permute.xlu0 %716 }
  0xba   : > { %720 = vst.msk [vmem:[#allocation3] sm:$0xff] %vm719_vm8, %v717_v38  ;;  %v985_v38 = vld [vmem:[#allocation2 + $0xed] ss:$2 sm:$0xff] }
  0xbc   : > { %1113 = vrot.lane.b32.xlu1 %v1111_v35, %s6692_s17  ;;  %1257 = vrot.lane.b32.xlu0 %v1255_v36, %s6664_s26  ;;  %s6696_s26 = smov 28  }
  0xc0   : > { %1300 = vrot.lane.b32.xlu1 %v1298_v39, %s6672_s23  ;;  %709 = vrot.lane.b32.xlu0 %v707_v40, %s4936_s18  ;;  %s6700_s18 = smov 36  }
  0xc2   : > { %v668_v43 = vpop.permute.xlu1 %667  ;;  %v611_v44 = vpop.permute.xlu0 %610 }
  0xc3   : > { %613 = vst.msk [vmem:[#allocation3 + $0x8] sm:$0xff] %vm605_vm6, %v611_v44 }
  0xc4   : > { %670 = vst.msk [vmem:[#allocation3 + $0x8] sm:$0xff] %vm662_vm7, %v668_v43  ;;  %759 = vrot.lane.b32.xlu1 %v757_v41, %s4937_s19  ;;  %923 = vrot.lane.b32.xlu0 %v921_v42, %s6691_s28  ;;  %v1129_v41 = vld [vmem:[#allocation2 + $0xda] ss:$2 sm:$0xff]  ;;  %v1173_v42 = vld [vmem:[#allocation2 + $0xb7] ss:$2 sm:$0xff] }
  0xc6   : > { %v725_v47 = vpop.permute.xlu1 %724  ;;  %v774_v48 = vpop.permute.xlu0 %773 }
  0xc7   : > { %727 = vst.msk [vmem:[#allocation3 + $0x8] sm:$0xff] %vm719_vm8, %v725_v47 }
  0xc8   : > { %777 = vst.msk [vmem:[#allocation3] sm:$0xff] %vm776_vm9, %v774_v48  ;;  %973 = vrot.lane.b32.xlu1 %v971_v45, %s6670_s20  ;;  %1119 = vrot.lane.b32.xlu0 %v1117_v46, %s6692_s17  ;;  %s6699_s20 = smov 20   ;;  %v1317_v45 = vld [vmem:[#allocation2 + $0xa4] ss:$2 sm:$0xff]  ;;  %v1361_v46 = vld [vmem:[#allocation2 + $0x81] ss:$2 sm:$0xff] }
  0xca   : > { %v618_v53 = vpop.permute.xlu1 %617  ;;  %v782_v54 = vpop.permute.xlu0 %781 }
  0xcb   : > { %620 = vst.msk [vmem:[#allocation3 + $0x10] sm:$0xff] %vm605_vm6, %v618_v53  ;;  %v1179_v53 = vld [vmem:[#allocation2 + $0xdb] ss:$2 sm:$0xff] }
  0xcc   : > { %784 = vst.msk [vmem:[#allocation3 + $0x8] sm:$0xff] %vm776_vm9, %v782_v54  ;;  %1163 = vrot.lane.b32.xlu1 %v1161_v51, %s6694_s22  ;;  %1307 = vrot.lane.b32.xlu0 %v1305_v52, %s6672_s23  ;;  %s6674_s23 = smov 60   ;;  %v1223_v54 = vld [vmem:[#allocation2 + $0xc6] ss:$2 sm:$0xff] }
  0xce   : > { %v831_v59 = vpop.permute.xlu1 %830  ;;  %v625_v60 = vpop.permute.xlu0 %624 }
  0xcf   : > { %834 = vst.msk [vmem:[#allocation3] sm:$0xff] %vm833_vm10, %v831_v59 }
  0xd0   : > { %627 = vst.msk [vmem:[#allocation3 + $0x18] sm:$0xff] %vm605_vm6, %v625_v60  ;;  %1350 = vrot.lane.b32.xlu1 %v1348_v57, %s6674_s23  ;;  %766 = vrot.lane.b32.xlu0 %v764_v58, %s4937_s19  ;;  %s6697_s23 = smov 48   ;;  %s6698_s19 = smov 60   ;;  %v1367_v57 = vld [vmem:[#allocation2 + $0xa5] ss:$2 sm:$0xff] }
  0xd1   : > { %v1042_v58 = vld [vmem:[#allocation2 + $0x120] ss:$2 sm:$0xff] }
  0xd2   : > { %v675_v0 = vpop.permute.xlu1 %674  ;;  %v839_v1 = vpop.permute.xlu0 %838 }
  0xd3   : > { %677 = vst.msk [vmem:[#allocation3 + $0x10] sm:$0xff] %vm662_vm7, %v675_v0 }
  0xd4   : > { %841 = vst.msk [vmem:[#allocation3 + $0x8] sm:$0xff] %vm833_vm10, %v839_v1  ;;  %816 = vrot.lane.b32.xlu1 %v814_v62, %s6695_s29  ;;  %980 = vrot.lane.b32.xlu0 %v978_v63, %s6696_s26  ;;  %v1085_v62 = vld [vmem:[#allocation2 + $0xfd] ss:$2 sm:$0xff] }
  0xd5   : > { %v1092_v1 = vld [vmem:[#allocation2 + $0x121] ss:$2 sm:$0xff] }
  0xd6   : > { %v888_v6 = vpop.permute.xlu1 %887  ;;  %v682_v7 = vpop.permute.xlu0 %681 }
  0xd7   : > { %891 = vst.msk [vmem:[#allocation3] sm:$0xff] %vm890_vm11, %v888_v6  ;;  %v1135_v6 = vld [vmem:[#allocation2 + $0xfe] ss:$2 sm:$0xff] }
  0xd8   : > { %684 = vst.msk [vmem:[#allocation3 + $0x18] sm:$0xff] %vm662_vm7, %v682_v7  ;;  %1025 = vrot.lane.b32.xlu1 %v1023_v4, %s6690_s30  ;;  %1169 = vrot.lane.b32.xlu0 %v1167_v5, %s6694_s22  ;;  %v1279_v5 = vld [vmem:[#allocation2 + $0xeb] ss:$2 sm:$0xff] }
  0xda   : > { %v732_v11 = vpop.permute.xlu1 %731  ;;  %v896_v12 = vpop.permute.xlu0 %895 }
  0xdb   : > { %734 = vst.msk [vmem:[#allocation3 + $0x10] sm:$0xff] %vm719_vm8, %v732_v11 }
  0xdc   : > { %898 = vst.msk [vmem:[#allocation3 + $0x8] sm:$0xff] %vm890_vm11, %v896_v12  ;;  %1213 = vrot.lane.b32.xlu1 %v1211_v9, %s6697_s23  ;;  %1357 = vrot.lane.b32.xlu0 %v1355_v10, %s6698_s19  ;;  %v1142_v9 = vld [vmem:[#allocation2 + $0x122] ss:$2 sm:$0xff] }
  0xdd   : > { %v1323_v10 = vld [vmem:[#allocation2 + $0xc8] ss:$2 sm:$0xff] }
  0xde   : > { %v945_v15 = vpop.permute.xlu1 %944  ;;  %v739_v16 = vpop.permute.xlu0 %738 }
  0xdf   : > { %948 = vst.msk [vmem:[#allocation3] sm:$0xff] %vm947_vm12, %v945_v15 }
  0xe0   : > { %741 = vst.msk [vmem:[#allocation3 + $0x18] sm:$0xff] %vm719_vm8, %v739_v16  ;;  %823 = vrot.lane.b32.xlu1 %v821_v13, %s6695_s29  ;;  %873 = vrot.lane.b32.xlu0 %v871_v14, %s6699_s20  ;;  %s6701_s29 = smov 52   ;;  %v1329_v13 = vld [vmem:[#allocation2 + $0xec] ss:$2 sm:$0xff]  ;;  %v1185_v14 = vld [vmem:[#allocation2 + $0xff] ss:$2 sm:$0xff] }
  0xe2   : > { %v789_v19 = vpop.permute.xlu1 %788  ;;  %v953_v20 = vpop.permute.xlu0 %952 }
  0xe3   : > { %791 = vst.msk [vmem:[#allocation3 + $0x10] sm:$0xff] %vm776_vm9, %v789_v19 }
  0xe4   : > { %955 = vst.msk [vmem:[#allocation3 + $0x8] sm:$0xff] %vm947_vm12, %v953_v20  ;;  %1031 = vrot.lane.b32.xlu1 %v1029_v17, %s6690_s30  ;;  %1075 = vrot.lane.b32.xlu0 %v1073_v18, %s6700_s18  ;;  %v1192_v17 = vld [vmem:[#allocation2 + $0x123] ss:$2 sm:$0xff] }
  0xe5   : > { %v1373_v18 = vld [vmem:[#allocation2 + $0xc9] ss:$2 sm:$0xff] }
  0xe6   : > { %v1001_v23 = vpop.permute.xlu1 %1000  ;;  %v632_v24 = vpop.permute.xlu0 %631 }
  0xe7   : > { %1004 = vst.msk [vmem:[#allocation3] sm:$0xff] %vm1003_vm13, %v1001_v23 }
  0xe8   : > { %634 = vst.msk [vmem:[#allocation3 + $0x20] sm:$0xff] %vm605_vm6, %v632_v24  ;;  %1219 = vrot.lane.b32.xlu1 %v1217_v21, %s6697_s23  ;;  %1263 = vrot.lane.b32.xlu0 %v1261_v22, %s6701_s29  ;;  %v1379_v21 = vld [vmem:[#allocation2 + $0xed] ss:$2 sm:$0xff]  ;;  %v1235_v22 = vld [vmem:[#allocation2 + $0x10e] ss:$2 sm:$0xff] }
  0xea   : > { %v796_v27 = vpop.permute.xlu1 %795  ;;  %v846_v28 = vpop.permute.xlu0 %845 }
  0xeb   : > { %798 = vst.msk [vmem:[#allocation3 + $0x18] sm:$0xff] %vm776_vm9, %v796_v27 }
  0xec   : > { %848 = vst.msk [vmem:[#allocation3 + $0x10] sm:$0xff] %vm833_vm10, %v846_v28  ;;  %880 = vrot.lane.b32.xlu1 %v878_v25, %s6699_s20  ;;  %930 = vrot.lane.b32.xlu0 %v928_v26, %s6691_s28  ;;  %s6702_s20 = smov 56   ;;  %v1242_v25 = vld [vmem:[#allocation2 + $0x132] ss:$2 sm:$0xff]  ;;  %v1285_v26 = vld [vmem:[#allocation2 + $0x10f] ss:$2 sm:$0xff] }
  0xee   : > { %v1008_v31 = vpop.permute.xlu1 %1007  ;;  %v1051_v32 = vpop.permute.xlu0 %1050 }
  0xef   : > { %1010 = vst.msk [vmem:[#allocation3 + $0x8] sm:$0xff] %vm1003_vm13, %v1008_v31 }
  0xf0   : > { %1054 = vst.msk [vmem:[#allocation3] sm:$0xff] %vm1053_vm14, %v1051_v32  ;;  %1081 = vrot.lane.b32.xlu1 %v1079_v29, %s6700_s18  ;;  %1125 = vrot.lane.b32.xlu0 %v1123_v30, %s6692_s17  ;;  %v1292_v29 = vld [vmem:[#allocation2 + $0x133] ss:$2 sm:$0xff]  ;;  %v1335_v30 = vld [vmem:[#allocation2 + $0x110] ss:$2 sm:$0xff] }
  0xf2   : > { %v639_v35 = vpop.permute.xlu1 %638  ;;  %v689_v36 = vpop.permute.xlu0 %688 }
  0xf3   : > { %641 = vst.msk [vmem:[#allocation3 + $0x28] sm:$0xff] %vm605_vm6, %v639_v35 }
  0xf4   : > { %691 = vst.msk [vmem:[#allocation3 + $0x20] sm:$0xff] %vm662_vm7, %v689_v36  ;;  %1269 = vrot.lane.b32.xlu1 %v1267_v33, %s6701_s29  ;;  %1313 = vrot.lane.b32.xlu0 %v1311_v34, %s6702_s20  ;;  %v1342_v33 = vld [vmem:[#allocation2 + $0x134] ss:$2 sm:$0xff]  ;;  %v1385_v34 = vld [vmem:[#allocation2 + $0x111] ss:$2 sm:$0xff] }
  0xf6   : > { %v853_v39 = vpop.permute.xlu1 %852  ;;  %v903_v40 = vpop.permute.xlu0 %902 }
  0xf7   : > { %855 = vst.msk [vmem:[#allocation3 + $0x18] sm:$0xff] %vm833_vm10, %v853_v39 }
  0xf8   : > { %905 = vst.msk [vmem:[#allocation3 + $0x10] sm:$0xff] %vm890_vm11, %v903_v40  ;;  %937 = vrot.lane.b32.xlu1 %v935_v37, %s6691_s28  ;;  %987 = vrot.lane.b32.xlu0 %v985_v38, %s6696_s26  ;;  %v1392_v37 = vld [vmem:[#allocation2 + $0x135] ss:$2 sm:$0xff]  ;;  %s6678_s28 = smov 64  }
  0xfa   : > { %v1058_v43 = vpop.permute.xlu1 %1057  ;;  %v1101_v44 = vpop.permute.xlu0 %1100 }
  0xfb   : > { %1060 = vst.msk [vmem:[#allocation3 + $0x8] sm:$0xff] %vm1053_vm14, %v1058_v43 }
  0xfc   : > { %1104 = vst.msk [vmem:[#allocation3] sm:$0xff] %vm1103_vm15, %v1101_v44  ;;  %1131 = vrot.lane.b32.xlu1 %v1129_v41, %s6692_s17  ;;  %1175 = vrot.lane.b32.xlu0 %v1173_v42, %s6694_s22 }
  0xfe   : > { %v696_v47 = vpop.permute.xlu1 %695  ;;  %v746_v48 = vpop.permute.xlu0 %745 }
  0xff   : > { %698 = vst.msk [vmem:[#allocation3 + $0x28] sm:$0xff] %vm662_vm7, %v696_v47 }
 0x100   : > { %748 = vst.msk [vmem:[#allocation3 + $0x20] sm:$0xff] %vm719_vm8, %v746_v48  ;;  %1319 = vrot.lane.b32.xlu1 %v1317_v45, %s6702_s20  ;;  %1363 = vrot.lane.b32.xlu0 %v1361_v46, %s6698_s19 }
 0x102   : > { %v910_v51 = vpop.permute.xlu1 %909  ;;  %v960_v52 = vpop.permute.xlu0 %959 }
 0x103   : > { %912 = vst.msk [vmem:[#allocation3 + $0x18] sm:$0xff] %vm890_vm11, %v910_v51 }
 0x104   : > { %962 = vst.msk [vmem:[#allocation3 + $0x10] sm:$0xff] %vm947_vm12, %v960_v52  ;;  %994 = vrot.lane.b32.xlu1 %v992_v49, %s6696_s26  ;;  %1037 = vrot.lane.b32.xlu0 %v1035_v50, %s6690_s30  ;;  %s4092_s26 = sand.u32 1, %s5044_s25  }
 0x106   : > { %v1108_v55 = vpop.permute.xlu1 %1107  ;;  %v1151_v56 = vpop.permute.xlu0 %1150 }
 0x107   : > { %1110 = vst.msk [vmem:[#allocation3 + $0x8] sm:$0xff] %vm1103_vm15, %v1108_v55 }
 0x108   : > { %1154 = vst.msk [vmem:[#allocation3] sm:$0xff] %vm1153_vm0, %v1151_v56  ;;  %1181 = vrot.lane.b32.xlu1 %v1179_v53, %s6694_s22  ;;  %1225 = vrot.lane.b32.xlu0 %v1223_v54, %s6697_s23 }
 0x10a   : > { %v753_v59 = vpop.permute.xlu1 %752  ;;  %v803_v60 = vpop.permute.xlu0 %802 }
 0x10b   : > { %755 = vst.msk [vmem:[#allocation3 + $0x28] sm:$0xff] %vm719_vm8, %v753_v59 }
 0x10c   : > { %805 = vst.msk [vmem:[#allocation3 + $0x20] sm:$0xff] %vm776_vm9, %v803_v60  ;;  %1369 = vrot.lane.b32.xlu1 %v1367_v57, %s6698_s19  ;;  %1044 = vrot.lane.b32.xlu0 %v1042_v58, %s6690_s30 }
 0x10e   : > { %v967_v63 = vpop.permute.xlu1 %966  ;;  %v1014_v0 = vpop.permute.xlu0 %1013 }
 0x10f   : > { %969 = vst.msk [vmem:[#allocation3 + $0x18] sm:$0xff] %vm947_vm12, %v967_v63 }
 0x110   : > { %1016 = vst.msk [vmem:[#allocation3 + $0x10] sm:$0xff] %vm1003_vm13, %v1014_v0  ;;  %1231 = vrot.lane.b32.xlu0 %v1229_v61, %s6697_s23  ;;  %1087 = vrot.lane.b32.xlu1 %v1085_v62, %s6700_s18 }
 0x112   : > { %v1158_v3 = vpop.permute.xlu1 %1157  ;;  %v1201_v4 = vpop.permute.xlu0 %1200 }
 0x113   : > { %1160 = vst.msk [vmem:[#allocation3 + $0x8] sm:$0xff] %vm1153_vm0, %v1158_v3 }
 0x114   : > { %1204 = vst.msk [vmem:[#allocation3] sm:$0xff] %vm1203_vm1, %v1201_v4  ;;  %1094 = vrot.lane.b32.xlu0 %v1092_v1, %s6700_s18  ;;  %1275 = vrot.lane.b32.xlu1 %v1273_v2, %s6701_s29  ;;  %s6704_s18 = smov 96  }
 0x116   : > { %v646_v7 = vpop.permute.xlu1 %645  ;;  %v810_v8 = vpop.permute.xlu0 %809 }
 0x117   : > { %648 = vst.msk [vmem:[#allocation3 + $0x30] sm:$0xff] %vm605_vm6, %v646_v7 }
 0x118   : > { %812 = vst.msk [vmem:[#allocation3 + $0x28] sm:$0xff] %vm776_vm9, %v810_v8  ;;  %1281 = vrot.lane.b32.xlu0 %v1279_v5, %s6701_s29  ;;  %1137 = vrot.lane.b32.xlu1 %v1135_v6, %s6692_s17 }
 0x11a   : > { %v860_v11 = vpop.permute.xlu1 %859  ;;  %v1020_v12 = vpop.permute.xlu0 %1019 }
 0x11b   : > { %862 = vst.msk [vmem:[#allocation3 + $0x20] sm:$0xff] %vm833_vm10, %v860_v11 }
 0x11c   : > { %1022 = vst.msk [vmem:[#allocation3 + $0x18] sm:$0xff] %vm1003_vm13, %v1020_v12  ;;  %1144 = vrot.lane.b32.xlu0 %v1142_v9, %s6692_s17  ;;  %1325 = vrot.lane.b32.xlu1 %v1323_v10, %s6702_s20  ;;  %s6676_s17 = smov 96  }
 0x11e   : > { %v1064_v15 = vpop.permute.xlu1 %1063  ;;  %v1208_v16 = vpop.permute.xlu0 %1207 }
 0x11f   : > { %1066 = vst.msk [vmem:[#allocation3 + $0x10] sm:$0xff] %vm1053_vm14, %v1064_v15 }
 0x120   : > { %1210 = vst.msk [vmem:[#allocation3 + $0x8] sm:$0xff] %vm1203_vm1, %v1208_v16  ;;  %1331 = vrot.lane.b32.xlu0 %v1329_v13, %s6702_s20  ;;  %1187 = vrot.lane.b32.xlu1 %v1185_v14, %s6694_s22 }
 0x122   : > { %v1251_v19 = vpop.permute.xlu1 %1250  ;;  %v653_v20 = vpop.permute.xlu0 %652 }
 0x123   : > { %1254 = vst.msk [vmem:[#allocation3] sm:$0xff] %vm1253_vm2, %v1251_v19 }
 0x124   : > { %655 = vst.msk [vmem:[#allocation3 + $0x38] sm:$0xff] %vm605_vm6, %v653_v20  ;;  %1194 = vrot.lane.b32.xlu0 %v1192_v17, %s6694_s22  ;;  %1375 = vrot.lane.b32.xlu1 %v1373_v18, %s6698_s19  ;;  %vm1569_vm6 = vcmask 257024   ;;  %s6551_s22 = scalar_lea.sflag [#allocation11], %s4092_s26 }
 0x126   : > { %v703_v23 = vpop.permute.xlu1 %702  ;;  %v867_v24 = vpop.permute.xlu0 %866 }
 0x127   : > { %705 = vst.msk [vmem:[#allocation3 + $0x30] sm:$0xff] %vm662_vm7, %v703_v23 }
 0x128   : > { %869 = vst.msk [vmem:[#allocation3 + $0x28] sm:$0xff] %vm833_vm10, %v867_v24  ;;  %1381 = vrot.lane.b32.xlu0 %v1379_v21, %s6698_s19  ;;  %1237 = vrot.lane.b32.xlu1 %v1235_v22, %s6697_s23 }
 0x12a   : > { %v917_v27 = vpop.permute.xlu1 %916  ;;  %v1070_v28 = vpop.permute.xlu0 %1069 }
 0x12b   : > { %919 = vst.msk [vmem:[#allocation3 + $0x20] sm:$0xff] %vm890_vm11, %v917_v27 }
 0x12c   : > { %1072 = vst.msk [vmem:[#allocation3 + $0x18] sm:$0xff] %vm1053_vm14, %v1070_v28  ;;  %1244 = vrot.lane.b32.xlu1 %v1242_v25, %s6697_s23  ;;  %1287 = vrot.lane.b32.xlu0 %v1285_v26, %s6701_s29  ;;  %v1588_v28 = vld [vmem:[#allocation4 + $0x1] ss:$2 sm:$0xf] }
 0x12e   : > { %v1114_v31 = vpop.permute.xlu1 %1113  ;;  %v1258_v32 = vpop.permute.xlu0 %1257 }
 0x12f   : > { %1116 = vst.msk [vmem:[#allocation3 + $0x10] sm:$0xff] %vm1103_vm15, %v1114_v31 }
 0x130   : > { %1260 = vst.msk [vmem:[#allocation3 + $0x8] sm:$0xff] %vm1253_vm2, %v1258_v32  ;;  %1294 = vrot.lane.b32.xlu1 %v1292_v29, %s6701_s29  ;;  %1337 = vrot.lane.b32.xlu0 %v1335_v30, %s6702_s20  ;;  %v1922_v29 = vld [vmem:[#allocation4 + $0x5b] ss:$2 sm:$0xf]  ;;  %s6705_s29 = smov 64  }
 0x131   : > { %v1924_v30 = vrot.slane %v1922_v29, 4  ;;  %v2019_v29 = vld [vmem:[%s6639_s3 + $0xe0] sm:$0xff] }
 0x132   : > { %v1301_v35 = vpop.permute.xlu1 %1300  ;;  %v710_v36 = vpop.permute.xlu0 %709 }
 0x133   : > { %1304 = vst.msk [vmem:[#allocation3] sm:$0xff] %vm1303_vm3, %v1301_v35 }
 0x134   : > { %712 = vst.msk [vmem:[#allocation3 + $0x38] sm:$0xff] %vm662_vm7, %v710_v36  ;;  %1344 = vrot.lane.b32.xlu1 %v1342_v33, %s6702_s20  ;;  %1387 = vrot.lane.b32.xlu0 %v1385_v34, %s6698_s19  ;;  %v1620_v33 = vld [vmem:[#allocation4 + $0x2] ss:$2 sm:$0xf]  ;;  %vm1593_vm7 = vcmask 519424   ;;  %s4120_s20 = scalar_lea.hbm %s6647_s11, %s6543_s0 }
 0x135   : > { %v1949_v34 = vld [vmem:[#allocation4 + $0x5c] ss:$2 sm:$0xf] }
 0x136   : > { %v760_v38 = vpop.permute.xlu1 %759  ;;  %v924_v39 = vpop.permute.xlu0 %923  ;;  %v1951_v35 = vrot.slane %v1949_v34, 4  ;;  %v2017_v34 = vld [vmem:[%s6639_s3 + $0xd0] sm:$0xff] }
 0x137   : > { %762 = vst.msk [vmem:[#allocation3 + $0x30] sm:$0xff] %vm719_vm8, %v760_v38 }
 0x138   : > { %926 = vst.msk [vmem:[#allocation3 + $0x28] sm:$0xff] %vm890_vm11, %v924_v39  ;;  %1394 = vrot.lane.b32.xlu1 %v1392_v37, %s6698_s19  ;;  %1590 = vrot.lane.b32.xlu0 %v1588_v28, %s6690_s30  ;;  %v1652_v39 = vld [vmem:[#allocation4 + $0x3] ss:$2 sm:$0xf] }
 0x139   : > { %v2004_v28 = vld [vmem:[%s6639_s3 + $0x68] sm:$0xff] }
 0x13a   : > { %v974_v40 = vpop.permute.xlu1 %973  ;;  %v1120_v41 = vpop.permute.xlu0 %1119 }
 0x13b   : > { %976 = vst.msk [vmem:[#allocation3 + $0x20] sm:$0xff] %vm947_vm12, %v974_v40  ;;  %v1976_v40 = vld [vmem:[#allocation4 + $0x5d] ss:$2 sm:$0xf] }
 0x13c   : > { %1122 = vst.msk [vmem:[#allocation3 + $0x18] sm:$0xff] %vm1103_vm15, %v1120_v41  ;;  %1925 = vrot.lane.b32.xlu1 %v1924_v30, %s6690_s30  ;;  %1622 = vrot.lane.b32.xlu0 %v1620_v33, %s6678_s28  ;;  %v1978_v41 = vrot.slane %v1976_v40, 4  ;;  %v2002_v33 = vld [vmem:[%s6639_s3 + $0x58] sm:$0xff]  ;;  %v2000_v40 = vld [vmem:[%s6639_s3 + $0x48] sm:$0xff] }
 0x13e   : > { %v1164_v42 = vpop.permute.xlu1 %1163  ;;  %v1308_v43 = vpop.permute.xlu0 %1307 }
 0x13f   : > { %1166 = vst.msk [vmem:[#allocation3 + $0x10] sm:$0xff] %vm1153_vm0, %v1164_v42 }
 0x140   : > { %1310 = vst.msk [vmem:[#allocation3 + $0x8] sm:$0xff] %vm1303_vm3, %v1308_v43  ;;  %1952 = vrot.lane.b32.xlu1 %v1951_v35, %s6678_s28  ;;  %1654 = vrot.lane.b32.xlu0 %v1652_v39, %s6676_s17  ;;  %v2001_v35 = vld [vmem:[%s6639_s3 + $0x50] sm:$0xff] }
 0x142   : > { %v1351_v44 = vpop.permute.xlu1 %1350  ;;  %v767_v45 = vpop.permute.xlu0 %766 }
 0x143   : > { %1354 = vst.msk [vmem:[#allocation3] sm:$0xff] %vm1353_vm4, %v1351_v44 }
 0x144   : > { %769 = vst.msk [vmem:[#allocation3 + $0x38] sm:$0xff] %vm719_vm8, %v767_v45  ;;  %1979 = vrot.lane.b32.xlu1 %v1978_v41, %s6676_s17  ;;  %vm1576_vm8 = vcmask 261124   ;;  %v2015_v41 = vld [vmem:[%s6639_s3 + $0xc0] sm:$0xff] }
 0x146   : > { %v817_v46 = vpop.permute.xlu1 %816  ;;  %v981_v47 = vpop.permute.xlu0 %980 }
 0x147   : > { %819 = vst.msk [vmem:[#allocation3 + $0x30] sm:$0xff] %vm776_vm9, %v817_v46 }
 0x148   : > { %983 = vst.msk [vmem:[#allocation3 + $0x28] sm:$0xff] %vm947_vm12, %v981_v47 }
 0x14a   : > { %v1026_v48 = vpop.permute.xlu1 %1025  ;;  %v1170_v49 = vpop.permute.xlu0 %1169  ;;  %v1398_v50 = vld [vmem:[#allocation3] sm:$0xff] }
 0x14b   : > { %1028 = vst.msk [vmem:[#allocation3 + $0x20] sm:$0xff] %vm1003_vm13, %v1026_v48  ;;  %4556 = vmatprep.mubr.msk.f32.mxu0 %vm1421_vm5, %v1398_v50  ;;  %v1568_v50 = vld [vmem:[#allocation4] ss:$2 sm:$0xf] }
 0x14c   : > { %1172 = vst.msk [vmem:[#allocation3 + $0x18] sm:$0xff] %vm1153_vm0, %v1170_v49 }
 0x14d   : > { %1570 = vst.msk [vmem:[#allocation5] sm:$0xf] %vm1569_vm6, %v1568_v50  ;;  %v1997_v50 = vld [vmem:[%s6639_s3 + $0x30] sm:$0xff] }
 0x14e   : > { %v1214_v51 = vpop.permute.xlu1 %1213  ;;  %v1358_v52 = vpop.permute.xlu0 %1357 }
 0x14f   : > { %1216 = vst.msk [vmem:[#allocation3 + $0x10] sm:$0xff] %vm1203_vm1, %v1214_v51 }
 0x150   : > { %1360 = vst.msk [vmem:[#allocation3 + $0x8] sm:$0xff] %vm1353_vm4, %v1358_v52  ;;  %v1897_v52 = vld [vmem:[#allocation4 + $0x5a] ss:$2 sm:$0xf] }
 0x152   : > { %v824_v53 = vpop.permute.xlu1 %823  ;;  %v874_v54 = vpop.permute.xlu0 %873 }
 0x153   : > { %826 = vst.msk [vmem:[#allocation3 + $0x38] sm:$0xff] %vm776_vm9, %v824_v53  ;;  %v1899_v53 = vrot.slane %v1897_v52, 4  ;;  %vm1602_vm9 = vcmask 523524  }
 0x154   : > { %876 = vst.msk [vmem:[#allocation3 + $0x30] sm:$0xff] %vm833_vm10, %v874_v54 }
 0x155   : > { %1901 = vst.msk [vmem:[#allocation5 + $0x38] sm:$0xf0] %vm1576_vm8, %v1899_v53 }
 0x156   : > { %v1032_v55 = vpop.permute.xlu1 %1031  ;;  %v1076_v56 = vpop.permute.xlu0 %1075 }
 0x157   : > { %v1399_v57 = vld [vmem:[#allocation3 + $0x8] sm:$0xff]  ;;  %1034 = vst.msk [vmem:[#allocation3 + $0x28] sm:$0xff] %vm1003_vm13, %v1032_v55 }
 0x158   : > { %1078 = vst.msk [vmem:[#allocation3 + $0x20] sm:$0xff] %vm1053_vm14, %v1076_v56  ;;  %4557 = vmatmul.mubr.msk.f32.vlgmr.msra.gmra.mxu0 %vm1421_vm5, %v1399_v57 }
 0x15a   : > { %v1220_v58 = vpop.permute.xlu1 %1219  ;;  %v1264_v59 = vpop.permute.xlu0 %1263 }
 0x15b   : > { %1222 = vst.msk [vmem:[#allocation3 + $0x18] sm:$0xff] %vm1203_vm1, %v1220_v58  ;;  %v5574_v58 = vld [vmem:[%s6703_s2] ss:$0 sm:$0xff] }
 0x15c   : > { %1266 = vst.msk [vmem:[#allocation3 + $0x10] sm:$0xff] %vm1253_vm2, %v1264_v59 }
 0x15e   : > { %v881_v60 = vpop.permute.xlu1 %880  ;;  %v931_v61 = vpop.permute.xlu0 %930 }
 0x15f   : > { %883 = vst.msk [vmem:[#allocation3 + $0x38] sm:$0xff] %vm833_vm10, %v881_v60  ;;  %vm1625_vm10 = vcmask 781824  }
 0x160   : > { %933 = vst.msk [vmem:[#allocation3 + $0x30] sm:$0xff] %vm890_vm11, %v931_v61 }
 0x162   : > { %v1082_v62 = vpop.permute.xlu1 %1081  ;;  %v1126_v63 = vpop.permute.xlu0 %1125 }
 0x163   : > { %1084 = vst.msk [vmem:[#allocation3 + $0x28] sm:$0xff] %vm1053_vm14, %v1082_v62 }
 0x164   : > { %1128 = vst.msk [vmem:[#allocation3 + $0x20] sm:$0xff] %vm1103_vm15, %v1126_v63 }
 0x166   : > { %v1270_v0 = vpop.permute.xlu1 %1269  ;;  %v1314_v1 = vpop.permute.xlu0 %1313 }
 0x167   : > { %1272 = vst.msk [vmem:[#allocation3 + $0x18] sm:$0xff] %vm1253_vm2, %v1270_v0 }
 0x168   : > { %1316 = vst.msk [vmem:[#allocation3 + $0x10] sm:$0xff] %vm1303_vm3, %v1314_v1 }
 0x16a   : > { %v938_v2 = vpop.permute.xlu1 %937  ;;  %v988_v3 = vpop.permute.xlu0 %987 }
 0x16b   : > { %940 = vst.msk [vmem:[#allocation3 + $0x38] sm:$0xff] %vm890_vm11, %v938_v2  ;;  %vm1634_vm11 = vcmask 785924  }
 0x16c   : > { %990 = vst.msk [vmem:[#allocation3 + $0x30] sm:$0xff] %vm947_vm12, %v988_v3 }
 0x16e   : > { %v1132_v4 = vpop.permute.xlu1 %1131  ;;  %v1176_v5 = vpop.permute.xlu0 %1175 }
 0x16f   : > { %1134 = vst.msk [vmem:[#allocation3 + $0x28] sm:$0xff] %vm1103_vm15, %v1132_v4 }
 0x170   : > { %1178 = vst.msk [vmem:[#allocation3 + $0x20] sm:$0xff] %vm1153_vm0, %v1176_v5 }
 0x172   : > { %v1320_v6 = vpop.permute.xlu1 %1319  ;;  %v1364_v7 = vpop.permute.xlu0 %1363 }
 0x173   : > { %1322 = vst.msk [vmem:[#allocation3 + $0x18] sm:$0xff] %vm1303_vm3, %v1320_v6 }
 0x174   : > { %1366 = vst.msk [vmem:[#allocation3 + $0x10] sm:$0xff] %vm1353_vm4, %v1364_v7 }
 0x176   : > { %v995_v8 = vpop.permute.xlu1 %994  ;;  %v1038_v9 = vpop.permute.xlu0 %1037 }
 0x177   : > { %997 = vst.msk [vmem:[#allocation3 + $0x38] sm:$0xff] %vm947_vm12, %v995_v8  ;;  %vm1657_vm12 = vcmask 1044224  }
 0x178   : > { %1040 = vst.msk [vmem:[#allocation3 + $0x30] sm:$0xff] %vm1003_vm13, %v1038_v9 }
 0x17a   : > { %v1182_v10 = vpop.permute.xlu1 %1181  ;;  %v1226_v11 = vpop.permute.xlu0 %1225 }
 0x17b   : > { %v1400_v12 = vld [vmem:[#allocation3 + $0x10] sm:$0xff]  ;;  %1184 = vst.msk [vmem:[#allocation3 + $0x28] sm:$0xff] %vm1153_vm0, %v1182_v10 }
 0x17c   : > { %1228 = vst.msk [vmem:[#allocation3 + $0x20] sm:$0xff] %vm1203_vm1, %v1226_v11  ;;  %4559 = vmatprep.mubr.msk.f32.mxu0 %vm1421_vm5, %v1400_v12 }
 0x17e   : > { %v1370_v13 = vpop.permute.xlu1 %1369  ;;  %v1045_v14 = vpop.permute.xlu0 %1044 }
 0x17f   : > { %1372 = vst.msk [vmem:[#allocation3 + $0x18] sm:$0xff] %vm1353_vm4, %v1370_v13 }
 0x180   : > { %1047 = vst.msk [vmem:[#allocation3 + $0x38] sm:$0xff] %vm1003_vm13, %v1045_v14  ;;  %vm1666_vm13 = vcmask 1048324   ;;  %v2022_v14 = vld [vmem:[%s6639_s3 + $0xf8] sm:$0xff] }
 0x181   : > { %4308 = vmatprep.subr.mxu1 %v2022_v14  ;;  %v2007_v14 = vld [vmem:[%s6639_s3 + $0x80] sm:$0xff] }
 0x182   : > { %v1232_v15 = vpop.permute.xlu0 %1231  ;;  %v1088_v16 = vpop.permute.xlu1 %1087 }
 0x183   : > { %1234 = vst.msk [vmem:[#allocation3 + $0x28] sm:$0xff] %vm1203_vm1, %v1232_v15 }
 0x184   : > { %1090 = vst.msk [vmem:[#allocation3 + $0x30] sm:$0xff] %vm1053_vm14, %v1088_v16 }
 0x186   : > { %v1095_v17 = vpop.permute.xlu0 %1094  ;;  %v1401_v18 = vld [vmem:[#allocation3 + $0x18] sm:$0xff]  ;;  %v1276_v19 = vpop.permute.xlu1 %1275 }
 0x187   : > { %1097 = vst.msk [vmem:[#allocation3 + $0x38] sm:$0xff] %vm1053_vm14, %v1095_v17  ;;  %4560 = vmatmul.mubr.msk.f32.gmra.mxu0 %vm1421_vm5, %v1401_v18  ;;  %vm1559_vm14 = vcmask 261120  }
 0x188   : > { %1278 = vst.msk [vmem:[#allocation3 + $0x20] sm:$0xff] %vm1253_vm2, %v1276_v19 }
 0x18a   : > { %v1282_v20 = vpop.permute.xlu0 %1281  ;;  %v1138_v21 = vpop.permute.xlu1 %1137 }
 0x18b   : > { %1284 = vst.msk [vmem:[#allocation3 + $0x28] sm:$0xff] %vm1253_vm2, %v1282_v20  ;;  %v2006_v20 = vld [vmem:[%s6639_s3 + $0x78] sm:$0xff] }
 0x18c   : > { %1140 = vst.msk [vmem:[#allocation3 + $0x30] sm:$0xff] %vm1103_vm15, %v1138_v21  ;;  %v2021_v21 = vld [vmem:[%s6639_s3 + $0xf0] sm:$0xff]  ;;  %4309 = vmatpush3.msra.mxu1 %v2006_v20  ;;  %v1991_v20 = vld [vmem:[%s6639_s3] sm:$0xff] }
 0x18d   : > { %4310 = vmatprep.subr.mxu1 %v2021_v21  ;;  %v2037_v21 = vld [vmem:[%s6639_s3 + $0x170] sm:$0xff] }
 0x18e   : > { %v1145_v22 = vpop.permute.xlu0 %1144  ;;  %v1326_v23 = vpop.permute.xlu1 %1325 }
 0x18f   : > { %1147 = vst.msk [vmem:[#allocation3 + $0x38] sm:$0xff] %vm1103_vm15, %v1145_v22  ;;  %vm4953_vm15 = vmmov 0  }
 0x190   : > { %1328 = vst.msk [vmem:[#allocation3 + $0x20] sm:$0xff] %vm1303_vm3, %v1326_v23 }
 0x192   : > { %v1332_v24 = vpop.permute.xlu0 %1331  ;;  %v1188_v25 = vpop.permute.xlu1 %1187 }
 0x193   : > { %1334 = vst.msk [vmem:[#allocation3 + $0x28] sm:$0xff] %vm1303_vm3, %v1332_v24  ;;  %v2005_v24 = vld [vmem:[%s6639_s3 + $0x70] sm:$0xff] }
 0x194   : > { %1190 = vst.msk [vmem:[#allocation3 + $0x30] sm:$0xff] %vm1153_vm0, %v1188_v25  ;;  %v2020_v25 = vld [vmem:[%s6639_s3 + $0xe8] sm:$0xff]  ;;  %4311 = vmatpush3.msra.mxu1 %v2005_v24 }
 0x195   : > { %4312 = vmatprep.subr.mxu1 %v2020_v25  ;;  %v2052_v24 = vld [vmem:[%s6639_s3 + $0x1e8] sm:$0xff] }
 0x196   : > { %v1195_v26 = vpop.permute.xlu0 %1194  ;;  %v1376_v27 = vpop.permute.xlu1 %1375  ;;  %4313 = vmatpush3.msra.mxu1 %v2004_v28 }
 0x197   : > { %1197 = vst.msk [vmem:[#allocation3 + $0x38] sm:$0xff] %vm1153_vm0, %v1195_v26  ;;  %4314 = vmatprep.subr.mxu1 %v2019_v29  ;;  %v2051_v29 = vld [vmem:[%s6639_s3 + $0x1e0] sm:$0xff]  ;;  %vm4076_vm0 = vcmask 57344  }
 0x198   : > { %1378 = vst.msk [vmem:[#allocation3 + $0x20] sm:$0xff] %vm1353_vm4, %v1376_v27 }
 0x19a   : > { %v1382_v31 = vpop.permute.xlu0 %1381  ;;  %v1238_v32 = vpop.permute.xlu1 %1237 }
 0x19b   : > { %1384 = vst.msk [vmem:[#allocation3 + $0x28] sm:$0xff] %vm1353_vm4, %v1382_v31  ;;  %v2003_v31 = vld [vmem:[%s6639_s3 + $0x60] sm:$0xff] }
 0x19c   : > { %1240 = vst.msk [vmem:[#allocation3 + $0x30] sm:$0xff] %vm1203_vm1, %v1238_v32  ;;  %v2018_v32 = vld [vmem:[%s6639_s3 + $0xd8] sm:$0xff]  ;;  %4315 = vmatpush3.msra.mxu1 %v2003_v31 }
 0x19d   : > { %4316 = vmatprep.subr.mxu1 %v2018_v32  ;;  %v2050_v31 = vld [vmem:[%s6639_s3 + $0x1d8] sm:$0xff] }
 0x19e   : > { %v1245_v36 = vpop.permute.xlu1 %1244  ;;  %v1288_v38 = vpop.permute.xlu0 %1287  ;;  %4317 = vmatpush3.msra.mxu1 %v2002_v33  ;;  %v2034_v32 = vld [vmem:[%s6639_s3 + $0x158] sm:$0xff]  ;;  %v2049_v33 = vld [vmem:[%s6639_s3 + $0x1d0] sm:$0xff] }
 0x19f   : > { %v1402_v37 = vld [vmem:[#allocation3 + $0x20] sm:$0xff]  ;;  %1247 = vst.msk [vmem:[#allocation3 + $0x38] sm:$0xff] %vm1203_vm1, %v1245_v36  ;;  %4318 = vmatprep.subr.mxu1 %v2017_v34  ;;  %v2033_v34 = vld [vmem:[%s6639_s3 + $0x150] sm:$0xff] }
 0x1a0   : > { %4562 = vmatprep.mubr.msk.f32.mxu0 %vm1421_vm5, %v1402_v37  ;;  %1290 = vst.msk [vmem:[#allocation3 + $0x30] sm:$0xff] %vm1253_vm2, %v1288_v38  ;;  %v2016_v36 = vld [vmem:[%s6639_s3 + $0xc8] sm:$0xff]  ;;  %4319 = vmatpush3.msra.mxu1 %v2001_v35 }
 0x1a1   : > { %4320 = vmatprep.subr.mxu1 %v2016_v36  ;;  %v2048_v35 = vld [vmem:[%s6639_s3 + $0x1c8] sm:$0xff] }
 0x1a2   : > { %v1403_v42 = vld [vmem:[#allocation3 + $0x28] sm:$0xff]  ;;  %v1295_v43 = vpop.permute.xlu1 %1294  ;;  %v1338_v44 = vpop.permute.xlu0 %1337  ;;  %4321 = vmatpush3.msra.mxu1 %v2000_v40  ;;  %v2047_v40 = vld [vmem:[%s6639_s3 + $0x1c0] sm:$0xff] }
 0x1a3   : > { %4563 = vmatmul.mubr.msk.f32.gmra.mxu0 %vm1421_vm5, %v1403_v42  ;;  %1297 = vst.msk [vmem:[#allocation3 + $0x38] sm:$0xff] %vm1253_vm2, %v1295_v43  ;;  %4322 = vmatprep.subr.mxu1 %v2015_v41 }
 0x1a4   : > { %1340 = vst.msk [vmem:[#allocation3 + $0x30] sm:$0xff] %vm1303_vm3, %v1338_v44 }
 0x1a6   : > { %v1345_v45 = vpop.permute.xlu1 %1344  ;;  %v1388_v46 = vpop.permute.xlu0 %1387 }
 0x1a7   : > { %1347 = vst.msk [vmem:[#allocation3 + $0x38] sm:$0xff] %vm1303_vm3, %v1345_v45  ;;  %v1999_v45 = vld [vmem:[%s6639_s3 + $0x40] sm:$0xff] }
 0x1a8   : > { %1390 = vst.msk [vmem:[#allocation3 + $0x30] sm:$0xff] %vm1353_vm4, %v1388_v46  ;;  %v2014_v46 = vld [vmem:[%s6639_s3 + $0xb8] sm:$0xff]  ;;  %4323 = vmatpush3.msra.mxu1 %v1999_v45 }
 0x1a9   : > { %4324 = vmatprep.subr.mxu1 %v2014_v46  ;;  %v2030_v46 = vld [vmem:[%s6639_s3 + $0x138] sm:$0xff] }
 0x1aa   : > { %v1395_v47 = vpop.permute.xlu1 %1394  ;;  %v1591_v51 = vpop.permute.xlu0 %1590 }
 0x1ab   : > { %1397 = vst.msk [vmem:[#allocation3 + $0x38] sm:$0xff] %vm1353_vm4, %v1395_v47  ;;  %v1998_v47 = vld [vmem:[%s6639_s3 + $0x38] sm:$0xff] }
 0x1ac   : > { %1594 = vst.msk [vmem:[#allocation5] sm:$0xf] %vm1593_vm7, %v1591_v51  ;;  %4325 = vmatpush3.msra.mxu1 %v1998_v47  ;;  %v2012_v51 = vld [vmem:[%s6639_s3 + $0xa8] sm:$0xff] }
 0x1ae   : > { %v1926_v54 = vpop.permute.xlu1 %1925  ;;  %v1623_v55 = vpop.permute.xlu0 %1622 }
 0x1af   : > { %v1404_v48 = vld [vmem:[#allocation3 + $0x30] sm:$0xff]  ;;  %1928 = vst.msk [vmem:[#allocation5 + $0x38] sm:$0xf0] %vm1602_vm9, %v1926_v54 }
 0x1b0   : > { %4565 = vmatprep.mubr.msk.f32.mxu0 %vm1421_vm5, %v1404_v48  ;;  %1626 = vst.msk [vmem:[#allocation5] sm:$0xf] %vm1625_vm10, %v1623_v55  ;;  %v2013_v48 = vld [vmem:[%s6639_s3 + $0xb0] sm:$0xff] }
 0x1b1   : > { %4326 = vmatprep.subr.mxu1 %v2013_v48 }
 0x1b2   : > { %v1405_v49 = vld [vmem:[#allocation3 + $0x38] sm:$0xff]  ;;  %v1953_v56 = vpop.permute.xlu1 %1952  ;;  %v1655_v57 = vpop.permute.xlu0 %1654  ;;  %4327 = vmatpush3.msra.mxu1 %v1997_v50 }
 0x1b3   : > { %4566 = vmatmul.mubr.msk.f32.gmra.mxu0 %vm1421_vm5, %v1405_v49  ;;  %1955 = vst.msk [vmem:[#allocation5 + $0x38] sm:$0xf0] %vm1634_vm11, %v1953_v56  ;;  %4328 = vmatprep.subr.mxu1 %v2012_v51 }
 0x1b4   : > { %1658 = vst.msk [vmem:[#allocation5] sm:$0xf] %vm1657_vm12, %v1655_v57  ;;  %v1996_v57 = vld [vmem:[%s6639_s3 + $0x28] sm:$0xff] }
 0x1b5   : > { %4329 = vmatpush3.msra.mxu1 %v1996_v57 }
 0x1b6   : > { %v1980_v59 = vpop.permute.xlu1 %1979 }
 0x1b7   : > { %1982 = vst.msk [vmem:[#allocation5 + $0x38] sm:$0xf0] %vm1666_vm13, %v1980_v59  ;;  %v2011_v59 = vld [vmem:[%s6639_s3 + $0xa0] sm:$0xff] }
 0x1b8   : > { %4330 = vmatprep.subr.mxu1 %v2011_v59  ;;  %v2028_v59 = vld [vmem:[%s6639_s3 + $0x128] sm:$0xff] }
 0x218   : > { %v4558_v60 = vpop.f32.mrf.mxu0 }
 0x219   : > { %v1518_v61 = vadd.f32 %v4558_v60, %v5574_v58 }
 0x21a   : > { %v1512_v62 = vpop.f32.mrf.mxu0 }
 0x21b   : > { %v1552_v63 = vmax.f32 %v1518_v61, 0.0  ;;  %v1513_v0 = vadd.f32 %v5574_v58, %v1512_v62  ;;  %v1995_v62 = vld [vmem:[%s6639_s3 + $0x20] sm:$0xff] }
 0x21c   : > { %4331 = vmatpush3.msra.mxu1 %v1995_v62 }
 0x21d   : > { %1561 = vst.msk [vmem:[#allocation4 + $0x15] sm:$0xff] %vm1559_vm14, %v1552_v63  ;;  %v1551_v1 = vmax.f32 %v1513_v0, 0.0  ;;  %v2010_v63 = vld [vmem:[%s6639_s3 + $0x98] sm:$0xff] }
 0x21e   : > { %4332 = vmatprep.subr.mxu1 %v2010_v63 }
 0x21f   : > { %1560 = vst.msk [vmem:[#allocation4 + $0xb] sm:$0xff] %vm1559_vm14, %v1551_v1  ;;  %v1994_v1 = vld [vmem:[%s6639_s3 + $0x18] sm:$0xff] }
 0x220   : > { %4333 = vmatpush3.msra.mxu1 %v1994_v1 }
 0x224   : > { %v1806_v2 = vld [vmem:[#allocation4 + $0x15] ss:$2 sm:$0xf]  ;;  %v1628_v5 = vld [vmem:[#allocation4 + $0x16] ss:$2 sm:$0xf] }
 0x225   : > { %v1596_v3 = vld [vmem:[#allocation4 + $0x15] ss:$2 sm:$0xf]  ;;  %1808 = vrot.lane.b32.xlu0 %v1806_v2, %s6690_s30  ;;  %v1833_v6 = vld [vmem:[#allocation4 + $0x16] ss:$2 sm:$0xf] }
 0x226   : > { %v1598_v4 = vrot.slane %v1596_v3, 4  ;;  %v1630_v7 = vrot.slane %v1628_v5, 4  ;;  %v1660_v8 = vld [vmem:[#allocation4 + $0x17] ss:$2 sm:$0xf] }
 0x227   : > { %v1791_v9 = vld [vmem:[#allocation4 + $0x14] ss:$2 sm:$0xf]  ;;  %v1684_v12 = vld [vmem:[#allocation4 + $0xa] ss:$2 sm:$0xf] }
 0x228   : > { %1599 = vrot.lane.b32.xlu1 %v1598_v4, %s6690_s30  ;;  %v1572_v10 = vld [vmem:[#allocation4 + $0x14] ss:$2 sm:$0xf]  ;;  %1792 = vst.msk [vmem:[#allocation5 + $0x10] sm:$0xf] %vm1569_vm6, %v1791_v9  ;;  %v1662_v15 = vrot.slane %v1660_v8, 4 }
 0x229   : > { %1835 = vrot.lane.b32.xlu0 %v1833_v6, %s6678_s28  ;;  %v1574_v11 = vrot.slane %v1572_v10, 4  ;;  %v1860_v13 = vld [vmem:[#allocation4 + $0x17] ss:$2 sm:$0xf]  ;;  %1685 = vst.msk [vmem:[#allocation5 + $0x8] sm:$0xf] %vm1569_vm6, %v1684_v12 }
 0x22a   : > { %v1702_v16 = vld [vmem:[#allocation4 + $0xb] ss:$2 sm:$0xf]  ;;  %v1732_v17 = vld [vmem:[#allocation4 + $0xc] ss:$2 sm:$0xf] }
 0x22b   : > { %1577 = vst.msk [vmem:[#allocation5] sm:$0xf0] %vm1576_vm8, %v1574_v11  ;;  %v1762_v18 = vld [vmem:[#allocation4 + $0xd] ss:$2 sm:$0xf]  ;;  %v2008_v9 = vld [vmem:[%s6639_s3 + $0x88] sm:$0xff] }
 0x22c   : > { %1631 = vrot.lane.b32.xlu1 %v1630_v7, %s6678_s28  ;;  %v2009_v4 = vld [vmem:[%s6639_s3 + $0x90] sm:$0xff]  ;;  %v2054_v5 = vld [vmem:[%s6639_s3 + $0x1f8] sm:$0xff]  ;;  %v1992_v12 = vld [vmem:[%s6639_s3 + $0x8] sm:$0xff] }
 0x22d   : > { %1862 = vrot.lane.b32.xlu0 %v1860_v13, %s6676_s17  ;;  %v1993_v7 = vld [vmem:[%s6639_s3 + $0x10] sm:$0xff]  ;;  %4346 = vmatprep.subr.mxu0 %v2054_v5  ;;  %v2038_v13 = vld [vmem:[%s6639_s3 + $0x178] sm:$0xff] }
 0x22e   : > { %4334 = vmatprep.subr.mxu1 %v2009_v4  ;;  %4347 = vmatpush3.msra.mxu0 %v2038_v13  ;;  %v2042_v4 = vld [vmem:[%s6639_s3 + $0x198] sm:$0xff] }
 0x22f   : > { %4335 = vmatpush3.msra.mxu1 %v1993_v7  ;;  %v2026_v7 = vld [vmem:[%s6639_s3 + $0x118] sm:$0xff] }
 0x230   : > { %1663 = vrot.lane.b32.xlu1 %v1662_v15, %s6676_s17  ;;  %4336 = vmatprep.subr.mxu1 %v2008_v9  ;;  %v2041_v9 = vld [vmem:[%s6639_s3 + $0x190] sm:$0xff] }
 0x231   : > { %1704 = vrot.lane.b32.xlu0 %v1702_v16, %s6690_s30  ;;  %4337 = vmatpush3.msra.mxu1 %v1992_v12  ;;  %v2040_v12 = vld [vmem:[%s6639_s3 + $0x188] sm:$0xff] }
 0x232   : > { %4338 = vmatprep.subr.mxu1 %v2007_v14 }
 0x233   : > { %4339 = vmatpush3.msra.mxu1 %v1991_v20 }
 0x235   : > { %1734 = vrot.lane.b32.xlu0 %v1732_v17, %s6678_s28  ;;  %v2053_v17 = vld [vmem:[%s6639_s3 + $0x1f0] sm:$0xff] }
 0x236   : > { %4348 = vmatprep.subr.mxu0 %v2053_v17 }
 0x237   : > { %4349 = vmatpush3.msra.mxu0 %v2037_v21 }
 0x238   : > { %4350 = vmatprep.subr.mxu0 %v2052_v24 }
 0x239   : > { %1764 = vrot.lane.b32.xlu0 %v1762_v18, %s6676_s17 }
 0x247   : > { %v4561_v19 = vpop.f32.mrf.mxu0 }
 0x248   : > { %v1528_v22 = vadd.f32 %v4561_v19, %v5574_v58 }
 0x249   : > { %v1522_v23 = vpop.f32.mrf.mxu0 }
 0x24a   : > { %v1554_v26 = vmax.f32 %v1528_v22, 0.0  ;;  %v1523_v27 = vadd.f32 %v5574_v58, %v1522_v23 }
 0x24c   : > { %1563 = vst.msk [vmem:[#allocation4 + $0x29] sm:$0xff] %vm1559_vm14, %v1554_v26  ;;  %v1553_v30 = vmax.f32 %v1523_v27, 0.0  ;;  %v2036_v26 = vld [vmem:[%s6639_s3 + $0x168] sm:$0xff] }
 0x24d   : > { %4351 = vmatpush3.msra.mxu0 %v2036_v26 }
 0x24e   : > { %1562 = vst.msk [vmem:[#allocation4 + $0x1f] sm:$0xff] %vm1559_vm14, %v1553_v30  ;;  %v2035_v30 = vld [vmem:[%s6639_s3 + $0x160] sm:$0xff]  ;;  %4352 = vmatprep.subr.mxu0 %v2051_v29 }
 0x24f   : > { %4353 = vmatpush3.msra.mxu0 %v2035_v30 }
 0x250   : > { %4354 = vmatprep.subr.mxu0 %v2050_v31 }
 0x251   : > { %4355 = vmatpush3.msra.mxu0 %v2034_v32 }
 0x252   : > { %4356 = vmatprep.subr.mxu0 %v2049_v33 }
 0x253   : > { %v1605_v37 = vld [vmem:[#allocation4 + $0x29] ss:$2 sm:$0xf]  ;;  %v1637_v42 = vld [vmem:[#allocation4 + $0x2a] ss:$2 sm:$0xf]  ;;  %4357 = vmatpush3.msra.mxu0 %v2033_v34 }
 0x254   : > { %v1812_v38 = vld [vmem:[#allocation4 + $0x29] ss:$2 sm:$0xf]  ;;  %1607 = vrot.lane.b32.xlu0 %v1605_v37, %s6690_s30  ;;  %v1839_v43 = vld [vmem:[#allocation4 + $0x2a] ss:$2 sm:$0xf]  ;;  %4358 = vmatprep.subr.mxu0 %v2048_v35 }
 0x255   : > { %v1814_v39 = vrot.slane %v1812_v38, 4  ;;  %v1841_v44 = vrot.slane %v1839_v43, 4  ;;  %v1866_v49 = vld [vmem:[#allocation4 + $0x2b] ss:$2 sm:$0xf] }
 0x256   : > { %v1669_v52 = vld [vmem:[#allocation4 + $0x2b] ss:$2 sm:$0xf]  ;;  %v1709_v53 = vld [vmem:[#allocation4 + $0x1f] ss:$2 sm:$0xf] }
 0x257   : > { %1815 = vrot.lane.b32.xlu1 %v1814_v39, %s6690_s30  ;;  %v1579_v54 = vld [vmem:[#allocation4 + $0x28] ss:$2 sm:$0xf]  ;;  %v1868_v55 = vrot.slane %v1866_v49, 4  ;;  %v1711_v6 = vrot.slane %v1709_v53, 4  ;;  %v2032_v39 = vld [vmem:[%s6639_s3 + $0x148] sm:$0xff] }
 0x258   : > { %1639 = vrot.lane.b32.xlu0 %v1637_v42, %s6678_s28  ;;  %1580 = vst.msk [vmem:[#allocation5 + $0x20] sm:$0xf] %vm1569_vm6, %v1579_v54  ;;  %v1793_v56 = vld [vmem:[#allocation4 + $0x28] ss:$2 sm:$0xf]  ;;  %4359 = vmatpush3.msra.mxu0 %v2032_v39  ;;  %v2031_v42 = vld [vmem:[%s6639_s3 + $0x140] sm:$0xff] }
 0x259   : > { %v1795_v60 = vrot.slane %v1793_v56, 4  ;;  %v1887_v61 = vld [vmem:[#allocation4 + $0x1e] ss:$2 sm:$0xf]  ;;  %v2046_v43 = vld [vmem:[%s6639_s3 + $0x1b8] sm:$0xff]  ;;  %4360 = vmatprep.subr.mxu0 %v2047_v40  ;;  %v2045_v49 = vld [vmem:[%s6639_s3 + $0x1b0] sm:$0xff] }
 0x25a   : > { %1888 = vst.msk [vmem:[#allocation5 + $0x18] sm:$0xf] %vm1569_vm6, %v1887_v61  ;;  %v1687_v0 = vld [vmem:[#allocation4 + $0x1e] ss:$2 sm:$0xf]  ;;  %4361 = vmatpush3.msra.mxu0 %v2031_v42 }
 0x25b   : > { %1842 = vrot.lane.b32.xlu1 %v1841_v44, %s6678_s28  ;;  %v1902_v2 = vld [vmem:[#allocation4 + $0x1f] ss:$2 sm:$0xf]  ;;  %1797 = vst.msk [vmem:[#allocation5 + $0x10] sm:$0xf0] %vm1576_vm8, %v1795_v60  ;;  %v1689_v3 = vrot.slane %v1687_v0, 4  ;;  %4362 = vmatprep.subr.mxu0 %v2046_v43 }
 0x25c   : > { %1671 = vrot.lane.b32.xlu0 %v1669_v52, %s6704_s18  ;;  %v1739_v8 = vld [vmem:[#allocation4 + $0x20] ss:$2 sm:$0xf]  ;;  %v1769_v19 = vld [vmem:[#allocation4 + $0x21] ss:$2 sm:$0xf]  ;;  %4363 = vmatpush3.msra.mxu0 %v2030_v46 }
 0x25d   : > { %1691 = vst.msk [vmem:[#allocation5 + $0x8] sm:$0xf0] %vm1576_vm8, %v1689_v3  ;;  %v1929_v10 = vld [vmem:[#allocation4 + $0x20] ss:$2 sm:$0xf]  ;;  %v1741_v16 = vrot.slane %v1739_v8, 4  ;;  %4364 = vmatprep.subr.mxu0 %v2045_v49 }
 0x25e   : > { %v1956_v25 = vld [vmem:[#allocation4 + $0x21] ss:$2 sm:$0xf]  ;;  %v1771_v28 = vrot.slane %v1769_v19, 4  ;;  %v2029_v52 = vld [vmem:[%s6639_s3 + $0x130] sm:$0xff]  ;;  %v2027_v3 = vld [vmem:[%s6639_s3 + $0x120] sm:$0xff] }
 0x25f   : > { %1869 = vrot.lane.b32.xlu1 %v1868_v55, %s6704_s18  ;;  %v2044_v56 = vld [vmem:[%s6639_s3 + $0x1a8] sm:$0xff]  ;;  %4365 = vmatpush3.msra.mxu0 %v2029_v52  ;;  %v2039_v19 = vld [vmem:[%s6639_s3 + $0x180] sm:$0xff]  ;;  %s6680_s28 = smov 120  }
 0x260   : > { %1904 = vrot.lane.b32.xlu0 %v1902_v2, %s6690_s30  ;;  %4366 = vmatprep.subr.mxu0 %v2044_v56 }
 0x261   : > { %4367 = vmatpush3.msra.mxu0 %v2028_v59 }
 0x263   : > { %1712 = vrot.lane.b32.xlu1 %v1711_v6, %s6690_s30  ;;  %v4564_v11 = vpop.f32.mrf.mxu0 }
 0x264   : > { %v1538_v15 = vadd.f32 %v4564_v11, %v5574_v58  ;;  %1931 = vrot.lane.b32.xlu0 %v1929_v10, %s6705_s29  ;;  %v2025_v11 = vld [vmem:[%s6639_s3 + $0x110] sm:$0xff] }
 0x265   : > { %v1532_v18 = vpop.f32.mrf.mxu0 }
 0x266   : > { %v1556_v22 = vmax.f32 %v1538_v15, 0.0  ;;  %v1533_v23 = vadd.f32 %v5574_v58, %v1532_v18 }
 0x267   : > { %1742 = vrot.lane.b32.xlu1 %v1741_v16, %s6705_s29  ;;  %v2024_v16 = vld [vmem:[%s6639_s3 + $0x108] sm:$0xff] }
 0x268   : > { %1565 = vst.msk [vmem:[#allocation4 + $0x3d] sm:$0xff] %vm1559_vm14, %v1556_v22  ;;  %v1555_v27 = vmax.f32 %v1533_v23, 0.0  ;;  %1958 = vrot.lane.b32.xlu0 %v1956_v25, %s6704_s18  ;;  %v2023_v22 = vld [vmem:[%s6639_s3 + $0x100] sm:$0xff] }
 0x26a   : > { %1564 = vst.msk [vmem:[#allocation4 + $0x33] sm:$0xff] %vm1559_vm14, %v1555_v27 }
 0x26b   : > { %1772 = vrot.lane.b32.xlu1 %v1771_v28, %s6704_s18 }
 0x26f   : > { %v1819_v36 = vld [vmem:[#allocation4 + $0x3d] ss:$2 sm:$0xf]  ;;  %v1644_v41 = vld [vmem:[#allocation4 + $0x3e] ss:$2 sm:$0xf] }
 0x270   : > { %v1612_v37 = vld [vmem:[#allocation4 + $0x3d] ss:$2 sm:$0xf]  ;;  %1821 = vrot.lane.b32.xlu0 %v1819_v36, %s6690_s30  ;;  %v1846_v44 = vld [vmem:[#allocation4 + $0x3e] ss:$2 sm:$0xf] }
 0x271   : > { %v1614_v38 = vrot.slane %v1612_v37, 4  ;;  %v1646_v48 = vrot.slane %v1644_v41, 4  ;;  %v1676_v51 = vld [vmem:[#allocation4 + $0x3f] ss:$2 sm:$0xf] }
 0x272   : > { %v1717_v55 = vld [vmem:[#allocation4 + $0x33] ss:$2 sm:$0xf]  ;;  %v1678_v61 = vrot.slane %v1676_v51, 4 }
 0x273   : > { %1615 = vrot.lane.b32.xlu1 %v1614_v38, %s6690_s30  ;;  %v4567_v45 = vpop.f32.mrf.mxu0  ;;  %v1908_v57 = vld [vmem:[#allocation4 + $0x33] ss:$2 sm:$0xf]  ;;  %v1798_v62 = vld [vmem:[#allocation4 + $0x3c] ss:$2 sm:$0xf] }
 0x274   : > { %1848 = vrot.lane.b32.xlu0 %v1846_v44, %s6705_s29  ;;  %v1548_v47 = vadd.f32 %v4567_v45, %v5574_v58  ;;  %1799 = vst.msk [vmem:[#allocation5 + $0x30] sm:$0xf] %vm1569_vm6, %v1798_v62  ;;  %v1582_v63 = vld [vmem:[#allocation4 + $0x3c] ss:$2 sm:$0xf]  ;;  %v1910_v8 = vrot.slane %v1908_v57, 4 }
 0x275   : > { %v1542_v50 = vpop.f32.mrf.mxu0  ;;  %v1693_v0 = vld [vmem:[#allocation4 + $0x32] ss:$2 sm:$0xf]  ;;  %v1584_v1 = vrot.slane %v1582_v63, 4 }
 0x276   : > { %v1558_v53 = vmax.f32 %v1548_v47, 0.0  ;;  %v1543_v54 = vadd.f32 %v5574_v58, %v1542_v50  ;;  %v2043_v58 = vld [vmem:[%s6639_s3 + $0x1a0] sm:$0xff]  ;;  %1694 = vst.msk [vmem:[#allocation5 + $0x28] sm:$0xf] %vm1569_vm6, %v1693_v0 }
 0x277   : > { %1647 = vrot.lane.b32.xlu1 %v1646_v48, %s6705_s29  ;;  %v1889_v2 = vld [vmem:[#allocation4 + $0x32] ss:$2 sm:$0xf]  ;;  %4368 = vmatprep.subr.mxu0 %v2043_v58  ;;  %1586 = vst.msk [vmem:[#allocation5 + $0x20] sm:$0xf0] %vm1576_vm8, %v1584_v1 }
 0x278   : > { %1567 = vst.msk [vmem:[#allocation4 + $0x51] sm:$0xff] %vm1559_vm14, %v1558_v53  ;;  %v1557_v60 = vmax.f32 %v1543_v54, 0.0  ;;  %1719 = vrot.lane.b32.xlu0 %v1717_v55, %s6690_s30  ;;  %v1747_v5 = vld [vmem:[#allocation4 + $0x34] ss:$2 sm:$0xf]  ;;  %v1891_v6 = vrot.slane %v1889_v2, 4  ;;  %4369 = vmatpush3.msra.mxu0 %v2027_v3 }
 0x279   : > { %v1935_v10 = vld [vmem:[#allocation4 + $0x34] ss:$2 sm:$0xf]  ;;  %4370 = vmatprep.subr.mxu0 %v2042_v4  ;;  %v1777_v13 = vld [vmem:[#allocation4 + $0x35] ss:$2 sm:$0xf] }
 0x27a   : > { %1566 = vst.msk [vmem:[#allocation4 + $0x47] sm:$0xff] %vm1559_vm14, %v1557_v60  ;;  %4371 = vmatpush3.msra.mxu0 %v2026_v7  ;;  %v1937_v14 = vrot.slane %v1935_v10, 4  ;;  %v1962_v15 = vld [vmem:[#allocation4 + $0x35] ss:$2 sm:$0xf] }
 0x27b   : > { %1679 = vrot.lane.b32.xlu1 %v1678_v61, %s6704_s18  ;;  %1893 = vst.msk [vmem:[#allocation5 + $0x18] sm:$0xf0] %vm1576_vm8, %v1891_v6  ;;  %4372 = vmatprep.subr.mxu0 %v2041_v9  ;;  %v1964_v20 = vrot.slane %v1962_v15, 4  ;;  %v1873_v34 = vld [vmem:[#allocation4 + $0x3f] ss:$2 sm:$0xf] }
 0x27c   : > { %1749 = vrot.lane.b32.xlu0 %v1747_v5, %s6705_s29  ;;  %4373 = vmatpush3.msra.mxu0 %v2025_v11 }
 0x27d   : > { %4374 = vmatprep.subr.mxu0 %v2040_v12 }
 0x27e   : > { %4375 = vmatpush3.msra.mxu0 %v2024_v16 }
 0x27f   : > { %1911 = vrot.lane.b32.xlu1 %v1910_v8, %s6690_s30  ;;  %v1826_v18 = vld [vmem:[#allocation4 + $0x51] ss:$2 sm:$0xf]  ;;  %4376 = vmatprep.subr.mxu0 %v2039_v19  ;;  %v1801_v25 = vld [vmem:[#allocation4 + $0x50] ss:$2 sm:$0xf] }
 0x280   : > { %1779 = vrot.lane.b32.xlu0 %v1777_v13, %s6704_s18  ;;  %v1828_v21 = vrot.slane %v1826_v18, 4  ;;  %4377 = vmatpush3.msra.mxu0 %v2023_v22  ;;  %v1853_v27 = vld [vmem:[#allocation4 + $0x52] ss:$2 sm:$0xf]  ;;  %v1803_v28 = vrot.slane %v1801_v25, 4 }
 0x281   : > { %v1915_v17 = vld [vmem:[#allocation4 + $0x47] ss:$2 sm:$0xf]  ;;  %v1942_v23 = vld [vmem:[#allocation4 + $0x48] ss:$2 sm:$0xf] }
 0x282   : > { %v1894_v24 = vld [vmem:[#allocation4 + $0x46] ss:$2 sm:$0xf]  ;;  %v1969_v30 = vld [vmem:[#allocation4 + $0x49] ss:$2 sm:$0xf] }
 0x283   : > { %1938 = vrot.lane.b32.xlu1 %v1937_v14, %s6705_s29  ;;  %1895 = vst.msk [vmem:[#allocation5 + $0x38] sm:$0xf] %vm1569_vm6, %v1894_v24  ;;  %v1696_v26 = vld [vmem:[#allocation4 + $0x46] ss:$2 sm:$0xf]  ;;  %v1855_v31 = vrot.slane %v1853_v27, 4 }
 0x284   : > { %1917 = vrot.lane.b32.xlu0 %v1915_v17, %s6690_s30  ;;  %v1698_v29 = vrot.slane %v1696_v26, 4  ;;  %1805 = vst.msk [vmem:[#allocation5 + $0x30] sm:$0xf0] %vm1576_vm8, %v1803_v28  ;;  %v1724_v32 = vld [vmem:[#allocation4 + $0x47] ss:$2 sm:$0xf] }
 0x285   : > { %v1726_v33 = vrot.slane %v1724_v32, 4  ;;  %v1754_v35 = vld [vmem:[#allocation4 + $0x48] ss:$2 sm:$0xf]  ;;  %v2609_v32 = vld [vmem:[%s6641_s5 + $0x78] sm:$0xff] }
 0x286   : > { %1700 = vst.msk [vmem:[#allocation5 + $0x28] sm:$0xf0] %vm1576_vm8, %v1698_v29  ;;  %v1756_v36 = vrot.slane %v1754_v35, 4  ;;  %v1784_v37 = vld [vmem:[#allocation4 + $0x49] ss:$2 sm:$0xf] }
 0x287   : > { %1965 = vrot.lane.b32.xlu1 %v1964_v20, %s6704_s18  ;;  %v1786_v40 = vrot.slane %v1784_v37, 4  ;;  %v1880_v41 = vld [vmem:[#allocation4 + $0x53] ss:$2 sm:$0xf]  ;;  %v2232_v27 = vld [vmem:[#allocation6 + $0x1] sm:$0xf] }
 0x288   : > { %1944 = vrot.lane.b32.xlu0 %v1942_v23, %s6705_s29  ;;  %v1882_v44 = vrot.slane %v1880_v41, 4  ;;  %v2258_v28 = vld [vmem:[#allocation6 + $0x2] sm:$0xf]  ;;  %v5897_v37 = vld [vmem:[%s6640_s4] ss:$0 sm:$0xff] }
 0x289   : > { %v2284_v29 = vld [vmem:[#allocation6 + $0x3] sm:$0xf] }
 0x28b   : > { %1829 = vrot.lane.b32.xlu1 %v1828_v21, %s6690_s30 }
 0x28c   : > { %1971 = vrot.lane.b32.xlu0 %v1969_v30, %s6704_s18  ;;  %v2218_v30 = vld [vmem:[#allocation6] sm:$0xf] }
 0x28d   : > { %2219 = vst.msk [vmem:[#allocation7] sm:$0xf] %vm1569_vm6, %v2218_v30 }
 0x28f   : > { %1856 = vrot.lane.b32.xlu1 %v1855_v31, %s6705_s29  ;;  %v2625_v31 = vld [vmem:[%s6641_s5 + $0xf8] sm:$0xff] }
 0x290   : > { %1875 = vrot.lane.b32.xlu0 %v1873_v34, %s6704_s18  ;;  %4384 = vmatprep.subr.mxu1 %v2625_v31 }
 0x293   : > { %1727 = vrot.lane.b32.xlu1 %v1726_v33, %s6690_s30 }
 0x294   : > { %2234 = vrot.lane.b32.xlu0 %v2232_v27, %s6690_s30 }
 0x297   : > { %1757 = vrot.lane.b32.xlu1 %v1756_v36, %s6705_s29  ;;  %v1809_v38 = vpop.permute.xlu0 %1808 }
 0x298   : > { %1811 = vst.msk [vmem:[#allocation5 + $0x10] sm:$0xf] %vm1593_vm7, %v1809_v38  ;;  %2260 = vrot.lane.b32.xlu0 %v2258_v28, %s6705_s29  ;;  %v2613_v28 = vld [vmem:[%s6641_s5 + $0x98] sm:$0xff] }
 0x29a   : > { %v1600_v39 = vpop.permute.xlu1 %1599 }
 0x29b   : > { %1603 = vst.msk [vmem:[#allocation5] sm:$0xf0] %vm1602_vm9, %v1600_v39  ;;  %1787 = vrot.lane.b32.xlu1 %v1786_v40, %s6704_s18  ;;  %v1836_v42 = vpop.permute.xlu0 %1835 }
 0x29c   : > { %1838 = vst.msk [vmem:[#allocation5 + $0x10] sm:$0xf] %vm1625_vm10, %v1836_v42  ;;  %2286 = vrot.lane.b32.xlu0 %v2284_v29, %s6704_s18  ;;  %v2597_v29 = vld [vmem:[%s6641_s5 + $0x18] sm:$0xff] }
 0x29e   : > { %v1632_v43 = vpop.permute.xlu1 %1631 }
 0x29f   : > { %1635 = vst.msk [vmem:[#allocation5] sm:$0xf0] %vm1634_vm11, %v1632_v43  ;;  %1883 = vrot.lane.b32.xlu1 %v1882_v44, %s6704_s18  ;;  %v1863_v45 = vpop.permute.xlu0 %1862  ;;  %v2624_v44 = vld [vmem:[%s6641_s5 + $0xf0] sm:$0xff] }
 0x2a0   : > { %1865 = vst.msk [vmem:[#allocation5 + $0x10] sm:$0xf] %vm1657_vm12, %v1863_v45  ;;  %v2608_v45 = vld [vmem:[%s6641_s5 + $0x70] sm:$0xff] }
 0x2a2   : > { %v1664_v46 = vpop.permute.xlu1 %1663 }
 0x2a3   : > { %1667 = vst.msk [vmem:[#allocation5] sm:$0xf0] %vm1666_vm13, %v1664_v46  ;;  %v1705_v47 = vpop.permute.xlu0 %1704 }
 0x2a4   : > { %1707 = vst.msk [vmem:[#allocation5 + $0x8] sm:$0xf] %vm1593_vm7, %v1705_v47  ;;  %v2623_v47 = vld [vmem:[%s6641_s5 + $0xe8] sm:$0xff] }
 0x2a7   : > { %v1735_v48 = vpop.permute.xlu0 %1734 }
 0x2a8   : > { %1737 = vst.msk [vmem:[#allocation5 + $0x8] sm:$0xf] %vm1625_vm10, %v1735_v48  ;;  %v2607_v48 = vld [vmem:[%s6641_s5 + $0x68] sm:$0xff] }
 0x2aa   : > { %v1983_v1 = vld [vmem:[#allocation5] sm:$0xff] }
 0x2ab   : > { %v1765_v49 = vpop.permute.xlu0 %1764 }
 0x2ac   : > { %1767 = vst.msk [vmem:[#allocation5 + $0x8] sm:$0xf] %vm1657_vm12, %v1765_v49 }
 0x2c6   : > { %v1608_v50 = vpop.permute.xlu0 %1607 }
 0x2c7   : > { %1610 = vst.msk [vmem:[#allocation5 + $0x20] sm:$0xf] %vm1593_vm7, %v1608_v50  ;;  %v2622_v50 = vld [vmem:[%s6641_s5 + $0xe0] sm:$0xff] }
 0x2c9   : > { %v1816_v51 = vpop.permute.xlu1 %1815 }
 0x2ca   : > { %1818 = vst.msk [vmem:[#allocation5 + $0x10] sm:$0xf0] %vm1602_vm9, %v1816_v51  ;;  %v1640_v52 = vpop.permute.xlu0 %1639  ;;  %v2606_v51 = vld [vmem:[%s6641_s5 + $0x60] sm:$0xff] }
 0x2cb   : > { %1642 = vst.msk [vmem:[#allocation5 + $0x20] sm:$0xf] %vm1625_vm10, %v1640_v52  ;;  %v2621_v52 = vld [vmem:[%s6641_s5 + $0xd8] sm:$0xff] }
 0x2cd   : > { %v1843_v53 = vpop.permute.xlu1 %1842 }
 0x2ce   : > { %1845 = vst.msk [vmem:[#allocation5 + $0x10] sm:$0xf0] %vm1634_vm11, %v1843_v53  ;;  %v1672_v54 = vpop.permute.xlu0 %1671  ;;  %v2605_v53 = vld [vmem:[%s6641_s5 + $0x58] sm:$0xff] }
 0x2cf   : > { %1674 = vst.msk [vmem:[#allocation5 + $0x20] sm:$0xf] %vm1657_vm12, %v1672_v54  ;;  %v2620_v54 = vld [vmem:[%s6641_s5 + $0xd0] sm:$0xff] }
 0x2d1   : > { %v1870_v55 = vpop.permute.xlu1 %1869 }
 0x2d2   : > { %1872 = vst.msk [vmem:[#allocation5 + $0x10] sm:$0xf0] %vm1666_vm13, %v1870_v55  ;;  %v1905_v56 = vpop.permute.xlu0 %1904  ;;  %v2604_v55 = vld [vmem:[%s6641_s5 + $0x50] sm:$0xff] }
 0x2d3   : > { %1907 = vst.msk [vmem:[#allocation5 + $0x18] sm:$0xf] %vm1593_vm7, %v1905_v56  ;;  %v2619_v56 = vld [vmem:[%s6641_s5 + $0xc8] sm:$0xff] }
 0x2d5   : > { %v1713_v57 = vpop.permute.xlu1 %1712 }
 0x2d6   : > { %1715 = vst.msk [vmem:[#allocation5 + $0x8] sm:$0xf0] %vm1602_vm9, %v1713_v57  ;;  %v1932_v59 = vpop.permute.xlu0 %1931  ;;  %v2603_v57 = vld [vmem:[%s6641_s5 + $0x48] sm:$0xff] }
 0x2d7   : > { %1934 = vst.msk [vmem:[#allocation5 + $0x18] sm:$0xf] %vm1625_vm10, %v1932_v59 }
 0x2d9   : > { %v1743_v60 = vpop.permute.xlu1 %1742  ;;  %v1985_v17 = vld [vmem:[#allocation5 + $0x10] sm:$0xff] }
 0x2da   : > { %1745 = vst.msk [vmem:[#allocation5 + $0x8] sm:$0xf0] %vm1634_vm11, %v1743_v60  ;;  %v1959_v61 = vpop.permute.xlu0 %1958 }
 0x2db   : > { %1961 = vst.msk [vmem:[#allocation5 + $0x18] sm:$0xf] %vm1657_vm12, %v1959_v61 }
 0x2dd   : > { %v1773_v62 = vpop.permute.xlu1 %1772 }
 0x2de   : > { %1775 = vst.msk [vmem:[#allocation5 + $0x8] sm:$0xf0] %vm1666_vm13, %v1773_v62  ;;  %v2618_v62 = vld [vmem:[%s6641_s5 + $0xc0] sm:$0xff] }
 0x2e2   : > { %v1822_v58 = vpop.permute.xlu0 %1821 }
 0x2e3   : > { %1824 = vst.msk [vmem:[#allocation5 + $0x30] sm:$0xf] %vm1593_vm7, %v1822_v58 }
 0x2e5   : > { %v1616_v63 = vpop.permute.xlu1 %1615  ;;  %v1984_v0 = vld [vmem:[#allocation5 + $0x8] sm:$0xff] }
 0x2e6   : > { %1618 = vst.msk [vmem:[#allocation5 + $0x20] sm:$0xf0] %vm1602_vm9, %v1616_v63  ;;  %2126 = vmatprep.mubr.f32.mxu1 %v1984_v0  ;;  %v1849_v2 = vpop.permute.xlu0 %1848  ;;  %v2602_v63 = vld [vmem:[%s6641_s5 + $0x40] sm:$0xff]  ;;  %v2617_v0 = vld [vmem:[%s6641_s5 + $0xb8] sm:$0xff] }
 0x2e7   : > { %2127 = vmatmul.mubr.f32.vlgmr.msra.gmra.mxu1 %v1983_v1  ;;  %1851 = vst.msk [vmem:[#allocation5 + $0x30] sm:$0xf] %vm1625_vm10, %v1849_v2 }
 0x2e8   : > { %4385 = vmatpush3.msra.mxu1 %v2609_v32  ;;  %v2612_v32 = vld [vmem:[%s6641_s5 + $0x90] sm:$0xff] }
 0x2e9   : > { %v1648_v3 = vpop.permute.xlu1 %1647  ;;  %4386 = vmatprep.subr.mxu1 %v2624_v44 }
 0x2ea   : > { %1650 = vst.msk [vmem:[#allocation5 + $0x20] sm:$0xf0] %vm1634_vm11, %v1648_v3  ;;  %v1720_v4 = vpop.permute.xlu0 %1719  ;;  %4387 = vmatpush3.msra.mxu1 %v2608_v45  ;;  %v2601_v3 = vld [vmem:[%s6641_s5 + $0x38] sm:$0xff]  ;;  %v2594_v45 = vld [vmem:[%s6641_s5] sm:$0xff] }
 0x2eb   : > { %1722 = vst.msk [vmem:[#allocation5 + $0x28] sm:$0xf] %vm1593_vm7, %v1720_v4  ;;  %4388 = vmatprep.subr.mxu1 %v2623_v47 }
 0x2ec   : > { %4389 = vmatpush3.msra.mxu1 %v2607_v48  ;;  %v2657_v48 = vld [vmem:[%s6641_s5 + $0x1f8] sm:$0xff] }
 0x2ed   : > { %v1680_v5 = vpop.permute.xlu1 %1679  ;;  %4390 = vmatprep.subr.mxu1 %v2622_v50  ;;  %v2527_v50 = vld [vmem:[#allocation6 + $0x2b] sm:$0xf]  ;;  %4422 = vmatprep.subr.mxu0 %v2657_v48  ;;  %v2627_v48 = vld [vmem:[%s6641_s5 + $0x108] sm:$0xff] }
 0x2ee   : > { %1682 = vst.msk [vmem:[#allocation5 + $0x20] sm:$0xf0] %vm1666_vm13, %v1680_v5  ;;  %v1750_v6 = vpop.permute.xlu0 %1749  ;;  %4391 = vmatpush3.msra.mxu1 %v2606_v51  ;;  %v2616_v5 = vld [vmem:[%s6641_s5 + $0xb0] sm:$0xff] }
 0x2ef   : > { %1752 = vst.msk [vmem:[#allocation5 + $0x28] sm:$0xf] %vm1625_vm10, %v1750_v6  ;;  %4392 = vmatprep.subr.mxu1 %v2621_v52  ;;  %v2656_v52 = vld [vmem:[%s6641_s5 + $0x1f0] sm:$0xff] }
 0x2f0   : > { %4393 = vmatpush3.msra.mxu1 %v2605_v53  ;;  %v2640_v53 = vld [vmem:[%s6641_s5 + $0x170] sm:$0xff] }
 0x2f1   : > { %v1912_v7 = vpop.permute.xlu1 %1911  ;;  %4394 = vmatprep.subr.mxu1 %v2620_v54 }
 0x2f2   : > { %1914 = vst.msk [vmem:[#allocation5 + $0x18] sm:$0xf0] %vm1602_vm9, %v1912_v7  ;;  %v1780_v8 = vpop.permute.xlu0 %1779  ;;  %4395 = vmatpush3.msra.mxu1 %v2604_v55  ;;  %v2655_v55 = vld [vmem:[%s6641_s5 + $0x1e8] sm:$0xff] }
 0x2f3   : > { %1782 = vst.msk [vmem:[#allocation5 + $0x28] sm:$0xf] %vm1657_vm12, %v1780_v8  ;;  %4396 = vmatprep.subr.mxu1 %v2619_v56  ;;  %v2639_v56 = vld [vmem:[%s6641_s5 + $0x168] sm:$0xff] }
 0x2f4   : > { %4397 = vmatpush3.msra.mxu1 %v2603_v57  ;;  %v2529_v57 = vrot.slane %v2527_v50, 4 }
 0x2f5   : > { %v1939_v9 = vpop.permute.xlu1 %1938  ;;  %v1987_v25 = vld [vmem:[#allocation5 + $0x20] sm:$0xff]  ;;  %4398 = vmatprep.subr.mxu1 %v2618_v62  ;;  %v2638_v62 = vld [vmem:[%s6641_s5 + $0x160] sm:$0xff] }
 0x2f6   : > { %1941 = vst.msk [vmem:[#allocation5 + $0x18] sm:$0xf0] %vm1634_vm11, %v1939_v9  ;;  %v1918_v10 = vpop.permute.xlu0 %1917  ;;  %4399 = vmatpush3.msra.mxu1 %v2602_v63  ;;  %v2600_v9 = vld [vmem:[%s6641_s5 + $0x30] sm:$0xff] }
 0x2f7   : > { %1920 = vst.msk [vmem:[#allocation5 + $0x38] sm:$0xf] %vm1593_vm7, %v1918_v10  ;;  %4400 = vmatprep.subr.mxu1 %v2617_v0  ;;  %v2653_v0 = vld [vmem:[%s6641_s5 + $0x1d8] sm:$0xff] }
 0x2f8   : > { %4401 = vmatpush3.msra.mxu1 %v2601_v3  ;;  %v2652_v3 = vld [vmem:[%s6641_s5 + $0x1d0] sm:$0xff] }
 0x2f9   : > { %v1966_v11 = vpop.permute.xlu1 %1965  ;;  %4402 = vmatprep.subr.mxu1 %v2616_v5 }
 0x2fa   : > { %1968 = vst.msk [vmem:[#allocation5 + $0x18] sm:$0xf0] %vm1666_vm13, %v1966_v11  ;;  %v1945_v12 = vpop.permute.xlu0 %1944  ;;  %4403 = vmatpush3.msra.mxu1 %v2600_v9 }
 0x2fb   : > { %1947 = vst.msk [vmem:[#allocation5 + $0x38] sm:$0xf] %vm1625_vm10, %v1945_v12 }
 0x2fd   : > { %v1830_v13 = vpop.permute.xlu1 %1829 }
 0x2fe   : > { %1832 = vst.msk [vmem:[#allocation5 + $0x30] sm:$0xf0] %vm1602_vm9, %v1830_v13  ;;  %v1972_v14 = vpop.permute.xlu0 %1971 }
 0x2ff   : > { %1974 = vst.msk [vmem:[#allocation5 + $0x38] sm:$0xf] %vm1657_vm12, %v1972_v14 }
 0x301   : > { %v1857_v15 = vpop.permute.xlu1 %1856  ;;  %v1986_v16 = vld [vmem:[#allocation5 + $0x18] sm:$0xff] }
 0x302   : > { %1859 = vst.msk [vmem:[#allocation5 + $0x30] sm:$0xf0] %vm1634_vm11, %v1857_v15  ;;  %2201 = vmatprep.mubr.f32.mxu0 %v1986_v16  ;;  %v1876_v18 = vpop.permute.xlu0 %1875 }
 0x303   : > { %2202 = vmatmul.mubr.f32.vlgmr.msra.gmra.mxu0 %v1985_v17  ;;  %1878 = vst.msk [vmem:[#allocation5 + $0x30] sm:$0xf] %vm1657_vm12, %v1876_v18  ;;  %v2615_v18 = vld [vmem:[%s6641_s5 + $0xa8] sm:$0xff] }
 0x304   : > { %4404 = vmatprep.subr.mxu1 %v2615_v18 }
 0x305   : > { %v1728_v19 = vpop.permute.xlu1 %1727 }
 0x306   : > { %1730 = vst.msk [vmem:[#allocation5 + $0x28] sm:$0xf0] %vm1602_vm9, %v1728_v19  ;;  %v1990_v20 = vld [vmem:[#allocation5 + $0x38] sm:$0xff]  ;;  %v2235_v35 = vpop.permute.xlu0 %2234 }
 0x307   : > { %2206 = vmatprep.mubr.f32.mxu0 %v1990_v20  ;;  %2237 = vst.msk [vmem:[#allocation7] sm:$0xf] %vm1593_vm7, %v2235_v35  ;;  %v2599_v19 = vld [vmem:[%s6641_s5 + $0x28] sm:$0xff]  ;;  %v2596_v35 = vld [vmem:[%s6641_s5 + $0x10] sm:$0xff] }
 0x308   : > { %4405 = vmatpush3.msra.mxu1 %v2599_v19 }
 0x309   : > { %v1758_v21 = vpop.permute.xlu1 %1757 }
 0x30a   : > { %1760 = vst.msk [vmem:[#allocation5 + $0x28] sm:$0xf0] %vm1634_vm11, %v1758_v21  ;;  %v2261_v39 = vpop.permute.xlu0 %2260 }
 0x30b   : > { %2263 = vst.msk [vmem:[#allocation7] sm:$0xf] %vm1625_vm10, %v2261_v39  ;;  %v2611_v39 = vld [vmem:[%s6641_s5 + $0x88] sm:$0xff] }
 0x30d   : > { %v1788_v22 = vpop.permute.xlu1 %1787 }
 0x30e   : > { %1790 = vst.msk [vmem:[#allocation5 + $0x28] sm:$0xf0] %vm1666_vm13, %v1788_v22  ;;  %v2287_v43 = vpop.permute.xlu0 %2286 }
 0x30f   : > { %2289 = vst.msk [vmem:[#allocation7] sm:$0xf] %vm1657_vm12, %v2287_v43  ;;  %v2411_v43 = vld [vmem:[#allocation6 + $0x23] sm:$0xf] }
 0x311   : > { %v1884_v23 = vpop.permute.xlu1 %1883 }
 0x312   : > { %1886 = vst.msk [vmem:[#allocation5 + $0x30] sm:$0xf0] %vm1666_vm13, %v1884_v23  ;;  %v2614_v23 = vld [vmem:[%s6641_s5 + $0xa0] sm:$0xff] }
 0x313   : > { %4406 = vmatprep.subr.mxu1 %v2614_v23 }
 0x315   : > { %v1988_v24 = vld [vmem:[#allocation5 + $0x28] sm:$0xff] }
 0x316   : > { %2131 = vmatprep.mubr.f32.mxu1 %v1988_v24  ;;  %v2598_v24 = vld [vmem:[%s6641_s5 + $0x20] sm:$0xff] }
 0x317   : > { %2132 = vmatmul.mubr.f32.gmra.mxu1 %v1987_v25 }
 0x318   : > { %4407 = vmatpush3.msra.mxu1 %v2598_v24 }
 0x319   : > { %v1989_v26 = vld [vmem:[#allocation5 + $0x30] sm:$0xff]  ;;  %4408 = vmatprep.subr.mxu1 %v2613_v28 }
 0x31a   : > { %2207 = vmatmul.mubr.f32.gmra.mxu0 %v1989_v26  ;;  %4409 = vmatpush3.msra.mxu1 %v2597_v29  ;;  %v2632_v29 = vld [vmem:[%s6641_s5 + $0x130] sm:$0xff] }
 0x31b   : > { %4410 = vmatprep.subr.mxu1 %v2612_v32  ;;  %v2647_v32 = vld [vmem:[%s6641_s5 + $0x1a8] sm:$0xff] }
 0x31c   : > { %4411 = vmatpush3.msra.mxu1 %v2596_v35  ;;  %v2521_v35 = vld [vmem:[#allocation6 + $0x24] sm:$0xf] }
 0x31d   : > { %4412 = vmatprep.subr.mxu1 %v2611_v39  ;;  %v2645_v39 = vld [vmem:[%s6641_s5 + $0x198] sm:$0xff] }
 0x3a7   : > { %v4340_v33 = vpop.f32.mrf.mxu1 }
 0x3a9   : > { %v4341_v34 = vpop.f32.mrf.mxu1 }
 0x3aa   : > { %v4342_v36 = vadd.f32 %v4341_v34, %v4340_v33  ;;  %v2503_v33 = vld [vmem:[#allocation6 + $0x2a] sm:$0xf] }
 0x3ac   : > { %v2129_v41 = vadd.f32 %v4342_v36, %v5897_v37  ;;  %v2505_v36 = vrot.slane %v2503_v33, 4 }
 0x3ae   : > { %2507 = vst.msk [vmem:[#allocation7 + $0x38] sm:$0xf0] %vm1576_vm8, %v2505_v36 }
 0x3c3   : > { %v4378_v38 = vpop.f32.mrf.mxu0 }
 0x3c5   : > { %v4379_v40 = vpop.f32.mrf.mxu0 }
 0x3c6   : > { %v4380_v42 = vadd.f32 %v4379_v40, %v4378_v38  ;;  %v2595_v40 = vld [vmem:[%s6641_s5 + $0x8] sm:$0xff] }
 0x3c7   : > { %4413 = vmatpush3.msra.mxu1 %v2595_v40 }
 0x3c8   : > { %v2204_v46 = vadd.f32 %v4380_v42, %v2129_v41  ;;  %v2610_v42 = vld [vmem:[%s6641_s5 + $0x80] sm:$0xff] }
 0x3c9   : > { %4414 = vmatprep.subr.mxu1 %v2610_v42 }
 0x3ca   : > { %v2212_v49 = vmax.f32 %v2204_v46, 0.0  ;;  %v2413_v46 = vrot.slane %v2411_v43, 4  ;;  %4415 = vmatpush3.msra.mxu1 %v2594_v45  ;;  %v2644_v43 = vld [vmem:[%s6641_s5 + $0x190] sm:$0xff] }
 0x3cc   : > { %2214 = vst.msk [vmem:[#allocation6 + $0x8] sm:$0xf] %vm1569_vm6, %v2212_v49 }
 0x3cd   : > { %2215 = vst.msk [vmem:[#allocation6 + $0xb] sm:$0xf0] %vm1576_vm8, %v2212_v49  ;;  %v2641_v49 = vld [vmem:[%s6641_s5 + $0x178] sm:$0xff]  ;;  %2415 = vst.msk [vmem:[#allocation7 + $0x30] sm:$0xf0] %vm1576_vm8, %v2413_v46  ;;  %v2643_v46 = vld [vmem:[%s6641_s5 + $0x188] sm:$0xff] }
 0x3ce   : > { %4423 = vmatpush3.msra.mxu0 %v2641_v49  ;;  %v2547_v49 = vld [vmem:[#allocation6 + $0x25] sm:$0xf] }
 0x3cf   : > { %4424 = vmatprep.subr.mxu0 %v2656_v52  ;;  %v2626_v52 = vld [vmem:[%s6641_s5 + $0x100] sm:$0xff] }
 0x3d0   : > { %4425 = vmatpush3.msra.mxu0 %v2640_v53  ;;  %v2553_v53 = vld [vmem:[#allocation6 + $0x2c] sm:$0xf] }
 0x3d1   : > { %4426 = vmatprep.subr.mxu0 %v2655_v55  ;;  %v2555_v55 = vrot.slane %v2553_v53, 4 }
 0x3d2   : > { %4427 = vmatpush3.msra.mxu0 %v2639_v56 }
 0x3d3   : > { %v2324_v59 = vld [vmem:[#allocation6 + $0x8] sm:$0xf] }
 0x3d4   : > { %v2330_v60 = vld [vmem:[#allocation6 + $0xf] sm:$0xf]  ;;  %2326 = vrot.lane.b32.xlu0 %v2324_v59, %s6690_s30  ;;  %v2238_v58 = vld [vmem:[#allocation6 + $0x8] sm:$0xf] }
 0x3d5   : > { %v2332_v61 = vrot.slane %v2330_v60, 4  ;;  %v2350_v2 = vld [vmem:[#allocation6 + $0x9] sm:$0xf]  ;;  %v2240_v4 = vrot.slane %v2238_v58, 4  ;;  %v2356_v8 = vld [vmem:[#allocation6 + $0x10] sm:$0xf] }
 0x3d6   : > { %v2376_v7 = vld [vmem:[#allocation6 + $0xa] sm:$0xf]  ;;  %v2312_v13 = vld [vmem:[#allocation6 + $0xe] sm:$0xf]  ;;  %v2358_v22 = vrot.slane %v2356_v8, 4 }
 0x3d7   : > { %2333 = vrot.lane.b32.xlu1 %v2332_v61, %s6690_s30  ;;  %v4343_v1 = vpop.f32.mrf.mxu1  ;;  %v2310_v12 = vld [vmem:[#allocation6 + $0x7] sm:$0xf]  ;;  %v2314_v15 = vrot.slane %v2312_v13, 4  ;;  %v2402_v17 = vld [vmem:[#allocation6 + $0xe] sm:$0xf]  ;;  %v2651_v13 = vld [vmem:[%s6641_s5 + $0x1c8] sm:$0xff] }
 0x3d8   : > { %2352 = vrot.lane.b32.xlu0 %v2350_v2, %s6705_s29  ;;  %v2220_v14 = vld [vmem:[#allocation6 + $0x7] sm:$0xf]  ;;  %2311 = vst.msk [vmem:[#allocation7 + $0x8] sm:$0xf] %vm1569_vm6, %v2310_v12  ;;  %2403 = vst.msk [vmem:[#allocation7 + $0x10] sm:$0xf] %vm1569_vm6, %v2402_v17 }
 0x3d9   : > { %v4344_v6 = vpop.f32.mrf.mxu1  ;;  %v2222_v16 = vrot.slane %v2220_v14, 4  ;;  %v2225_v25 = vld [vmem:[#allocation6 + $0xe] sm:$0xf]  ;;  %v2264_v27 = vld [vmem:[#allocation6 + $0x9] sm:$0xf]  ;;  %v2635_v14 = vld [vmem:[%s6641_s5 + $0x148] sm:$0xff] }
 0x3da   : > { %v4345_v10 = vadd.f32 %v4344_v6, %v4343_v1  ;;  %v4381_v11 = vpop.f32.mrf.mxu0  ;;  %2316 = vst.msk [vmem:[#allocation7 + $0x8] sm:$0xf0] %vm1576_vm8, %v2314_v15  ;;  %v2416_v31 = vld [vmem:[#allocation6 + $0xf] sm:$0xf]  ;;  %v2266_v34 = vrot.slane %v2264_v27, 4 }
 0x3db   : > { %2241 = vrot.lane.b32.xlu1 %v2240_v4, %s6690_s30  ;;  %2224 = vst.msk [vmem:[#allocation7] sm:$0xf0] %vm1576_vm8, %v2222_v16  ;;  %v2382_v38 = vld [vmem:[#allocation6 + $0x11] sm:$0xf]  ;;  %v2290_v47 = vld [vmem:[#allocation6 + $0xa] sm:$0xf] }
 0x3dc   : > { %v2134_v20 = vadd.f32 %v4345_v10, %v5897_v37  ;;  %2378 = vrot.lane.b32.xlu0 %v2376_v7, %s6704_s18  ;;  %v4382_v21 = vpop.f32.mrf.mxu0  ;;  %2226 = vst.msk [vmem:[#allocation7 + $0x20] sm:$0xf] %vm1569_vm6, %v2225_v25  ;;  %v2442_v41 = vld [vmem:[#allocation6 + $0x10] sm:$0xf]  ;;  %v2384_v44 = vrot.slane %v2382_v38, 4  ;;  %v2292_v54 = vrot.slane %v2290_v47, 4 }
 0x3dd   : > { %v4383_v26 = vadd.f32 %v4382_v21, %v4381_v11  ;;  %v2468_v51 = vld [vmem:[#allocation6 + $0x11] sm:$0xf]  ;;  %v2435_v60 = vld [vmem:[#allocation6 + $0x24] sm:$0xf]  ;;  %v2637_v2 = vld [vmem:[%s6641_s5 + $0x158] sm:$0xff] }
 0x3de   : > { %v2245_v59 = vld [vmem:[#allocation6 + $0xf] sm:$0xf]  ;;  %v2437_v58 = vrot.slane %v2435_v60, 4  ;;  %v2636_v10 = vld [vmem:[%s6641_s5 + $0x150] sm:$0xff] }
 0x3df   : > { %2359 = vrot.lane.b32.xlu1 %v2358_v22, %s6705_s29  ;;  %v2209_v30 = vadd.f32 %v4383_v26, %v2134_v20  ;;  %v2654_v61 = vld [vmem:[%s6641_s5 + $0x1e0] sm:$0xff]  ;;  %v2501_v15 = vld [vmem:[#allocation6 + $0x23] sm:$0xf]  ;;  %v2649_v20 = vld [vmem:[%s6641_s5 + $0x1b8] sm:$0xff] }
 0x3e0   : > { %2418 = vrot.lane.b32.xlu0 %v2416_v31, %s6690_s30  ;;  %4428 = vmatprep.subr.mxu0 %v2654_v61  ;;  %v2271_v63 = vld [vmem:[#allocation6 + $0x10] sm:$0xf]  ;;  %2502 = vst.msk [vmem:[#allocation7 + $0x38] sm:$0xf] %vm1569_vm6, %v2501_v15  ;;  %v2633_v21 = vld [vmem:[%s6641_s5 + $0x138] sm:$0xff]  ;;  %v2648_v26 = vld [vmem:[%s6641_s5 + $0x1b0] sm:$0xff] }
 0x3e1   : > { %v2213_v37 = vmax.f32 %v2209_v30, 0.0  ;;  %4429 = vmatpush3.msra.mxu0 %v2638_v62  ;;  %v2650_v16 = vld [vmem:[%s6641_s5 + $0x1c0] sm:$0xff] }
 0x3e2   : > { %4430 = vmatprep.subr.mxu0 %v2653_v0  ;;  %v2634_v17 = vld [vmem:[%s6641_s5 + $0x140] sm:$0xff] }
 0x3e3   : > { %2267 = vrot.lane.b32.xlu1 %v2266_v34, %s6705_s29  ;;  %2216 = vst.msk [vmem:[#allocation6 + $0x16] sm:$0xf] %vm1569_vm6, %v2213_v37  ;;  %4431 = vmatpush3.msra.mxu0 %v2637_v2  ;;  %v2631_v34 = vld [vmem:[%s6641_s5 + $0x128] sm:$0xff]  ;;  %v2630_v38 = vld [vmem:[%s6641_s5 + $0x120] sm:$0xff] }
 0x3e4   : > { %2217 = vst.msk [vmem:[#allocation6 + $0x19] sm:$0xf0] %vm1576_vm8, %v2213_v37  ;;  %2444 = vrot.lane.b32.xlu0 %v2442_v41, %s6705_s29  ;;  %4432 = vmatprep.subr.mxu0 %v2652_v3  ;;  %v2646_v37 = vld [vmem:[%s6641_s5 + $0x1a0] sm:$0xff]  ;;  %v2629_v41 = vld [vmem:[%s6641_s5 + $0x118] sm:$0xff] }
 0x3e5   : > { %4433 = vmatpush3.msra.mxu0 %v2636_v10  ;;  %v2297_v45 = vld [vmem:[#allocation6 + $0x11] sm:$0xf]  ;;  %v2579_v61 = vld [vmem:[#allocation6 + $0x2d] sm:$0xf] }
 0x3e6   : > { %4434 = vmatprep.subr.mxu0 %v2651_v13  ;;  %v2581_v62 = vrot.slane %v2579_v61, 4 }
 0x3e7   : > { %2385 = vrot.lane.b32.xlu1 %v2384_v44, %s6704_s18  ;;  %4435 = vmatpush3.msra.mxu0 %v2635_v14  ;;  %v2628_v44 = vld [vmem:[%s6641_s5 + $0x110] sm:$0xff] }
 0x3e8   : > { %2470 = vrot.lane.b32.xlu0 %v2468_v51, %s6704_s18  ;;  %4436 = vmatprep.subr.mxu0 %v2650_v16  ;;  %v2642_v51 = vld [vmem:[%s6641_s5 + $0x180] sm:$0xff]  ;;  %v2487_v14 = vld [vmem:[#allocation6 + $0x26] sm:$0xf] }
 0x3e9   : > { %4437 = vmatpush3.msra.mxu0 %v2634_v17  ;;  %v2489_v16 = vrot.slane %v2487_v14, 4  ;;  %v2974_v14 = vld [vmem:[%s6643_s7 + $0x40] sm:$0xff] }
 0x3ea   : > { %v2508_v4 = vld [vmem:[#allocation6 + $0x16] sm:$0xf]  ;;  %4438 = vmatprep.subr.mxu0 %v2649_v20 }
 0x3eb   : > { %2293 = vrot.lane.b32.xlu1 %v2292_v54, %s6704_s18  ;;  %v2514_v1 = vld [vmem:[#allocation6 + $0x1d] sm:$0xf]  ;;  %v2422_v5 = vld [vmem:[#allocation6 + $0x16] sm:$0xf]  ;;  %4439 = vmatpush3.msra.mxu0 %v2633_v21 }
 0x3ec   : > { %2247 = vrot.lane.b32.xlu0 %v2245_v59, %s6690_s30  ;;  %v2494_v6 = vld [vmem:[#allocation6 + $0x15] sm:$0xf]  ;;  %v2516_v7 = vrot.slane %v2514_v1, 4  ;;  %v2496_v8 = vld [vmem:[#allocation6 + $0x1c] sm:$0xf]  ;;  %v2424_v19 = vrot.slane %v2422_v5, 4  ;;  %4440 = vmatprep.subr.mxu0 %v2648_v26 }
 0x3ed   : > { %2495 = vst.msk [vmem:[#allocation7 + $0x18] sm:$0xf] %vm1569_vm6, %v2494_v6  ;;  %v2404_v9 = vld [vmem:[#allocation6 + $0x15] sm:$0xf]  ;;  %v2498_v11 = vrot.slane %v2496_v8, 4  ;;  %4441 = vmatpush3.msra.mxu0 %v2632_v29 }
 0x3ee   : > { %v2406_v12 = vrot.slane %v2404_v9, 4  ;;  %v2534_v18 = vld [vmem:[#allocation6 + $0x17] sm:$0xf]  ;;  %v2409_v23 = vld [vmem:[#allocation6 + $0x1c] sm:$0xf]  ;;  %4442 = vmatprep.subr.mxu0 %v2647_v32 }
 0x3ef   : > { %2530 = vrot.lane.b32.xlu1 %v2529_v57, %s6690_s30  ;;  %2500 = vst.msk [vmem:[#allocation7 + $0x18] sm:$0xf0] %vm1576_vm8, %v2498_v11  ;;  %v2317_v22 = vld [vmem:[#allocation6 + $0x15] sm:$0xf]  ;;  %v2319_v24 = vld [vmem:[#allocation6 + $0x1c] sm:$0xf]  ;;  %4443 = vmatpush3.msra.mxu0 %v2631_v34 }
 0x3f0   : > { %2273 = vrot.lane.b32.xlu0 %v2271_v63, %s6705_s29  ;;  %2408 = vst.msk [vmem:[#allocation7 + $0x10] sm:$0xf0] %vm1576_vm8, %v2406_v12  ;;  %v2540_v25 = vld [vmem:[#allocation6 + $0x1e] sm:$0xf]  ;;  %v2321_v27 = vrot.slane %v2319_v24, 4  ;;  %4444 = vmatprep.subr.mxu0 %v2646_v37 }
 0x3f1   : > { %2318 = vst.msk [vmem:[#allocation7 + $0x28] sm:$0xf] %vm1569_vm6, %v2317_v22  ;;  %2410 = vst.msk [vmem:[#allocation7 + $0x30] sm:$0xf] %vm1569_vm6, %v2409_v23  ;;  %v2227_v28 = vld [vmem:[#allocation6 + $0x15] sm:$0xf]  ;;  %4445 = vmatpush3.msra.mxu0 %v2630_v38 }
 0x3f2   : > { %v2229_v30 = vrot.slane %v2227_v28, 4  ;;  %v2560_v31 = vld [vmem:[#allocation6 + $0x18] sm:$0xf]  ;;  %2323 = vst.msk [vmem:[#allocation7 + $0x28] sm:$0xf0] %vm1576_vm8, %v2321_v27  ;;  %v2542_v33 = vrot.slane %v2540_v25, 4  ;;  %4446 = vmatprep.subr.mxu0 %v2645_v39 }
 0x3f3   : > { %2438 = vrot.lane.b32.xlu1 %v2437_v58, %s6690_s30  ;;  %v2448_v36 = vld [vmem:[#allocation6 + $0x17] sm:$0xf]  ;;  %v2566_v42 = vld [vmem:[#allocation6 + $0x1f] sm:$0xf]  ;;  %4447 = vmatpush3.msra.mxu0 %v2629_v41  ;;  %v2461_v57 = vld [vmem:[#allocation6 + $0x25] sm:$0xf] }
 0x3f4   : > { %2510 = vrot.lane.b32.xlu0 %v2508_v4, %s6690_s30  ;;  %2231 = vst.msk [vmem:[#allocation7 + $0x20] sm:$0xf0] %vm1576_vm8, %v2229_v30  ;;  %v2450_v40 = vrot.slane %v2448_v36, 4  ;;  %v2568_v47 = vrot.slane %v2566_v42, 4  ;;  %4448 = vmatprep.subr.mxu0 %v2644_v43  ;;  %v2474_v50 = vld [vmem:[#allocation6 + $0x18] sm:$0xf] }
 0x3f5   : > { %4449 = vmatpush3.msra.mxu0 %v2628_v44  ;;  %v2476_v54 = vrot.slane %v2474_v50, 4  ;;  %v2337_v56 = vld [vmem:[#allocation6 + $0x16] sm:$0xf]  ;;  %v2463_v59 = vrot.slane %v2461_v57, 4  ;;  %v2343_v63 = vld [vmem:[#allocation6 + $0x1d] sm:$0xf] }
 0x3f6   : > { %4450 = vmatprep.subr.mxu0 %v2643_v46  ;;  %v2363_v60 = vld [vmem:[#allocation6 + $0x17] sm:$0xf]  ;;  %v2429_v0 = vld [vmem:[#allocation6 + $0x1d] sm:$0xf]  ;;  %v2345_v1 = vrot.slane %v2343_v63, 4 }
 0x3f7   : > { %2517 = vrot.lane.b32.xlu1 %v2516_v7, %s6690_s30  ;;  %4451 = vmatpush3.msra.mxu0 %v2627_v48  ;;  %v2389_v58 = vld [vmem:[#allocation6 + $0x18] sm:$0xf]  ;;  %v2455_v3 = vld [vmem:[#allocation6 + $0x1e] sm:$0xf]  ;;  %v2573_v5 = vld [vmem:[#allocation6 + $0x26] sm:$0xf] }
 0x3f8   : > { %2536 = vrot.lane.b32.xlu0 %v2534_v18, %s6705_s29  ;;  %4452 = vmatprep.subr.mxu0 %v2642_v51  ;;  %v2251_v2 = vld [vmem:[#allocation6 + $0x16] sm:$0xf]  ;;  %v2369_v6 = vld [vmem:[#allocation6 + $0x1e] sm:$0xf] }
 0x3f9   : > { %4453 = vmatpush3.msra.mxu0 %v2626_v52  ;;  %v2253_v4 = vrot.slane %v2251_v2, 4  ;;  %v2371_v7 = vrot.slane %v2369_v6, 4  ;;  %v2277_v8 = vld [vmem:[#allocation6 + $0x17] sm:$0xf]  ;;  %v2481_v9 = vld [vmem:[#allocation6 + $0x1f] sm:$0xf] }
 0x3fa   : > { %v2279_v10 = vrot.slane %v2277_v8, 4  ;;  %v2395_v11 = vld [vmem:[#allocation6 + $0x1f] sm:$0xf]  ;;  %v2303_v13 = vld [vmem:[#allocation6 + $0x18] sm:$0xf]  ;;  %v2821_v6 = vld [vmem:[%s6643_s7 + $0x18] sm:$0xff] }
 0x3fb   : > { %2425 = vrot.lane.b32.xlu1 %v2424_v19, %s6690_s30  ;;  %v2397_v12 = vrot.slane %v2395_v11, 4  ;;  %v2305_v15 = vrot.slane %v2303_v13, 4  ;;  %v2820_v8 = vld [vmem:[%s6643_s7 + $0x10] sm:$0xff]  ;;  %v2975_v13 = vld [vmem:[%s6643_s7 + $0x48] sm:$0xff] }
 0x3fc   : > { %2562 = vrot.lane.b32.xlu0 %v2560_v31, %s6704_s18  ;;  %v2976_v11 = vld [vmem:[%s6643_s7 + $0x50] sm:$0xff] }
 0x3ff   : > { %2543 = vrot.lane.b32.xlu1 %v2542_v33, %s6705_s29 }
 0x400   : > { %2523 = vrot.lane.b32.xlu0 %v2521_v35, %s6690_s30 }
 0x403   : > { %2451 = vrot.lane.b32.xlu1 %v2450_v40, %s6705_s29 }
 0x404   : > { %2299 = vrot.lane.b32.xlu0 %v2297_v45, %s6704_s18 }
 0x407   : > { %2569 = vrot.lane.b32.xlu1 %v2568_v47, %s6704_s18 }
 0x408   : > { %2549 = vrot.lane.b32.xlu0 %v2547_v49, %s6705_s29 }
 0x40b   : > { %2477 = vrot.lane.b32.xlu1 %v2476_v54, %s6704_s18 }
 0x40c   : > { %2339 = vrot.lane.b32.xlu0 %v2337_v56, %s6690_s30 }
 0x40f   : > { %2556 = vrot.lane.b32.xlu1 %v2555_v55, %s6705_s29 }
 0x410   : > { %2365 = vrot.lane.b32.xlu0 %v2363_v60, %s6705_s29 }
 0x413   : > { %2464 = vrot.lane.b32.xlu1 %v2463_v59, %s6705_s29 }
 0x414   : > { %2391 = vrot.lane.b32.xlu0 %v2389_v58, %s6704_s18 }
 0x417   : > { %2582 = vrot.lane.b32.xlu1 %v2581_v62, %s6704_s18 }
 0x418   : > { %2431 = vrot.lane.b32.xlu0 %v2429_v0, %s6690_s30 }
 0x41b   : > { %2346 = vrot.lane.b32.xlu1 %v2345_v1, %s6690_s30 }
 0x41c   : > { %2457 = vrot.lane.b32.xlu0 %v2455_v3, %s6705_s29 }
 0x41f   : > { %2254 = vrot.lane.b32.xlu1 %v2253_v4, %s6690_s30  ;;  %s4955_s30 = smov [#allocation10]  }
 0x420   : > { %2575 = vrot.lane.b32.xlu0 %v2573_v5, %s6704_s18 }
 0x423   : > { %2372 = vrot.lane.b32.xlu1 %v2371_v7, %s6705_s29  ;;  %v4952_v7 = vmov 0.0  }
 0x424   : > { %2483 = vrot.lane.b32.xlu0 %v2481_v9, %s6704_s18  ;;  %4568 = vmatprep.subr.mxu1 %v4952_v7  ;;  %v2977_v9 = vld [vmem:[%s6643_s7 + $0x58] sm:$0xff] }
 0x425   : > { %4590 = vmatprep.subr.mxu0 %v4952_v7 }
 0x427   : > { %2280 = vrot.lane.b32.xlu1 %v2279_v10, %s6705_s29  ;;  %v2819_v10 = vld [vmem:[%s6643_s7 + $0x8] sm:$0xff]  ;;  %s6706_s29 = scalar_lea.vmem [#allocation10], %s5074_s15 }
 0x428   : > { %s6707_s1 = smov %s6706_s29 }
 0x429   : > { %s4122_s2 = sshll.u32 %s6707_s1, 4  ;;  %s4123_s2 = int_to_ptr.vmem [resolvable:$true] %s4122_s2 }
 0x42a   : > { %s4816_s17 = scalar_lea.vmem %s4123_s2, 16 }
 0x42b   : > { %2398 = vrot.lane.b32.xlu1 %v2397_v12, %s6704_s18  ;;  %v2818_v12 = vld [vmem:[%s6643_s7] sm:$0xff]  ;;  %p4817_p12 = scmp.ne.s32.totalorder %s4123_s2, %s4816_s17 }
 0x42d   : > { %p4818_p13 = pnand %p4817_p12, %p5063_p5 }
 0x42f   : > { %2306 = vrot.lane.b32.xlu1 %v2305_v15, %s6704_s18  ;;  %p4819_p0 = pneg %p4818_p13 }
 0x433   : > { %2490 = vrot.lane.b32.xlu1 %v2489_v16, %s6704_s18  ;;  %s4820_s18 = sshll.u32 %s4955_s30, 4  ;;  %s4821_s18 = int_to_ptr.vmem [resolvable:$false] %s4820_s18 }
 0x434   : > { %s4822_s25 = scalar_lea.vmem %s4821_s18, 32  ;;  %p4823_p1 = scmp.lt.s32.totalorder %s4123_s2, %s4821_s18 }
 0x435   : > { %p4824_p2 = scmp.lt.s32.totalorder %s4822_s25, %s4816_s17 }
 0x437   : > { %p4825_p3 = por %p4824_p2, %p4823_p1 }
 0x439   : > { %p4826_p4 = pnand %p4825_p3, %p4819_p0 }
 0x446   : > { %v2327_v17 = vpop.permute.xlu0 %2326 }
 0x447   : > { %2329 = vst.msk [vmem:[#allocation7 + $0x8] sm:$0xf] %vm1593_vm7, %v2327_v17 }
 0x449   : > { %v2334_v18 = vpop.permute.xlu1 %2333 }
 0x44a   : > { %2336 = vst.msk [vmem:[#allocation7 + $0x8] sm:$0xf0] %vm1602_vm9, %v2334_v18  ;;  %v2353_v19 = vpop.permute.xlu0 %2352  ;;  %v6239_v18 = vld [vmem:[%s6642_s6] ss:$0 sm:$0xff] }
 0x44b   : > { %2355 = vst.msk [vmem:[#allocation7 + $0x8] sm:$0xf] %vm1625_vm10, %v2353_v19 }
 0x44d   : > { %v2242_v20 = vpop.permute.xlu1 %2241 }
 0x44e   : > { %2244 = vst.msk [vmem:[#allocation7] sm:$0xf0] %vm1602_vm9, %v2242_v20  ;;  %v2379_v21 = vpop.permute.xlu0 %2378 }
 0x44f   : > { %2381 = vst.msk [vmem:[#allocation7 + $0x8] sm:$0xf] %vm1657_vm12, %v2379_v21 }
 0x451   : > { %v2360_v22 = vpop.permute.xlu1 %2359 }
 0x452   : > { %2362 = vst.msk [vmem:[#allocation7 + $0x8] sm:$0xf0] %vm1634_vm11, %v2360_v22  ;;  %v2419_v23 = vpop.permute.xlu0 %2418 }
 0x453   : > { %2421 = vst.msk [vmem:[#allocation7 + $0x10] sm:$0xf] %vm1593_vm7, %v2419_v23 }
 0x455   : > { %v2268_v24 = vpop.permute.xlu1 %2267 }
 0x456   : > { %2270 = vst.msk [vmem:[#allocation7] sm:$0xf0] %vm1634_vm11, %v2268_v24  ;;  %v2445_v25 = vpop.permute.xlu0 %2444 }
 0x457   : > { %2447 = vst.msk [vmem:[#allocation7 + $0x10] sm:$0xf] %vm1625_vm10, %v2445_v25  ;;  %v2899_v25 = vld [vmem:[%s6643_s7 + $0x38] sm:$0xff] }
 0x459   : > { %v2386_v26 = vpop.permute.xlu1 %2385 }
 0x45a   : > { %2388 = vst.msk [vmem:[#allocation7 + $0x8] sm:$0xf0] %vm1666_vm13, %v2386_v26  ;;  %v2471_v27 = vpop.permute.xlu0 %2470  ;;  %v2898_v26 = vld [vmem:[%s6643_s7 + $0x30] sm:$0xff] }
 0x45b   : > { %2473 = vst.msk [vmem:[#allocation7 + $0x10] sm:$0xf] %vm1657_vm12, %v2471_v27 }
 0x45d   : > { %v2294_v28 = vpop.permute.xlu1 %2293 }
 0x45e   : > { %2296 = vst.msk [vmem:[#allocation7] sm:$0xf0] %vm1666_vm13, %v2294_v28  ;;  %v2248_v29 = vpop.permute.xlu0 %2247  ;;  %v3133_v28 = vld [vmem:[%s6643_s7 + $0x98] sm:$0xff] }
 0x45f   : > { %2250 = vst.msk [vmem:[#allocation7 + $0x20] sm:$0xf] %vm1593_vm7, %v2248_v29  ;;  %v2897_v29 = vld [vmem:[%s6643_s7 + $0x28] sm:$0xff] }
 0x461   : > { %v2531_v30 = vpop.permute.xlu1 %2530  ;;  %v2587_v31 = vld [vmem:[#allocation7 + $0x8] sm:$0xff] }
 0x462   : > { %2533 = vst.msk [vmem:[#allocation7 + $0x38] sm:$0xf0] %vm1602_vm9, %v2531_v30  ;;  %2729 = vmatprep.mubr.f32.mxu1 %v2587_v31  ;;  %v2274_v32 = vpop.permute.xlu0 %2273  ;;  %v3132_v30 = vld [vmem:[%s6643_s7 + $0x90] sm:$0xff]  ;;  %v2896_v31 = vld [vmem:[%s6643_s7 + $0x20] sm:$0xff] }
 0x463   : > { %2276 = vst.msk [vmem:[#allocation7 + $0x20] sm:$0xf] %vm1625_vm10, %v2274_v32  ;;  %v3131_v32 = vld [vmem:[%s6643_s7 + $0x88] sm:$0xff] }
 0x465   : > { %v2439_v33 = vpop.permute.xlu1 %2438  ;;  %v2586_v34 = vld [vmem:[#allocation7] sm:$0xff] }
 0x466   : > { %2441 = vst.msk [vmem:[#allocation7 + $0x30] sm:$0xf0] %vm1602_vm9, %v2439_v33  ;;  %2730 = vmatmul.mubr.f32.vlgmr.msra.gmra.mxu1 %v2586_v34  ;;  %v2511_v35 = vpop.permute.xlu0 %2510  ;;  %v3055_v34 = vld [vmem:[%s6643_s7 + $0x78] sm:$0xff] }
 0x467   : > { %2513 = vst.msk [vmem:[#allocation7 + $0x18] sm:$0xf] %vm1593_vm7, %v2511_v35  ;;  %4569 = vmatpush3.msra.mxu1 %v2821_v6  ;;  %v3130_v35 = vld [vmem:[%s6643_s7 + $0x80] sm:$0xff]  ;;  %v3521_v6 = vld [vmem:[%s6643_s7 + $0x128] sm:$0xff] }
 0x468   : > { %4570 = vmatprep.subr.mxu1 %v4952_v7 }
 0x469   : > { %v2518_v36 = vpop.permute.xlu1 %2517  ;;  %4571 = vmatpush3.msra.mxu1 %v2820_v8 }
 0x46a   : > { %2520 = vst.msk [vmem:[#allocation7 + $0x18] sm:$0xf0] %vm1602_vm9, %v2518_v36  ;;  %v2537_v37 = vpop.permute.xlu0 %2536  ;;  %4572 = vmatprep.subr.mxu1 %v4952_v7 }
 0x46b   : > { %2539 = vst.msk [vmem:[#allocation7 + $0x18] sm:$0xf] %vm1625_vm10, %v2537_v37  ;;  %4573 = vmatpush3.msra.mxu1 %v2819_v10  ;;  %v3054_v37 = vld [vmem:[%s6643_s7 + $0x70] sm:$0xff]  ;;  %v3520_v10 = vld [vmem:[%s6643_s7 + $0x120] sm:$0xff] }
 0x46c   : > { %4574 = vmatprep.subr.mxu1 %v4952_v7 }
 0x46d   : > { %v2426_v38 = vpop.permute.xlu1 %2425  ;;  %4575 = vmatpush3.msra.mxu1 %v2818_v12  ;;  %v3600_v12 = vld [vmem:[%s6643_s7 + $0x150] sm:$0xff] }
 0x46e   : > { %2428 = vst.msk [vmem:[#allocation7 + $0x10] sm:$0xf0] %vm1602_vm9, %v2426_v38  ;;  %v2563_v39 = vpop.permute.xlu0 %2562  ;;  %4579 = vmatprep.subr.mxu1 %v4952_v7  ;;  %v3289_v38 = vld [vmem:[%s6643_s7 + $0xd8] sm:$0xff] }
 0x46f   : > { %2565 = vst.msk [vmem:[#allocation7 + $0x18] sm:$0xf] %vm1657_vm12, %v2563_v39  ;;  %v3053_v39 = vld [vmem:[%s6643_s7 + $0x68] sm:$0xff] }
 0x471   : > { %v2544_v40 = vpop.permute.xlu1 %2543 }
 0x472   : > { %2546 = vst.msk [vmem:[#allocation7 + $0x18] sm:$0xf0] %vm1634_vm11, %v2544_v40  ;;  %v2524_v41 = vpop.permute.xlu0 %2523  ;;  %v3288_v40 = vld [vmem:[%s6643_s7 + $0xd0] sm:$0xff] }
 0x473   : > { %2526 = vst.msk [vmem:[#allocation7 + $0x38] sm:$0xf] %vm1593_vm7, %v2524_v41  ;;  %v3052_v41 = vld [vmem:[%s6643_s7 + $0x60] sm:$0xff] }
 0x475   : > { %v2452_v42 = vpop.permute.xlu1 %2451 }
 0x476   : > { %2454 = vst.msk [vmem:[#allocation7 + $0x10] sm:$0xf0] %vm1634_vm11, %v2452_v42  ;;  %v2300_v43 = vpop.permute.xlu0 %2299  ;;  %v3287_v42 = vld [vmem:[%s6643_s7 + $0xc8] sm:$0xff] }
 0x477   : > { %2302 = vst.msk [vmem:[#allocation7 + $0x20] sm:$0xf] %vm1657_vm12, %v2300_v43 }
 0x479   : > { %v2570_v44 = vpop.permute.xlu1 %2569 }
 0x47a   : > { %2572 = vst.msk [vmem:[#allocation7 + $0x18] sm:$0xf0] %vm1666_vm13, %v2570_v44  ;;  %v2550_v45 = vpop.permute.xlu0 %2549  ;;  %v3211_v44 = vld [vmem:[%s6643_s7 + $0xb8] sm:$0xff] }
 0x47b   : > { %2552 = vst.msk [vmem:[#allocation7 + $0x38] sm:$0xf] %vm1625_vm10, %v2550_v45  ;;  %v3286_v45 = vld [vmem:[%s6643_s7 + $0xc0] sm:$0xff] }
 0x47d   : > { %v2478_v46 = vpop.permute.xlu1 %2477 }
 0x47e   : > { %2480 = vst.msk [vmem:[#allocation7 + $0x10] sm:$0xf0] %vm1666_vm13, %v2478_v46  ;;  %v2340_v47 = vpop.permute.xlu0 %2339 }
 0x47f   : > { %2342 = vst.msk [vmem:[#allocation7 + $0x28] sm:$0xf] %vm1593_vm7, %v2340_v47  ;;  %v3210_v47 = vld [vmem:[%s6643_s7 + $0xb0] sm:$0xff] }
 0x481   : > { %v2557_v48 = vpop.permute.xlu1 %2556  ;;  %v2589_v49 = vld [vmem:[#allocation7 + $0x18] sm:$0xff] }
 0x482   : > { %2559 = vst.msk [vmem:[#allocation7 + $0x38] sm:$0xf0] %vm1634_vm11, %v2557_v48  ;;  %2804 = vmatprep.mubr.f32.mxu0 %v2589_v49  ;;  %v2366_v50 = vpop.permute.xlu0 %2365  ;;  %v3209_v48 = vld [vmem:[%s6643_s7 + $0xa8] sm:$0xff]  ;;  %v3445_v49 = vld [vmem:[%s6643_s7 + $0x118] sm:$0xff] }
 0x483   : > { %2368 = vst.msk [vmem:[#allocation7 + $0x28] sm:$0xf] %vm1625_vm10, %v2366_v50  ;;  %v3208_v50 = vld [vmem:[%s6643_s7 + $0xa0] sm:$0xff] }
 0x485   : > { %v2465_v51 = vpop.permute.xlu1 %2464  ;;  %v2588_v52 = vld [vmem:[#allocation7 + $0x10] sm:$0xff] }
 0x486   : > { %2467 = vst.msk [vmem:[#allocation7 + $0x30] sm:$0xf0] %vm1634_vm11, %v2465_v51  ;;  %2805 = vmatmul.mubr.f32.vlgmr.msra.gmra.mxu0 %v2588_v52  ;;  %v2392_v53 = vpop.permute.xlu0 %2391  ;;  %v3444_v51 = vld [vmem:[%s6643_s7 + $0x110] sm:$0xff] }
 0x487   : > { %2394 = vst.msk [vmem:[#allocation7 + $0x28] sm:$0xf] %vm1657_vm12, %v2392_v53  ;;  %4591 = vmatpush3.msra.mxu0 %v2977_v9  ;;  %v3367_v53 = vld [vmem:[%s6643_s7 + $0xf8] sm:$0xff] }
 0x488   : > { %4592 = vmatprep.subr.mxu0 %v4952_v7  ;;  %v3601_v9 = vld [vmem:[%s6643_s7 + $0x158] sm:$0xff] }
 0x489   : > { %v2583_v54 = vpop.permute.xlu1 %2582  ;;  %4593 = vmatpush3.msra.mxu0 %v2976_v11 }
 0x48a   : > { %2585 = vst.msk [vmem:[#allocation7 + $0x38] sm:$0xf0] %vm1666_vm13, %v2583_v54  ;;  %v2432_v55 = vpop.permute.xlu0 %2431  ;;  %4594 = vmatprep.subr.mxu0 %v4952_v7  ;;  %v3366_v54 = vld [vmem:[%s6643_s7 + $0xf0] sm:$0xff] }
 0x48b   : > { %2434 = vst.msk [vmem:[#allocation7 + $0x30] sm:$0xf] %vm1593_vm7, %v2432_v55  ;;  %4595 = vmatpush3.msra.mxu0 %v2975_v13  ;;  %v3679_v13 = vld [vmem:[%s6643_s7 + $0x178] sm:$0xff] }
 0x48c   : > { %4596 = vmatprep.subr.mxu0 %v4952_v7 }
 0x48d   : > { %v2347_v56 = vpop.permute.xlu1 %2346  ;;  %4597 = vmatpush3.msra.mxu0 %v2974_v14  ;;  %v3599_v14 = vld [vmem:[%s6643_s7 + $0x148] sm:$0xff] }
 0x48e   : > { %2349 = vst.msk [vmem:[#allocation7 + $0x28] sm:$0xf0] %vm1602_vm9, %v2347_v56  ;;  %v2458_v57 = vpop.permute.xlu0 %2457  ;;  %4612 = vmatprep.subr.mxu0 %v4952_v7  ;;  %v3443_v56 = vld [vmem:[%s6643_s7 + $0x108] sm:$0xff] }
 0x48f   : > { %2460 = vst.msk [vmem:[#allocation7 + $0x30] sm:$0xf] %vm1625_vm10, %v2458_v57  ;;  %v3365_v57 = vld [vmem:[%s6643_s7 + $0xe8] sm:$0xff] }
 0x491   : > { %v2255_v59 = vpop.permute.xlu1 %2254 }
 0x492   : > { %2257 = vst.msk [vmem:[#allocation7 + $0x20] sm:$0xf0] %vm1602_vm9, %v2255_v59  ;;  %v2576_v60 = vpop.permute.xlu0 %2575 }
 0x493   : > { %2578 = vst.msk [vmem:[#allocation7 + $0x38] sm:$0xf] %vm1657_vm12, %v2576_v60  ;;  %v3442_v60 = vld [vmem:[%s6643_s7 + $0x100] sm:$0xff] }
 0x495   : > { %v2373_v61 = vpop.permute.xlu1 %2372 }
 0x496   : > { %2375 = vst.msk [vmem:[#allocation7 + $0x28] sm:$0xf0] %vm1634_vm11, %v2373_v61  ;;  %v2484_v62 = vpop.permute.xlu0 %2483 }
 0x497   : > { %2486 = vst.msk [vmem:[#allocation7 + $0x30] sm:$0xf] %vm1657_vm12, %v2484_v62  ;;  %v3364_v62 = vld [vmem:[%s6643_s7 + $0xe0] sm:$0xff] }
 0x499   : > { %v2281_v58 = vpop.permute.xlu1 %2280 }
 0x49a   : > { %2283 = vst.msk [vmem:[#allocation7 + $0x20] sm:$0xf0] %vm1634_vm11, %v2281_v58  ;;  %v2593_v63 = vld [vmem:[#allocation7 + $0x38] sm:$0xff] }
 0x49b   : > { %2809 = vmatprep.mubr.f32.mxu0 %v2593_v63 }
 0x49d   : > { %v2399_v0 = vpop.permute.xlu1 %2398 }
 0x49e   : > { %2401 = vst.msk [vmem:[#allocation7 + $0x28] sm:$0xf0] %vm1666_vm13, %v2399_v0 }
 0x4a1   : > { %v2307_v1 = vpop.permute.xlu1 %2306 }
 0x4a2   : > { %2309 = vst.msk [vmem:[#allocation7 + $0x20] sm:$0xf0] %vm1666_vm13, %v2307_v1  ;;  %v3523_v1 = vld [vmem:[%s6643_s7 + $0x138] sm:$0xff] }
 0x4a5   : > { %v2491_v2 = vpop.permute.xlu1 %2490  ;;  %v2591_v3 = vld [vmem:[#allocation7 + $0x28] sm:$0xff] }
 0x4a6   : > { %2493 = vst.msk [vmem:[#allocation7 + $0x30] sm:$0xf0] %vm1666_vm13, %v2491_v2  ;;  %2734 = vmatprep.mubr.f32.mxu1 %v2591_v3 }
 0x4a9   : > { %v2590_v4 = vld [vmem:[#allocation7 + $0x20] sm:$0xff] }
 0x4aa   : > { %2735 = vmatmul.mubr.f32.gmra.mxu1 %v2590_v4  ;;  %v3522_v4 = vld [vmem:[%s6643_s7 + $0x130] sm:$0xff] }
 0x4ab   : > { %4576 = vmatprep.mubr.msk.f32.mxu1 %vm4953_vm15, %v4952_v7 }
 0x4ad   : > { %v2592_v5 = vld [vmem:[#allocation7 + $0x30] sm:$0xff] }
 0x4ae   : > { %2810 = vmatmul.mubr.f32.gmra.mxu0 %v2592_v5 }
 0x4af   : > { %4598 = vmatprep.mubr.msk.f32.mxu0 %vm4953_vm15, %v4952_v7 }
 0x526   : > { %v4416_v15 = vpop.f32.mrf.mxu1 }
 0x528   : > { %v4417_v16 = vpop.f32.mrf.mxu1 }
 0x529   : > { %v4418_v17 = vadd.f32 %v4417_v16, %v4416_v15  ;;  %v3678_v15 = vld [vmem:[%s6643_s7 + $0x170] sm:$0xff]  ;;  %v3598_v16 = vld [vmem:[%s6643_s7 + $0x140] sm:$0xff] }
 0x52b   : > { %v2732_v21 = vadd.f32 %v4418_v17, %v6239_v18  ;;  %v3677_v17 = vld [vmem:[%s6643_s7 + $0x168] sm:$0xff] }
 0x546   : > { %v4454_v19 = vpop.f32.mrf.mxu0 }
 0x548   : > { %v4455_v20 = vpop.f32.mrf.mxu0 }
 0x549   : > { %v4456_v22 = vadd.f32 %v4455_v20, %v4454_v19  ;;  %v3676_v19 = vld [vmem:[%s6643_s7 + $0x160] sm:$0xff]  ;;  %v3757_v20 = vld [vmem:[%s6643_s7 + $0x198] sm:$0xff] }
 0x54b   : > { %v2807_v23 = vadd.f32 %v4456_v22, %v2732_v21  ;;  %v3756_v22 = vld [vmem:[%s6643_s7 + $0x190] sm:$0xff] }
 0x54d   : > { %v6242_v24 = vmax.f32 %v2807_v23, 0.0  ;;  %v3835_v23 = vld [vmem:[%s6643_s7 + $0x1b8] sm:$0xff] }
 0x54f   : > { %4577 = vmatmul.mubr.msk.f32.vlgmr.msra.gmra.mxu1 %vm1559_vm14, %v6242_v24  ;;  %v2978_v27 = vrot.slane %v6242_v24, 2  ;;  %v2900_v33 = vrot.slane %v6242_v24, 1  ;;  %v3134_v36 = vrot.slane %v6242_v24, 4  ;;  %v3056_v43 = vrot.slane %v6242_v24, 3 }
 0x550   : > { %4580 = vmatpush3.msra.mxu1 %v2899_v25  ;;  %4587 = vmatprep.mubr.msk.f32.mxu1 %vm4953_vm15, %v4952_v7  ;;  %v3290_v46 = vrot.slane %v6242_v24, 6  ;;  %v3212_v52 = vrot.slane %v6242_v24, 5  ;;  %v3368_v63 = vrot.slane %v6242_v24, 7  ;;  %v3755_v24 = vld [vmem:[%s6643_s7 + $0x188] sm:$0xff]  ;;  %v3834_v25 = vld [vmem:[%s6643_s7 + $0x1b0] sm:$0xff] }
 0x551   : > { %4581 = vmatprep.subr.mxu1 %v4952_v7  ;;  %4599 = vmatmul.mubr.msk.f32.vlgmr.msra.gmra.mxu0 %vm1559_vm14, %v2978_v27  ;;  %v3833_v27 = vld [vmem:[%s6643_s7 + $0x1a8] sm:$0xff] }
 0x552   : > { %4582 = vmatpush3.msra.mxu1 %v2898_v26  ;;  %4613 = vmatpush3.msra.mxu0 %v3133_v28  ;;  %v3754_v26 = vld [vmem:[%s6643_s7 + $0x180] sm:$0xff] }
 0x553   : > { %4583 = vmatprep.subr.mxu1 %v4952_v7  ;;  %4614 = vmatprep.subr.mxu0 %v4952_v7 }
 0x554   : > { %4584 = vmatpush3.msra.mxu1 %v2897_v29  ;;  %4615 = vmatpush3.msra.mxu0 %v3132_v30  ;;  %v3832_v29 = vld [vmem:[%s6643_s7 + $0x1a0] sm:$0xff]  ;;  %v3913_v30 = vld [vmem:[%s6643_s7 + $0x1d8] sm:$0xff] }
 0x555   : > { %4585 = vmatprep.subr.mxu1 %v4952_v7  ;;  %4616 = vmatprep.subr.mxu0 %v4952_v7 }
 0x556   : > { %4586 = vmatpush3.msra.mxu1 %v2896_v31  ;;  %4617 = vmatpush3.msra.mxu0 %v3131_v32  ;;  %v3912_v32 = vld [vmem:[%s6643_s7 + $0x1d0] sm:$0xff] }
 0x557   : > { %4588 = vmatmul.mubr.msk.f32.vlgmr.msra.gmra.mxu1 %vm1559_vm14, %v2900_v33  ;;  %4601 = vmatprep.subr.mxu1 %v4952_v7  ;;  %v3991_v33 = vld [vmem:[%s6643_s7 + $0x1f8] sm:$0xff] }
 0x558   : > { %4618 = vmatprep.subr.mxu0 %v4952_v7  ;;  %4602 = vmatpush3.msra.mxu1 %v3055_v34  ;;  %v3911_v34 = vld [vmem:[%s6643_s7 + $0x1c8] sm:$0xff] }
 0x559   : > { %4619 = vmatpush3.msra.mxu0 %v3130_v35  ;;  %4620 = vmatprep.mubr.msk.f32.mxu0 %vm4953_vm15, %v4952_v7  ;;  %v3990_v35 = vld [vmem:[%s6643_s7 + $0x1f0] sm:$0xff] }
 0x55a   : > { %4603 = vmatprep.subr.mxu1 %v4952_v7  ;;  %4621 = vmatmul.mubr.msk.f32.vlgmr.msra.gmra.mxu0 %vm1559_vm14, %v3134_v36  ;;  %v3910_v36 = vld [vmem:[%s6643_s7 + $0x1c0] sm:$0xff] }
 0x55b   : > { %4634 = vmatprep.subr.mxu0 %v4952_v7  ;;  %4604 = vmatpush3.msra.mxu1 %v3054_v37  ;;  %v3989_v37 = vld [vmem:[%s6643_s7 + $0x1e8] sm:$0xff] }
 0x55c   : > { %4635 = vmatpush3.msra.mxu0 %v3289_v38  ;;  %4605 = vmatprep.subr.mxu1 %v4952_v7 }
 0x55d   : > { %4636 = vmatprep.subr.mxu0 %v4952_v7  ;;  %4606 = vmatpush3.msra.mxu1 %v3053_v39  ;;  %v3988_v39 = vld [vmem:[%s6643_s7 + $0x1e0] sm:$0xff] }
 0x55e   : > { %4637 = vmatpush3.msra.mxu0 %v3288_v40  ;;  %4607 = vmatprep.subr.mxu1 %v4952_v7 }
 0x55f   : > { %4638 = vmatprep.subr.mxu0 %v4952_v7  ;;  %4608 = vmatpush3.msra.mxu1 %v3052_v41 }
 0x560   : > { %4609 = vmatprep.mubr.msk.f32.mxu1 %vm4953_vm15, %v4952_v7  ;;  %4639 = vmatpush3.msra.mxu0 %v3287_v42 }
 0x561   : > { %4610 = vmatmul.mubr.msk.f32.vlgmr.msra.gmra.mxu1 %vm1559_vm14, %v3056_v43  ;;  %4623 = vmatprep.subr.mxu1 %v4952_v7 }
 0x562   : > { %4640 = vmatprep.subr.mxu0 %v4952_v7  ;;  %4624 = vmatpush3.msra.mxu1 %v3211_v44 }
 0x563   : > { %4641 = vmatpush3.msra.mxu0 %v3286_v45  ;;  %4642 = vmatprep.mubr.msk.f32.mxu0 %vm4953_vm15, %v4952_v7 }
 0x564   : > { %4625 = vmatprep.subr.mxu1 %v4952_v7  ;;  %4643 = vmatmul.mubr.msk.f32.vlgmr.msra.gmra.mxu0 %vm1559_vm14, %v3290_v46 }
 0x565   : > { %4626 = vmatpush3.msra.mxu1 %v3210_v47  ;;  %4631 = vmatprep.mubr.msk.f32.mxu1 %vm4953_vm15, %v4952_v7 }
 0x566   : > { %4627 = vmatprep.subr.mxu1 %v4952_v7  ;;  %4656 = vmatprep.subr.mxu0 %v4952_v7 }
 0x567   : > { %4628 = vmatpush3.msra.mxu1 %v3209_v48  ;;  %4657 = vmatpush3.msra.mxu0 %v3445_v49 }
 0x568   : > { %4629 = vmatprep.subr.mxu1 %v4952_v7  ;;  %4658 = vmatprep.subr.mxu0 %v4952_v7 }
 0x569   : > { %4630 = vmatpush3.msra.mxu1 %v3208_v50  ;;  %4659 = vmatpush3.msra.mxu0 %v3444_v51 }
 0x56a   : > { %4632 = vmatmul.mubr.msk.f32.vlgmr.msra.gmra.mxu1 %vm1559_vm14, %v3212_v52  ;;  %4645 = vmatprep.subr.mxu1 %v4952_v7  ;;  %v4419_v55 = vpop.f32.mrf.mxu1 }
 0x56b   : > { %4646 = vmatpush3.msra.mxu1 %v3367_v53  ;;  %4653 = vmatprep.mubr.msk.f32.mxu1 %vm4953_vm15, %v4952_v7 }
 0x56c   : > { %4647 = vmatprep.subr.mxu1 %v4952_v7  ;;  %v4420_v59 = vpop.f32.mrf.mxu1  ;;  %4660 = vmatprep.subr.mxu0 %v4952_v7 }
 0x56d   : > { %4648 = vmatpush3.msra.mxu1 %v3366_v54  ;;  %v4421_v61 = vadd.f32 %v4420_v59, %v4419_v55  ;;  %4661 = vmatpush3.msra.mxu0 %v3443_v56 }
 0x56e   : > { %4649 = vmatprep.subr.mxu1 %v4952_v7  ;;  %v4457_v58 = vpop.f32.mrf.mxu0  ;;  %4662 = vmatprep.subr.mxu0 %v4952_v7 }
 0x56f   : > { %4650 = vmatpush3.msra.mxu1 %v3365_v57  ;;  %4663 = vmatpush3.msra.mxu0 %v3442_v60  ;;  %v2737_v2 = vadd.f32 %v4421_v61, %v6239_v18 }
 0x570   : > { %4651 = vmatprep.subr.mxu1 %v4952_v7  ;;  %v4458_v0 = vpop.f32.mrf.mxu0  ;;  %4664 = vmatprep.mubr.msk.f32.mxu0 %vm4953_vm15, %v4952_v7 }
 0x571   : > { %4652 = vmatpush3.msra.mxu1 %v3364_v62  ;;  %v4459_v3 = vadd.f32 %v4458_v0, %v4457_v58  ;;  %4678 = vmatprep.subr.mxu0 %v4952_v7 }
 0x572   : > { %4654 = vmatmul.mubr.msk.f32.vlgmr.msra.gmra.mxu1 %vm1559_vm14, %v3368_v63  ;;  %4667 = vmatprep.subr.mxu1 %v4952_v7 }
 0x573   : > { %v2812_v5 = vadd.f32 %v4459_v3, %v2737_v2  ;;  %4668 = vmatpush3.msra.mxu1 %v3523_v1  ;;  %4675 = vmatprep.mubr.msk.f32.mxu1 %vm4953_vm15, %v4952_v7 }
 0x574   : > { %4669 = vmatprep.subr.mxu1 %v4952_v7 }
 0x575   : > { %v6399_v8 = vmax.f32 %v2812_v5, 0.0  ;;  %4670 = vmatpush3.msra.mxu1 %v3522_v4 }
 0x576   : > { %4671 = vmatprep.subr.mxu1 %v4952_v7 }
 0x577   : > { %4672 = vmatpush3.msra.mxu1 %v3521_v6  ;;  %4665 = vmatmul.mubr.msk.f32.vlgmr.msra.gmra.mxu0 %vm1559_vm14, %v6399_v8  ;;  %v3524_v11 = vrot.slane %v6399_v8, 1  ;;  %v3602_v18 = vrot.slane %v6399_v8, 2  ;;  %v3680_v21 = vrot.slane %v6399_v8, 3  ;;  %v3758_v28 = vrot.slane %v6399_v8, 4 }
 0x578   : > { %4673 = vmatprep.subr.mxu1 %v4952_v7  ;;  %4679 = vmatpush3.msra.mxu0 %v3601_v9  ;;  %v3836_v31 = vrot.slane %v6399_v8, 5  ;;  %v3914_v38 = vrot.slane %v6399_v8, 6  ;;  %v3992_v40 = vrot.slane %v6399_v8, 7 }
 0x579   : > { %4674 = vmatpush3.msra.mxu1 %v3520_v10  ;;  %4680 = vmatprep.subr.mxu0 %v4952_v7 }
 0x57a   : > { %4689 = vmatprep.subr.mxu1 %v4952_v7  ;;  %4676 = vmatmul.mubr.msk.f32.vlgmr.msra.gmra.mxu1 %vm1559_vm14, %v3524_v11 }
 0x57b   : > { %4681 = vmatpush3.msra.mxu0 %v3600_v12  ;;  %4690 = vmatpush3.msra.mxu1 %v3679_v13 }
 0x57c   : > { %4682 = vmatprep.subr.mxu0 %v4952_v7  ;;  %4691 = vmatprep.subr.mxu1 %v4952_v7 }
 0x57d   : > { %4683 = vmatpush3.msra.mxu0 %v3599_v14  ;;  %4692 = vmatpush3.msra.mxu1 %v3678_v15 }
 0x57e   : > { %4684 = vmatprep.subr.mxu0 %v4952_v7  ;;  %4693 = vmatprep.subr.mxu1 %v4952_v7 }
 0x57f   : > { %4685 = vmatpush3.msra.mxu0 %v3598_v16  ;;  %4686 = vmatprep.mubr.msk.f32.mxu0 %vm4953_vm15, %v4952_v7 }
 0x580   : > { %4694 = vmatpush3.msra.mxu1 %v3677_v17  ;;  %4687 = vmatmul.mubr.msk.f32.vlgmr.msra.gmra.mxu0 %vm1559_vm14, %v3602_v18  ;;  %v4080_v17 = vlaneseq }
 0x581   : > { %4695 = vmatprep.subr.mxu1 %v4952_v7  ;;  %4700 = vmatprep.subr.mxu0 %v4952_v7 }
 0x582   : > { %4696 = vmatpush3.msra.mxu1 %v3676_v19  ;;  %4697 = vmatprep.mubr.msk.f32.mxu1 %vm4953_vm15, %v4952_v7 }
 0x583   : > { %4701 = vmatpush3.msra.mxu0 %v3757_v20  ;;  %4698 = vmatmul.mubr.msk.f32.vlgmr.msra.gmra.mxu1 %vm1559_vm14, %v3680_v21  ;;  %v4081_v20 = vshrl.u32 %v4080_v17, 7 }
 0x584   : > { %4702 = vmatprep.subr.mxu0 %v4952_v7  ;;  %4711 = vmatprep.subr.mxu1 %v4952_v7 }
 0x585   : > { %4703 = vmatpush3.msra.mxu0 %v3756_v22  ;;  %4712 = vmatpush3.msra.mxu1 %v3835_v23 }
 0x586   : > { %4704 = vmatprep.subr.mxu0 %v4952_v7  ;;  %4713 = vmatprep.subr.mxu1 %v4952_v7 }
 0x587   : > { %4705 = vmatpush3.msra.mxu0 %v3755_v24  ;;  %4714 = vmatpush3.msra.mxu1 %v3834_v25  ;;  %v4082_v25 = vsub.s32 0, %v4081_v20 }
 0x588   : > { %4706 = vmatprep.subr.mxu0 %v4952_v7  ;;  %4715 = vmatprep.subr.mxu1 %v4952_v7 }
 0x589   : > { %4707 = vmatpush3.msra.mxu0 %v3754_v26  ;;  %4708 = vmatprep.mubr.msk.f32.mxu0 %vm4953_vm15, %v4952_v7 }
 0x58a   : > { %4716 = vmatpush3.msra.mxu1 %v3833_v27  ;;  %4709 = vmatmul.mubr.msk.f32.vlgmr.msra.gmra.mxu0 %vm1559_vm14, %v3758_v28 }
 0x58b   : > { %4717 = vmatprep.subr.mxu1 %v4952_v7  ;;  %4722 = vmatprep.subr.mxu0 %v4952_v7 }
 0x58c   : > { %4718 = vmatpush3.msra.mxu1 %v3832_v29  ;;  %4719 = vmatprep.mubr.msk.f32.mxu1 %vm4953_vm15, %v4952_v7 }
 0x58d   : > { %4723 = vmatpush3.msra.mxu0 %v3913_v30  ;;  %4720 = vmatmul.mubr.msk.f32.vlgmr.msra.gmra.mxu1 %vm1559_vm14, %v3836_v31 }
 0x58e   : > { %4724 = vmatprep.subr.mxu0 %v4952_v7  ;;  %4733 = vmatprep.subr.mxu1 %v4952_v7 }
 0x58f   : > { %4725 = vmatpush3.msra.mxu0 %v3912_v32  ;;  %4734 = vmatpush3.msra.mxu1 %v3991_v33 }
 0x590   : > { %4726 = vmatprep.subr.mxu0 %v4952_v7  ;;  %4735 = vmatprep.subr.mxu1 %v4952_v7 }
 0x591   : > { %4727 = vmatpush3.msra.mxu0 %v3911_v34  ;;  %4736 = vmatpush3.msra.mxu1 %v3990_v35 }
 0x592   : > { %4728 = vmatprep.subr.mxu0 %v4952_v7  ;;  %4737 = vmatprep.subr.mxu1 %v4952_v7 }
 0x593   : > { %4729 = vmatpush3.msra.mxu0 %v3910_v36  ;;  %4730 = vmatprep.mubr.msk.f32.mxu0 %vm4953_vm15, %v4952_v7 }
 0x594   : > { %4738 = vmatpush3.msra.mxu1 %v3989_v37  ;;  %4731 = vmatmul.mubr.msk.f32.vlgmr.msra.gmra.mxu0 %vm1559_vm14, %v3914_v38 }
 0x595   : > { %4739 = vmatprep.subr.mxu1 %v4952_v7  ;;  %4741 = vmatprep.mubr.msk.f32.mxu1 %vm4953_vm15, %v4952_v7  ;;  %v2817_v7 = vld [vmem:[%s6644_s8] sm:$0x1] }
 0x596   : > { %4740 = vmatpush3.msra.mxu1 %v3988_v39 }
 0x597   : > { %4742 = vmatmul.mubr.msk.f32.vlgmr.msra.gmra.mxu1 %vm1559_vm14, %v3992_v40 }
 0x60f   : > { %v2891_v41 = vpop.f32.mrf.mxu1 }
 0x610   : > { %v2895_v55 = vadd.f32 %v2891_v41, %v2817_v7 }
 0x611   : > { %v4578_v42 = vpop.f32.mrf.mxu1  ;;  %v3047_v43 = vpop.f32.mrf.mxu0 }
 0x613   : > { %v4600_v44 = vpop.f32.mrf.mxu0 }
 0x617   : > { %v2969_v45 = vpop.f32.mrf.mxu1 }
 0x618   : > { %v2973_v56 = vadd.f32 %v2969_v45, %v2895_v55 }
 0x619   : > { %v4589_v46 = vpop.f32.mrf.mxu1 }
 0x61a   : > { %v3203_v47 = vpop.f32.mrf.mxu0  ;;  %v3051_v59 = vadd.f32 %v3047_v43, %v2973_v56 }
 0x61c   : > { %v4622_v48 = vpop.f32.mrf.mxu0 }
 0x621   : > { %v3125_v49 = vpop.f32.mrf.mxu1 }
 0x622   : > { %v3129_v61 = vadd.f32 %v3125_v49, %v3051_v59 }
 0x623   : > { %v4611_v50 = vpop.f32.mrf.mxu1 }
 0x624   : > { %v3359_v51 = vpop.f32.mrf.mxu0  ;;  %v3207_v58 = vadd.f32 %v3203_v47, %v3129_v61 }
 0x626   : > { %v4644_v52 = vpop.f32.mrf.mxu0 }
 0x62a   : > { %v3281_v53 = vpop.f32.mrf.mxu1 }
 0x62b   : > { %v3285_v1 = vadd.f32 %v3281_v53, %v3207_v58 }
 0x62c   : > { %v4633_v54 = vpop.f32.mrf.mxu1 }
 0x62d   : > { %v3363_v3 = vadd.f32 %v3359_v51, %v3285_v1 }
 0x632   : > { %v3437_v57 = vpop.f32.mrf.mxu1 }
 0x633   : > { %v3441_v5 = vadd.f32 %v3437_v57, %v3363_v3 }
 0x634   : > { %v4655_v60 = vpop.f32.mrf.mxu1 }
 0x637   : > { %v3515_v62 = vpop.f32.mrf.mxu0 }
 0x638   : > { %v3519_v8 = vadd.f32 %v3515_v62, %v3441_v5 }
 0x639   : > { %v4666_v63 = vpop.f32.mrf.mxu0 }
 0x63a   : > { %v3593_v0 = vpop.f32.mrf.mxu1 }
 0x63b   : > { %v3597_v11 = vadd.f32 %v3593_v0, %v3519_v8 }
 0x63c   : > { %v4677_v2 = vpop.f32.mrf.mxu1 }
 0x640   : > { %v3671_v4 = vpop.f32.mrf.mxu0 }
 0x641   : > { %v3675_v12 = vadd.f32 %v3671_v4, %v3597_v11 }
 0x642   : > { %v4688_v6 = vpop.f32.mrf.mxu0 }
 0x643   : > { %v3749_v9 = vpop.f32.mrf.mxu1 }
 0x644   : > { %v3753_v15 = vadd.f32 %v3749_v9, %v3675_v12 }
 0x645   : > { %v4699_v10 = vpop.f32.mrf.mxu1 }
 0x64a   : > { %v3827_v13 = vpop.f32.mrf.mxu0 }
 0x64b   : > { %v3831_v18 = vadd.f32 %v3827_v13, %v3753_v15 }
 0x64c   : > { %v4710_v14 = vpop.f32.mrf.mxu0 }
 0x64d   : > { %v3905_v16 = vpop.f32.mrf.mxu1 }
 0x64e   : > { %v3909_v21 = vadd.f32 %v3905_v16, %v3831_v18 }
 0x64f   : > { %v4721_v19 = vpop.f32.mrf.mxu1 }
 0x654   : > { %v3983_v22 = vpop.f32.mrf.mxu0 }
 0x655   : > { %v3987_v23 = vadd.f32 %v3983_v22, %v3909_v21 }
 0x656   : > { %v4732_v24 = vpop.f32.mrf.mxu0 }
 0x657   : > { %v4061_v26 = vpop.f32.mrf.mxu1 }
 0x658   : > { %v6532_v27 = vadd.f32 %v4061_v26, %v3987_v23 }
 0x659   : > { %v4743_v28 = vpop.f32.mrf.mxu1 }
 0x65a   : > { %v4066_v29 = vmul.f32 0.5, %v6532_v27  ;;  %v4083_v30 = vrot.slane %v6532_v27, %v4082_v25  ;;  %4078 = vst.msk [vmem:[%s6706_s29] sm:$0x1] %vm4076_vm0, %v6532_v27 }
 0x65c   : > { %v4067_v31 = vmul.f32 1.442695, %v4066_v29  ;;  %4084 = vrot.lane.b32.xlu1 %v4083_v30, %s6680_s28 }
 0x65e   : > { %4814 = vpow2.f32 %v4067_v31 }
 0x65f   : > { %4829 = shalt.err (!%p4826_p4)
}
 0x660   : > { %s4830_s29 = scalar_lea.hbm %s4120_s20, 16  ;;  %s4834_s19 = scalar_lea.hbm %s6647_s11, 32 }
 0x661   : > { %p4831_p7 = scmp.ne.s32.totalorder %s4120_s20, %s4830_s29  ;;  %p4835_p10 = scmp.lt.s32.totalorder %s4120_s20, %s6647_s11 }
 0x662   : > { %p4836_p11 = scmp.lt.s32.totalorder %s4834_s19, %s4830_s29 }
 0x663   : > { %p4832_p8 = pnand %p4831_p7, %p5063_p5 }
 0x664   : > { %p4837_p12 = por %p4836_p11, %p4835_p10 }
 0x665   : > { %p4833_p9 = pneg %p4832_p8 }
 0x667   : > { %p4838_p13 = pnand %p4837_p12, %p4833_p9 }
 0x669   : > { %4841 = shalt.err (!%p4838_p13)
}
 0x66a   : > { %4745 = dma.vmem_to_hbm [thread:$0]  (%p5063_p5), %s4123_s2, 16, %s4120_s20, %s6551_s22  }
 0x66b   : > { %v4815_v32 = vpop.eup %4814  ;;  %s6708_s17 = smov 120   ;;  %s6709_s30 = scalar_lea.vmem [#allocation12], %s5074_s15 }
 0x66c   : > { %4071 = vrot.lane.b32.xlu0 %v4815_v32, %s6708_s17  ;;  %s4135_s18 = sshll.u32 %s6709_s30, 4  ;;  %s4133_s29 = scalar_lea.hbm %s6648_s12, %s6543_s0  ;;  %s4136_s18 = int_to_ptr.vmem [resolvable:$true] %s4135_s18 }
 0x66d   : > { %s6710_s26 = smov %s6709_s30  ;;  %s4842_s23 = scalar_lea.vmem %s4136_s18, 16 }
 0x66e   : > { %p4843_p0 = scmp.ne.s32.totalorder %s4136_s18, %s4842_s23  ;;  %s4956_s20 = smov [#allocation12]  }
 0x66f   : > { %s4846_s2 = sshll.u32 %s4956_s20, 4  ;;  %s4847_s2 = int_to_ptr.vmem [resolvable:$false] %s4846_s2 }
 0x670   : > { %p4844_p1 = pnand %p4843_p0, %p5063_p5  ;;  %s4848_s19 = scalar_lea.vmem %s4847_s2, 32 }
 0x671   : > { %p4849_p3 = scmp.lt.s32.totalorder %s4136_s18, %s4847_s2  ;;  %p4850_p4 = scmp.lt.s32.totalorder %s4848_s19, %s4842_s23 }
 0x672   : > { %p4845_p2 = pneg %p4844_p1 }
 0x673   : > { %p4851_p7 = por %p4850_p4, %p4849_p3 }
 0x675   : > { %p4852_p8 = pnand %p4851_p7, %p4845_p2 }
 0x6ce   : > { %v4085_v33 = vpop.permute.xlu1 %4084 }
 0x6cf   : > { %4087 = vst.msk [vmem:[%s6710_s26] sm:$0x1] %vm4076_vm0, %v4085_v33 }
 0x6d0   : > { %4855 = shalt.err (!%p4852_p8)
}
 0x6d1   : > { %s4856_s1 = scalar_lea.hbm %s4133_s29, 16  ;;  %s4860_s25 = scalar_lea.hbm %s6648_s12, 32 }
 0x6d2   : > { %p4857_p9 = scmp.ne.s32.totalorder %s4133_s29, %s4856_s1  ;;  %p4861_p12 = scmp.lt.s32.totalorder %s4133_s29, %s6648_s12 }
 0x6d3   : > { %p4862_p13 = scmp.lt.s32.totalorder %s4860_s25, %s4856_s1 }
 0x6d4   : > { %p4858_p10 = pnand %p4857_p9, %p5063_p5 }
 0x6d5   : > { %p4863_p0 = por %p4862_p13, %p4861_p12 }
 0x6d6   : > { %p4859_p11 = pneg %p4858_p10 }
 0x6d8   : > { %p4864_p1 = pnand %p4863_p0, %p4859_p11 }
 0x6da   : > { %4867 = shalt.err (!%p4864_p1)
}
 0x6db   : > { %4746 = dma.vmem_to_hbm [thread:$0]  (%p5063_p5), %s4136_s18, 16, %s4133_s29, %s6551_s22  }
 0x6dc   : > { %s6711_s2 = scalar_lea.vmem %s6645_s9, %s5078_s16  ;;  %s6712_s19 = scalar_lea.vmem [#allocation8], %s5074_s15 }
 0x6dd   : > { %v4069_v34 = vld [vmem:[%s6711_s2] sm:$0x1]  ;;  %s4109_s1 = sshll.u32 %s6712_s19, 4  ;;  %s4107_s25 = scalar_lea.hbm %s6646_s10, %s6543_s0  ;;  %s4110_s1 = int_to_ptr.vmem [resolvable:$true] %s4109_s1 }
 0x6de   : > { %v4072_v35 = vpop.permute.xlu0 %4071  ;;  %s6713_s28 = smov %s6712_s19  ;;  %s4089_s22 = scalar_lea.sflag [#allocation9], %s5074_s15 }
 0x6df   : > { %v4074_v36 = vmul.f32 %v4072_v35, %v4069_v34  ;;  %s4868_s18 = scalar_lea.vmem %s4110_s1, 16  ;;  %s4957_s16 = smov [#allocation8]  }
 0x6e0   : > { %p4869_p2 = scmp.ne.s32.totalorder %s4110_s1, %s4868_s18  ;;  %s4872_s29 = sshll.u32 %s4957_s16, 4  ;;  %s4873_s29 = int_to_ptr.vmem [resolvable:$false] %s4872_s29 }
 0x6e1   : > { %v4075_v37 = vadd.f32 %v4074_v36, %v6532_v27  ;;  %s4874_s26 = scalar_lea.vmem %s4873_s29, 32  ;;  %p4875_p7 = scmp.lt.s32.totalorder %s4110_s1, %s4873_s29 }
 0x6e2   : > { %p4870_p3 = pnand %p4869_p2, %p5063_p5  ;;  %p4876_p8 = scmp.lt.s32.totalorder %s4874_s26, %s4868_s18 }
 0x6e3   : > { %4077 = vst.msk [vmem:[%s6713_s28] sm:$0x1] %vm4076_vm0, %v4075_v37 }
 0x6e4   : > { %p4871_p4 = pneg %p4870_p3  ;;  %p4877_p9 = por %p4876_p8, %p4875_p7 }
 0x6e6   : > { %p4878_p10 = pnand %p4877_p9, %p4871_p4 }
 0x6e8   : > { %4881 = shalt.err (!%p4878_p10)
}
 0x6e9   : > { %s4882_s0 = scalar_lea.hbm %s4107_s25, 16  ;;  %s4886_s20 = scalar_lea.hbm %s6646_s10, 32 }
 0x6ea   : > { %p4883_p11 = scmp.ne.s32.totalorder %s4107_s25, %s4882_s0  ;;  %p4887_p0 = scmp.lt.s32.totalorder %s4107_s25, %s6646_s10 }
 0x6eb   : > { %p4888_p1 = scmp.lt.s32.totalorder %s4886_s20, %s4882_s0 }
 0x6ec   : > { %p4884_p12 = pnand %p4883_p11, %p5063_p5 }
 0x6ed   : > { %p4889_p2 = por %p4888_p1, %p4887_p0 }
 0x6ee   : > { %p4885_p13 = pneg %p4884_p12 }
 0x6f0   : > { %p4890_p3 = pnand %p4889_p2, %p4885_p13 }
 0x6f2   : > { %4893 = shalt.err (!%p4890_p3)
}
 0x6f3   : > { %4744 = dma.vmem_to_hbm [thread:$0]  (%p5063_p5), %s4110_s1, 16, %s4107_s25, %s4089_s22  }
 0x6f4 PF: > { %p4760_p4 = scmp.ge.s32.totalorder %s4932_s24, 2  ;;  %s4147_s17 = sand.u32 1, %s4920_s21  }
 0x6f5   : > { %s4148_s30 = scalar_lea.sflag [#allocation9], %s4147_s17 }
 0x6f6   : > { %p4751_p7 = pnand %p4760_p4, %p5067_p6 }
 0x6f8   : > { %p4752_p8 = pneg %p4751_p7 }
 0x6fa   : > { %4911 = dma.done.wait (%p4752_p8), %s4148_s30, 16  }
 0x6fb   : > { %4913 = vsyncadd (%p4752_p8), %s4148_s30, 4294967280  ;;  %s6714_s28 = sadd.s32 4294967294, %s4932_s24  }
 0x6fc   : > { %s4155_s18 = sand.u32 1, %s6714_s28  }
 0x6fd   : > { %s4156_s16 = scalar_lea.sflag [#allocation11], %s4155_s18 }
 0x6fe   : > { %4915 = dma.done.wait (%p4752_p8), %s4156_s16, 32  }
 0x6ff   : > { %4917 = vsyncadd (%p4752_p8), %s4156_s16, 4294967264  ;;  %s6715_s21 = sld [smem:[#allocation15_spill]]  ;;  %p26_p5 = scmp.ge.s32.totalorder %s5048_s27, 4  }
 0x700   : > { %s6716_s22 = sld [smem:[#allocation16_spill]]  ;;  %s6718_s24 = smov %s5048_s27 }
 0x701   : > { %s6717_s23 = sld [smem:[#allocation17_spill]]  ;;  %28 = sbr.rel (!%p26_p5) target bundleno = 9 (0x9), region = 244 }
 0x706   :  { %4168 = vsyncpa [#allocation9], 1 }
 0x707   :  { %4170 = vsyncpa [#allocation9 + $0x1], 1 }
 0x708   :  { %4171 = vsyncpa [#allocation11], 1 }
 0x709   :  { %4173 = vsyncpa [#allocation11 + $0x1], 1 }

</bundles_post_ra>
